<compile_context>
chip_gen: v7x
topology: tpu7x:2x2x1
jax: 0.10.0
libtpu: 0.0.40
codegen_flags: <defaults>
</compile_context>

<pallas_src>
import functools

import jax
import jax.numpy as jnp
import numpy as np
from jax import lax
from jax.experimental import pallas as pl
from jax.experimental.pallas import tpu as pltpu

LANE = 128                 # TPU lane width
CDT = jnp.bfloat16         # MXU-input / HBM-I/O dtype (f32 accumulate)
WPAD_L = 8                 # left W-halo -> interior store is sublane-aligned


def _round_up(x, m):
    return (x + m - 1) // m * m


# ---------------------------------------------------------------------------
# Kernel
# ---------------------------------------------------------------------------
def _bottleneck_kernel(x_ref, xprev_ref, xnext_ref,
                       w1_ref, w2_ref, w3_ref,
                       s1_ref, b1_ref, s2_ref, b2_ref, s3_ref, b3_ref,
                       out_ref, pad_ref,
                       *, D, Dt, H, W, Cinp, Cmp, Coutp):
    f32 = jnp.float32
    HW = H * W
    Wp = W + WPAD_L + 1                     # padded W extent of the scratch
    d0 = pl.program_id(1) * Dt              # first output D-plane of this tile

    w1 = w1_ref[...]                        # (Cinp, Cmp)  bf16
    s1 = s1_ref[...]                        # (1, Cmp)     f32
    b1 = b1_ref[...]

    def conv1(x_rows):                      # (R, Cinp) bf16 -> (R, Cmp) f32
        h = jnp.dot(x_rows, w1, preferred_element_type=f32)
        return jnp.maximum(h * s1 + b1, 0.0)

    # ---- zero the halo shell (H/W borders) of the conv2 input buffer ------
    # Interior (incl. D-halo plane interiors) is fully overwritten below.
    # Kept unconditional so megacore grid-sharding cannot leave it stale.
    pad_ref[:, 0:1, :, :] = jnp.zeros((Dt + 2, 1, Wp, Cmp), CDT)
    pad_ref[:, H + 1:H + 2, :, :] = jnp.zeros((Dt + 2, 1, Wp, Cmp), CDT)
    pad_ref[:, :, 0:WPAD_L, :] = jnp.zeros((Dt + 2, H + 2, WPAD_L, Cmp), CDT)
    pad_ref[:, :, W + WPAD_L:W + WPAD_L + 1, :] = jnp.zeros(
        (Dt + 2, H + 2, 1, Cmp), CDT)

    # ---- conv1 + bn1 + relu for the Dt output planes ----------------------
    h1 = conv1(x_ref[...].reshape(Dt * HW, Cinp))
    pad_ref[1:Dt + 1, 1:H + 1, WPAD_L:WPAD_L + W, :] = (
        h1.astype(CDT).reshape(Dt, H, W, Cmp))

    # ---- conv1 for the two D-halo planes (zero at the volume boundary) ----
    @pl.when(d0 > 0)
    def _():
        hp = conv1(xprev_ref[...].reshape(HW, Cinp))
        pad_ref[0:1, 1:H + 1, WPAD_L:WPAD_L + W, :] = (
            hp.astype(CDT).reshape(1, H, W, Cmp))

    @pl.when(d0 == 0)
    def _():
        pad_ref[0:1, 1:H + 1, WPAD_L:WPAD_L + W, :] = (
            jnp.zeros((1, H, W, Cmp), CDT))

    @pl.when(d0 + Dt < D)
    def _():
        hn = conv1(xnext_ref[...].reshape(HW, Cinp))
        pad_ref[Dt + 1:Dt + 2, 1:H + 1, WPAD_L:WPAD_L + W, :] = (
            hn.astype(CDT).reshape(1, H, W, Cmp))

    @pl.when(d0 + Dt >= D)
    def _():
        pad_ref[Dt + 1:Dt + 2, 1:H + 1, WPAD_L:WPAD_L + W, :] = (
            jnp.zeros((1, H, W, Cmp), CDT))

    # ---- conv2 (3x3x3, stride 1, pad 1): tap-group accumulation -----------
    # 9 MXU matmuls with K = 3*Cmp (three kw taps fused per dot). Only one
    # (Dt*HW, 3*Cmp) bf16 slab is live at a time -> no 27*Cmp im2col buffer.
    h2 = jnp.zeros((Dt * HW, Cmp), f32)
    for kd in range(3):
        for kh in range(3):
            slab = jnp.concatenate(
                [pad_ref[kd:kd + Dt, kh:kh + H,
                         WPAD_L - 1 + kw:WPAD_L - 1 + kw + W, :]
                 .reshape(Dt * HW, Cmp) for kw in range(3)],
                axis=-1)                               # (Dt*HW, 3*Cmp) bf16
            t0 = (kd * 3 + kh) * 3 * Cmp
            h2 = h2 + jnp.dot(slab, w2_ref[t0:t0 + 3 * Cmp, :],
                              preferred_element_type=f32)
    h2 = jnp.maximum(h2 * s2_ref[...] + b2_ref[...], 0.0)

    # ---- conv3 + bn3 + residual + relu -------------------------------------
    h3 = jnp.dot(h2.astype(CDT), w3_ref[...], preferred_element_type=f32)
    h3 = h3 * s3_ref[...] + b3_ref[...]
    # Reload identity just before the add (keeps its live range short).
    identity = x_ref[...].reshape(Dt * HW, Coutp).astype(f32)  # Cinp == Coutp
    y = jnp.maximum(h3 + identity, 0.0)
    out_ref[...] = y.reshape(Dt, H, W, Coutp).astype(out_ref.dtype)


# ---------------------------------------------------------------------------
# Wrapper
# ---------------------------------------------------------------------------
def bottleneck3d_pallas(x_ndhwc, w1, w2, w3, s1, b1, s2, b2, s3, b3,
                        *, d_tile=None):
    N, D, H, W, Cinp = x_ndhwc.shape
    Cmp = w1.shape[1]
    Coutp = w3.shape[1]
    assert Cinp == Coutp, "residual path requires Cin == Cout (downsample=None)"
    assert x_ndhwc.dtype == CDT

    if d_tile is None:
        d_tile = 1
        for t in range(min(D, 8), 0, -1):
            if D % t == 0:
                d_tile = t
                break
    Dt = d_tile
    assert D % Dt == 0

    kernel = functools.partial(_bottleneck_kernel, D=D, Dt=Dt, H=H, W=W,
                               Cinp=Cinp, Cmp=Cmp, Coutp=Coutp)

    # ---- VMEM budget: double-buffered blocks + scratch + f32 temporaries --
    bpe = 2  # bf16
    blk_bytes = (Dt * H * W * Cinp * bpe          # x main slab
                 + 2 * H * W * Cinp * bpe         # two D-halo planes
                 + Dt * H * W * Coutp * bpe)      # output block
    w_bytes = (Cinp * Cmp + 27 * Cmp * Cmp + Cmp * Coutp) * bpe \
        + 4 * (4 * Cmp + 2 * Coutp)               # folded BN vectors (f32)
    scratch_bytes = (Dt + 2) * (H + 2) * (W + WPAD_L + 1) * Cmp * bpe
    acc_bytes = 3 * Dt * H * W * max(Cmp, Coutp) * 4
    need = 2 * (blk_bytes + w_bytes) + scratch_bytes + acc_bytes
    vmem_limit = int(min(max(2 * need, 32 << 20), 60 << 20))  # safe on v7x too

    flops = 2 * N * D * H * W * (Cinp * Cmp + 27 * Cmp * Cmp + Cmp * Coutp)
    bytes_accessed = (N * D * H * W * (Cinp + Coutp) * bpe
                      + (Cinp * Cmp + 27 * Cmp * Cmp + Cmp * Coutp) * bpe)

    grid_spec = pltpu.PrefetchScalarGridSpec(
        num_scalar_prefetch=0,
        grid=(N, D // Dt),
        in_specs=[
            # main D-slab of x (auto-pipelined / double-buffered)
            pl.BlockSpec((None, Dt, H, W, Cinp),
                         lambda n, d: (n, d, 0, 0, 0)),
            # previous D plane (clamped; zeroed in-kernel at the boundary)
            pl.BlockSpec((None, 1, H, W, Cinp),
                         lambda n, d: (n, jnp.maximum(d * Dt - 1, 0), 0, 0, 0)),
            # next D plane (clamped; zeroed in-kernel at the boundary)
            pl.BlockSpec((None, 1, H, W, Cinp),
                         lambda n, d: (n, jnp.minimum(d * Dt + Dt, D - 1),
                                       0, 0, 0)),
            pl.BlockSpec((Cinp, Cmp),     lambda n, d: (0, 0)),
            pl.BlockSpec((27 * Cmp, Cmp), lambda n, d: (0, 0)),
            pl.BlockSpec((Cmp, Coutp),    lambda n, d: (0, 0)),
            pl.BlockSpec((1, Cmp),        lambda n, d: (0, 0)),
            pl.BlockSpec((1, Cmp),        lambda n, d: (0, 0)),
            pl.BlockSpec((1, Cmp),        lambda n, d: (0, 0)),
            pl.BlockSpec((1, Cmp),        lambda n, d: (0, 0)),
            pl.BlockSpec((1, Coutp),      lambda n, d: (0, 0)),
            pl.BlockSpec((1, Coutp),      lambda n, d: (0, 0)),
        ],
        out_specs=pl.BlockSpec((None, Dt, H, W, Coutp),
                               lambda n, d: (n, d, 0, 0, 0)),
        scratch_shapes=[
            pltpu.VMEM((Dt + 2, H + 2, W + WPAD_L + 1, Cmp), CDT)],
    )

    return pl.pallas_call(
        kernel,
        out_shape=jax.ShapeDtypeStruct((N, D, H, W, Coutp), CDT),
        grid_spec=grid_spec,
        compiler_params=pltpu.CompilerParams(
            dimension_semantics=("parallel", "parallel"),
            vmem_limit_bytes=vmem_limit),
        cost_estimate=pl.CostEstimate(flops=flops, transcendentals=0,
                                      bytes_accessed=bytes_accessed),
    )(x_ndhwc, x_ndhwc, x_ndhwc, w1, w2, w3, s1, b1, s2, b2, s3, b3)


# ---------------------------------------------------------------------------
# Host-side packing: PyTorch-layout weights / BN stats -> lane-padded bf16.
# ---------------------------------------------------------------------------
def pack_params(w1_pt, w2_pt, w3_pt, bn1, bn2, bn3, eps=1e-5):
    Cm, Cin = w1_pt.shape[:2]
    Cout = w3_pt.shape[0]
    Cinp, Cmp, Coutp = (_round_up(c, LANE) for c in (Cin, Cm, Cout))

    def fold(gamma, beta, mean, var, cp):
        scale = gamma / jnp.sqrt(var + eps)
        bias = beta - mean * scale
        s = jnp.zeros((1, cp), jnp.float32).at[0, :scale.shape[0]].set(scale)
        b = jnp.zeros((1, cp), jnp.float32).at[0, :bias.shape[0]].set(bias)
        return s, b

    w1 = jnp.zeros((Cinp, Cmp), jnp.float32).at[:Cin, :Cm].set(
        jnp.transpose(w1_pt[:, :, 0, 0, 0], (1, 0)))
    w2_t = jnp.transpose(w2_pt, (2, 3, 4, 1, 0))            # (3,3,3,Ci,Co)
    w2 = jnp.zeros((3, 3, 3, Cmp, Cmp), jnp.float32).at[
        :, :, :, :Cm, :Cm].set(w2_t)
    w2 = w2.reshape(27 * Cmp, Cmp)
    w3 = jnp.zeros((Cmp, Coutp), jnp.float32).at[:Cm, :Cout].set(
        jnp.transpose(w3_pt[:, :, 0, 0, 0], (1, 0)))

    s1, b1 = fold(*bn1, Cmp)
    s2, b2 = fold(*bn2, Cmp)
    s3, b3 = fold(*bn3, Coutp)
    return (w1.astype(CDT), w2.astype(CDT), w3.astype(CDT),
            s1, b1, s2, b2, s3, b3, Cinp, Cmp, Coutp)


# ---------------------------------------------------------------------------
# Pure-JAX reference (mirrors PyTorch NCDHW semantics, BN in eval mode).
# ---------------------------------------------------------------------------
def _bn(y, gamma, beta, mean, var, eps=1e-5):
    shp = (1, -1, 1, 1, 1)
    inv = gamma / jnp.sqrt(var + eps)
    return (y - mean.reshape(shp)) * inv.reshape(shp) + beta.reshape(shp)


def bottleneck3d_ref(x_ncdhw, p):
    dn = ("NCDHW", "OIDHW", "NCDHW")
    out = lax.conv_general_dilated(x_ncdhw, p["conv1"], (1, 1, 1), "VALID",
                                   dimension_numbers=dn)
    out = jax.nn.relu(_bn(out, *p["bn1"]))
    out = lax.conv_general_dilated(out, p["conv2"], (1, 1, 1),
                                   [(1, 1), (1, 1), (1, 1)],
                                   dimension_numbers=dn)
    out = jax.nn.relu(_bn(out, *p["bn2"]))
    out = lax.conv_general_dilated(out, p["conv3"], (1, 1, 1), "VALID",
                                   dimension_numbers=dn)
    out = _bn(out, *p["bn3"])
    return jax.nn.relu(out + x_ncdhw)


if __name__ == "__main__":
    # in_channels = out_channels * expansion so downsample=None works.
    N, Cin, D, H, W = 2, 64, 4, 8, 8
    Cm = 16                # out_channels
    Cout = Cm * 4          # == Cin

    key = jax.random.PRNGKey(0)
    k = jax.random.split(key, 4)

    x = jax.random.normal(k[0], (N, Cin, D, H, W), jnp.float32)
    w1_pt = jax.random.normal(k[1], (Cm, Cin, 1, 1, 1), jnp.float32) / np.sqrt(Cin)
    w2_pt = jax.random.normal(k[2], (Cm, Cm, 3, 3, 3), jnp.float32) / np.sqrt(27 * Cm)
    w3_pt = jax.random.normal(k[3], (Cout, Cm, 1, 1, 1), jnp.float32) / np.sqrt(Cm)

    def bn_params(c, phase):
        i = jnp.arange(c, dtype=jnp.float32)
        gamma = 1.0 + 0.1 * jnp.cos(i + phase)
        beta = 0.1 * jnp.sin(i - phase)
        mean = 0.05 * jnp.sin(i)
        var = 1.0 + 0.1 * jnp.abs(jnp.cos(i))
        return gamma, beta, mean, var

    bn1 = bn_params(Cm, 0.0)
    bn2 = bn_params(Cm, 1.0)
    bn3 = bn_params(Cout, 2.0)

    params = {"conv1": w1_pt, "conv2": w2_pt, "conv3": w3_pt,
              "bn1": bn1, "bn2": bn2, "bn3": bn3}

    # ---- pack weights / BN for the Pallas kernel ---------------------------
    (w1, w2, w3, s1, b1, s2, b2, s3, b3,
     Cinp, Cmp, Coutp) = pack_params(w1_pt, w2_pt, w3_pt, bn1, bn2, bn3)

    # bf16 NDHWC input, channel-padded to the lane width.
    x_ndhwc = jnp.transpose(x, (0, 2, 3, 4, 1)).astype(CDT)   # NCDHW->NDHWC
    x_pad = jnp.zeros((N, D, H, W, Cinp), CDT)
    x_pad = x_pad.at[..., :Cin].set(x_ndhwc)

    out_pad = bottleneck3d_pallas(x_pad, w1, w2, w3,
                                  s1, b1, s2, b2, s3, b3, d_tile=2)
    out_pad = jax.block_until_ready(out_pad)
    out_ncdhw = jnp.transpose(out_pad[..., :Cout].astype(jnp.float32),
                              (0, 4, 1, 2, 3))

    ref = jax.block_until_ready(bottleneck3d_ref(x, params))

    # bf16 I/O + bf16 MXU inputs with f32 accumulation -> loose tolerance.
    np.testing.assert_allclose(np.asarray(out_ncdhw), np.asarray(ref),
                               rtol=5e-2, atol=5e-2)
    print("KERNEL_OK")
</pallas_src>

<mosaic_0001>
module attributes {stable_mosaic.version = 11 : i64} {
  func.func @_bottleneck_kernel(%arg0: i32, %arg1: i32, %arg2: memref<1x2x8x8x128xbf16, #tpu.memory_space<vmem>>, %arg3: memref<1x1x8x8x128xbf16, #tpu.memory_space<vmem>>, %arg4: memref<1x1x8x8x128xbf16, #tpu.memory_space<vmem>>, %arg5: memref<128x128xbf16, #tpu.memory_space<vmem>>, %arg6: memref<3456x128xbf16, #tpu.memory_space<vmem>>, %arg7: memref<128x128xbf16, #tpu.memory_space<vmem>>, %arg8: memref<1x128xf32, #tpu.memory_space<vmem>>, %arg9: memref<1x128xf32, #tpu.memory_space<vmem>>, %arg10: memref<1x128xf32, #tpu.memory_space<vmem>>, %arg11: memref<1x128xf32, #tpu.memory_space<vmem>>, %arg12: memref<1x128xf32, #tpu.memory_space<vmem>>, %arg13: memref<1x128xf32, #tpu.memory_space<vmem>>, %arg14: memref<1x2x8x8x128xbf16, #tpu.memory_space<vmem>>, %arg15: memref<4x10x17x128xbf16, #tpu.memory_space<vmem>>) attributes {dimension_semantics = [#tpu.dimension_semantics<parallel>, #tpu.dimension_semantics<parallel>], iteration_bounds = array<i64: 2, 2>, scalar_prefetch = 0 : i64, scratch_operands = 1 : i64, tpu.core_type = #tpu.core_type<tc>, window_params = [{transform_indices = @transform_0, window_bounds = array<i64: 1, 2, 8, 8, 128>}, {transform_indices = @transform_1, window_bounds = array<i64: 1, 1, 8, 8, 128>}, {transform_indices = @transform_2, window_bounds = array<i64: 1, 1, 8, 8, 128>}, {pipeline_mode = #tpu.pipeline_mode<synchronous>, transform_indices = @transform_3, window_bounds = array<i64: 128, 128>}, {pipeline_mode = #tpu.pipeline_mode<synchronous>, transform_indices = @transform_4, window_bounds = array<i64: 3456, 128>}, {pipeline_mode = #tpu.pipeline_mode<synchronous>, transform_indices = @transform_5, window_bounds = array<i64: 128, 128>}, {pipeline_mode = #tpu.pipeline_mode<synchronous>, transform_indices = @transform_6, window_bounds = array<i64: 1, 128>}, {pipeline_mode = #tpu.pipeline_mode<synchronous>, transform_indices = @transform_7, window_bounds = array<i64: 1, 128>}, {pipeline_mode = #tpu.pipeline_mode<synchronous>, transform_indices = @transform_8, window_bounds = array<i64: 1, 128>}, {pipeline_mode = #tpu.pipeline_mode<synchronous>, transform_indices = @transform_9, window_bounds = array<i64: 1, 128>}, {pipeline_mode = #tpu.pipeline_mode<synchronous>, transform_indices = @transform_10, window_bounds = array<i64: 1, 128>}, {pipeline_mode = #tpu.pipeline_mode<synchronous>, transform_indices = @transform_11, window_bounds = array<i64: 1, 128>}, {transform_indices = @transform_12, window_bounds = array<i64: 1, 2, 8, 8, 128>}]} {
    %c2_i32 = arith.constant 2 : i32
    %0 = arith.muli %arg1, %c2_i32 : i32
    %c0 = arith.constant 0 : index
    %c0_0 = arith.constant 0 : index
    %1 = vector.load %arg5[%c0, %c0_0] : memref<128x128xbf16, #tpu.memory_space<vmem>>, vector<128x128xbf16>
    %c0_1 = arith.constant 0 : index
    %c0_2 = arith.constant 0 : index
    %2 = vector.load %arg8[%c0_1, %c0_2] : memref<1x128xf32, #tpu.memory_space<vmem>>, vector<1x128xf32>
    %c0_3 = arith.constant 0 : index
    %c0_4 = arith.constant 0 : index
    %3 = vector.load %arg9[%c0_3, %c0_4] : memref<1x128xf32, #tpu.memory_space<vmem>>, vector<1x128xf32>
    %cst = arith.constant 0.000000e+00 : bf16
    %4 = vector.broadcast %cst : bf16 to vector<4x1x17x128xbf16>
    %c0_5 = arith.constant 0 : index
    %c0_6 = arith.constant 0 : index
    %c0_7 = arith.constant 0 : index
    %c0_8 = arith.constant 0 : index
    %5 = vector.load %arg15[%c0_5, %c0_6, %c0_7, %c0_8] : memref<4x10x17x128xbf16, #tpu.memory_space<vmem>>, vector<4x1x17x128xbf16>
    tpu.vector_store %arg15[%c0_5, %c0_6, %c0_7, %c0_8], %4 {strides = array<i32>} : memref<4x10x17x128xbf16, #tpu.memory_space<vmem>>, vector<4x1x17x128xbf16>,
    %cst_9 = arith.constant 0.000000e+00 : bf16
    %6 = vector.broadcast %cst_9 : bf16 to vector<4x1x17x128xbf16>
    %c0_10 = arith.constant 0 : index
    %c9 = arith.constant 9 : index
    %c0_11 = arith.constant 0 : index
    %c0_12 = arith.constant 0 : index
    %7 = vector.load %arg15[%c0_10, %c9, %c0_11, %c0_12] : memref<4x10x17x128xbf16, #tpu.memory_space<vmem>>, vector<4x1x17x128xbf16>
    tpu.vector_store %arg15[%c0_10, %c9, %c0_11, %c0_12], %6 {strides = array<i32>} : memref<4x10x17x128xbf16, #tpu.memory_space<vmem>>, vector<4x1x17x128xbf16>,
    %cst_13 = arith.constant 0.000000e+00 : bf16
    %8 = vector.broadcast %cst_13 : bf16 to vector<4x10x8x128xbf16>
    %c0_14 = arith.constant 0 : index
    %c0_15 = arith.constant 0 : index
    %c0_16 = arith.constant 0 : index
    %c0_17 = arith.constant 0 : index
    %9 = vector.load %arg15[%c0_14, %c0_15, %c0_16, %c0_17] : memref<4x10x17x128xbf16, #tpu.memory_space<vmem>>, vector<4x10x8x128xbf16>
    tpu.vector_store %arg15[%c0_14, %c0_15, %c0_16, %c0_17], %8 {strides = array<i32>} : memref<4x10x17x128xbf16, #tpu.memory_space<vmem>>, vector<4x10x8x128xbf16>,
    %cst_18 = arith.constant 0.000000e+00 : bf16
    %10 = vector.broadcast %cst_18 : bf16 to vector<4x10x1x128xbf16>
    %c0_19 = arith.constant 0 : index
    %c0_20 = arith.constant 0 : index
    %c16 = arith.constant 16 : index
    %c0_21 = arith.constant 0 : index
    %11 = vector.load %arg15[%c0_19, %c0_20, %c16, %c0_21] : memref<4x10x17x128xbf16, #tpu.memory_space<vmem>>, vector<4x10x1x128xbf16>
    tpu.vector_store %arg15[%c0_19, %c0_20, %c16, %c0_21], %10 {strides = array<i32>} : memref<4x10x17x128xbf16, #tpu.memory_space<vmem>>, vector<4x10x1x128xbf16>,
    %c0_22 = arith.constant 0 : index
    %c0_23 = arith.constant 0 : index
    %c0_24 = arith.constant 0 : index
    %c0_25 = arith.constant 0 : index
    %c0_26 = arith.constant 0 : index
    %12 = vector.load %arg2[%c0_22, %c0_23, %c0_24, %c0_25, %c0_26] : memref<1x2x8x8x128xbf16, #tpu.memory_space<vmem>>, vector<1x2x8x8x128xbf16>
    %13 = vector.shape_cast %12 : vector<1x2x8x8x128xbf16> to vector<2x8x8x128xbf16>
    %14 = vector.shape_cast %13 : vector<2x8x8x128xbf16> to vector<128x128xbf16>
    %cst_27 = arith.constant dense<0.000000e+00> : vector<128x128xf32>
    %15 = tpu.matmul %14, %1, %cst_27 {dimension_numbers = #tpu.dot_dimension_numbers<[1], [0], [0], [1], [0, 0, 1, 1], [], []>} : vector<128x128xbf16>, vector<128x128xbf16>, vector<128x128xf32> -> vector<128x128xf32>
    %16 = vector.broadcast %2 : vector<1x128xf32> to vector<128x128xf32>
    %17 = arith.mulf %15, %16 : vector<128x128xf32>
    %18 = vector.broadcast %3 : vector<1x128xf32> to vector<128x128xf32>
    %19 = arith.addf %17, %18 : vector<128x128xf32>
    %cst_28 = arith.constant 0.000000e+00 : f32
    %20 = vector.broadcast %cst_28 : f32 to vector<128x128xf32>
    %21 = arith.maximumf %19, %20 : vector<128x128xf32>
    %22 = arith.truncf %21 : vector<128x128xf32> to vector<128x128xbf16>
    %23 = vector.shape_cast %22 : vector<128x128xbf16> to vector<2x8x8x128xbf16>
    %c1 = arith.constant 1 : index
    %c1_29 = arith.constant 1 : index
    %c8 = arith.constant 8 : index
    %c0_30 = arith.constant 0 : index
    %24 = vector.load %arg15[%c1, %c1_29, %c8, %c0_30] : memref<4x10x17x128xbf16, #tpu.memory_space<vmem>>, vector<2x8x8x128xbf16>
    tpu.vector_store %arg15[%c1, %c1_29, %c8, %c0_30], %23 {strides = array<i32>} : memref<4x10x17x128xbf16, #tpu.memory_space<vmem>>, vector<2x8x8x128xbf16>,
    %c0_i32 = arith.constant 0 : i32
    %25 = arith.cmpi sgt, %0, %c0_i32 : i32
    %26 = arith.extui %25 : i1 to i32
    %c0_i32_31 = arith.constant 0 : i32
    %27 = arith.cmpi ne, %26, %c0_i32_31 : i32
    scf.if %27 {
      %c0_188 = arith.constant 0 : index
      %c0_189 = arith.constant 0 : index
      %c0_190 = arith.constant 0 : index
      %c0_191 = arith.constant 0 : index
      %c0_192 = arith.constant 0 : index
      %159 = vector.load %arg3[%c0_188, %c0_189, %c0_190, %c0_191, %c0_192] : memref<1x1x8x8x128xbf16, #tpu.memory_space<vmem>>, vector<1x1x8x8x128xbf16>
      %160 = vector.shape_cast %159 : vector<1x1x8x8x128xbf16> to vector<1x8x8x128xbf16>
      %161 = vector.shape_cast %160 : vector<1x8x8x128xbf16> to vector<64x128xbf16>
      %cst_193 = arith.constant dense<0.000000e+00> : vector<64x128xf32>
      %162 = tpu.matmul %161, %1, %cst_193 {dimension_numbers = #tpu.dot_dimension_numbers<[1], [0], [0], [1], [0, 0, 1, 1], [], []>} : vector<64x128xbf16>, vector<128x128xbf16>, vector<64x128xf32> -> vector<64x128xf32>
      %163 = vector.broadcast %2 : vector<1x128xf32> to vector<64x128xf32>
      %164 = arith.mulf %162, %163 : vector<64x128xf32>
      %165 = vector.broadcast %3 : vector<1x128xf32> to vector<64x128xf32>
      %166 = arith.addf %164, %165 : vector<64x128xf32>
      %cst_194 = arith.constant 0.000000e+00 : f32
      %167 = vector.broadcast %cst_194 : f32 to vector<64x128xf32>
      %168 = arith.maximumf %166, %167 : vector<64x128xf32>
      %169 = arith.truncf %168 : vector<64x128xf32> to vector<64x128xbf16>
      %170 = vector.shape_cast %169 : vector<64x128xbf16> to vector<1x8x8x128xbf16>
      %c0_195 = arith.constant 0 : index
      %c1_196 = arith.constant 1 : index
      %c8_197 = arith.constant 8 : index
      %c0_198 = arith.constant 0 : index
      %171 = vector.load %arg15[%c0_195, %c1_196, %c8_197, %c0_198] : memref<4x10x17x128xbf16, #tpu.memory_space<vmem>>, vector<1x8x8x128xbf16>
      tpu.vector_store %arg15[%c0_195, %c1_196, %c8_197, %c0_198], %170 {strides = array<i32>} : memref<4x10x17x128xbf16, #tpu.memory_space<vmem>>, vector<1x8x8x128xbf16>,
    } else {
    }
    %c0_i32_32 = arith.constant 0 : i32
    %28 = arith.cmpi eq, %0, %c0_i32_32 : i32
    %29 = arith.extui %28 : i1 to i32
    %c0_i32_33 = arith.constant 0 : i32
    %30 = arith.cmpi ne, %29, %c0_i32_33 : i32
    scf.if %30 {
      %cst_188 = arith.constant 0.000000e+00 : bf16
      %159 = vector.broadcast %cst_188 : bf16 to vector<1x8x8x128xbf16>
      %c0_189 = arith.constant 0 : index
      %c1_190 = arith.constant 1 : index
      %c8_191 = arith.constant 8 : index
      %c0_192 = arith.constant 0 : index
      %160 = vector.load %arg15[%c0_189, %c1_190, %c8_191, %c0_192] : memref<4x10x17x128xbf16, #tpu.memory_space<vmem>>, vector<1x8x8x128xbf16>
      tpu.vector_store %arg15[%c0_189, %c1_190, %c8_191, %c0_192], %159 {strides = array<i32>} : memref<4x10x17x128xbf16, #tpu.memory_space<vmem>>, vector<1x8x8x128xbf16>,
    } else {
    }
    %c2_i32_34 = arith.constant 2 : i32
    %31 = arith.addi %0, %c2_i32_34 : i32
    %c4_i32 = arith.constant 4 : i32
    %32 = arith.cmpi slt, %31, %c4_i32 : i32
    %33 = arith.extui %32 : i1 to i32
    %c0_i32_35 = arith.constant 0 : i32
    %34 = arith.cmpi ne, %33, %c0_i32_35 : i32
    scf.if %34 {
      %c0_188 = arith.constant 0 : index
      %c0_189 = arith.constant 0 : index
      %c0_190 = arith.constant 0 : index
      %c0_191 = arith.constant 0 : index
      %c0_192 = arith.constant 0 : index
      %159 = vector.load %arg4[%c0_188, %c0_189, %c0_190, %c0_191, %c0_192] : memref<1x1x8x8x128xbf16, #tpu.memory_space<vmem>>, vector<1x1x8x8x128xbf16>
      %160 = vector.shape_cast %159 : vector<1x1x8x8x128xbf16> to vector<1x8x8x128xbf16>
      %161 = vector.shape_cast %160 : vector<1x8x8x128xbf16> to vector<64x128xbf16>
      %cst_193 = arith.constant dense<0.000000e+00> : vector<64x128xf32>
      %162 = tpu.matmul %161, %1, %cst_193 {dimension_numbers = #tpu.dot_dimension_numbers<[1], [0], [0], [1], [0, 0, 1, 1], [], []>} : vector<64x128xbf16>, vector<128x128xbf16>, vector<64x128xf32> -> vector<64x128xf32>
      %163 = vector.broadcast %2 : vector<1x128xf32> to vector<64x128xf32>
      %164 = arith.mulf %162, %163 : vector<64x128xf32>
      %165 = vector.broadcast %3 : vector<1x128xf32> to vector<64x128xf32>
      %166 = arith.addf %164, %165 : vector<64x128xf32>
      %cst_194 = arith.constant 0.000000e+00 : f32
      %167 = vector.broadcast %cst_194 : f32 to vector<64x128xf32>
      %168 = arith.maximumf %166, %167 : vector<64x128xf32>
      %169 = arith.truncf %168 : vector<64x128xf32> to vector<64x128xbf16>
      %170 = vector.shape_cast %169 : vector<64x128xbf16> to vector<1x8x8x128xbf16>
      %c3 = arith.constant 3 : index
      %c1_195 = arith.constant 1 : index
      %c8_196 = arith.constant 8 : index
      %c0_197 = arith.constant 0 : index
      %171 = vector.load %arg15[%c3, %c1_195, %c8_196, %c0_197] : memref<4x10x17x128xbf16, #tpu.memory_space<vmem>>, vector<1x8x8x128xbf16>
      tpu.vector_store %arg15[%c3, %c1_195, %c8_196, %c0_197], %170 {strides = array<i32>} : memref<4x10x17x128xbf16, #tpu.memory_space<vmem>>, vector<1x8x8x128xbf16>,
    } else {
    }
    %c2_i32_36 = arith.constant 2 : i32
    %35 = arith.addi %0, %c2_i32_36 : i32
    %c4_i32_37 = arith.constant 4 : i32
    %36 = arith.cmpi sge, %35, %c4_i32_37 : i32
    %37 = arith.extui %36 : i1 to i32
    %c0_i32_38 = arith.constant 0 : i32
    %38 = arith.cmpi ne, %37, %c0_i32_38 : i32
    scf.if %38 {
      %cst_188 = arith.constant 0.000000e+00 : bf16
      %159 = vector.broadcast %cst_188 : bf16 to vector<1x8x8x128xbf16>
      %c3 = arith.constant 3 : index
      %c1_189 = arith.constant 1 : index
      %c8_190 = arith.constant 8 : index
      %c0_191 = arith.constant 0 : index
      %160 = vector.load %arg15[%c3, %c1_189, %c8_190, %c0_191] : memref<4x10x17x128xbf16, #tpu.memory_space<vmem>>, vector<1x8x8x128xbf16>
      tpu.vector_store %arg15[%c3, %c1_189, %c8_190, %c0_191], %159 {strides = array<i32>} : memref<4x10x17x128xbf16, #tpu.memory_space<vmem>>, vector<1x8x8x128xbf16>,
    } else {
    }
    %cst_39 = arith.constant 0.000000e+00 : f32
    %39 = vector.broadcast %cst_39 : f32 to vector<128x128xf32>
    %c0_40 = arith.constant 0 : index
    %c0_41 = arith.constant 0 : index
    %c7 = arith.constant 7 : index
    %c0_42 = arith.constant 0 : index
    %40 = vector.load %arg15[%c0_40, %c0_41, %c7, %c0_42] : memref<4x10x17x128xbf16, #tpu.memory_space<vmem>>, vector<2x8x8x128xbf16>
    %41 = vector.shape_cast %40 : vector<2x8x8x128xbf16> to vector<128x128xbf16>
    %c0_43 = arith.constant 0 : index
    %c0_44 = arith.constant 0 : index
    %c8_45 = arith.constant 8 : index
    %c0_46 = arith.constant 0 : index
    %42 = vector.load %arg15[%c0_43, %c0_44, %c8_45, %c0_46] : memref<4x10x17x128xbf16, #tpu.memory_space<vmem>>, vector<2x8x8x128xbf16>
    %43 = vector.shape_cast %42 : vector<2x8x8x128xbf16> to vector<128x128xbf16>
    %c0_47 = arith.constant 0 : index
    %c0_48 = arith.constant 0 : index
    %c9_49 = arith.constant 9 : index
    %c0_50 = arith.constant 0 : index
    %44 = vector.load %arg15[%c0_47, %c0_48, %c9_49, %c0_50] : memref<4x10x17x128xbf16, #tpu.memory_space<vmem>>, vector<2x8x8x128xbf16>
    %45 = vector.shape_cast %44 : vector<2x8x8x128xbf16> to vector<128x128xbf16>
    %46 = tpu.concatenate %41, %43, %45 in 1 : vector<128x128xbf16>, vector<128x128xbf16>, vector<128x128xbf16> -> vector<128x384xbf16>
    %c0_51 = arith.constant 0 : index
    %c0_52 = arith.constant 0 : index
    %47 = vector.load %arg6[%c0_51, %c0_52] : memref<3456x128xbf16, #tpu.memory_space<vmem>>, vector<384x128xbf16>
    %cst_53 = arith.constant dense<0.000000e+00> : vector<128x128xf32>
    %48 = tpu.matmul %46, %47, %cst_53 {dimension_numbers = #tpu.dot_dimension_numbers<[1], [0], [0], [1], [0, 0, 1, 1], [], []>} : vector<128x384xbf16>, vector<384x128xbf16>, vector<128x128xf32> -> vector<128x128xf32>
    %49 = arith.addf %39, %48 : vector<128x128xf32>
    %c0_54 = arith.constant 0 : index
    %c1_55 = arith.constant 1 : index
    %c7_56 = arith.constant 7 : index
    %c0_57 = arith.constant 0 : index
    %50 = vector.load %arg15[%c0_54, %c1_55, %c7_56, %c0_57] : memref<4x10x17x128xbf16, #tpu.memory_space<vmem>>, vector<2x8x8x128xbf16>
    %51 = vector.shape_cast %50 : vector<2x8x8x128xbf16> to vector<128x128xbf16>
    %c0_58 = arith.constant 0 : index
    %c1_59 = arith.constant 1 : index
    %c8_60 = arith.constant 8 : index
    %c0_61 = arith.constant 0 : index
    %52 = vector.load %arg15[%c0_58, %c1_59, %c8_60, %c0_61] : memref<4x10x17x128xbf16, #tpu.memory_space<vmem>>, vector<2x8x8x128xbf16>
    %53 = vector.shape_cast %52 : vector<2x8x8x128xbf16> to vector<128x128xbf16>
    %c0_62 = arith.constant 0 : index
    %c1_63 = arith.constant 1 : index
    %c9_64 = arith.constant 9 : index
    %c0_65 = arith.constant 0 : index
    %54 = vector.load %arg15[%c0_62, %c1_63, %c9_64, %c0_65] : memref<4x10x17x128xbf16, #tpu.memory_space<vmem>>, vector<2x8x8x128xbf16>
    %55 = vector.shape_cast %54 : vector<2x8x8x128xbf16> to vector<128x128xbf16>
    %56 = tpu.concatenate %51, %53, %55 in 1 : vector<128x128xbf16>, vector<128x128xbf16>, vector<128x128xbf16> -> vector<128x384xbf16>
    %c384 = arith.constant 384 : index
    %c0_66 = arith.constant 0 : index
    %57 = vector.load %arg6[%c384, %c0_66] : memref<3456x128xbf16, #tpu.memory_space<vmem>>, vector<384x128xbf16>
    %cst_67 = arith.constant dense<0.000000e+00> : vector<128x128xf32>
    %58 = tpu.matmul %56, %57, %cst_67 {dimension_numbers = #tpu.dot_dimension_numbers<[1], [0], [0], [1], [0, 0, 1, 1], [], []>} : vector<128x384xbf16>, vector<384x128xbf16>, vector<128x128xf32> -> vector<128x128xf32>
    %59 = arith.addf %49, %58 : vector<128x128xf32>
    %c0_68 = arith.constant 0 : index
    %c2 = arith.constant 2 : index
    %c7_69 = arith.constant 7 : index
    %c0_70 = arith.constant 0 : index
    %60 = vector.load %arg15[%c0_68, %c2, %c7_69, %c0_70] : memref<4x10x17x128xbf16, #tpu.memory_space<vmem>>, vector<2x8x8x128xbf16>
    %61 = vector.shape_cast %60 : vector<2x8x8x128xbf16> to vector<128x128xbf16>
    %c0_71 = arith.constant 0 : index
    %c2_72 = arith.constant 2 : index
    %c8_73 = arith.constant 8 : index
    %c0_74 = arith.constant 0 : index
    %62 = vector.load %arg15[%c0_71, %c2_72, %c8_73, %c0_74] : memref<4x10x17x128xbf16, #tpu.memory_space<vmem>>, vector<2x8x8x128xbf16>
    %63 = vector.shape_cast %62 : vector<2x8x8x128xbf16> to vector<128x128xbf16>
    %c0_75 = arith.constant 0 : index
    %c2_76 = arith.constant 2 : index
    %c9_77 = arith.constant 9 : index
    %c0_78 = arith.constant 0 : index
    %64 = vector.load %arg15[%c0_75, %c2_76, %c9_77, %c0_78] : memref<4x10x17x128xbf16, #tpu.memory_space<vmem>>, vector<2x8x8x128xbf16>
    %65 = vector.shape_cast %64 : vector<2x8x8x128xbf16> to vector<128x128xbf16>
    %66 = tpu.concatenate %61, %63, %65 in 1 : vector<128x128xbf16>, vector<128x128xbf16>, vector<128x128xbf16> -> vector<128x384xbf16>
    %c768 = arith.constant 768 : index
    %c0_79 = arith.constant 0 : index
    %67 = vector.load %arg6[%c768, %c0_79] : memref<3456x128xbf16, #tpu.memory_space<vmem>>, vector<384x128xbf16>
    %cst_80 = arith.constant dense<0.000000e+00> : vector<128x128xf32>
    %68 = tpu.matmul %66, %67, %cst_80 {dimension_numbers = #tpu.dot_dimension_numbers<[1], [0], [0], [1], [0, 0, 1, 1], [], []>} : vector<128x384xbf16>, vector<384x128xbf16>, vector<128x128xf32> -> vector<128x128xf32>
    %69 = arith.addf %59, %68 : vector<128x128xf32>
    %c1_81 = arith.constant 1 : index
    %c0_82 = arith.constant 0 : index
    %c7_83 = arith.constant 7 : index
    %c0_84 = arith.constant 0 : index
    %70 = vector.load %arg15[%c1_81, %c0_82, %c7_83, %c0_84] : memref<4x10x17x128xbf16, #tpu.memory_space<vmem>>, vector<2x8x8x128xbf16>
    %71 = vector.shape_cast %70 : vector<2x8x8x128xbf16> to vector<128x128xbf16>
    %c1_85 = arith.constant 1 : index
    %c0_86 = arith.constant 0 : index
    %c8_87 = arith.constant 8 : index
    %c0_88 = arith.constant 0 : index
    %72 = vector.load %arg15[%c1_85, %c0_86, %c8_87, %c0_88] : memref<4x10x17x128xbf16, #tpu.memory_space<vmem>>, vector<2x8x8x128xbf16>
    %73 = vector.shape_cast %72 : vector<2x8x8x128xbf16> to vector<128x128xbf16>
    %c1_89 = arith.constant 1 : index
    %c0_90 = arith.constant 0 : index
    %c9_91 = arith.constant 9 : index
    %c0_92 = arith.constant 0 : index
    %74 = vector.load %arg15[%c1_89, %c0_90, %c9_91, %c0_92] : memref<4x10x17x128xbf16, #tpu.memory_space<vmem>>, vector<2x8x8x128xbf16>
    %75 = vector.shape_cast %74 : vector<2x8x8x128xbf16> to vector<128x128xbf16>
    %76 = tpu.concatenate %71, %73, %75 in 1 : vector<128x128xbf16>, vector<128x128xbf16>, vector<128x128xbf16> -> vector<128x384xbf16>
    %c1152 = arith.constant 1152 : index
    %c0_93 = arith.constant 0 : index
    %77 = vector.load %arg6[%c1152, %c0_93] : memref<3456x128xbf16, #tpu.memory_space<vmem>>, vector<384x128xbf16>
    %cst_94 = arith.constant dense<0.000000e+00> : vector<128x128xf32>
    %78 = tpu.matmul %76, %77, %cst_94 {dimension_numbers = #tpu.dot_dimension_numbers<[1], [0], [0], [1], [0, 0, 1, 1], [], []>} : vector<128x384xbf16>, vector<384x128xbf16>, vector<128x128xf32> -> vector<128x128xf32>
    %79 = arith.addf %69, %78 : vector<128x128xf32>
    %c1_95 = arith.constant 1 : index
    %c1_96 = arith.constant 1 : index
    %c7_97 = arith.constant 7 : index
    %c0_98 = arith.constant 0 : index
    %80 = vector.load %arg15[%c1_95, %c1_96, %c7_97, %c0_98] : memref<4x10x17x128xbf16, #tpu.memory_space<vmem>>, vector<2x8x8x128xbf16>
    %81 = vector.shape_cast %80 : vector<2x8x8x128xbf16> to vector<128x128xbf16>
    %c1_99 = arith.constant 1 : index
    %c1_100 = arith.constant 1 : index
    %c8_101 = arith.constant 8 : index
    %c0_102 = arith.constant 0 : index
    %82 = vector.load %arg15[%c1_99, %c1_100, %c8_101, %c0_102] : memref<4x10x17x128xbf16, #tpu.memory_space<vmem>>, vector<2x8x8x128xbf16>
    %83 = vector.shape_cast %82 : vector<2x8x8x128xbf16> to vector<128x128xbf16>
    %c1_103 = arith.constant 1 : index
    %c1_104 = arith.constant 1 : index
    %c9_105 = arith.constant 9 : index
    %c0_106 = arith.constant 0 : index
    %84 = vector.load %arg15[%c1_103, %c1_104, %c9_105, %c0_106] : memref<4x10x17x128xbf16, #tpu.memory_space<vmem>>, vector<2x8x8x128xbf16>
    %85 = vector.shape_cast %84 : vector<2x8x8x128xbf16> to vector<128x128xbf16>
    %86 = tpu.concatenate %81, %83, %85 in 1 : vector<128x128xbf16>, vector<128x128xbf16>, vector<128x128xbf16> -> vector<128x384xbf16>
    %c1536 = arith.constant 1536 : index
    %c0_107 = arith.constant 0 : index
    %87 = vector.load %arg6[%c1536, %c0_107] : memref<3456x128xbf16, #tpu.memory_space<vmem>>, vector<384x128xbf16>
    %cst_108 = arith.constant dense<0.000000e+00> : vector<128x128xf32>
    %88 = tpu.matmul %86, %87, %cst_108 {dimension_numbers = #tpu.dot_dimension_numbers<[1], [0], [0], [1], [0, 0, 1, 1], [], []>} : vector<128x384xbf16>, vector<384x128xbf16>, vector<128x128xf32> -> vector<128x128xf32>
    %89 = arith.addf %79, %88 : vector<128x128xf32>
    %c1_109 = arith.constant 1 : index
    %c2_110 = arith.constant 2 : index
    %c7_111 = arith.constant 7 : index
    %c0_112 = arith.constant 0 : index
    %90 = vector.load %arg15[%c1_109, %c2_110, %c7_111, %c0_112] : memref<4x10x17x128xbf16, #tpu.memory_space<vmem>>, vector<2x8x8x128xbf16>
    %91 = vector.shape_cast %90 : vector<2x8x8x128xbf16> to vector<128x128xbf16>
    %c1_113 = arith.constant 1 : index
    %c2_114 = arith.constant 2 : index
    %c8_115 = arith.constant 8 : index
    %c0_116 = arith.constant 0 : index
    %92 = vector.load %arg15[%c1_113, %c2_114, %c8_115, %c0_116] : memref<4x10x17x128xbf16, #tpu.memory_space<vmem>>, vector<2x8x8x128xbf16>
    %93 = vector.shape_cast %92 : vector<2x8x8x128xbf16> to vector<128x128xbf16>
    %c1_117 = arith.constant 1 : index
    %c2_118 = arith.constant 2 : index
    %c9_119 = arith.constant 9 : index
    %c0_120 = arith.constant 0 : index
    %94 = vector.load %arg15[%c1_117, %c2_118, %c9_119, %c0_120] : memref<4x10x17x128xbf16, #tpu.memory_space<vmem>>, vector<2x8x8x128xbf16>
    %95 = vector.shape_cast %94 : vector<2x8x8x128xbf16> to vector<128x128xbf16>
    %96 = tpu.concatenate %91, %93, %95 in 1 : vector<128x128xbf16>, vector<128x128xbf16>, vector<128x128xbf16> -> vector<128x384xbf16>
    %c1920 = arith.constant 1920 : index
    %c0_121 = arith.constant 0 : index
    %97 = vector.load %arg6[%c1920, %c0_121] : memref<3456x128xbf16, #tpu.memory_space<vmem>>, vector<384x128xbf16>
    %cst_122 = arith.constant dense<0.000000e+00> : vector<128x128xf32>
    %98 = tpu.matmul %96, %97, %cst_122 {dimension_numbers = #tpu.dot_dimension_numbers<[1], [0], [0], [1], [0, 0, 1, 1], [], []>} : vector<128x384xbf16>, vector<384x128xbf16>, vector<128x128xf32> -> vector<128x128xf32>
    %99 = arith.addf %89, %98 : vector<128x128xf32>
    %c2_123 = arith.constant 2 : index
    %c0_124 = arith.constant 0 : index
    %c7_125 = arith.constant 7 : index
    %c0_126 = arith.constant 0 : index
    %100 = vector.load %arg15[%c2_123, %c0_124, %c7_125, %c0_126] : memref<4x10x17x128xbf16, #tpu.memory_space<vmem>>, vector<2x8x8x128xbf16>
    %101 = vector.shape_cast %100 : vector<2x8x8x128xbf16> to vector<128x128xbf16>
    %c2_127 = arith.constant 2 : index
    %c0_128 = arith.constant 0 : index
    %c8_129 = arith.constant 8 : index
    %c0_130 = arith.constant 0 : index
    %102 = vector.load %arg15[%c2_127, %c0_128, %c8_129, %c0_130] : memref<4x10x17x128xbf16, #tpu.memory_space<vmem>>, vector<2x8x8x128xbf16>
    %103 = vector.shape_cast %102 : vector<2x8x8x128xbf16> to vector<128x128xbf16>
    %c2_131 = arith.constant 2 : index
    %c0_132 = arith.constant 0 : index
    %c9_133 = arith.constant 9 : index
    %c0_134 = arith.constant 0 : index
    %104 = vector.load %arg15[%c2_131, %c0_132, %c9_133, %c0_134] : memref<4x10x17x128xbf16, #tpu.memory_space<vmem>>, vector<2x8x8x128xbf16>
    %105 = vector.shape_cast %104 : vector<2x8x8x128xbf16> to vector<128x128xbf16>
    %106 = tpu.concatenate %101, %103, %105 in 1 : vector<128x128xbf16>, vector<128x128xbf16>, vector<128x128xbf16> -> vector<128x384xbf16>
    %c2304 = arith.constant 2304 : index
    %c0_135 = arith.constant 0 : index
    %107 = vector.load %arg6[%c2304, %c0_135] : memref<3456x128xbf16, #tpu.memory_space<vmem>>, vector<384x128xbf16>
    %cst_136 = arith.constant dense<0.000000e+00> : vector<128x128xf32>
    %108 = tpu.matmul %106, %107, %cst_136 {dimension_numbers = #tpu.dot_dimension_numbers<[1], [0], [0], [1], [0, 0, 1, 1], [], []>} : vector<128x384xbf16>, vector<384x128xbf16>, vector<128x128xf32> -> vector<128x128xf32>
    %109 = arith.addf %99, %108 : vector<128x128xf32>
    %c2_137 = arith.constant 2 : index
    %c1_138 = arith.constant 1 : index
    %c7_139 = arith.constant 7 : index
    %c0_140 = arith.constant 0 : index
    %110 = vector.load %arg15[%c2_137, %c1_138, %c7_139, %c0_140] : memref<4x10x17x128xbf16, #tpu.memory_space<vmem>>, vector<2x8x8x128xbf16>
    %111 = vector.shape_cast %110 : vector<2x8x8x128xbf16> to vector<128x128xbf16>
    %c2_141 = arith.constant 2 : index
    %c1_142 = arith.constant 1 : index
    %c8_143 = arith.constant 8 : index
    %c0_144 = arith.constant 0 : index
    %112 = vector.load %arg15[%c2_141, %c1_142, %c8_143, %c0_144] : memref<4x10x17x128xbf16, #tpu.memory_space<vmem>>, vector<2x8x8x128xbf16>
    %113 = vector.shape_cast %112 : vector<2x8x8x128xbf16> to vector<128x128xbf16>
    %c2_145 = arith.constant 2 : index
    %c1_146 = arith.constant 1 : index
    %c9_147 = arith.constant 9 : index
    %c0_148 = arith.constant 0 : index
    %114 = vector.load %arg15[%c2_145, %c1_146, %c9_147, %c0_148] : memref<4x10x17x128xbf16, #tpu.memory_space<vmem>>, vector<2x8x8x128xbf16>
    %115 = vector.shape_cast %114 : vector<2x8x8x128xbf16> to vector<128x128xbf16>
    %116 = tpu.concatenate %111, %113, %115 in 1 : vector<128x128xbf16>, vector<128x128xbf16>, vector<128x128xbf16> -> vector<128x384xbf16>
    %c2688 = arith.constant 2688 : index
    %c0_149 = arith.constant 0 : index
    %117 = vector.load %arg6[%c2688, %c0_149] : memref<3456x128xbf16, #tpu.memory_space<vmem>>, vector<384x128xbf16>
    %cst_150 = arith.constant dense<0.000000e+00> : vector<128x128xf32>
    %118 = tpu.matmul %116, %117, %cst_150 {dimension_numbers = #tpu.dot_dimension_numbers<[1], [0], [0], [1], [0, 0, 1, 1], [], []>} : vector<128x384xbf16>, vector<384x128xbf16>, vector<128x128xf32> -> vector<128x128xf32>
    %119 = arith.addf %109, %118 : vector<128x128xf32>
    %c2_151 = arith.constant 2 : index
    %c2_152 = arith.constant 2 : index
    %c7_153 = arith.constant 7 : index
    %c0_154 = arith.constant 0 : index
    %120 = vector.load %arg15[%c2_151, %c2_152, %c7_153, %c0_154] : memref<4x10x17x128xbf16, #tpu.memory_space<vmem>>, vector<2x8x8x128xbf16>
    %121 = vector.shape_cast %120 : vector<2x8x8x128xbf16> to vector<128x128xbf16>
    %c2_155 = arith.constant 2 : index
    %c2_156 = arith.constant 2 : index
    %c8_157 = arith.constant 8 : index
    %c0_158 = arith.constant 0 : index
    %122 = vector.load %arg15[%c2_155, %c2_156, %c8_157, %c0_158] : memref<4x10x17x128xbf16, #tpu.memory_space<vmem>>, vector<2x8x8x128xbf16>
    %123 = vector.shape_cast %122 : vector<2x8x8x128xbf16> to vector<128x128xbf16>
    %c2_159 = arith.constant 2 : index
    %c2_160 = arith.constant 2 : index
    %c9_161 = arith.constant 9 : index
    %c0_162 = arith.constant 0 : index
    %124 = vector.load %arg15[%c2_159, %c2_160, %c9_161, %c0_162] : memref<4x10x17x128xbf16, #tpu.memory_space<vmem>>, vector<2x8x8x128xbf16>
    %125 = vector.shape_cast %124 : vector<2x8x8x128xbf16> to vector<128x128xbf16>
    %126 = tpu.concatenate %121, %123, %125 in 1 : vector<128x128xbf16>, vector<128x128xbf16>, vector<128x128xbf16> -> vector<128x384xbf16>
    %c3072 = arith.constant 3072 : index
    %c0_163 = arith.constant 0 : index
    %127 = vector.load %arg6[%c3072, %c0_163] : memref<3456x128xbf16, #tpu.memory_space<vmem>>, vector<384x128xbf16>
    %cst_164 = arith.constant dense<0.000000e+00> : vector<128x128xf32>
    %128 = tpu.matmul %126, %127, %cst_164 {dimension_numbers = #tpu.dot_dimension_numbers<[1], [0], [0], [1], [0, 0, 1, 1], [], []>} : vector<128x384xbf16>, vector<384x128xbf16>, vector<128x128xf32> -> vector<128x128xf32>
    %129 = arith.addf %119, %128 : vector<128x128xf32>
    %c0_165 = arith.constant 0 : index
    %c0_166 = arith.constant 0 : index
    %130 = vector.load %arg10[%c0_165, %c0_166] : memref<1x128xf32, #tpu.memory_space<vmem>>, vector<1x128xf32>
    %131 = vector.broadcast %130 : vector<1x128xf32> to vector<128x128xf32>
    %132 = arith.mulf %129, %131 : vector<128x128xf32>
    %c0_167 = arith.constant 0 : index
    %c0_168 = arith.constant 0 : index
    %133 = vector.load %arg11[%c0_167, %c0_168] : memref<1x128xf32, #tpu.memory_space<vmem>>, vector<1x128xf32>
    %134 = vector.broadcast %133 : vector<1x128xf32> to vector<128x128xf32>
    %135 = arith.addf %132, %134 : vector<128x128xf32>
    %cst_169 = arith.constant 0.000000e+00 : f32
    %136 = vector.broadcast %cst_169 : f32 to vector<128x128xf32>
    %137 = arith.maximumf %135, %136 : vector<128x128xf32>
    %138 = arith.truncf %137 : vector<128x128xf32> to vector<128x128xbf16>
    %c0_170 = arith.constant 0 : index
    %c0_171 = arith.constant 0 : index
    %139 = vector.load %arg7[%c0_170, %c0_171] : memref<128x128xbf16, #tpu.memory_space<vmem>>, vector<128x128xbf16>
    %cst_172 = arith.constant dense<0.000000e+00> : vector<128x128xf32>
    %140 = tpu.matmul %138, %139, %cst_172 {dimension_numbers = #tpu.dot_dimension_numbers<[1], [0], [0], [1], [0, 0, 1, 1], [], []>} : vector<128x128xbf16>, vector<128x128xbf16>, vector<128x128xf32> -> vector<128x128xf32>
    %c0_173 = arith.constant 0 : index
    %c0_174 = arith.constant 0 : index
    %141 = vector.load %arg12[%c0_173, %c0_174] : memref<1x128xf32, #tpu.memory_space<vmem>>, vector<1x128xf32>
    %142 = vector.broadcast %141 : vector<1x128xf32> to vector<128x128xf32>
    %143 = arith.mulf %140, %142 : vector<128x128xf32>
    %c0_175 = arith.constant 0 : index
    %c0_176 = arith.constant 0 : index
    %144 = vector.load %arg13[%c0_175, %c0_176] : memref<1x128xf32, #tpu.memory_space<vmem>>, vector<1x128xf32>
    %145 = vector.broadcast %144 : vector<1x128xf32> to vector<128x128xf32>
    %146 = arith.addf %143, %145 : vector<128x128xf32>
    %c0_177 = arith.constant 0 : index
    %c0_178 = arith.constant 0 : index
    %c0_179 = arith.constant 0 : index
    %c0_180 = arith.constant 0 : index
    %c0_181 = arith.constant 0 : index
    %147 = vector.load %arg2[%c0_177, %c0_178, %c0_179, %c0_180, %c0_181] : memref<1x2x8x8x128xbf16, #tpu.memory_space<vmem>>, vector<1x2x8x8x128xbf16>
    %148 = vector.shape_cast %147 : vector<1x2x8x8x128xbf16> to vector<2x8x8x128xbf16>
    %149 = vector.shape_cast %148 : vector<2x8x8x128xbf16> to vector<128x128xbf16>
    %150 = arith.extf %149 : vector<128x128xbf16> to vector<128x128xf32>
    %151 = arith.addf %146, %150 : vector<128x128xf32>
    %cst_182 = arith.constant 0.000000e+00 : f32
    %152 = vector.broadcast %cst_182 : f32 to vector<128x128xf32>
    %153 = arith.maximumf %151, %152 : vector<128x128xf32>
    %154 = vector.shape_cast %153 : vector<128x128xf32> to vector<2x8x8x128xf32>
    %155 = arith.truncf %154 : vector<2x8x8x128xf32> to vector<2x8x8x128xbf16>
    %c0_183 = arith.constant 0 : index
    %c0_184 = arith.constant 0 : index
    %c0_185 = arith.constant 0 : index
    %c0_186 = arith.constant 0 : index
    %c0_187 = arith.constant 0 : index
    %156 = vector.load %arg14[%c0_183, %c0_184, %c0_185, %c0_186, %c0_187] : memref<1x2x8x8x128xbf16, #tpu.memory_space<vmem>>, vector<1x2x8x8x128xbf16>
    %157 = vector.shape_cast %156 : vector<1x2x8x8x128xbf16> to vector<2x8x8x128xbf16>
    %158 = vector.shape_cast %155 : vector<2x8x8x128xbf16> to vector<1x2x8x8x128xbf16>
    tpu.vector_store %arg14[%c0_183, %c0_184, %c0_185, %c0_186, %c0_187], %158 {strides = array<i32>} : memref<1x2x8x8x128xbf16, #tpu.memory_space<vmem>>, vector<1x2x8x8x128xbf16>,
    return
  }
  func.func @transform_0(%arg0: i32, %arg1: i32) -> (i32, i32, i32, i32, i32) {
    %c0_i32 = arith.constant 0 : i32
    %c0_i32_0 = arith.constant 0 : i32
    %c0_i32_1 = arith.constant 0 : i32
    %c0_i32_2 = arith.constant 0 : i32
    return %arg0, %arg1, %c0_i32, %c0_i32_0, %c0_i32_1 : i32, i32, i32, i32, i32
  }
  func.func @transform_1(%arg0: i32, %arg1: i32) -> (i32, i32, i32, i32, i32) {
    %c2_i32 = arith.constant 2 : i32
    %0 = arith.muli %arg1, %c2_i32 : i32
    %c1_i32 = arith.constant 1 : i32
    %1 = arith.subi %0, %c1_i32 : i32
    %c0_i32 = arith.constant 0 : i32
    %2 = arith.maxsi %1, %c0_i32 : i32
    %c0_i32_0 = arith.constant 0 : i32
    %c0_i32_1 = arith.constant 0 : i32
    %c0_i32_2 = arith.constant 0 : i32
    %c0_i32_3 = arith.constant 0 : i32
    return %arg0, %2, %c0_i32_0, %c0_i32_1, %c0_i32_2 : i32, i32, i32, i32, i32
  }
  func.func @transform_2(%arg0: i32, %arg1: i32) -> (i32, i32, i32, i32, i32) {
    %c2_i32 = arith.constant 2 : i32
    %0 = arith.muli %arg1, %c2_i32 : i32
    %c2_i32_0 = arith.constant 2 : i32
    %1 = arith.addi %0, %c2_i32_0 : i32
    %c3_i32 = arith.constant 3 : i32
    %2 = arith.minsi %1, %c3_i32 : i32
    %c0_i32 = arith.constant 0 : i32
    %c0_i32_1 = arith.constant 0 : i32
    %c0_i32_2 = arith.constant 0 : i32
    %c0_i32_3 = arith.constant 0 : i32
    return %arg0, %2, %c0_i32, %c0_i32_1, %c0_i32_2 : i32, i32, i32, i32, i32
  }
  func.func @transform_3(%arg0: i32, %arg1: i32) -> (i32, i32) {
    %c0_i32 = arith.constant 0 : i32
    %c0_i32_0 = arith.constant 0 : i32
    %c0_i32_1 = arith.constant 0 : i32
    return %c0_i32, %c0_i32_0 : i32, i32
  }
  func.func @transform_4(%arg0: i32, %arg1: i32) -> (i32, i32) {
    %c0_i32 = arith.constant 0 : i32
    %c0_i32_0 = arith.constant 0 : i32
    %c0_i32_1 = arith.constant 0 : i32
    return %c0_i32, %c0_i32_0 : i32, i32
  }
  func.func @transform_5(%arg0: i32, %arg1: i32) -> (i32, i32) {
    %c0_i32 = arith.constant 0 : i32
    %c0_i32_0 = arith.constant 0 : i32
    %c0_i32_1 = arith.constant 0 : i32
    return %c0_i32, %c0_i32_0 : i32, i32
  }
  func.func @transform_6(%arg0: i32, %arg1: i32) -> (i32, i32) {
    %c0_i32 = arith.constant 0 : i32
    %c0_i32_0 = arith.constant 0 : i32
    %c0_i32_1 = arith.constant 0 : i32
    return %c0_i32, %c0_i32_0 : i32, i32
  }
  func.func @transform_7(%arg0: i32, %arg1: i32) -> (i32, i32) {
    %c0_i32 = arith.constant 0 : i32
    %c0_i32_0 = arith.constant 0 : i32
    %c0_i32_1 = arith.constant 0 : i32
    return %c0_i32, %c0_i32_0 : i32, i32
  }
  func.func @transform_8(%arg0: i32, %arg1: i32) -> (i32, i32) {
    %c0_i32 = arith.constant 0 : i32
    %c0_i32_0 = arith.constant 0 : i32
    %c0_i32_1 = arith.constant 0 : i32
    return %c0_i32, %c0_i32_0 : i32, i32
  }
  func.func @transform_9(%arg0: i32, %arg1: i32) -> (i32, i32) {
    %c0_i32 = arith.constant 0 : i32
    %c0_i32_0 = arith.constant 0 : i32
    %c0_i32_1 = arith.constant 0 : i32
    return %c0_i32, %c0_i32_0 : i32, i32
  }
  func.func @transform_10(%arg0: i32, %arg1: i32) -> (i32, i32) {
    %c0_i32 = arith.constant 0 : i32
    %c0_i32_0 = arith.constant 0 : i32
    %c0_i32_1 = arith.constant 0 : i32
    return %c0_i32, %c0_i32_0 : i32, i32
  }
  func.func @transform_11(%arg0: i32, %arg1: i32) -> (i32, i32) {
    %c0_i32 = arith.constant 0 : i32
    %c0_i32_0 = arith.constant 0 : i32
    %c0_i32_1 = arith.constant 0 : i32
    return %c0_i32, %c0_i32_0 : i32, i32
  }
  func.func @transform_12(%arg0: i32, %arg1: i32) -> (i32, i32, i32, i32, i32) {
    %c0_i32 = arith.constant 0 : i32
    %c0_i32_0 = arith.constant 0 : i32
    %c0_i32_1 = arith.constant 0 : i32
    %c0_i32_2 = arith.constant 0 : i32
    return %arg0, %arg1, %c0_i32, %c0_i32_0, %c0_i32_1 : i32, i32, i32, i32, i32
  }
}

</mosaic_0001>

<bundles_post_ra>
// kernel: tpu_custom_call.1
= control target key start
LH: loop header
LB: loop body
LE: loop exit
PB: predicated region body
PF: predicated region fallthrough
CT: control target
= control target key end

     0   :  { %s16929_s0 = inlined_call_operand.hbm [shape: bf16[2,4,8,8,128], index: 0, kind: input, shape index: {}]   ;;  %s16930_s1 = inlined_call_operand.hbm [shape: bf16[2,4,8,8,128], index: 1, kind: input, shape index: {}]   ;;  %s16931_s2 = inlined_call_operand.hbm [shape: bf16[2,4,8,8,128], index: 2, kind: input, shape index: {}]   ;;  %s16932_s3 = inlined_call_operand.hbm [shape: bf16[128,128], index: 3, kind: input, shape index: {}]   ;;  %s16933_s4 = inlined_call_operand.hbm [shape: bf16[3456,128], index: 4, kind: input, shape index: {}]   ;;  %s16934_s5 = inlined_call_operand.hbm [shape: bf16[128,128], index: 5, kind: input, shape index: {}]   ;;  %s16935_s6 = inlined_call_operand.vmem [shape: f32[1,128], index: 6, kind: input, shape index: {}]   ;;  %s16936_s7 = inlined_call_operand.vmem [shape: f32[1,128], index: 7, kind: input, shape index: {}]   ;;  %s16937_s8 = inlined_call_operand.vmem [shape: f32[1,128], index: 8, kind: input, shape index: {}]   ;;  %s16938_s9 = inlined_call_operand.vmem [shape: f32[1,128], index: 9, kind: input, shape index: {}]   ;;  %s16939_s10 = inlined_call_operand.vmem [shape: f32[1,128], index: 10, kind: input, shape index: {}]   ;;  %s16940_s11 = inlined_call_operand.vmem [shape: f32[1,128], index: 11, kind: input, shape index: {}]   ;;  %s16941_s12 = inlined_call_operand.hbm [shape: bf16[2,4,8,8,128], index: 12, kind: output, shape index: {}]  }
   0x1   :  { %16992 = sst [smem:[#allocation78_spill]] %s16929_s0 }
   0x2   :  { %16993 = sst [smem:[#allocation79_spill]] %s16930_s1 }
   0x3   :  { %16994 = sst [smem:[#allocation80_spill]] %s16931_s2 }
   0x4   :  { %16995 = sst [smem:[#allocation81_spill]] %s16932_s3 }
   0x5   :  { %16996 = sst [smem:[#allocation82_spill]] %s16933_s4 }
   0x6   :  { %16997 = sst [smem:[#allocation83_spill]] %s16934_s5 }
   0x7   :  { %16998 = sst [smem:[#allocation84_spill]] %s16935_s6 }
   0x8   :  { %16999 = sst [smem:[#allocation85_spill]] %s16936_s7 }
   0x9   :  { %17000 = sst [smem:[#allocation86_spill]] %s16937_s8 }
   0xa   :  { %17001 = sst [smem:[#allocation87_spill]] %s16938_s9 }
   0xb   :  { %17002 = sst [smem:[#allocation88_spill]] %s16939_s10 }
   0xc   :  { %17003 = sst [smem:[#allocation89_spill]] %s16940_s11 }
   0xd   :  { %17004 = sst [smem:[#allocation90_spill]] %s16941_s12 }
   0xe   :  { %17 = vsyncpa [#allocation4], 0 }
   0xf   :  { %19 = vsyncpa [#allocation4 + $0x1], 0 }
  0x10   :  { %20 = vsyncpa [#allocation7], 0 }
  0x11   :  { %22 = vsyncpa [#allocation7 + $0x1], 0 }
  0x12   :  { %23 = vsyncpa [#allocation10], 0 }
  0x13   :  { %24 = vsyncpa [#allocation13], 0 }
  0x14   :  { %25 = vsyncpa [#allocation5], 0 }
  0x15   :  { %27 = vsyncpa [#allocation5 + $0x1], 0  ;;  %s13533_s21 = smov 0   ;;  %s13535_s22 = smov 0  }
  0x16   :  { %s13537_s23 = smov 0   ;;  %s13539_s24 = smov 0  }
  0x17   :  { %s13541_s25 = smov 0   ;;  %s13543_s26 = smov 0  }
  0x18   :  { %s13545_s27 = smov 0   ;;  %s13547_s28 = smov 0  }
  0x19   :  { %s13549_s29 = smov 0   ;;  %s13551_s30 = smov 0  }
  0x1a   :  { %s13553_s13 = smov 0   ;;  %s13555_s14 = smov 0  }
  0x1b   :  { %s13557_s15 = smov 0   ;;  %s13559_s16 = smov 0  }
  0x1c LB: > { %17005 = sst [smem:[#allocation21_spill]] %s13400_s21  ;;  %s13604_s17 = sadd.s32 4294967295, %s13452_s16   ;;  %s13452_s16 = sphi %s13559_s16, %s33_s16   ;;  %s13448_s15 = sphi %s13557_s15, %s17332_s15   ;;  %s13444_s14 = sphi %s13555_s14, %s17331_s14   ;;  %s13440_s13 = sphi %s13553_s13, %s17330_s13   ;;  %s13436_s30 = sphi %s13551_s30, %s17329_s30   ;;  %s13432_s29 = sphi %s13549_s29, %s17328_s29   ;;  %s13428_s28 = sphi %s13547_s28, %s17327_s28   ;;  %s13424_s27 = sphi %s13545_s27, %s17326_s27   ;;  %s13420_s26 = sphi %s13543_s26, %s17325_s26   ;;  %s13416_s25 = sphi %s13541_s25, %s17324_s25   ;;  %s13412_s24 = sphi %s13539_s24, %s17323_s24   ;;  %s13408_s23 = sphi %s13537_s23, %s17322_s23   ;;  %s13404_s22 = sphi %s13535_s22, %s17314_s22   ;;  %s13400_s21 = sphi %s13533_s21, %s17313_s21  }
  0x1d   : > { %17006 = sst [smem:[#allocation22_spill]] %s13404_s22  ;;  %p10319_p0 = scmp.ge.s32.totalorder %s13452_s16, 1 }
  0x1e   : > { %17007 = sst [smem:[#allocation23_spill]] %s13408_s23  ;;  %p16943_p1 = scmp.eq.s32.totalorder %s13604_s17, 0 }
  0x1f   : > { %17008 = sst [smem:[#allocation24_spill]] %s13416_s25  ;;  %p367_p3 = scmp.lt.s32.totalorder %s13452_s16, 5 }
  0x20   : > { %17009 = sst [smem:[#allocation25_spill]] %s13436_s30  ;;  %s13454_s19 = smov [#allocation9]  }
  0x21   : > { %17010 = sst [smem:[#allocation26_spill]] %s13440_s13  ;;  %p13610_p4 = pnand %p10319_p0, %p367_p3 }
  0x22   : > { %17011 = sst [smem:[#allocation27_spill]] %s13444_s14  ;;  %s379_s20 = sshll.u32 %s13454_s19, 4  ;;  %s380_s20 = int_to_ptr.vmem [resolvable:$true] %s379_s20 }
  0x23   : > { %17012 = sst [smem:[#allocation28_spill]] %s13448_s15  ;;  %p12642_p5 = pneg %p13610_p4 }
  0x24   : > { %s17013_s18 = scalar_select %p13610_p4, 1, 0 }
  0x25   : > { %p13618_p6 = pnand %p12642_p5, %p16943_p1  ;;  %s17016_s3 = sld [smem:[#allocation81_spill]] }
  0x26   : > { %17014 = sst [smem:[#allocation29_spill]] %s17013_s18 }
  0x27   : > { %s17015_s12 = scalar_select %p13618_p6, 1, 0 }
  0x28   : > { %p13630_p8 = pneg %p13618_p6 }
  0x2b   : > { %s13116_s10 = scalar_lea.hbm %s17016_s3, 1024 }
  0x2c   : > { %p13117_p7 = scmp.ne.s32.totalorder %s17016_s3, %s13116_s10  ;;  %p13123_p11 = scmp.lt.u32.totalorder %s13116_s10, %s17016_s3 }
  0x2e   : > { %p13119_p9 = pnand %p13630_p8, %p13117_p7 }
  0x30   : > { %p13120_p10 = pneg %p13119_p9 }
  0x32   : > { %p13125_p12 = pnand %p13123_p11, %p13120_p10 }
  0x34   : > { %13128 = shalt.err (!%p13125_p12)
}
  0x35   : > { %s13129_s11 = scalar_lea.vmem %s380_s20, 1024  ;;  %p13137_p5 = scmp.lt.s32.totalorder %s380_s20, %s380_s20 }
  0x36   : > { %p13130_p13 = scmp.ne.s32.totalorder %s380_s20, %s13129_s11  ;;  %p13138_p2 = scmp.lt.s32.totalorder %s13129_s11, %s13129_s11 }
  0x38   : > { %p13132_p0 = pnand %p13130_p13, %p13630_p8  ;;  %p13139_p1 = por %p13138_p2, %p13137_p5 }
  0x3a   : > { %p13133_p3 = pneg %p13132_p0 }
  0x3c   : > { %p13140_p4 = pnand %p13139_p1, %p13133_p3 }
  0x3e   : > { %13143 = shalt.err (!%p13140_p4)
}
  0x3f   : > { %s16947_s8 = smov 64   ;;  %s16949_s6 = smov 4  }
  0x40   : > { %12645 = dma.hbm_to_vmem [thread:$0]  (!%p13618_p6), %s17016_s3, 1024, %s380_s20, [#allocation10], %s16947_s8, %s16947_s8, %s16949_s6  }
  0x41   : > { %s42_s10 = sadd.s32 1, %s13444_s14  ;;  %s45_s13 = sadd.s32 1, %s13448_s15 }
  0x42   : > { %p43_p1 = scmp.ge.s32.totalorder %s42_s10, 2  ;;  %p16963_p2 = scmp.eq.s32.totalorder %s13452_s16, 0 }
  0x43   : > { %s10313_s11 = sshll.u32 %s13444_s14, 1  ;;  %s90_s30 = sadd.s32 1, %s13420_s26 }
  0x44   : > { %s17334_s10 = smov (%p43_p1, %s42_s10), 0  ;;  %s17336_s13 = smov (!%p43_p1, %s45_s13), %s13448_s15 }
  0x45   : > { %17018 = sst [smem:[#allocation30_spill]] %s17334_s10  ;;  %s50_s18 = ssub.s32 %s13444_s14, %s17334_s10 }
  0x46   : > { %s10314_s2 = sadd.s32 4294967295, %s10313_s11  ;;  %p47_p4 = scmp.ge.s32.totalorder %s17336_s13, 2 }
  0x47   : > { %p79_p7 = scmp.gt.s32.totalorder %s10314_s2, 0  ;;  %s10315_s20 = sshll.u32 %s17334_s10, 1 }
  0x48   : > { %p97_p9 = scmp.ne.s32.totalorder %s13420_s26, %s13416_s25  ;;  %s17338_s13 = smov (%p47_p4, %s17336_s13), 0 }
  0x49   : > { %17019 = sst [smem:[#allocation31_spill]] %s17338_s13  ;;  %s17340_s2 = smov (!%p79_p7, %s10314_s2), 0 }
  0x4a   : > { %s13666_s7 = ssub.s32 %s13448_s15, %s17338_s13  ;;  %s10316_s9 = sadd.s32 4294967295, %s10315_s20 }
  0x4b   : > { %17020 = sst [smem:[#allocation32_spill]] %s13666_s7  ;;  %s13669_s8 = sor.u32 %s50_s18, %s13666_s7 }
  0x4c   : > { %p83_p10 = scmp.gt.s32.totalorder %s10316_s9, 0  ;;  %p13674_p12 = por %p97_p9, %p16963_p2 }
  0x4d   : > { %p103_p13 = scmp.ne.s32.totalorder %s13416_s25, %s13412_s24  ;;  %s13680_s3 = sadd.s32 2, %s10313_s11 }
  0x4e   : > { %s17342_s9 = smov (!%p83_p10, %s10316_s9), 0  ;;  %17022 = sst [smem:[#allocation33_spill]] %s13680_s3 }
  0x4f   : > { %s86_s13 = ssub.s32 %s17340_s2, %s17342_s9  ;;  %p17023_p3 = scmp.eq.s32.totalorder %s13604_s17, 0 }
  0x50   : > { %s87_s18 = sor.u32 %s86_s13, %s13666_s7  ;;  %s13690_s21 = sadd.s32 2, %s10315_s20 }
  0x51   : > { %p13686_p5 = por %p103_p13, %p17023_p3  ;;  %p88_p1 = scmp.eq.s32.totalorder %s87_s18, 0 }
  0x52   : > { %p16962_p7 = scmp.lt.s32.totalorder %s13452_s16, 4  ;;  %s13698_s11 = sshll.u32 %s13448_s15, 5 }
  0x53   : > { %s17024_s10 = scalar_select %p13686_p5, 1, 0 }
  0x54   : > { %s13695_s24 = scalar_select %p88_p1, %s13420_s26, %s90_s30  }
  0x55   : > { %17025 = sst [smem:[#allocation34_spill]] %s17024_s10  ;;  %s461_s9 = sand.u32 1, %s13452_s16  }
  0x56   : > { %s463_s13 = sand.u32 1, %s13420_s26   ;;  %s10332_s7 = sshll.u32 %s17340_s2, 3 }
  0x57   : > { %s10329_s25 = sshll.u32 %s463_s13, 5  ;;  %s475_s22 = sadd.s32 %s10332_s7, %s13698_s11 }
  0x58   : > { %s10334_s3 = sshll.u32 %s475_s22, 6  ;;  %s465_s10 = scalar_lea.vmem [#allocation6], %s10329_s25 }
  0x59   : > { %s478_s18 = sshll.u32 %s465_s10, 4  ;;  %s17026_s1 = sld [smem:[#allocation79_spill]]  ;;  %s13708_s18 = int_to_ptr.vmem [resolvable:$true] %s478_s18 }
  0x5a   : > { %p13714_p9 = pnand %p16962_p7, %p13674_p12  ;;  %s13457_s2 = smov [#allocation11]  }
  0x5b   : > { %s392_s22 = sshll.u32 %s13457_s2, 4  ;;  %s13720_s0 = scalar_lea.sflag [#allocation7], %s461_s9  ;;  %s13718_s22 = int_to_ptr.vmem [resolvable:$true] %s392_s22 }
  0x5c   : > { %p13146_p13 = pneg %p13714_p9 }
  0x5f   : > { %s13706_s20 = scalar_lea.hbm %s17026_s1, %s10334_s3  ;;  %s13149_s6 = scalar_lea.hbm %s17026_s1, 4096 }
  0x60   : > { %s13144_s3 = scalar_lea.hbm %s13706_s20, 512  ;;  %p13150_p12 = scmp.lt.u32.totalorder %s13706_s20, %s17026_s1 }
  0x61   : > { %p13145_p10 = scmp.ne.s32.totalorder %s13706_s20, %s13144_s3  ;;  %p13151_p4 = scmp.lt.u32.totalorder %s13149_s6, %s13144_s3 }
  0x62   : > { %p13153_p7 = scmp.lt.u32.totalorder %s13144_s3, %s13706_s20 }
  0x63   : > { %p13147_p3 = pnand %p13146_p13, %p13145_p10  ;;  %p13152_p0 = por %p13151_p4, %p13150_p12 }
  0x65   : > { %p13148_p1 = pneg %p13147_p3  ;;  %p13154_p2 = por %p13153_p7, %p13152_p0 }
  0x67   : > { %p13155_p11 = pnand %p13154_p2, %p13148_p1 }
  0x69   : > { %13158 = shalt.err (!%p13155_p11)
}
  0x6a   : > { %s13159_s9 = scalar_lea.vmem %s13708_s18, 512  ;;  %s13458_s13 = smov [#allocation6]  }
  0x6b   : > { %p13160_p10 = scmp.ne.s32.totalorder %s13708_s18, %s13159_s9  ;;  %s13164_s2 = sshll.u32 %s13458_s13, 4  ;;  %s13165_s2 = int_to_ptr.vmem [resolvable:$false] %s13164_s2 }
  0x6c   : > { %s13166_s23 = scalar_lea.vmem %s13165_s2, 1024  ;;  %p13167_p6 = scmp.lt.s32.totalorder %s13708_s18, %s13165_s2 }
  0x6d   : > { %p13162_p3 = pnand %p13160_p10, %p13146_p13  ;;  %p13168_p4 = scmp.lt.s32.totalorder %s13166_s23, %s13159_s9 }
  0x6f   : > { %p13163_p5 = pneg %p13162_p3  ;;  %p13169_p12 = por %p13168_p4, %p13167_p6 }
  0x71   : > { %p13170_p0 = pnand %p13169_p12, %p13163_p5 }
  0x73   : > { %13173 = shalt.err (!%p13170_p0)
}
  0x74   : > { %s17028_s3 = smov 4   ;;  %s17029_s25 = smov 64  }
  0x75   : > { %12658 = dma.hbm_to_vmem [thread:$0]  (!%p13714_p9), %s13706_s20, 512, %s13708_s18, %s13720_s0, %s17029_s25, %s17029_s25, %s17028_s3  }
  0x76   : > { %s17030_s4 = sld [smem:[#allocation82_spill]] }
  0x7c   : > { %s13174_s7 = scalar_lea.hbm %s17030_s4, 27648 }
  0x7d   : > { %p13175_p6 = scmp.ne.s32.totalorder %s17030_s4, %s13174_s7  ;;  %p13181_p5 = scmp.lt.u32.totalorder %s13174_s7, %s17030_s4 }
  0x7f   : > { %p13177_p2 = pnand %p13175_p6, %p13630_p8 }
  0x81   : > { %p13178_p11 = pneg %p13177_p2 }
  0x83   : > { %p13183_p7 = pnand %p13181_p5, %p13178_p11 }
  0x85   : > { %13186 = shalt.err (!%p13183_p7)
}
  0x86   : > { %s13187_s18 = scalar_lea.vmem %s13718_s22, 27648  ;;  %p13195_p10 = scmp.lt.s32.totalorder %s13718_s22, %s13718_s22 }
  0x87   : > { %p13188_p9 = scmp.ne.s32.totalorder %s13718_s22, %s13187_s18  ;;  %p13196_p3 = scmp.lt.s32.totalorder %s13187_s18, %s13187_s18 }
  0x89   : > { %p13190_p13 = pnand %p13188_p9, %p13630_p8  ;;  %p13197_p4 = por %p13196_p3, %p13195_p10 }
  0x8b   : > { %p13191_p1 = pneg %p13190_p13 }
  0x8d   : > { %p13198_p12 = pnand %p13197_p4, %p13191_p1 }
  0x8f   : > { %13201 = shalt.err (!%p13198_p12)
}
  0x90   : > { %p17031_p0 = scmp.ne.s32.totalorder %s17015_s12, 0  ;;  %s13459_s6 = smov [#allocation12]  }
  0x91   : > { %s405_s10 = sshll.u32 %s13459_s6, 4  ;;  %s17032_s5 = sld [smem:[#allocation83_spill]]  ;;  %s406_s10 = int_to_ptr.vmem [resolvable:$true] %s405_s10 }
  0x92   : > { %12648 = dma.hbm_to_vmem [thread:$0]  (!%p17031_p0), %s17030_s4, 27648, %s13718_s22, [#allocation10], %s17029_s25, %s17029_s25, %s17028_s3  }
  0x97   : > { %s13202_s2 = scalar_lea.hbm %s17032_s5, 1024 }
  0x98   : > { %p13203_p6 = scmp.ne.s32.totalorder %s17032_s5, %s13202_s2  ;;  %p13209_p5 = scmp.lt.u32.totalorder %s13202_s2, %s17032_s5 }
  0x9a   : > { %p13205_p2 = pnand %p13203_p6, %p13630_p8 }
  0x9c   : > { %p13206_p11 = pneg %p13205_p2 }
  0x9e   : > { %p13211_p7 = pnand %p13209_p5, %p13206_p11 }
  0xa0   : > { %13214 = shalt.err (!%p13211_p7)
}
  0xa1   : > { %s13215_s22 = scalar_lea.vmem %s406_s10, 1024  ;;  %p13223_p10 = scmp.lt.s32.totalorder %s406_s10, %s406_s10 }
  0xa2   : > { %p13216_p9 = scmp.ne.s32.totalorder %s406_s10, %s13215_s22  ;;  %p13224_p3 = scmp.lt.s32.totalorder %s13215_s22, %s13215_s22 }
  0xa4   : > { %p13218_p13 = pnand %p13216_p9, %p13630_p8  ;;  %p13225_p4 = por %p13224_p3, %p13223_p10 }
  0xa6   : > { %p13219_p1 = pneg %p13218_p13 }
  0xa8   : > { %p13226_p12 = pnand %p13225_p4, %p13219_p1 }
  0xaa   : > { %13229 = shalt.err (!%p13226_p12)
}
  0xab   : > { %12651 = dma.hbm_to_vmem [thread:$0]  (!%p17031_p0), %s17032_s5, 1024, %s406_s10, [#allocation13], %s17029_s25, %s17029_s25, %s17028_s3  }
  0xac   : > { %s10312_s12 = sadd.s32 4294967294, %s13452_s16   ;;  %s54_s19 = sadd.s32 1, %s13432_s29 }
  0xad   : > { %p17033_p8 = scmp.eq.s32.totalorder %s13669_s8, 0  ;;  %p61_p6 = scmp.ne.s32.totalorder %s13432_s29, %s13428_s28 }
  0xae   : > { %p67_p2 = scmp.ne.s32.totalorder %s13428_s28, %s13424_s27  ;;  %p360_p11 = scmp.eq.s32.totalorder %s10312_s12, 3 }
  0xaf   : > { %s13803_s23 = scalar_select %p17033_p8, %s13432_s29, %s54_s19  }
  0xb0   : > { %s437_s6 = sand.u32 1, %s13432_s29   ;;  %p17035_p5 = scmp.eq.s32.totalorder %s13452_s16, 0 }
  0xb1   : > { %17034 = sst [smem:[#allocation35_spill]] %s13803_s23  ;;  %p17036_p9 = scmp.eq.s32.totalorder %s13604_s17, 0 }
  0xb2   : > { %p63_p7 = por %p17035_p5, %p61_p6  ;;  %p17038_p1 = scmp.eq.s32.totalorder %s13604_s17, 3 }
  0xb3   : > { %p13814_p13 = por %p17036_p9, %p67_p2  ;;  %p13824_p0 = por %p360_p11, %p67_p2 }
  0xb4   : > { %p13820_p10 = por %p17038_p1, %p61_p6  ;;  %s10324_s13 = sshll.u32 %s437_s6, 6 }
  0xb5   : > { %s17040_s8 = scalar_select %p13824_p0, 1, 0 }
  0xb6   : > { %s17039_s10 = scalar_select %p13820_p10, 1, 0 }
  0xb7   : > { %17041 = sst [smem:[#allocation36_spill]] %s17040_s8  ;;  %s11006_s2 = sshll.u32 %s13444_s14, 4 }
  0xb8   : > { %s448_s30 = sadd.s32 %s11006_s2, %s13698_s11  ;;  %s441_s9 = scalar_lea.vmem [#allocation3], %s10324_s13 }
  0xb9   : > { %s451_s18 = sshll.u32 %s441_s9, 4  ;;  %s10328_s22 = sshll.u32 %s448_s30, 6  ;;  %s13830_s18 = int_to_ptr.vmem [resolvable:$true] %s451_s18 }
  0xba   : > { %s17042_s12 = sld [smem:[#allocation78_spill]]  ;;  %p17043_p3 = scmp.lt.s32.totalorder %s13452_s16, 4 }
  0xbb   : > { %s13843_s13 = scalar_lea.sflag [#allocation4], %s437_s6 }
  0xbc   : > { %p13839_p4 = pnand %p17043_p3, %p63_p7 }
  0xbe   : > { %p13232_p8 = pneg %p13839_p4 }
  0xc0   : > { %s13835_s19 = scalar_lea.hbm %s17042_s12, %s10328_s22  ;;  %s13235_s22 = scalar_lea.hbm %s17042_s12, 4096 }
  0xc1   : > { %s13230_s2 = scalar_lea.hbm %s13835_s19, 1024  ;;  %p13236_p11 = scmp.lt.u32.totalorder %s13835_s19, %s17042_s12 }
  0xc2   : > { %p13231_p12 = scmp.ne.s32.totalorder %s13835_s19, %s13230_s2  ;;  %p13237_p5 = scmp.lt.u32.totalorder %s13235_s22, %s13230_s2 }
  0xc3   : > { %p13239_p9 = scmp.lt.u32.totalorder %s13230_s2, %s13835_s19 }
  0xc4   : > { %p13233_p6 = pnand %p13232_p8, %p13231_p12  ;;  %p13238_p7 = por %p13237_p5, %p13236_p11 }
  0xc6   : > { %p13234_p2 = pneg %p13233_p6  ;;  %p13240_p1 = por %p13239_p9, %p13238_p7 }
  0xc8   : > { %p13241_p3 = pnand %p13240_p1, %p13234_p2 }
  0xca   : > { %13244 = shalt.err (!%p13241_p3)
}
  0xcb   : > { %s13245_s6 = scalar_lea.vmem %s13830_s18, 1024  ;;  %s13460_s30 = smov [#allocation3]  }
  0xcc   : > { %p13246_p12 = scmp.ne.s32.totalorder %s13830_s18, %s13245_s6  ;;  %s13250_s9 = sshll.u32 %s13460_s30, 4  ;;  %s13251_s9 = int_to_ptr.vmem [resolvable:$false] %s13250_s9 }
  0xcd   : > { %s13252_s1 = scalar_lea.vmem %s13251_s9, 2048  ;;  %p13253_p10 = scmp.lt.s32.totalorder %s13830_s18, %s13251_s9 }
  0xce   : > { %p13248_p6 = pnand %p13246_p12, %p13232_p8  ;;  %p13254_p11 = scmp.lt.s32.totalorder %s13252_s1, %s13245_s6 }
  0xd0   : > { %p13249_p0 = pneg %p13248_p6  ;;  %p13255_p5 = por %p13254_p11, %p13253_p10 }
  0xd2   : > { %p13256_p7 = pnand %p13255_p5, %p13249_p0 }
  0xd4   : > { %13259 = shalt.err (!%p13256_p7)
}
  0xd5   : > { %s17045_s2 = sld [smem:[#allocation23_spill]]  ;;  %s17046_s22 = sld [smem:[#allocation33_spill]] }
  0xd6   : > { %s17047_s20 = sld [smem:[#allocation22_spill]]  ;;  %s17049_s6 = sld [smem:[#allocation32_spill]] }
  0xd7   : > { %s17048_s30 = sld [smem:[#allocation21_spill]]  ;;  %p17051_p0 = scmp.lt.s32.totalorder %s13690_s21, 3 }
  0xd8   : > { %12655 = dma.hbm_to_vmem [thread:$0]  (!%p13839_p4), %s13835_s19, 1024, %s13830_s18, %s13843_s13, %s17029_s25, %s17029_s25, %s17028_s3  }
  0xd9   : > { %s17346_s21 = smov (!%p17051_p0, %s13690_s21), 3  ;;  %p17052_p9 = scmp.eq.s32.totalorder %s13452_s16, 0 }
  0xda   : > { %p17053_p12 = scmp.eq.s32.totalorder %s13604_s17, 0  ;;  %s17055_s23 = sld [smem:[#allocation80_spill]] }
  0xdb   : > { %s126_s4 = sadd.s32 1, %s17045_s2  ;;  %p17050_p10 = scmp.lt.s32.totalorder %s17046_s22, 3 }
  0xdc   : > { %p133_p8 = scmp.ne.s32.totalorder %s17045_s2, %s17047_s20  ;;  %s490_s1 = sand.u32 1, %s17045_s2  }
  0xdd   : > { %s17344_s22 = smov (!%p17050_p10, %s17046_s22), 3  ;;  %p139_p2 = scmp.ne.s32.totalorder %s17047_s20, %s17048_s30 }
  0xde   : > { %s122_s9 = ssub.s32 %s17344_s22, %s17346_s21  ;;  %p135_p1 = por %p133_p8, %p17052_p9 }
  0xdf   : > { %s123_s5 = sor.u32 %s122_s9, %s17049_s6  ;;  %p13891_p6 = por %p139_p2, %p17053_p12 }
  0xe0   : > { %p124_p3 = scmp.eq.s32.totalorder %s123_s5, 0  ;;  %s10335_s18 = sshll.u32 %s490_s1, 5 }
  0xe1   : > { %s17054_s12 = scalar_select %p13891_p6, 1, 0 }
  0xe2   : > { %s10337_s19 = sshll.u32 %s17344_s22, 3  ;;  %s17348_s2 = smov (!%p124_p3, %s17045_s2), %s126_s4 }
  0xe3   : > { %s502_s13 = sadd.s32 %s10337_s19, %s13698_s11  ;;  %s492_s14 = scalar_lea.vmem [#allocation8], %s10335_s18 }
  0xe4   : > { %s10339_s15 = sshll.u32 %s502_s13, 6  ;;  %s505_s20 = sshll.u32 %s492_s14, 4  ;;  %s13904_s20 = int_to_ptr.vmem [resolvable:$true] %s505_s20 }
  0xe5   : > { %s17056_s8 = smov %s17055_s23  ;;  %s13902_s6 = scalar_lea.hbm %s17055_s23, %s10339_s15 }
  0xe6   : > { %p17057_p4 = scmp.lt.s32.totalorder %s13452_s16, 4  ;;  %s13260_s11 = scalar_lea.hbm %s13902_s6, 512 }
  0xe7   : > { %p13261_p5 = scmp.ne.s32.totalorder %s13902_s6, %s13260_s11  ;;  %s13265_s23 = scalar_lea.hbm %s17056_s8, 4096 }
  0xe8   : > { %p13908_p11 = pnand %p17057_p4, %p135_p1  ;;  %p13266_p8 = scmp.lt.u32.totalorder %s13902_s6, %s17056_s8 }
  0xe9   : > { %p13267_p2 = scmp.lt.u32.totalorder %s13265_s23, %s13260_s11  ;;  %p13269_p1 = scmp.lt.u32.totalorder %s13260_s11, %s13902_s6 }
  0xea   : > { %p13262_p7 = pneg %p13908_p11 }
  0xeb   : > { %p13268_p9 = por %p13267_p2, %p13266_p8 }
  0xec   : > { %p13263_p10 = pnand %p13262_p7, %p13261_p5 }
  0xed   : > { %p13270_p3 = por %p13269_p1, %p13268_p9 }
  0xee   : > { %p13264_p0 = pneg %p13263_p10 }
  0xf0   : > { %p13271_p12 = pnand %p13270_p3, %p13264_p0 }
  0xf2   : > { %13274 = shalt.err (!%p13271_p12)
}
  0xf3   : > { %s13275_s9 = scalar_lea.vmem %s13904_s20, 512  ;;  %s13461_s1 = smov [#allocation8]  }
  0xf4   : > { %p13276_p4 = scmp.ne.s32.totalorder %s13904_s20, %s13275_s9  ;;  %s13280_s18 = sshll.u32 %s13461_s1, 4  ;;  %s13281_s18 = int_to_ptr.vmem [resolvable:$false] %s13280_s18 }
  0xf5   : > { %s13282_s19 = scalar_lea.vmem %s13281_s18, 1024  ;;  %p13283_p6 = scmp.lt.s32.totalorder %s13904_s20, %s13281_s18 }
  0xf6   : > { %p13278_p5 = pnand %p13276_p4, %p13262_p7  ;;  %p13284_p8 = scmp.lt.s32.totalorder %s13282_s19, %s13275_s9 }
  0xf8   : > { %p13279_p10 = pneg %p13278_p5  ;;  %p13285_p2 = por %p13284_p8, %p13283_p6 }
  0xfa   : > { %p13286_p9 = pnand %p13285_p2, %p13279_p10 }
  0xfc   : > { %13289 = shalt.err (!%p13286_p9)
}
  0xfd   : > { %12661 = dma.hbm_to_vmem [thread:$0]  (!%p13908_p11), %s13902_s6, 512, %s13904_s20, %s13720_s0, %s17029_s25, %s17029_s25, %s17028_s3  }
  0xfe   : > { %s17059_s13 = sld [smem:[#allocation29_spill]] }
 0x104   : > { %p17060_p7 = scmp.ne.s32.totalorder %s17059_s13, 0 }
 0x106   : > { %517 = sbr.rel (%p17060_p7) target bundleno = 2209 (0x8a1), region = 68 }
 0x10d   : > { %s13944_s30 = sand.u32 1, %s13428_s28  }
 0x10e   : > { %s10341_s21 = sshll.u32 %s13944_s30, 6  ;;  %s520_s11 = scalar_lea.sflag [#allocation4], %s13944_s30 }
 0x10f   : > { %s13950_s5 = scalar_lea.vmem [#allocation3], %s10341_s21 }
 0x110   : > { %13375 = dma.done.wait (%p13814_p13), %s520_s11, 1024  }
 0x111   : > { %13377 = vsyncadd (%p13814_p13), %s520_s11, 4294966272  ;;  %s17061_s0 = sld [smem:[#allocation24_spill]]  ;;  %s17062_s3 = sld [smem:[#allocation34_spill]] }
 0x112   : > { %s528_s25 = sand.u32 1, %s13604_s17  }
 0x113   : > { %s529_s14 = scalar_lea.sflag [#allocation7], %s528_s25 }
 0x117   : > { %s530_s20 = sand.u32 1, %s17061_s0   ;;  %p17063_p6 = scmp.ne.s32.totalorder %s17062_s3, 0 }
 0x118   : > { %s10342_s6 = sshll.u32 %s530_s20, 5 }
 0x119   : > { %s13958_s15 = scalar_lea.vmem [#allocation6], %s10342_s6 }
 0x11a   : > { %13379 = dma.done.wait (%p17063_p6), %s529_s14, 512  }
 0x11b   : > { %13381 = vsyncadd (%p17063_p6), %s529_s14, 4294966784  ;;  %s17064_s23 = sld [smem:[#allocation22_spill]]  ;;  %p17065_p13 = scmp.ne.s32.totalorder %s17054_s12, 0 }
 0x121   : > { %s539_s22 = sand.u32 1, %s17064_s23  }
 0x122   : > { %s10343_s4 = sshll.u32 %s539_s22, 5 }
 0x123   : > { %s13965_s7 = scalar_lea.vmem [#allocation8], %s10343_s4 }
 0x124   : > { %13383 = dma.done.wait (%p17065_p13), %s529_s14, 512  }
 0x125   : > { %13385 = vsyncadd (%p17065_p13), %s529_s14, 4294966784  ;;  %p17066_p11 = scmp.eq.s32.totalorder %s13604_s17, 0 }
 0x127   : > { %13387 = dma.done.wait (%p17066_p11), [#allocation10], 28672   ;;  %p17067_p0 = pmov %p17066_p11 }
 0x129   : > { %13389 = vsyncadd (%p17067_p0), [#allocation10], 4294938624  ;;  %p17068_p1 = pmov %p17067_p0 }
 0x12a   : > { %p17069_p3 = pmov %p17067_p0 }
 0x12b   : > { %13391 = dma.done.wait (%p17068_p1), [#allocation13], 1024  }
 0x12c   : > { %13393 = vsyncadd (%p17069_p3), [#allocation13], 4294966272  ;;  %v13462_v0 = vmov 0   ;;  %s17070_s17 = sld [smem:[#allocation25_spill]]  ;;  %vm636_vm0 = vcmask 1040384   ;;  %v13993_v9 = vld [vmem:[#allocation9] sm:$0xff]  }
 0x12d   : > { %634 = vst [vmem:[#allocation2] sm:$0xf] %v13462_v0  ;;  %635 = vst [vmem:[#allocation2 + $0x4] sm:$0xf] %v13462_v0  ;;  %vm637_vm1 = vsmask.f32 256  ;;  %11902 = vmatprep.subr.bf16.mxu0 %v13993_v9  ;;  %12302 = vmatprep.subr.bf16.mxu1 %v13993_v9 }
 0x12e   : > { %642 = vst [vmem:[#allocation2 + $0x78] sm:$0xf] %v13462_v0  ;;  %643 = vst [vmem:[#allocation2 + $0x7c] sm:$0xf] %v13462_v0  ;;  %v639_v2 = vld [vmem:[#allocation2 + $0x8] sm:$0x1]  ;;  %11903 = vmatpush3.bf16.msra.mxu0 %v13993_v9  ;;  %12310 = vmatpush3.bf16.msra.mxu1 %v13993_v9 }
 0x12f   : > { %647 = vst [vmem:[#allocation2 + $0xf0] sm:$0xf] %v13462_v0  ;;  %648 = vst [vmem:[#allocation2 + $0xf4] sm:$0xf] %v13462_v0  ;;  %v644_v3 = vld [vmem:[#allocation2 + $0x80] sm:$0x1] }
 0x130   : > { %652 = vst [vmem:[#allocation2 + $0x168] sm:$0xf] %v13462_v0  ;;  %653 = vst [vmem:[#allocation2 + $0x16c] sm:$0xf] %v13462_v0  ;;  %v649_v4 = vld [vmem:[#allocation2 + $0xf8] sm:$0x1] }
 0x131   : > { %658 = vst [vmem:[#allocation2 + $0x6c] sm:$0xf] %v13462_v0  ;;  %659 = vst [vmem:[#allocation2 + $0x70] sm:$0xf] %v13462_v0  ;;  %v654_v8 = vld [vmem:[#allocation2 + $0x170] sm:$0x1] }
 0x132   : > { %663 = vst [vmem:[#allocation2 + $0xe4] sm:$0xf] %v13462_v0  ;;  %664 = vst [vmem:[#allocation2 + $0xe8] sm:$0xf] %v13462_v0  ;;  %s13980_s12 = sshll.u32 %s17070_s17, 1  ;;  %v13997_v13 = vld [vmem:[#allocation9 + $0x8] sm:$0xff]  }
 0x133   : > { %668 = vst [vmem:[#allocation2 + $0x15c] sm:$0xf] %v13462_v0  ;;  %669 = vst [vmem:[#allocation2 + $0x160] sm:$0xf] %v13462_v0  ;;  %v660_v11 = vld [vmem:[#allocation2 + $0x74] sm:$0x1]  ;;  %11904 = vmatprep.subr.bf16.mxu0 %v13997_v13  ;;  %12303 = vmatprep.subr.bf16.mxu1 %v13997_v13 }
 0x134   : > { %673 = vst [vmem:[#allocation2 + $0x1d4] sm:$0xf] %v13462_v0  ;;  %674 = vst [vmem:[#allocation2 + $0x1d8] sm:$0xf] %v13462_v0  ;;  %v665_v12 = vld [vmem:[#allocation2 + $0xec] sm:$0x1]  ;;  %11905 = vmatpush3.bf16.msra.mxu0 %v13997_v13  ;;  %12311 = vmatpush3.bf16.msra.mxu1 %v13997_v13 }
 0x135   : > { %679 = vst [vmem:[#allocation2 + $0xc] sm:$0xf] %v13462_v0  ;;  %680 = vst [vmem:[#allocation2 + $0x18] sm:$0xf] %v13462_v0  ;;  %v670_v16 = vld [vmem:[#allocation2 + $0x164] sm:$0x1] }
 0x136   : > { %681 = vst [vmem:[#allocation2 + $0x24] sm:$0xf] %v13462_v0  ;;  %682 = vst [vmem:[#allocation2 + $0x30] sm:$0xf] %v13462_v0  ;;  %v675_v17 = vld [vmem:[#allocation2 + $0x1dc] sm:$0x1] }
 0x137   : > { %683 = vst [vmem:[#allocation2 + $0x3c] sm:$0xf] %v13462_v0  ;;  %684 = vst [vmem:[#allocation2 + $0x48] sm:$0xf] %v13462_v0  ;;  %v721_v20 = vld [vmem:[#allocation2 + $0x14] sm:$0x1] }
 0x138   : > { %685 = vst [vmem:[#allocation2 + $0x54] sm:$0xf] %v13462_v0  ;;  %686 = vst [vmem:[#allocation2 + $0x60] sm:$0xf] %v13462_v0  ;;  %v724_v21 = vld [vmem:[#allocation2 + $0x20] sm:$0x1] }
 0x139   : > { %689 = vst [vmem:[#allocation2 + $0x84] sm:$0xf] %v13462_v0  ;;  %690 = vst [vmem:[#allocation2 + $0x90] sm:$0xf] %v13462_v0  ;;  %v727_v24 = vld [vmem:[#allocation2 + $0x2c] sm:$0x1] }
 0x13a   : > { %691 = vst [vmem:[#allocation2 + $0x9c] sm:$0xf] %v13462_v0  ;;  %692 = vst [vmem:[#allocation2 + $0xa8] sm:$0xf] %v13462_v0  ;;  %v730_v25 = vld [vmem:[#allocation2 + $0x38] sm:$0x1] }
 0x13b   : > { %693 = vst [vmem:[#allocation2 + $0xb4] sm:$0xf] %v13462_v0  ;;  %694 = vst [vmem:[#allocation2 + $0xc0] sm:$0xf] %v13462_v0  ;;  %v733_v28 = vld [vmem:[#allocation2 + $0x44] sm:$0x1] }
 0x13c   : > { %695 = vst [vmem:[#allocation2 + $0xcc] sm:$0xf] %v13462_v0  ;;  %696 = vst [vmem:[#allocation2 + $0xd8] sm:$0xf] %v13462_v0  ;;  %v736_v29 = vld [vmem:[#allocation2 + $0x50] sm:$0x1] }
 0x13d   : > { %699 = vst [vmem:[#allocation2 + $0xfc] sm:$0xf] %v13462_v0  ;;  %700 = vst [vmem:[#allocation2 + $0x108] sm:$0xf] %v13462_v0  ;;  %v739_v32 = vld [vmem:[#allocation2 + $0x5c] sm:$0x1] }
 0x13e   : > { %701 = vst [vmem:[#allocation2 + $0x114] sm:$0xf] %v13462_v0  ;;  %702 = vst [vmem:[#allocation2 + $0x120] sm:$0xf] %v13462_v0  ;;  %v742_v33 = vld [vmem:[#allocation2 + $0x68] sm:$0x1] }
 0x13f   : > { %703 = vst [vmem:[#allocation2 + $0x12c] sm:$0xf] %v13462_v0  ;;  %704 = vst [vmem:[#allocation2 + $0x138] sm:$0xf] %v13462_v0  ;;  %v751_v36 = vld [vmem:[#allocation2 + $0x8c] sm:$0x1] }
 0x140   : > { %705 = vst [vmem:[#allocation2 + $0x144] sm:$0xf] %v13462_v0  ;;  %706 = vst [vmem:[#allocation2 + $0x150] sm:$0xf] %v13462_v0  ;;  %v754_v37 = vld [vmem:[#allocation2 + $0x98] sm:$0x1] }
 0x141   : > { %709 = vst [vmem:[#allocation2 + $0x174] sm:$0xf] %v13462_v0  ;;  %710 = vst [vmem:[#allocation2 + $0x180] sm:$0xf] %v13462_v0  ;;  %v757_v44 = vld [vmem:[#allocation2 + $0xa4] sm:$0x1] }
 0x142   : > { %711 = vst [vmem:[#allocation2 + $0x18c] sm:$0xf] %v13462_v0  ;;  %712 = vst [vmem:[#allocation2 + $0x198] sm:$0xf] %v13462_v0  ;;  %v760_v45 = vld [vmem:[#allocation2 + $0xb0] sm:$0x1] }
 0x143   : > { %713 = vst [vmem:[#allocation2 + $0x1a4] sm:$0xf] %v13462_v0  ;;  %714 = vst [vmem:[#allocation2 + $0x1b0] sm:$0xf] %v13462_v0  ;;  %v763_v49 = vld [vmem:[#allocation2 + $0xbc] sm:$0x1] }
 0x144   : > { %715 = vst [vmem:[#allocation2 + $0x1bc] sm:$0xf] %v13462_v0  ;;  %716 = vst [vmem:[#allocation2 + $0x1c8] sm:$0xf] %v13462_v0  ;;  %v766_v52 = vld [vmem:[#allocation2 + $0xc8] sm:$0x1] }
 0x145   : > { %678 = vst [vmem:[#allocation2] sm:$0xf] %v13462_v0  ;;  %687 = vst [vmem:[#allocation2 + $0x6c] sm:$0xf] %v13462_v0  ;;  %v769_v53 = vld [vmem:[#allocation2 + $0xd4] sm:$0x1] }
 0x146   : > { %688 = vst [vmem:[#allocation2 + $0x78] sm:$0xf] %v13462_v0  ;;  %697 = vst [vmem:[#allocation2 + $0xe4] sm:$0xf] %v13462_v0  ;;  %v772_v56 = vld [vmem:[#allocation2 + $0xe0] sm:$0x1] }
 0x147   : > { %698 = vst [vmem:[#allocation2 + $0xf0] sm:$0xf] %v13462_v0  ;;  %707 = vst [vmem:[#allocation2 + $0x15c] sm:$0xf] %v13462_v0  ;;  %v781_v61 = vld [vmem:[#allocation2 + $0x104] sm:$0x1] }
 0x148   : > { %708 = vst [vmem:[#allocation2 + $0x168] sm:$0xf] %v13462_v0  ;;  %717 = vst [vmem:[#allocation2 + $0x1d4] sm:$0xf] %v13462_v0  ;;  %v784_v0 = vld [vmem:[#allocation2 + $0x110] sm:$0x1] }
 0x149   : > { %vm13983_vm2 = vmand %vm636_vm0, %vm637_vm1  ;;  %v14105_v1 = vld [vmem:[#allocation9 + $0x20] sm:$0xff]   ;;  %s17073_s18 = sld [smem:[#allocation84_spill]]  ;;  %s17074_s11 = sld [smem:[#allocation85_spill]] }
 0x14a   : > { %v640_v5 = vsel %vm13983_vm2, 0, %v639_v2  ;;  %v645_v6 = vsel %vm13983_vm2, 0, %v644_v3  ;;  %v650_v7 = vsel %vm13983_vm2, 0, %v649_v4  ;;  %v655_v10 = vsel %vm13983_vm2, 0, %v654_v8  ;;  %v787_v2 = vld [vmem:[#allocation2 + $0x11c] sm:$0x1] }
 0x14b   : > { %641 = vst [vmem:[#allocation2 + $0x8] sm:$0x1] %v640_v5  ;;  %646 = vst [vmem:[#allocation2 + $0x80] sm:$0x1] %v645_v6  ;;  %v661_v14 = vsel %vm13983_vm2, 0, %v660_v11  ;;  %v666_v15 = vsel %vm13983_vm2, 0, %v665_v12 }
 0x14c   : > { %651 = vst [vmem:[#allocation2 + $0xf8] sm:$0x1] %v650_v7  ;;  %656 = vst [vmem:[#allocation2 + $0x170] sm:$0x1] %v655_v10  ;;  %v671_v18 = vsel %vm13983_vm2, 0, %v670_v16  ;;  %v676_v19 = vsel %vm13983_vm2, 0, %v675_v17 }
 0x14d   : > { %662 = vst [vmem:[#allocation2 + $0x74] sm:$0x1] %v661_v14  ;;  %667 = vst [vmem:[#allocation2 + $0xec] sm:$0x1] %v666_v15  ;;  %v722_v22 = vsel %vm13983_vm2, 0, %v721_v20  ;;  %v725_v23 = vsel %vm13983_vm2, 0, %v724_v21 }
 0x14e   : > { %672 = vst [vmem:[#allocation2 + $0x164] sm:$0x1] %v671_v18  ;;  %677 = vst [vmem:[#allocation2 + $0x1dc] sm:$0x1] %v676_v19  ;;  %v728_v26 = vsel %vm13983_vm2, 0, %v727_v24  ;;  %v731_v27 = vsel %vm13983_vm2, 0, %v730_v25 }
 0x14f   : > { %723 = vst [vmem:[#allocation2 + $0x14] sm:$0x1] %v722_v22  ;;  %726 = vst [vmem:[#allocation2 + $0x20] sm:$0x1] %v725_v23  ;;  %v734_v30 = vsel %vm13983_vm2, 0, %v733_v28  ;;  %v737_v31 = vsel %vm13983_vm2, 0, %v736_v29 }
 0x150   : > { %729 = vst [vmem:[#allocation2 + $0x2c] sm:$0x1] %v728_v26  ;;  %732 = vst [vmem:[#allocation2 + $0x38] sm:$0x1] %v731_v27  ;;  %v740_v34 = vsel %vm13983_vm2, 0, %v739_v32  ;;  %v743_v35 = vsel %vm13983_vm2, 0, %v742_v33 }
 0x151   : > { %735 = vst [vmem:[#allocation2 + $0x44] sm:$0x1] %v734_v30  ;;  %738 = vst [vmem:[#allocation2 + $0x50] sm:$0x1] %v737_v31  ;;  %v752_v40 = vsel %vm13983_vm2, 0, %v751_v36  ;;  %v755_v41 = vsel %vm13983_vm2, 0, %v754_v37 }
 0x152   : > { %v718_v38 = vld [vmem:[#allocation2 + $0x8] sm:$0x1]  ;;  %741 = vst [vmem:[#allocation2 + $0x5c] sm:$0x1] %v740_v34  ;;  %744 = vst [vmem:[#allocation2 + $0x68] sm:$0x1] %v743_v35 }
 0x153   : > { %v748_v39 = vld [vmem:[#allocation2 + $0x80] sm:$0x1]  ;;  %v719_v42 = vsel %vm13983_vm2, 0, %v718_v38  ;;  %753 = vst [vmem:[#allocation2 + $0x8c] sm:$0x1] %v752_v40  ;;  %v758_v47 = vsel %vm13983_vm2, 0, %v757_v44 }
 0x154   : > { %v749_v43 = vsel %vm13983_vm2, 0, %v748_v39  ;;  %756 = vst [vmem:[#allocation2 + $0x98] sm:$0x1] %v755_v41  ;;  %720 = vst [vmem:[#allocation2 + $0x8] sm:$0x1] %v719_v42  ;;  %v761_v48 = vsel %vm13983_vm2, 0, %v760_v45 }
 0x155   : > { %v745_v46 = vld [vmem:[#allocation2 + $0x74] sm:$0x1]  ;;  %750 = vst [vmem:[#allocation2 + $0x80] sm:$0x1] %v749_v43  ;;  %759 = vst [vmem:[#allocation2 + $0xa4] sm:$0x1] %v758_v47 }
 0x156   : > { %v746_v50 = vsel %vm13983_vm2, 0, %v745_v46  ;;  %762 = vst [vmem:[#allocation2 + $0xb0] sm:$0x1] %v761_v48  ;;  %v764_v51 = vsel %vm13983_vm2, 0, %v763_v49  ;;  %v767_v54 = vsel %vm13983_vm2, 0, %v766_v52  ;;  %v770_v55 = vsel %vm13983_vm2, 0, %v769_v53 }
 0x157   : > { %747 = vst [vmem:[#allocation2 + $0x74] sm:$0x1] %v746_v50  ;;  %765 = vst [vmem:[#allocation2 + $0xbc] sm:$0x1] %v764_v51  ;;  %v775_v57 = vld [vmem:[#allocation2 + $0xec] sm:$0x1] }
 0x158   : > { %768 = vst [vmem:[#allocation2 + $0xc8] sm:$0x1] %v767_v54  ;;  %771 = vst [vmem:[#allocation2 + $0xd4] sm:$0x1] %v770_v55  ;;  %v773_v58 = vsel %vm13983_vm2, 0, %v772_v56  ;;  %v776_v59 = vsel %vm13983_vm2, 0, %v775_v57 }
 0x159   : > { %v778_v60 = vld [vmem:[#allocation2 + $0xf8] sm:$0x1]  ;;  %774 = vst [vmem:[#allocation2 + $0xe0] sm:$0x1] %v773_v58  ;;  %777 = vst [vmem:[#allocation2 + $0xec] sm:$0x1] %v776_v59 }
 0x15a   : > { %v779_v62 = vsel %vm13983_vm2, 0, %v778_v60  ;;  %v782_v63 = vsel %vm13983_vm2, 0, %v781_v61  ;;  %v785_v3 = vsel %vm13983_vm2, 0, %v784_v0  ;;  %v788_v4 = vsel %vm13983_vm2, 0, %v787_v2  ;;  %v790_v5 = vld [vmem:[#allocation2 + $0x128] sm:$0x1] }
 0x15b   : > { %780 = vst [vmem:[#allocation2 + $0xf8] sm:$0x1] %v779_v62  ;;  %783 = vst [vmem:[#allocation2 + $0x104] sm:$0x1] %v782_v63  ;;  %v793_v6 = vld [vmem:[#allocation2 + $0x134] sm:$0x1] }
 0x15c   : > { %786 = vst [vmem:[#allocation2 + $0x110] sm:$0x1] %v785_v3  ;;  %789 = vst [vmem:[#allocation2 + $0x11c] sm:$0x1] %v788_v4  ;;  %v791_v7 = vsel %vm13983_vm2, 0, %v790_v5  ;;  %v794_v8 = vsel %vm13983_vm2, 0, %v793_v6 }
 0x15d   : > { %v796_v10 = vld [vmem:[#allocation2 + $0x140] sm:$0x1]  ;;  %v799_v11 = vld [vmem:[#allocation2 + $0x14c] sm:$0x1]  ;;  %792 = vst [vmem:[#allocation2 + $0x128] sm:$0x1] %v791_v7 }
 0x15e   : > { %795 = vst [vmem:[#allocation2 + $0x134] sm:$0x1] %v794_v8  ;;  %v797_v12 = vsel %vm13983_vm2, 0, %v796_v10  ;;  %v800_v14 = vsel %vm13983_vm2, 0, %v799_v11  ;;  %v802_v15 = vld [vmem:[#allocation2 + $0x158] sm:$0x1] }
 0x15f   : > { %v805_v16 = vld [vmem:[#allocation2 + $0x164] sm:$0x1]  ;;  %798 = vst [vmem:[#allocation2 + $0x140] sm:$0x1] %v797_v12  ;;  %801 = vst [vmem:[#allocation2 + $0x14c] sm:$0x1] %v800_v14 }
 0x160   : > { %v803_v17 = vsel %vm13983_vm2, 0, %v802_v15  ;;  %v806_v18 = vsel %vm13983_vm2, 0, %v805_v16  ;;  %v808_v19 = vld [vmem:[#allocation2 + $0x170] sm:$0x1]  ;;  %v811_v20 = vld [vmem:[#allocation2 + $0x17c] sm:$0x1] }
 0x161   : > { %804 = vst [vmem:[#allocation2 + $0x158] sm:$0x1] %v803_v17  ;;  %807 = vst [vmem:[#allocation2 + $0x164] sm:$0x1] %v806_v18  ;;  %v809_v21 = vsel %vm13983_vm2, 0, %v808_v19  ;;  %v812_v22 = vsel %vm13983_vm2, 0, %v811_v20 }
 0x162   : > { %v814_v23 = vld [vmem:[#allocation2 + $0x188] sm:$0x1]  ;;  %v817_v24 = vld [vmem:[#allocation2 + $0x194] sm:$0x1]  ;;  %810 = vst [vmem:[#allocation2 + $0x170] sm:$0x1] %v809_v21 }
 0x163   : > { %813 = vst [vmem:[#allocation2 + $0x17c] sm:$0x1] %v812_v22  ;;  %v815_v25 = vsel %vm13983_vm2, 0, %v814_v23  ;;  %v818_v26 = vsel %vm13983_vm2, 0, %v817_v24  ;;  %v820_v27 = vld [vmem:[#allocation2 + $0x1a0] sm:$0x1] }
 0x164   : > { %v823_v28 = vld [vmem:[#allocation2 + $0x1ac] sm:$0x1]  ;;  %816 = vst [vmem:[#allocation2 + $0x188] sm:$0x1] %v815_v25  ;;  %819 = vst [vmem:[#allocation2 + $0x194] sm:$0x1] %v818_v26 }
 0x165   : > { %v821_v29 = vsel %vm13983_vm2, 0, %v820_v27  ;;  %v824_v30 = vsel %vm13983_vm2, 0, %v823_v28  ;;  %v826_v31 = vld [vmem:[#allocation2 + $0x1b8] sm:$0x1]  ;;  %v829_v32 = vld [vmem:[#allocation2 + $0x1c4] sm:$0x1] }
 0x166   : > { %822 = vst [vmem:[#allocation2 + $0x1a0] sm:$0x1] %v821_v29  ;;  %825 = vst [vmem:[#allocation2 + $0x1ac] sm:$0x1] %v824_v30  ;;  %v827_v33 = vsel %vm13983_vm2, 0, %v826_v31  ;;  %v830_v34 = vsel %vm13983_vm2, 0, %v829_v32 }
 0x167   : > { %v832_v35 = vld [vmem:[#allocation2 + $0x1d0] sm:$0x1]  ;;  %v835_v36 = vld [vmem:[#allocation2 + $0x1dc] sm:$0x1]  ;;  %828 = vst [vmem:[#allocation2 + $0x1b8] sm:$0x1] %v827_v33 }
 0x168   : > { %831 = vst [vmem:[#allocation2 + $0x1c4] sm:$0x1] %v830_v34  ;;  %v833_v37 = vsel %vm13983_vm2, 0, %v832_v35  ;;  %v836_v38 = vsel %vm13983_vm2, 0, %v835_v36  ;;  %v14095_v39 = vld [vmem:[#allocation9 + $0x10] sm:$0xff]   ;;  %v14097_v40 = vld [vmem:[#allocation9 + $0x18] sm:$0xff]  }
 0x169   : > { %834 = vst [vmem:[#allocation2 + $0x1d0] sm:$0x1] %v833_v37  ;;  %837 = vst [vmem:[#allocation2 + $0x1dc] sm:$0x1] %v836_v38  ;;  %11906 = vmatprep.subr.bf16.mxu0 %v14095_v39  ;;  %12304 = vmatprep.subr.bf16.mxu1 %v14095_v39  ;;  %v12804_v41 = vld [vmem:[%s13950_s5] sm:$0xff]   ;;  %v14113_v43 = vld [vmem:[#allocation9 + $0x28] sm:$0xff]  }
 0x16a   : > { %11907 = vmatpush3.bf16.msra.mxu0 %v14095_v39  ;;  %12312 = vmatpush3.bf16.msra.mxu1 %v14095_v39  ;;  %v12805_v42 = vld [vmem:[%s13950_s5 + $0x20] sm:$0xff]   ;;  %v14119_v44 = vld [vmem:[#allocation9 + $0x30] sm:$0xff]   ;;  %v14125_v45 = vld [vmem:[#allocation9 + $0x38] sm:$0xff]   ;;  %s14183_s0 = scalar_lea.vmem [#allocation14], %s10341_s21  ;;  %p10383_p12 = scmp.le.s32.totalorder %s13980_s12, 0 }
 0x16b   : > { %11908 = vmatprep.subr.bf16.mxu0 %v14097_v40  ;;  %12305 = vmatprep.subr.bf16.mxu1 %v14097_v40  ;;  %v12806_v46 = vld [vmem:[%s13950_s5 + $0x8] sm:$0xff]   ;;  %v12808_v48 = vld [vmem:[%s13950_s5 + $0x10] sm:$0xff]   ;;  %v12810_v50 = vld [vmem:[%s13950_s5 + $0x18] sm:$0xff]  }
 0x16c   : > { %11918 = vmatprep.mubr.bf16.mxu0 %v12804_v41  ;;  %11926 = vmatprep.mubr.bf16.mxu1 %v12805_v42  ;;  %v12807_v47 = vld [vmem:[%s13950_s5 + $0x28] sm:$0xff]   ;;  %v12809_v49 = vld [vmem:[%s13950_s5 + $0x30] sm:$0xff]   ;;  %v12811_v51 = vld [vmem:[%s13950_s5 + $0x38] sm:$0xff]  }
 0x16d   : > { %v14142_v52 = vld [vmem:[%s17073_s18] ss:$0 sm:$0xff] }
 0x16e   : > { %11909 = vmatpush3.bf16.msra.mxu0 %v14097_v40  ;;  %12313 = vmatpush3.bf16.msra.mxu1 %v14097_v40  ;;  %v14147_v53 = vld [vmem:[%s17074_s11] ss:$0 sm:$0xff] }
 0x16f   : > { %11910 = vmatprep.subr.bf16.mxu0 %v14105_v1  ;;  %12306 = vmatprep.subr.bf16.mxu1 %v14105_v1 }
 0x172   : > { %11911 = vmatpush3.bf16.msra.mxu0 %v14105_v1  ;;  %12314 = vmatpush3.bf16.msra.mxu1 %v14105_v1 }
 0x173   : > { %11912 = vmatprep.subr.bf16.mxu0 %v14113_v43  ;;  %12307 = vmatprep.subr.bf16.mxu1 %v14113_v43 }
 0x176   : > { %11913 = vmatpush3.bf16.msra.mxu0 %v14113_v43  ;;  %12315 = vmatpush3.bf16.msra.mxu1 %v14113_v43 }
 0x177   : > { %11914 = vmatprep.subr.bf16.mxu0 %v14119_v44  ;;  %12308 = vmatprep.subr.bf16.mxu1 %v14119_v44 }
 0x17a   : > { %11915 = vmatpush3.bf16.msra.mxu0 %v14119_v44  ;;  %12316 = vmatpush3.bf16.msra.mxu1 %v14119_v44 }
 0x17b   : > { %11916 = vmatprep.subr.bf16.mxu0 %v14125_v45  ;;  %12309 = vmatprep.subr.bf16.mxu1 %v14125_v45 }
 0x17e   : > { %11917 = vmatpush3.bf16.msra.mxu0 %v14125_v45  ;;  %12317 = vmatpush3.bf16.msra.mxu1 %v14125_v45 }
 0x17f   : > { %11934 = vmatprep.subr.bf16.mxu0 (!%p10383_p12), %v13993_v9  ;;  %12318 = vmatprep.subr.bf16.mxu1 (!%p10383_p12), %v13993_v9 }
 0x181   : > { %11919 = vmatmul.mubr.bf16.vlgmr.msra.gmra.mrb[0].mxu0 %v12806_v46  ;;  %11927 = vmatmul.mubr.bf16.vlgmr.msra.gmra.mrb[0].mxu1 %v12807_v47 }
 0x182   : > { %11922 = vmatprep.mubr.bf16.mxu0 %v12808_v48  ;;  %11930 = vmatprep.mubr.bf16.mxu1 %v12809_v49 }
 0x183   : > { %11935 = vmatpush3.bf16.msra.mxu0 (!%p10383_p12), %v13993_v9  ;;  %12326 = vmatpush3.bf16.msra.mxu1 (!%p10383_p12), %v13993_v9 }
 0x184   : > { %11936 = vmatprep.subr.bf16.mxu0 (!%p10383_p12), %v13997_v13  ;;  %12319 = vmatprep.subr.bf16.mxu1 (!%p10383_p12), %v13997_v13 }
 0x187   : > { %11937 = vmatpush3.bf16.msra.mxu0 (!%p10383_p12), %v13997_v13  ;;  %12327 = vmatpush3.bf16.msra.mxu1 (!%p10383_p12), %v13997_v13 }
 0x188   : > { %11938 = vmatprep.subr.bf16.mxu0 (!%p10383_p12), %v14095_v39  ;;  %12320 = vmatprep.subr.bf16.mxu1 (!%p10383_p12), %v14095_v39 }
 0x189   : > { %11923 = vmatmul.mubr.bf16.gmra.mrb[4].mxu0 %v12810_v50  ;;  %11931 = vmatmul.mubr.bf16.gmra.mrb[4].mxu1 %v12811_v51 }
 0x18b   : > { %11939 = vmatpush3.bf16.msra.mxu0 (!%p10383_p12), %v14095_v39  ;;  %12328 = vmatpush3.bf16.msra.mxu1 (!%p10383_p12), %v14095_v39 }
 0x18c   : > { %11940 = vmatprep.subr.bf16.mxu0 (!%p10383_p12), %v14097_v40  ;;  %12321 = vmatprep.subr.bf16.mxu1 (!%p10383_p12), %v14097_v40 }
 0x18f   : > { %11941 = vmatpush3.bf16.msra.mxu0 (!%p10383_p12), %v14097_v40  ;;  %12329 = vmatpush3.bf16.msra.mxu1 (!%p10383_p12), %v14097_v40 }
 0x190   : > { %11942 = vmatprep.subr.bf16.mxu0 (!%p10383_p12), %v14105_v1  ;;  %12322 = vmatprep.subr.bf16.mxu1 (!%p10383_p12), %v14105_v1 }
 0x193   : > { %11943 = vmatpush3.bf16.msra.mxu0 (!%p10383_p12), %v14105_v1  ;;  %12330 = vmatpush3.bf16.msra.mxu1 (!%p10383_p12), %v14105_v1 }
 0x194   : > { %11944 = vmatprep.subr.bf16.mxu0 (!%p10383_p12), %v14113_v43  ;;  %12323 = vmatprep.subr.bf16.mxu1 (!%p10383_p12), %v14113_v43 }
 0x197   : > { %11945 = vmatpush3.bf16.msra.mxu0 (!%p10383_p12), %v14113_v43  ;;  %12331 = vmatpush3.bf16.msra.mxu1 (!%p10383_p12), %v14113_v43 }
 0x198   : > { %11946 = vmatprep.subr.bf16.mxu0 (!%p10383_p12), %v14119_v44  ;;  %12324 = vmatprep.subr.bf16.mxu1 (!%p10383_p12), %v14119_v44 }
 0x19b   : > { %11947 = vmatpush3.bf16.msra.mxu0 (!%p10383_p12), %v14119_v44  ;;  %12332 = vmatpush3.bf16.msra.mxu1 (!%p10383_p12), %v14119_v44 }
 0x19c   : > { %11948 = vmatprep.subr.bf16.mxu0 (!%p10383_p12), %v14125_v45  ;;  %12325 = vmatprep.subr.bf16.mxu1 (!%p10383_p12), %v14125_v45 }
 0x19f   : > { %11949 = vmatpush3.bf16.msra.mxu0 (!%p10383_p12), %v14125_v45  ;;  %12333 = vmatpush3.bf16.msra.mxu1 (!%p10383_p12), %v14125_v45 }
 0x254   : > { %v11920_v54 = vpop.f32.mrb[0].mxu0  ;;  %v11928_v55 = vpop.f32.mrb[0].mxu1 }
 0x255   : > { %v1055_v56 = vmul.f32 %v11920_v54, %v14142_v52  ;;  %v1063_v57 = vmul.f32 %v11928_v55, %v14142_v52  ;;  %v984_v58 = vpop.f32.mrb[1].mxu0  ;;  %v1016_v59 = vpop.f32.mrb[1].mxu1 }
 0x256   : > { %v1053_v60 = vmul.f32 %v14142_v52, %v984_v58  ;;  %v1061_v61 = vmul.f32 %v14142_v52, %v1016_v59  ;;  %v11921_v62 = vpop.f32.mrb[2].mxu0  ;;  %v11929_v63 = vpop.f32.mrb[2].mxu1 }
 0x257   : > { %v1077_v0 = vadd.f32 %v14147_v53, %v1055_v56  ;;  %v1085_v2 = vadd.f32 %v14147_v53, %v1063_v57  ;;  %v1056_v3 = vmul.f32 %v11921_v62, %v14142_v52  ;;  %v1064_v4 = vmul.f32 %v11929_v63, %v14142_v52  ;;  %v987_v5 = vpop.f32.mrb[3].mxu0  ;;  %v1019_v6 = vpop.f32.mrb[3].mxu1 }
 0x258   : > { %v1075_v7 = vadd.f32 %v14147_v53, %v1053_v60  ;;  %v1083_v8 = vadd.f32 %v14147_v53, %v1061_v61  ;;  %v1054_v10 = vmul.f32 %v14142_v52, %v987_v5  ;;  %v1062_v11 = vmul.f32 %v14142_v52, %v1019_v6 }
 0x259   : > { %v1093_v12 = vmax.f32 %v1077_v0, 0.0  ;;  %v1101_v14 = vmax.f32 %v1085_v2, 0.0  ;;  %v1078_v15 = vadd.f32 %v14147_v53, %v1056_v3  ;;  %v1086_v16 = vadd.f32 %v14147_v53, %v1064_v4 }
 0x25a   : > { %v1091_v17 = vmax.f32 %v1075_v7, 0.0  ;;  %v1099_v18 = vmax.f32 %v1083_v8, 0.0  ;;  %v1076_v19 = vadd.f32 %v14147_v53, %v1054_v10  ;;  %v1084_v20 = vadd.f32 %v14147_v53, %v1062_v11 }
 0x25b   : > { %v11009_v21 = vpack.c.bf16 %v1093_v12, %v1093_v12  ;;  %v11017_v22 = vpack.c.bf16 %v1101_v14, %v1101_v14  ;;  %v1094_v23 = vmax.f32 %v1078_v15, 0.0  ;;  %v1102_v24 = vmax.f32 %v1086_v16, 0.0 }
 0x25c   : > { %v11007_v25 = vpack.c.bf16 %v1091_v17, %v1091_v17  ;;  %v11015_v26 = vpack.c.bf16 %v1099_v18, %v1099_v18  ;;  %v1092_v27 = vmax.f32 %v1076_v19, 0.0  ;;  %v1100_v28 = vmax.f32 %v1084_v20, 0.0  ;;  %v11924_v29 = vpop.f32.mrb[4].mxu0  ;;  %v11932_v30 = vpop.f32.mrb[4].mxu1  ;;  %v12812_v19 = vld [vmem:[%s13958_s15] sm:$0xff] (!%p10383_p12)   ;;  %v12813_v20 = vld [vmem:[%s13958_s15 + $0x10] sm:$0xff] (!%p10383_p12)  }
 0x25d   : > { %1174 = vst [vmem:[#allocation2 + $0xa0] sm:$0xf] %v11009_v21  ;;  %1182 = vst [vmem:[#allocation2 + $0x118] sm:$0xf] %v11017_v22  ;;  %v11010_v31 = vpack.c.bf16 %v1094_v23, %v1094_v23  ;;  %v11018_v32 = vpack.c.bf16 %v1102_v24, %v1102_v24  ;;  %v1059_v33 = vmul.f32 %v11924_v29, %v14142_v52  ;;  %v1000_v35 = vpop.f32.mrb[5].mxu0  ;;  %v1032_v36 = vpop.f32.mrb[5].mxu1  ;;  %11950 = vmatprep.mubr.bf16.mxu0 (!%p10383_p12), %v12812_v19 }
 0x25e   : > { %v1067_v34 = vmul.f32 %v11932_v30, %v14142_v52  ;;  %1172 = vst [vmem:[#allocation2 + $0x88] sm:$0xf] %v11007_v25  ;;  %1180 = vst [vmem:[#allocation2 + $0x100] sm:$0xf] %v11015_v26  ;;  %v11008_v37 = vpack.c.bf16 %v1092_v27, %v1092_v27  ;;  %v11016_v38 = vpack.c.bf16 %v1100_v28, %v1100_v28  ;;  %v11925_v46 = vpop.f32.mrb[6].mxu0  ;;  %v11933_v47 = vpop.f32.mrb[6].mxu1  ;;  %11954 = vmatprep.mubr.bf16.mxu1 (!%p10383_p12), %v12813_v20 }
 0x25f   : > { %v1057_v41 = vmul.f32 %v14142_v52, %v1000_v35  ;;  %v1065_v42 = vmul.f32 %v14142_v52, %v1032_v36  ;;  %1175 = vst [vmem:[#allocation2 + $0xac] sm:$0xf] %v11010_v31  ;;  %1183 = vst [vmem:[#allocation2 + $0x124] sm:$0xf] %v11018_v32  ;;  %v1081_v48 = vadd.f32 %v14147_v53, %v1059_v33  ;;  %v1003_v54 = vpop.f32.mrb[7].mxu0  ;;  %v1035_v55 = vpop.f32.mrb[7].mxu1 }
 0x260   : > { %v1089_v49 = vadd.f32 %v14147_v53, %v1067_v34  ;;  %v1060_v50 = vmul.f32 %v11925_v46, %v14142_v52  ;;  %v1068_v51 = vmul.f32 %v11933_v47, %v14142_v52  ;;  %1173 = vst [vmem:[#allocation2 + $0x94] sm:$0xf] %v11008_v37  ;;  %1181 = vst [vmem:[#allocation2 + $0x10c] sm:$0xf] %v11016_v38  ;;  %v12814_v21 = vld [vmem:[%s13958_s15 + $0x8] sm:$0xff] (!%p10383_p12)   ;;  %v12815_v22 = vld [vmem:[%s13958_s15 + $0x18] sm:$0xff] (!%p10383_p12)  }
 0x261   : > { %v1079_v56 = vadd.f32 %v14147_v53, %v1057_v41  ;;  %v1087_v57 = vadd.f32 %v14147_v53, %v1065_v42  ;;  %v1058_v58 = vmul.f32 %v14142_v52, %v1003_v54  ;;  %v1066_v59 = vmul.f32 %v14142_v52, %v1035_v55  ;;  %11951 = vmatmul.mubr.bf16.vlgmr.msra.gmra.mrb[0].mxu0 (!%p10383_p12), %v12814_v21 }
 0x262   : > { %v1097_v60 = vmax.f32 %v1081_v48, 0.0  ;;  %v1105_v61 = vmax.f32 %v1089_v49, 0.0  ;;  %v1082_v62 = vadd.f32 %v14147_v53, %v1060_v50  ;;  %v1090_v63 = vadd.f32 %v14147_v53, %v1068_v51  ;;  %11955 = vmatmul.mubr.bf16.vlgmr.msra.gmra.mrb[0].mxu1 (!%p10383_p12), %v12815_v22 }
 0x263   : > { %v1095_v0 = vmax.f32 %v1079_v56, 0.0  ;;  %v1103_v2 = vmax.f32 %v1087_v57, 0.0  ;;  %v1080_v3 = vadd.f32 %v14147_v53, %v1058_v58  ;;  %v1088_v4 = vadd.f32 %v14147_v53, %v1066_v59  ;;  %1191 = sbr.rel (%p10383_p12) target bundleno = 834 (0x342), region = 96 }
 0x264   : > { %v11013_v5 = vpack.c.bf16 %v1097_v60, %v1097_v60  ;;  %v11021_v6 = vpack.c.bf16 %v1105_v61, %v1105_v61  ;;  %v1098_v7 = vmax.f32 %v1082_v62, 0.0  ;;  %v1106_v8 = vmax.f32 %v1090_v63, 0.0 }
 0x265   : > { %v11011_v10 = vpack.c.bf16 %v1095_v0, %v1095_v0  ;;  %v11019_v11 = vpack.c.bf16 %v1103_v2, %v1103_v2  ;;  %v1096_v12 = vmax.f32 %v1080_v3, 0.0  ;;  %v1104_v14 = vmax.f32 %v1088_v4, 0.0 }
 0x266   : > { %1178 = vst [vmem:[#allocation2 + $0xd0] sm:$0xf] %v11013_v5  ;;  %1186 = vst [vmem:[#allocation2 + $0x148] sm:$0xf] %v11021_v6  ;;  %v11014_v15 = vpack.c.bf16 %v1098_v7, %v1098_v7  ;;  %v11022_v16 = vpack.c.bf16 %v1106_v8, %v1106_v8 }
 0x267   : > { %1176 = vst [vmem:[#allocation2 + $0xb8] sm:$0xf] %v11011_v10  ;;  %1184 = vst [vmem:[#allocation2 + $0x130] sm:$0xf] %v11019_v11  ;;  %v11012_v17 = vpack.c.bf16 %v1096_v12, %v1096_v12  ;;  %v11020_v18 = vpack.c.bf16 %v1104_v14, %v1104_v14 }
 0x268   : > { %1179 = vst [vmem:[#allocation2 + $0xdc] sm:$0xf] %v11014_v15  ;;  %1187 = vst [vmem:[#allocation2 + $0x154] sm:$0xf] %v11022_v16 }
 0x269   : > { %1177 = vst [vmem:[#allocation2 + $0xc4] sm:$0xf] %v11012_v17  ;;  %1185 = vst [vmem:[#allocation2 + $0x13c] sm:$0xf] %v11020_v18 }
 0x334   : > { %v11952_v23 = vpop.f32.mrb[0].mxu0 }
 0x335   : > { %v11956_v24 = vpop.f32.mrb[0].mxu1  ;;  %v1291_v25 = vmul.f32 %v11952_v23, %v14142_v52  ;;  %v1258_v27 = vpop.f32.mrb[1].mxu0 }
 0x336   : > { %v1295_v26 = vmul.f32 %v11956_v24, %v14142_v52  ;;  %v1274_v28 = vpop.f32.mrb[1].mxu1  ;;  %v1289_v29 = vmul.f32 %v14142_v52, %v1258_v27  ;;  %v11953_v31 = vpop.f32.mrb[2].mxu0 }
 0x337   : > { %v1293_v30 = vmul.f32 %v14142_v52, %v1274_v28  ;;  %v11957_v32 = vpop.f32.mrb[2].mxu1  ;;  %v1299_v33 = vadd.f32 %v14147_v53, %v1291_v25  ;;  %v1292_v35 = vmul.f32 %v11953_v31, %v14142_v52  ;;  %v1261_v37 = vpop.f32.mrb[3].mxu0 }
 0x338   : > { %v1303_v34 = vadd.f32 %v14147_v53, %v1295_v26  ;;  %v1296_v36 = vmul.f32 %v11957_v32, %v14142_v52  ;;  %v1277_v38 = vpop.f32.mrb[3].mxu1  ;;  %v1297_v41 = vadd.f32 %v14147_v53, %v1289_v29  ;;  %v1290_v46 = vmul.f32 %v14142_v52, %v1261_v37 }
 0x339   : > { %v1301_v42 = vadd.f32 %v14147_v53, %v1293_v30  ;;  %v1294_v47 = vmul.f32 %v14142_v52, %v1277_v38  ;;  %v1307_v48 = vmax.f32 %v1299_v33, 0.0  ;;  %v1300_v50 = vadd.f32 %v14147_v53, %v1292_v35 }
 0x33a   : > { %v1311_v49 = vmax.f32 %v1303_v34, 0.0  ;;  %v1304_v51 = vadd.f32 %v14147_v53, %v1296_v36  ;;  %v1305_v54 = vmax.f32 %v1297_v41, 0.0  ;;  %v1298_v56 = vadd.f32 %v14147_v53, %v1290_v46 }
 0x33b   : > { %v1309_v55 = vmax.f32 %v1301_v42, 0.0  ;;  %v1302_v57 = vadd.f32 %v14147_v53, %v1294_v47  ;;  %v11025_v58 = vpack.c.bf16 %v1307_v48, %v1307_v48  ;;  %v1308_v60 = vmax.f32 %v1300_v50, 0.0 }
 0x33c   : > { %v11029_v59 = vpack.c.bf16 %v1311_v49, %v1311_v49  ;;  %v1312_v61 = vmax.f32 %v1304_v51, 0.0  ;;  %v11023_v62 = vpack.c.bf16 %v1305_v54, %v1305_v54  ;;  %v1306_v0 = vmax.f32 %v1298_v56, 0.0 }
 0x33d   : > { %v11027_v63 = vpack.c.bf16 %v1309_v55, %v1309_v55  ;;  %v1310_v2 = vmax.f32 %v1302_v57, 0.0  ;;  %1348 = vst [vmem:[#allocation2 + $0x28] sm:$0xf] %v11025_v58  ;;  %v11026_v3 = vpack.c.bf16 %v1308_v60, %v1308_v60 }
 0x33e   : > { %1352 = vst [vmem:[#allocation2 + $0x58] sm:$0xf] %v11029_v59  ;;  %v11030_v4 = vpack.c.bf16 %v1312_v61, %v1312_v61  ;;  %1346 = vst [vmem:[#allocation2 + $0x10] sm:$0xf] %v11023_v62  ;;  %v11024_v5 = vpack.c.bf16 %v1306_v0, %v1306_v0 }
 0x33f   : > { %1350 = vst [vmem:[#allocation2 + $0x40] sm:$0xf] %v11027_v63  ;;  %v11028_v6 = vpack.c.bf16 %v1310_v2, %v1310_v2  ;;  %1349 = vst [vmem:[#allocation2 + $0x34] sm:$0xf] %v11026_v3 }
 0x340   : > { %1353 = vst [vmem:[#allocation2 + $0x64] sm:$0xf] %v11030_v4  ;;  %1347 = vst [vmem:[#allocation2 + $0x1c] sm:$0xf] %v11024_v5 }
 0x341   : > { %1351 = vst [vmem:[#allocation2 + $0x4c] sm:$0xf] %v11028_v6 }
 0x342 PF: > { %p10396_p4 = scmp.ne.s32.totalorder %s13980_s12, 0 }
 0x343   : > { %v13463_v7 = vmov (!%p10396_p4), 0  }
 0x344   : > { %1357 = sbr.rel (%p10396_p4) target bundleno = 843 (0x34b), region = 100  ;;  %1359 = vst [vmem:[#allocation2 + $0x10] sm:$0xf] (!%p10396_p4), %v13463_v7  ;;  %1360 = vst [vmem:[#allocation2 + $0x1c] sm:$0xf] (!%p10396_p4), %v13463_v7 }
 0x345   : > { %1361 = vst [vmem:[#allocation2 + $0x28] sm:$0xf] (!%p10396_p4), %v13463_v7  ;;  %1362 = vst [vmem:[#allocation2 + $0x34] sm:$0xf] (!%p10396_p4), %v13463_v7 }
 0x346   : > { %1363 = vst [vmem:[#allocation2 + $0x40] sm:$0xf] (!%p10396_p4), %v13463_v7  ;;  %1364 = vst [vmem:[#allocation2 + $0x4c] sm:$0xf] (!%p10396_p4), %v13463_v7 }
 0x347   : > { %1365 = vst [vmem:[#allocation2 + $0x58] sm:$0xf] (!%p10396_p4), %v13463_v7  ;;  %1366 = vst [vmem:[#allocation2 + $0x64] sm:$0xf] (!%p10396_p4), %v13463_v7 }
 0x34b PF: > { %s1367_s21 = sadd.s32 2, %s13980_s12 }
 0x34c   : > { %p10397_p5 = scmp.ge.s32.totalorder %s1367_s21, 4 }
 0x34d   : > { %11958 = vmatprep.subr.bf16.mxu0 (!%p10397_p5), %v13993_v9  ;;  %12334 = vmatprep.subr.bf16.mxu1 (!%p10397_p5), %v13993_v9  ;;  %v12816_v8 = vld [vmem:[%s13965_s7] sm:$0xff] (!%p10397_p5)   ;;  %v12817_v10 = vld [vmem:[%s13965_s7 + $0x10] sm:$0xff] (!%p10397_p5)  }
 0x34e   : > { %1371 = sbr.rel (%p10397_p5) target bundleno = 1101 (0x44d), region = 104  ;;  %11959 = vmatpush3.bf16.msra.mxu0 (!%p10397_p5), %v13993_v9  ;;  %12342 = vmatpush3.bf16.msra.mxu1 (!%p10397_p5), %v13993_v9  ;;  %v12818_v9 = vld [vmem:[%s13965_s7 + $0x8] sm:$0xff] (!%p10397_p5)  }
 0x34f   : > { %11960 = vmatprep.subr.bf16.mxu0 (!%p10397_p5), %v13997_v13  ;;  %12335 = vmatprep.subr.bf16.mxu1 (!%p10397_p5), %v13997_v13 }
 0x350   : > { %11974 = vmatprep.mubr.bf16.mxu0 (!%p10397_p5), %v12816_v8  ;;  %11978 = vmatprep.mubr.bf16.mxu1 (!%p10397_p5), %v12817_v10 }
 0x352   : > { %11961 = vmatpush3.bf16.msra.mxu0 (!%p10397_p5), %v13997_v13  ;;  %12343 = vmatpush3.bf16.msra.mxu1 (!%p10397_p5), %v13997_v13  ;;  %v12819_v13 = vld [vmem:[%s13965_s7 + $0x18] sm:$0xff] (!%p10397_p5)  }
 0x353   : > { %11962 = vmatprep.subr.bf16.mxu0 (!%p10397_p5), %v14095_v39  ;;  %12336 = vmatprep.subr.bf16.mxu1 (!%p10397_p5), %v14095_v39 }
 0x356   : > { %11963 = vmatpush3.bf16.msra.mxu0 %v14095_v39  ;;  %12344 = vmatpush3.bf16.msra.mxu1 %v14095_v39 }
 0x357   : > { %11964 = vmatprep.subr.bf16.mxu0 %v14097_v40  ;;  %12337 = vmatprep.subr.bf16.mxu1 %v14097_v40 }
 0x35a   : > { %11965 = vmatpush3.bf16.msra.mxu0 %v14097_v40  ;;  %12345 = vmatpush3.bf16.msra.mxu1 %v14097_v40 }
 0x35b   : > { %11966 = vmatprep.subr.bf16.mxu0 %v14105_v1  ;;  %12338 = vmatprep.subr.bf16.mxu1 %v14105_v1 }
 0x35e   : > { %11967 = vmatpush3.bf16.msra.mxu0 %v14105_v1  ;;  %12346 = vmatpush3.bf16.msra.mxu1 %v14105_v1 }
 0x35f   : > { %11968 = vmatprep.subr.bf16.mxu0 %v14113_v43  ;;  %12339 = vmatprep.subr.bf16.mxu1 %v14113_v43 }
 0x362   : > { %11969 = vmatpush3.bf16.msra.mxu0 %v14113_v43  ;;  %12347 = vmatpush3.bf16.msra.mxu1 %v14113_v43 }
 0x363   : > { %11970 = vmatprep.subr.bf16.mxu0 %v14119_v44  ;;  %12340 = vmatprep.subr.bf16.mxu1 %v14119_v44 }
 0x366   : > { %11971 = vmatpush3.bf16.msra.mxu0 %v14119_v44  ;;  %12348 = vmatpush3.bf16.msra.mxu1 %v14119_v44 }
 0x367   : > { %11972 = vmatprep.subr.bf16.mxu0 %v14125_v45  ;;  %12341 = vmatprep.subr.bf16.mxu1 %v14125_v45 }
 0x36a   : > { %11973 = vmatpush3.bf16.msra.mxu0 %v14125_v45  ;;  %12349 = vmatpush3.bf16.msra.mxu1 %v14125_v45 }
 0x36d   : > { %11975 = vmatmul.mubr.bf16.vlgmr.msra.gmra.mrb[0].mxu0 %v12818_v9  ;;  %11979 = vmatmul.mubr.bf16.vlgmr.msra.gmra.mrb[0].mxu1 %v12819_v13 }
 0x440   : > { %v11976_v39 = vpop.f32.mrb[0].mxu0  ;;  %v11980_v40 = vpop.f32.mrb[0].mxu1 }
 0x441   : > { %v1471_v1 = vmul.f32 %v11976_v39, %v14142_v52  ;;  %v1475_v43 = vmul.f32 %v11980_v40, %v14142_v52  ;;  %v1438_v11 = vpop.f32.mrb[1].mxu0  ;;  %v1454_v44 = vpop.f32.mrb[1].mxu1 }
 0x442   : > { %v1469_v12 = vmul.f32 %v14142_v52, %v1438_v11  ;;  %v1473_v14 = vmul.f32 %v14142_v52, %v1454_v44  ;;  %v11977_v15 = vpop.f32.mrb[2].mxu0  ;;  %v11981_v16 = vpop.f32.mrb[2].mxu1 }
 0x443   : > { %v1479_v17 = vadd.f32 %v14147_v53, %v1471_v1  ;;  %v1483_v45 = vadd.f32 %v14147_v53, %v1475_v43  ;;  %v1472_v18 = vmul.f32 %v11977_v15, %v14142_v52  ;;  %v1476_v19 = vmul.f32 %v11981_v16, %v14142_v52  ;;  %v1441_v20 = vpop.f32.mrb[3].mxu0  ;;  %v1457_v21 = vpop.f32.mrb[3].mxu1 }
 0x444   : > { %v1477_v22 = vadd.f32 %v14147_v53, %v1469_v12  ;;  %v1481_v23 = vadd.f32 %v14147_v53, %v1473_v14  ;;  %v1470_v24 = vmul.f32 %v14142_v52, %v1441_v20  ;;  %v1474_v25 = vmul.f32 %v14142_v52, %v1457_v21 }
 0x445   : > { %v1487_v26 = vmax.f32 %v1479_v17, 0.0  ;;  %v1491_v27 = vmax.f32 %v1483_v45, 0.0  ;;  %v1480_v28 = vadd.f32 %v14147_v53, %v1472_v18  ;;  %v1484_v29 = vadd.f32 %v14147_v53, %v1476_v19 }
 0x446   : > { %v1485_v30 = vmax.f32 %v1477_v22, 0.0  ;;  %v1489_v31 = vmax.f32 %v1481_v23, 0.0  ;;  %v1478_v32 = vadd.f32 %v14147_v53, %v1470_v24  ;;  %v1482_v33 = vadd.f32 %v14147_v53, %v1474_v25 }
 0x447   : > { %v11033_v34 = vpack.c.bf16 %v1487_v26, %v1487_v26  ;;  %v11037_v35 = vpack.c.bf16 %v1491_v27, %v1491_v27  ;;  %v1488_v36 = vmax.f32 %v1480_v28, 0.0  ;;  %v1492_v37 = vmax.f32 %v1484_v29, 0.0 }
 0x448   : > { %v11031_v38 = vpack.c.bf16 %v1485_v30, %v1485_v30  ;;  %v11035_v41 = vpack.c.bf16 %v1489_v31, %v1489_v31  ;;  %v1486_v42 = vmax.f32 %v1478_v32, 0.0  ;;  %v1490_v52 = vmax.f32 %v1482_v33, 0.0 }
 0x449   : > { %1528 = vst [vmem:[#allocation2 + $0x190] sm:$0xf] %v11033_v34  ;;  %1532 = vst [vmem:[#allocation2 + $0x1c0] sm:$0xf] %v11037_v35  ;;  %v11034_v46 = vpack.c.bf16 %v1488_v36, %v1488_v36  ;;  %v11038_v47 = vpack.c.bf16 %v1492_v37, %v1492_v37 }
 0x44a   : > { %1526 = vst [vmem:[#allocation2 + $0x178] sm:$0xf] %v11031_v38  ;;  %1530 = vst [vmem:[#allocation2 + $0x1a8] sm:$0xf] %v11035_v41  ;;  %v11032_v48 = vpack.c.bf16 %v1486_v42, %v1486_v42  ;;  %v11036_v49 = vpack.c.bf16 %v1490_v52, %v1490_v52 }
 0x44b   : > { %1529 = vst [vmem:[#allocation2 + $0x19c] sm:$0xf] %v11034_v46  ;;  %1533 = vst [vmem:[#allocation2 + $0x1cc] sm:$0xf] %v11038_v47 }
 0x44c   : > { %1527 = vst [vmem:[#allocation2 + $0x184] sm:$0xf] %v11032_v48  ;;  %1531 = vst [vmem:[#allocation2 + $0x1b4] sm:$0xf] %v11036_v49 }
 0x44d PF: > { %p10410_p10 = scmp.lt.s32.totalorder %s1367_s21, 4 }
 0x44e   : > { %v13464_v53 = vmov (!%p10410_p10), 0  }
 0x44f   : > { %1537 = sbr.rel (%p10410_p10) target bundleno = 1110 (0x456), region = 108  ;;  %1539 = vst [vmem:[#allocation2 + $0x178] sm:$0xf] (!%p10410_p10), %v13464_v53  ;;  %1540 = vst [vmem:[#allocation2 + $0x184] sm:$0xf] (!%p10410_p10), %v13464_v53 }
 0x450   : > { %1541 = vst [vmem:[#allocation2 + $0x190] sm:$0xf] (!%p10410_p10), %v13464_v53  ;;  %1542 = vst [vmem:[#allocation2 + $0x19c] sm:$0xf] (!%p10410_p10), %v13464_v53 }
 0x451   : > { %1543 = vst [vmem:[#allocation2 + $0x1a8] sm:$0xf] (!%p10410_p10), %v13464_v53  ;;  %1544 = vst [vmem:[#allocation2 + $0x1b4] sm:$0xf] (!%p10410_p10), %v13464_v53 }
 0x452   : > { %1545 = vst [vmem:[#allocation2 + $0x1c0] sm:$0xf] (!%p10410_p10), %v13464_v53  ;;  %1546 = vst [vmem:[#allocation2 + $0x1cc] sm:$0xf] (!%p10410_p10), %v13464_v53 }
 0x456 PF: > { %v12820_v50 = vld [vmem:[#allocation11 + $0x100] sm:$0xff]   ;;  %v12823_v55 = vld [vmem:[#allocation11 + $0x108] sm:$0xff]   ;;  %v12826_v58 = vld [vmem:[#allocation11 + $0x110] sm:$0xff]   ;;  %vm1805_vm3 = vsmask.f32 3328  ;;  %s17301_s20 = sld [smem:[#allocation86_spill]] }
 0x457   : > { %v12821_v51 = vld [vmem:[#allocation11 + $0x140] sm:$0xff]   ;;  %11166 = vmatprep.subr.bf16.mxu0 %v12820_v50  ;;  %v12824_v56 = vld [vmem:[#allocation11 + $0x148] sm:$0xff]   ;;  %v12827_v59 = vld [vmem:[#allocation11 + $0x150] sm:$0xff]   ;;  %vm1806_vm4 = vsmask.f32 7440  ;;  %s17302_s15 = sld [smem:[#allocation87_spill]] }
 0x458   : > { %v12822_v54 = vld [vmem:[#allocation11 + $0xc0] sm:$0xff]   ;;  %11982 = vmatprep.subr.bf16.mxu1 %v12821_v51  ;;  %v12825_v57 = vld [vmem:[#allocation11 + $0xc8] sm:$0xff]   ;;  %v12828_v60 = vld [vmem:[#allocation11 + $0xd0] sm:$0xff]   ;;  %vm1579_vm5 = vsmask.f32 4368  ;;  %s17303_s4 = sld [smem:[#allocation88_spill]] }
 0x459   : > { %11167 = vmatpush3.bf16.msra.mxu0 %v12822_v54  ;;  %11983 = vmatpush3.bf16.msra.mxu1 %v12821_v51  ;;  %v12829_v61 = vld [vmem:[#allocation11 + $0x118] sm:$0xff]   ;;  %v12832_v0 = vld [vmem:[#allocation11 + $0x120] sm:$0xff]   ;;  %v12835_v4 = vld [vmem:[#allocation11 + $0x128] sm:$0xff]   ;;  %s17304_s12 = sld [smem:[#allocation89_spill]]  ;;  %s17305_s9 = sld [smem:[#allocation25_spill]] }
 0x45a   : > { %11168 = vmatprep.subr.bf16.mxu0 %v12823_v55  ;;  %11984 = vmatprep.subr.bf16.mxu1 %v12824_v56  ;;  %v12830_v62 = vld [vmem:[#allocation11 + $0x158] sm:$0xff]   ;;  %v12833_v2 = vld [vmem:[#allocation11 + $0x160] sm:$0xff]   ;;  %v12836_v5 = vld [vmem:[#allocation11 + $0x168] sm:$0xff]   ;;  %s17306_s1 = sld [smem:[#allocation26_spill]]  ;;  %s10143_s13 = sshll.u32 %s14183_s0, 4  ;;  %s16844_s13 = int_to_ptr.vmem [resolvable:$true] %s10143_s13 }
 0x45b   : > { %v12831_v63 = vld [vmem:[#allocation11 + $0xd8] sm:$0xff]   ;;  %v12834_v3 = vld [vmem:[#allocation11 + $0xe0] sm:$0xff]   ;;  %v12837_v6 = vld [vmem:[#allocation11 + $0xe8] sm:$0xff]   ;;  %s17307_s25 = sld [smem:[#allocation90_spill]]  ;;  %s10127_s14 = scalar_lea.sflag [#allocation5], %s13944_s30 }
 0x45c   : > { %v12838_v7 = vld [vmem:[#allocation11 + $0x130] sm:$0xff]   ;;  %v12841_v9 = vld [vmem:[#allocation11 + $0x138] sm:$0xff]   ;;  %v2354_v16 = vld [vmem:[#allocation2 + $0x20] sm:$0x1]  ;;  %p17309_p2 = scmp.ne.s32.totalorder %s17039_s10, 0  ;;  %s13465_s23 = smov [#allocation14]  }
 0x45d   : > { %11169 = vmatpush3.bf16.msra.mxu0 %v12825_v57  ;;  %11985 = vmatpush3.bf16.msra.mxu1 %v12824_v56  ;;  %v12839_v8 = vld [vmem:[#allocation11 + $0x170] sm:$0xff]   ;;  %v12842_v13 = vld [vmem:[#allocation11 + $0x178] sm:$0xff]   ;;  %v2113_v21 = vld [vmem:[#allocation2 + $0xc] sm:$0x8]  ;;  %v2383_v26 = vshll.u32 %v2354_v16, 16  ;;  %s13294_s22 = sshll.u32 %s13465_s23, 4  ;;  %s13295_s22 = int_to_ptr.vmem [resolvable:$false] %s13294_s22 }
 0x45e   : > { %11170 = vmatprep.subr.bf16.mxu0 %v12826_v58  ;;  %11986 = vmatprep.subr.bf16.mxu1 %v12827_v59  ;;  %v12840_v10 = vld [vmem:[#allocation11 + $0xf0] sm:$0xff]   ;;  %v2116_v40 = vld [vmem:[#allocation2 + $0x1c] sm:$0xf]  ;;  %v12845_v22 = vld [vmem:[#allocation11 + $0x40] sm:$0xff]   ;;  %v2146_v36 = vshrl.u32 %v2113_v21, 16  ;;  %p13297_p6 = scmp.lt.s32.totalorder %s16844_s13, %s13295_s22 }
 0x45f   : > { %v2114_v39 = vld [vmem:[#allocation2 + $0x10] sm:$0xf]  ;;  %v2164_v11 = vshrl.u32 %v2116_v40, 16  ;;  %v2167_v44 = vshll.u32 %v2116_v40, 16  ;;  %v2353_v12 = vld [vmem:[#allocation2 + $0x14] sm:$0x1]  ;;  %vm14302_vm6 = vmor %vm1805_vm3, %vm1806_vm4 }
 0x460   : > { %v2151_v1 = vshrl.u32 %v2114_v39, 16  ;;  %v2154_v43 = vshll.u32 %v2114_v39, 16  ;;  %v12843_v14 = vld [vmem:[#allocation11 + $0xf8] sm:$0xff]   ;;  %v10475_v15 = vcombine.low %v2114_v39, %v2116_v40  ;;  %v2374_v17 = vshll.u32 %v2353_v12, 16  ;;  %v14296_v31 = vld [vmem:[#allocation2 + $0x28] sm:$0xf]  ;;  %vm14307_vm7 = vmor %vm637_vm1, %vm1579_vm5 }
 0x461   : > { %11171 = vmatpush3.bf16.msra.mxu0 %v12828_v60  ;;  %11987 = vmatpush3.bf16.msra.mxu1 %v12827_v59  ;;  %v2166_v18 = vrot.slane %v2164_v11, 7  ;;  %v2378_v23 = vrot.slane %v2164_v11, 4  ;;  %v2379_v24 = vrot.slane %v2167_v44, 5  ;;  %v2115_v27 = vld [vmem:[#allocation2 + $0x18] sm:$0x8]  ;;  %v2385_v35 = vrot.slane %v2383_v26, 5 }
 0x462   : > { %11172 = vmatprep.subr.bf16.mxu0 %v12829_v61  ;;  %11988 = vmatprep.subr.bf16.mxu1 %v12830_v62  ;;  %v2153_v45 = vrot.slane %v2151_v1, 7  ;;  %v2369_v19 = vrot.slane %v2151_v1, 4  ;;  %v2370_v20 = vrot.slane %v2154_v43, 5  ;;  %v2376_v25 = vrot.slane %v2374_v17, 5  ;;  %v14298_v32 = vld [vmem:[#allocation2 + $0x34] sm:$0xf] }
 0x463   : > { %v2169_v29 = vor.u32 %v2167_v44, %v2166_v18  ;;  %2849 = vmatprep.mubr.bf16.mxu0 %v10475_v15  ;;  %v2380_v34 = vor.u32 %v2379_v24, %v2378_v23  ;;  %v2159_v37 = vshrl.u32 %v2115_v27, 16  ;;  %v2355_v38 = vld [vmem:[#allocation2 + $0x2c] sm:$0x1]  ;;  %v12846_v41 = vld [vmem:[#allocation11 + $0x1c0] sm:$0xff]   ;;  %v2177_v46 = vshrl.u32 %v14296_v31, 16  ;;  %s11039_s18 = sshll.u32 %s17305_s9, 4 }
 0x464   : > { %v2156_v28 = vor.u32 %v2154_v43, %v2153_v45  ;;  %v2371_v30 = vor.u32 %v2370_v20, %v2369_v19  ;;  %v2180_v47 = vshll.u32 %v14296_v31, 16  ;;  %v2190_v48 = vshrl.u32 %v14298_v32, 16  ;;  %v2356_v49 = vld [vmem:[#allocation2 + $0x38] sm:$0x1]  ;;  %v14331_v40 = vld [vmem:[#allocation2 + $0x40] sm:$0xf] }
 0x465   : > { %11173 = vmatpush3.bf16.msra.mxu0 %v12831_v63  ;;  %11989 = vmatpush3.bf16.msra.mxu1 %v12830_v62  ;;  %v2381_v53 = vrot.slane %v2380_v34, 4  ;;  %v10451_v50 = vrot.slane %v2146_v36, 11  ;;  %v10452_v51 = vrot.slane %v2159_v37, 11  ;;  %v2193_v54 = vshll.u32 %v14298_v32, 16  ;;  %v12848_v63 = vld [vmem:[#allocation11 + $0x180] sm:$0xff]   ;;  %v12853_v26 = vld [vmem:[#allocation11 + $0x1c8] sm:$0xff]  }
 0x466   : > { %11174 = vmatprep.subr.bf16.mxu0 %v12832_v0  ;;  %11990 = vmatprep.subr.bf16.mxu1 %v12833_v2  ;;  %v2372_v42 = vrot.slane %v2371_v30, 4  ;;  %v2387_v56 = vrot.slane %v2177_v46, 4  ;;  %v2388_v57 = vrot.slane %v2180_v47, 5  ;;  %v2392_v58 = vshll.u32 %v2355_v38, 16  ;;  %v14333_v1 = vld [vmem:[#allocation2 + $0x4c] sm:$0xf] }
 0x467   : > { %v2386_v59 = vsel %vm14302_vm6, %v2381_v53, %v2385_v35  ;;  %v2157_v60 = vsel %vm14307_vm7, %v10451_v50, %v2156_v28  ;;  %v2170_v61 = vsel %vm14307_vm7, %v10452_v51, %v2169_v29  ;;  %v2396_v62 = vrot.slane %v2190_v48, 4  ;;  %v2357_v43 = vld [vmem:[#allocation2 + $0x44] sm:$0x1]  ;;  %v2358_v15 = vld [vmem:[#allocation2 + $0x50] sm:$0x1]  ;;  %v12849_v28 = vld [vmem:[#allocation11 + $0x48] sm:$0xff]  }
 0x468   : > { %v2377_v55 = vsel %vm14302_vm6, %v2372_v42, %v2376_v25  ;;  %v2203_v44 = vshrl.u32 %v14331_v40, 16  ;;  %v2206_v12 = vshll.u32 %v14331_v40, 16  ;;  %v12847_v16 = vld [vmem:[#allocation11] sm:$0xff]   ;;  %v2219_v17 = vshll.u32 %v14333_v1, 16  ;;  %v2119_v25 = vld [vmem:[#allocation2 + $0x30] sm:$0x8] }
 0x469   : > { %11175 = vmatpush3.bf16.msra.mxu0 %v12834_v3  ;;  %11991 = vmatpush3.bf16.msra.mxu1 %v12833_v2  ;;  %v10483_v0 = vcombine.low %v2377_v55, %v2386_v59  ;;  %v10467_v2 = vcombine.low %v2157_v60, %v2170_v61  ;;  %v2389_v3 = vor.u32 %v2388_v57, %v2387_v56  ;;  %v2410_v45 = vshll.u32 %v2357_v43, 16  ;;  %v2117_v19 = vld [vmem:[#allocation2 + $0x24] sm:$0x8]  ;;  %v14349_v34 = vld [vmem:[#allocation2 + $0x58] sm:$0xf]  ;;  %v12855_v42 = vld [vmem:[#allocation11 + $0x188] sm:$0xff]  }
 0x46a   : > { %11176 = vmatprep.subr.bf16.mxu0 %v12835_v4  ;;  %11992 = vmatprep.subr.bf16.mxu1 %v12836_v5  ;;  %v2394_v4 = vrot.slane %v2392_v58, 5  ;;  %v2419_v18 = vshll.u32 %v2358_v15, 16  ;;  %v2406_v23 = vrot.slane %v2206_v12, 5  ;;  %v2415_v30 = vrot.slane %v2219_v17, 5  ;;  %v2359_v51 = vld [vmem:[#allocation2 + $0x5c] sm:$0x1] }
 0x46b   : > { %11998 = vmatprep.mubr.bf16.mxu1 %v10483_v0  ;;  %v2412_v29 = vrot.slane %v2410_v45, 5  ;;  %v2172_v36 = vshrl.u32 %v2117_v19, 16  ;;  %v2185_v37 = vshrl.u32 %v2119_v25, 16  ;;  %v2192_v38 = vrot.slane %v2190_v48, 7  ;;  %v2360_v58 = vld [vmem:[#allocation2 + $0x68] sm:$0x1] }
 0x46c   : > { %v2232_v53 = vshll.u32 %v14349_v34, 16  ;;  %v12852_v59 = vld [vmem:[#allocation11 + $0x50] sm:$0xff]   ;;  %v12856_v43 = vld [vmem:[#allocation11 + $0x58] sm:$0xff]   ;;  %v10477_v15 = vcombine.low %v14331_v40, %v14333_v1  ;;  %s11002_s19 = sshll.u32 %s17306_s1, 5 }
 0x46d   : > { %11177 = vmatpush3.bf16.msra.mxu0 %v12837_v6  ;;  %11993 = vmatpush3.bf16.msra.mxu1 %v12836_v5  ;;  %v2397_v5 = vrot.slane %v2193_v54, 5  ;;  %v2401_v6 = vshll.u32 %v2356_v49, 16  ;;  %v2229_v49 = vshrl.u32 %v14349_v34, 16  ;;  %v10453_v56 = vrot.slane %v2172_v36, 11  ;;  %v12857_v19 = vld [vmem:[#allocation11 + $0x18] sm:$0xff]  }
 0x46e   : > { %11178 = vmatprep.subr.bf16.mxu0 %v12838_v7  ;;  %11994 = vmatprep.subr.bf16.mxu1 %v12839_v8  ;;  %v10476_v7 = vcombine.low %v14296_v31, %v14298_v32  ;;  %v2421_v31 = vrot.slane %v2419_v18, 5  ;;  %v10454_v57 = vrot.slane %v2185_v37, 11  ;;  %v2195_v48 = vor.u32 %v2193_v54, %v2192_v38 }
 0x470   : > { %v2196_v54 = vsel %vm14307_vm7, %v10454_v57, %v2195_v48 }
 0x471   : > { %11179 = vmatpush3.bf16.msra.mxu0 %v12840_v10  ;;  %11995 = vmatpush3.bf16.msra.mxu1 %v12839_v8  ;;  %v2390_v8 = vrot.slane %v2389_v3, 4  ;;  %v2398_v10 = vor.u32 %v2397_v5, %v2396_v62  ;;  %v2423_v62 = vrot.slane %v2229_v49, 4  ;;  %v12854_v3 = vld [vmem:[#allocation11 + $0x10] sm:$0xff]  }
 0x472   : > { %11180 = vmatprep.subr.bf16.mxu0 %v12841_v9  ;;  %11996 = vmatprep.subr.bf16.mxu1 %v12842_v13  ;;  %v2403_v9 = vrot.slane %v2401_v6, 5 }
 0x473   : > { %v2395_v39 = vsel %vm14302_vm6, %v2390_v8, %v2394_v4  ;;  %v2399_v11 = vrot.slane %v2398_v10, 4  ;;  %v12860_v8 = vld [vmem:[#allocation11 + $0x1d0] sm:$0xff]  }
 0x475   : > { %11181 = vmatpush3.bf16.msra.mxu0 %v12843_v14  ;;  %11997 = vmatpush3.bf16.msra.mxu1 %v12842_v13  ;;  %v2179_v13 = vrot.slane %v2177_v46, 7  ;;  %v2216_v14 = vshrl.u32 %v14333_v1, 16  ;;  %v2404_v21 = vsel %vm14302_vm6, %v2399_v11, %v2403_v9  ;;  %v12850_v46 = vld [vmem:[#allocation11 + $0x8] sm:$0xff]  }
 0x476   : > { %11246 = vmatprep.subr.bf16.mxu1 %v12845_v22  ;;  %11326 = vmatprep.subr.bf16.mxu0 %v12846_v41  ;;  %v2405_v22 = vrot.slane %v2203_v44, 4  ;;  %v10484_v27 = vcombine.low %v2395_v39, %v2404_v21  ;;  %v14353_v41 = vld [vmem:[#allocation2 + $0x64] sm:$0xf]  ;;  %v2437_v39 = vshll.u32 %v2360_v58, 16  ;;  %v14383_v21 = vld [vmem:[#allocation2 + $0x88] sm:$0xf] }
 0x477   : > { %v2182_v20 = vor.u32 %v2180_v47, %v2179_v13  ;;  %v2414_v24 = vrot.slane %v2216_v14, 4  ;;  %v2242_v50 = vshrl.u32 %v14353_v41, 16  ;;  %v2245_v61 = vshll.u32 %v14353_v41, 16 }
 0x478   : > { %2850 = vmatmul.mubr.bf16.vlgmr.msra.gmra.mrb[0].mxu0 %v10467_v2  ;;  %v2407_v35 = vor.u32 %v2406_v23, %v2405_v22  ;;  %11999 = vmatmul.mubr.bf16.vlgmr.msra.gmra.mrb[0].mxu1 %v10484_v27  ;;  %v2428_v2 = vshll.u32 %v2359_v51, 16  ;;  %v2439_v18 = vrot.slane %v2437_v39, 5  ;;  %v12859_v22 = vld [vmem:[#allocation11 + $0x60] sm:$0xff]   ;;  %v10478_v23 = vcombine.low %v14349_v34, %v14353_v41 }
 0x479   : > { %11327 = vmatpush3.bf16.msra.mxu0 %v12848_v63  ;;  %2857 = vmatprep.mubr.bf16.mxu0 %v10476_v7  ;;  %v2416_v47 = vor.u32 %v2415_v30, %v2414_v24  ;;  %v2424_v63 = vrot.slane %v2232_v53, 5  ;;  %v2183_v32 = vsel %vm14307_vm7, %v10453_v56, %v2182_v20  ;;  %v2432_v7 = vrot.slane %v2242_v50, 4  ;;  %v2361_v30 = vld [vmem:[#allocation2 + $0x8c] sm:$0x1] }
 0x47a   : > { %11328 = vmatprep.subr.bf16.mxu0 %v12853_v26  ;;  %11247 = vmatpush3.bf16.msra.mxu1 %v12847_v16  ;;  %v2408_v55 = vrot.slane %v2407_v35, 4  ;;  %v10468_v5 = vcombine.low %v2183_v32, %v2196_v54  ;;  %v2430_v9 = vrot.slane %v2428_v2, 5  ;;  %v2433_v13 = vrot.slane %v2245_v61, 5  ;;  %v12867_v2 = vld [vmem:[#allocation11 + $0x1d8] sm:$0xff]  }
 0x47b   : > { %11248 = vmatprep.subr.bf16.mxu1 %v12849_v28  ;;  %v2417_v60 = vrot.slane %v2416_v47, 4  ;;  %v2425_v6 = vor.u32 %v2424_v63, %v2423_v62  ;;  %v2205_v16 = vrot.slane %v2203_v44, 7  ;;  %v2218_v20 = vrot.slane %v2216_v14, 7  ;;  %v14389_v44 = vld [vmem:[#allocation2 + $0x94] sm:$0xf] }
 0x47c   : > { %v2413_v0 = vsel %vm14302_vm6, %v2408_v55, %v2412_v29  ;;  %v2434_v45 = vor.u32 %v2433_v13, %v2432_v7  ;;  %v2255_v26 = vshrl.u32 %v14383_v21, 16  ;;  %v2258_v27 = vshll.u32 %v14383_v21, 16  ;;  %v12862_v14 = vld [vmem:[#allocation11 + $0x190] sm:$0xff]   ;;  %v2121_v47 = vld [vmem:[#allocation2 + $0x3c] sm:$0x8]  ;;  %v12861_v55 = vld [vmem:[#allocation11 + $0x20] sm:$0xff]  }
 0x47d   : > { %11329 = vmatpush3.bf16.msra.mxu0 %v12855_v42  ;;  %v2422_v4 = vsel %vm14302_vm6, %v2417_v60, %v2421_v31  ;;  %v2426_v11 = vrot.slane %v2425_v6, 4  ;;  %v2268_v28 = vshrl.u32 %v14389_v44, 16  ;;  %v2271_v29 = vshll.u32 %v14389_v44, 16  ;;  %v2362_v31 = vld [vmem:[#allocation2 + $0x98] sm:$0x1]  ;;  %v12863_v60 = vld [vmem:[#allocation11 + $0x68] sm:$0xff]  }
 0x47e   : > { %11249 = vmatpush3.bf16.msra.mxu1 %v12850_v46  ;;  %v10485_v10 = vcombine.low %v2413_v0, %v2422_v4  ;;  %11330 = vmatprep.subr.bf16.mxu0 %v12860_v8  ;;  %v2435_v25 = vrot.slane %v2434_v45, 4  ;;  %v2208_v35 = vor.u32 %v2206_v12, %v2205_v16  ;;  %v2221_v36 = vor.u32 %v2219_v17, %v2218_v20  ;;  %v2123_v17 = vld [vmem:[#allocation2 + $0x48] sm:$0x8]  ;;  %v14411_v0 = vld [vmem:[#allocation2 + $0xac] sm:$0xf] }
 0x47f   : > { %11250 = vmatprep.subr.bf16.mxu1 %v12852_v59  ;;  %v2431_v24 = vsel %vm14302_vm6, %v2426_v11, %v2430_v9  ;;  %v2441_v38 = vrot.slane %v2255_v26, 4  ;;  %v2442_v42 = vrot.slane %v2258_v27, 5  ;;  %v2446_v46 = vshll.u32 %v2361_v30, 16  ;;  %v14409_v59 = vld [vmem:[#allocation2 + $0xa0] sm:$0xf]  ;;  %v12864_v45 = vld [vmem:[#allocation11 + $0x28] sm:$0xff]  }
 0x480   : > { %2858 = vmatmul.mubr.bf16.gmra.mrb[4].mxu0 %v10468_v5  ;;  %12002 = vmatprep.mubr.bf16.mxu1 %v10485_v10  ;;  %v2440_v37 = vsel %vm14302_vm6, %v2435_v25, %v2439_v18  ;;  %v2450_v40 = vrot.slane %v2268_v28, 4  ;;  %v2451_v1 = vrot.slane %v2271_v29, 5  ;;  %v2455_v12 = vshll.u32 %v2362_v31, 16  ;;  %v2363_v7 = vld [vmem:[#allocation2 + $0xa4] sm:$0x1] }
 0x481   : > { %2865 = vmatprep.mubr.bf16.mxu0 %v10477_v15  ;;  %11331 = vmatpush3.bf16.msra.mxu0 %v12862_v14  ;;  %v10486_v51 = vcombine.low %v2431_v24, %v2440_v37  ;;  %v2443_v56 = vor.u32 %v2442_v42, %v2441_v38  ;;  %v2448_v57 = vrot.slane %v2446_v46, 5  ;;  %v2198_v48 = vshrl.u32 %v2121_v47, 16  ;;  %v2364_v9 = vld [vmem:[#allocation2 + $0xb0] sm:$0x1]  ;;  %v12870_v42 = vld [vmem:[#allocation11 + $0x78] sm:$0xff]  }
 0x482   : > { %11251 = vmatpush3.bf16.msra.mxu1 %v12854_v3  ;;  %v2211_v58 = vshrl.u32 %v2123_v17, 16  ;;  %v2452_v62 = vor.u32 %v2451_v1, %v2450_v40  ;;  %v2457_v63 = vrot.slane %v2455_v12, 5  ;;  %v2281_v32 = vshrl.u32 %v14409_v59, 16  ;;  %11332 = vmatprep.subr.bf16.mxu0 %v12867_v2  ;;  %v12866_v24 = vld [vmem:[#allocation11 + $0x70] sm:$0xff]   ;;  %v14442_v12 = vld [vmem:[#allocation2 + $0xb8] sm:$0xf] }
 0x483   : > { %11252 = vmatprep.subr.bf16.mxu1 %v12856_v43  ;;  %12003 = vmatmul.mubr.bf16.gmra.mrb[4].mxu1 %v10486_v51  ;;  %v2284_v54 = vshll.u32 %v14409_v59, 16  ;;  %v2444_v3 = vrot.slane %v2443_v56, 4  ;;  %v10455_v4 = vrot.slane %v2198_v48, 11  ;;  %v2294_v6 = vshrl.u32 %v14411_v0, 16 }
 0x484   : > { %v10456_v5 = vrot.slane %v2211_v58, 11  ;;  %v2453_v8 = vrot.slane %v2452_v62, 4  ;;  %v2297_v10 = vshll.u32 %v14411_v0, 16  ;;  %v2459_v13 = vrot.slane %v2281_v32, 4  ;;  %v2365_v58 = vld [vmem:[#allocation2 + $0xbc] sm:$0x1] }
 0x485   : > { %v2460_v39 = vrot.slane %v2284_v54, 5  ;;  %v2449_v43 = vsel %vm14302_vm6, %v2444_v3, %v2448_v57  ;;  %v2209_v11 = vsel %vm14307_vm7, %v10455_v4, %v2208_v35  ;;  %v2464_v16 = vshll.u32 %v2363_v7, 16  ;;  %v12868_v35 = vld [vmem:[#allocation11 + $0x30] sm:$0xff]   ;;  %v2366_v62 = vld [vmem:[#allocation2 + $0xc8] sm:$0x1] }
 0x486   : > { %11253 = vmatpush3.bf16.msra.mxu1 %v12857_v19  ;;  %v2222_v15 = vsel %vm14307_vm7, %v10456_v5, %v2221_v36  ;;  %v2458_v18 = vsel %vm14302_vm6, %v2453_v8, %v2457_v63  ;;  %v2469_v30 = vrot.slane %v2297_v10, 5  ;;  %v2473_v31 = vshll.u32 %v2364_v9, 16  ;;  %v12869_v36 = vld [vmem:[#allocation11 + $0x198] sm:$0xff]   ;;  %v2127_v8 = vld [vmem:[#allocation2 + $0x60] sm:$0x8] }
 0x487   : > { %11254 = vmatprep.subr.bf16.mxu1 %v12859_v22  ;;  %v10469_v19 = vcombine.low %v2209_v11, %v2222_v15  ;;  %v2461_v20 = vor.u32 %v2460_v39, %v2459_v13  ;;  %v2468_v22 = vrot.slane %v2294_v6, 4  ;;  %v10487_v25 = vcombine.low %v2449_v43, %v2458_v18  ;;  %11333 = vmatpush3.bf16.msra.mxu0 %v12869_v36  ;;  %v12874_v9 = vld [vmem:[#allocation11 + $0x1e0] sm:$0xff]   ;;  %v14470_v39 = vld [vmem:[#allocation2 + $0xd0] sm:$0xf]  ;;  %v14472_v15 = vld [vmem:[#allocation2 + $0xdc] sm:$0xf] }
 0x488   : > { %v2466_v14 = vrot.slane %v2464_v16, 5  ;;  %v2231_v38 = vrot.slane %v2229_v49, 7  ;;  %v2475_v47 = vrot.slane %v2473_v31, 5  ;;  %v2244_v51 = vrot.slane %v2242_v50, 7  ;;  %v14444_v49 = vld [vmem:[#allocation2 + $0xc4] sm:$0xf]  ;;  %11334 = vmatprep.subr.bf16.mxu0 %v12874_v9 }
 0x489   : > { %2866 = vmatmul.mubr.bf16.gmra.mrb[8].mxu0 %v10469_v19  ;;  %v2462_v37 = vrot.slane %v2461_v20, 4  ;;  %12006 = vmatprep.mubr.bf16.mxu1 %v10487_v25  ;;  %v2470_v46 = vor.u32 %v2469_v30, %v2468_v22  ;;  %v10479_v50 = vcombine.low %v14383_v21, %v14389_v44  ;;  %v2307_v56 = vshrl.u32 %v14442_v12, 16  ;;  %v12875_v18 = vld [vmem:[#allocation11 + $0x1a0] sm:$0xff]   ;;  %v2367_v25 = vld [vmem:[#allocation2 + $0xd4] sm:$0x1] }
 0x48a   : > { %11255 = vmatpush3.bf16.msra.mxu1 %v12861_v55  ;;  %2873 = vmatprep.mubr.bf16.mxu0 %v10478_v23  ;;  %v2234_v17 = vor.u32 %v2232_v53, %v2231_v38  ;;  %v12871_v55 = vld [vmem:[#allocation11 + $0x38] sm:$0xff]   ;;  %v2310_v23 = vshll.u32 %v14442_v12, 16  ;;  %v2320_v57 = vshrl.u32 %v14444_v49, 16  ;;  %v2323_v48 = vshll.u32 %v14444_v49, 16  ;;  %v2125_v53 = vld [vmem:[#allocation2 + $0x54] sm:$0x8] }
 0x48b   : > { %11256 = vmatprep.subr.bf16.mxu1 %v12863_v60  ;;  %v2467_v40 = vsel %vm14302_vm6, %v2462_v37, %v2466_v14  ;;  %v2471_v1 = vrot.slane %v2470_v46, 4  ;;  %v2482_v34 = vshll.u32 %v2365_v58, 16  ;;  %v2247_v63 = vor.u32 %v2245_v61, %v2244_v51  ;;  %v12878_v14 = vld [vmem:[#allocation11 + $0x1e8] sm:$0xff]   ;;  %v2368_v36 = vld [vmem:[#allocation2 + $0xe0] sm:$0x1]  ;;  %11335 = vmatpush3.bf16.msra.mxu0 %v12875_v18 }
 0x48c   : > { %v14460_v2 = vrot.slane %v2255_v26, 7  ;;  %v2477_v4 = vrot.slane %v2307_v56, 4  ;;  %v2478_v5 = vrot.slane %v2310_v23, 5  ;;  %v2486_v7 = vrot.slane %v2320_v57, 4  ;;  %11336 = vmatprep.subr.bf16.mxu0 %v12878_v14  ;;  %v12879_v51 = vld [vmem:[#allocation11 + $0x1a8] sm:$0xff]  }
 0x48d   : > { %v2476_v60 = vsel %vm14302_vm6, %v2471_v1, %v2475_v47  ;;  %v2484_v41 = vrot.slane %v2482_v34, 5  ;;  %v2487_v61 = vrot.slane %v2323_v48, 5  ;;  %v2491_v13 = vshll.u32 %v2366_v62, 16  ;;  %v2129_v14 = vld [vmem:[#allocation2 + $0x84] sm:$0x8] }
 0x48e   : > { %11257 = vmatpush3.bf16.msra.mxu1 %v12864_v45  ;;  %v10488_v3 = vcombine.low %v2467_v40, %v2476_v60  ;;  %v2224_v26 = vshrl.u32 %v2125_v53, 16  ;;  %v2479_v43 = vor.u32 %v2478_v5, %v2477_v4  ;;  %v2237_v11 = vshrl.u32 %v2127_v8, 16  ;;  %v12882_v53 = vld [vmem:[#allocation11 + $0x1f0] sm:$0xff]  }
 0x48f   : > { %11258 = vmatprep.subr.bf16.mxu1 %v12866_v24  ;;  %v2333_v16 = vshrl.u32 %v14470_v39, 16  ;;  %v2336_v45 = vshll.u32 %v14470_v39, 16  ;;  %v2488_v19 = vor.u32 %v2487_v61, %v2486_v7  ;;  %v2493_v20 = vrot.slane %v2491_v13, 5  ;;  %11337 = vmatpush3.bf16.msra.mxu0 %v12879_v51  ;;  %v12883_v7 = vld [vmem:[#allocation11 + $0x1b0] sm:$0xff]  }
 0x490   : > { %12007 = vmatmul.mubr.bf16.gmra.mrb[8].mxu1 %v10488_v3  ;;  %v10457_v22 = vrot.slane %v2224_v26, 11  ;;  %v2346_v24 = vshrl.u32 %v14472_v15, 16  ;;  %v2480_v30 = vrot.slane %v2479_v43, 4  ;;  %v10458_v31 = vrot.slane %v2237_v11, 11  ;;  %11338 = vmatprep.subr.bf16.mxu0 %v12882_v53  ;;  %v1548_v43 = vld [vmem:[#allocation2 + $0x4] sm:$0xf] }
 0x491   : > { %v2495_v37 = vrot.slane %v2333_v16, 4  ;;  %v2489_v38 = vrot.slane %v2488_v19, 4  ;;  %v2496_v46 = vrot.slane %v2336_v45, 5  ;;  %v2500_v47 = vshll.u32 %v2367_v25, 16  ;;  %v1550_v11 = vld [vmem:[#allocation2 + $0x10] sm:$0xf] }
 0x492   : > { %11259 = vmatpush3.bf16.msra.mxu1 %v12868_v35  ;;  %v2349_v35 = vshll.u32 %v14472_v15, 16  ;;  %v2485_v40 = vsel %vm14302_vm6, %v2480_v30, %v2484_v41  ;;  %v2248_v1 = vsel %vm14307_vm7, %v10458_v31, %v2247_v63  ;;  %v2509_v5 = vshll.u32 %v2368_v36, 16  ;;  %v12886_v30 = vld [vmem:[#allocation11 + $0x1f8] sm:$0xff]   ;;  %v2131_v21 = vld [vmem:[#allocation2 + $0x90] sm:$0x8] }
 0x493   : > { %11260 = vmatprep.subr.bf16.mxu1 %v12870_v42  ;;  %v2235_v42 = vsel %vm14307_vm7, %v10457_v22, %v2234_v17  ;;  %v2494_v17 = vsel %vm14302_vm6, %v2489_v38, %v2493_v20  ;;  %v2497_v62 = vor.u32 %v2496_v46, %v2495_v37  ;;  %v2502_v34 = vrot.slane %v2500_v47, 5  ;;  %11339 = vmatpush3.bf16.msra.mxu0 %v12883_v7  ;;  %v1549_v46 = vld [vmem:[#allocation2 + $0xc] sm:$0x8]  ;;  %v1552_v53 = vld [vmem:[#allocation2 + $0x1c] sm:$0xf] }
 0x494   : > { %v2505_v58 = vrot.slane %v2349_v35, 5  ;;  %v10470_v60 = vcombine.low %v2235_v42, %v2248_v1  ;;  %v10489_v3 = vcombine.low %v2485_v40, %v2494_v17  ;;  %v2270_v8 = vrot.slane %v2268_v28, 7  ;;  %11340 = vmatprep.subr.bf16.mxu0 %v12886_v30  ;;  %v1553_v30 = vld [vmem:[#allocation2 + $0x24] sm:$0x8] }
 0x495   : > { %v2498_v63 = vrot.slane %v2497_v62, 4  ;;  %v2511_v41 = vrot.slane %v2509_v5, 5  ;;  %v10480_v61 = vcombine.low %v14409_v59, %v14411_v0  ;;  %v10481_v13 = vcombine.low %v14442_v12, %v14444_v49 }
 0x496   : > { %11261 = vmatpush3.bf16.msra.mxu1 %v12871_v55  ;;  %v2504_v55 = vrot.slane %v2346_v24, 4  ;;  %2874 = vmatmul.mubr.bf16.gmra.mrb[12].mxu0 %v10470_v60  ;;  %v2260_v28 = vor.u32 %v2258_v27, %v14460_v2  ;;  %v2273_v18 = vor.u32 %v2271_v29, %v2270_v8  ;;  %v1587_v20 = vshrl.u32 %v1548_v43, 16  ;;  %v1547_v2 = vld [vmem:[#allocation2] sm:$0x8] }
 0x497   : > { %12010 = vmatprep.mubr.bf16.mxu1 %v10489_v3  ;;  %2881 = vmatprep.mubr.bf16.mxu0 %v10479_v50  ;;  %v2503_v26 = vsel %vm14302_vm6, %v2498_v63, %v2502_v34  ;;  %v10482_v50 = vcombine.low %v14470_v39, %v14472_v15  ;;  %v1590_v22 = vshll.u32 %v1548_v43, 16  ;;  %v1600_v25 = vshrl.u32 %v1550_v11, 16  ;;  %v1554_v63 = vld [vmem:[#allocation2 + $0x28] sm:$0xf] }
 0x498   : > { %v2506_v4 = vor.u32 %v2505_v58, %v2504_v55  ;;  %v1603_v36 = vshll.u32 %v1550_v11, 16  ;;  %v10435_v37 = vcombine.low %v1548_v43, %v1550_v11  ;;  %v2250_v27 = vshrl.u32 %v2129_v14, 16  ;;  %v1551_v14 = vld [vmem:[#allocation2 + $0x18] sm:$0x8] }
 0x499   : > { %v1589_v44 = vrot.slane %v1587_v20, 7  ;;  %v1602_v29 = vrot.slane %v1600_v25, 7  ;;  %v14514_v38 = vrot.slane %v1587_v20, 4  ;;  %v14516_v42 = vrot.slane %v1590_v22, 5 }
 0x49a   : > { %v2507_v9 = vrot.slane %v2506_v4, 4  ;;  %v14518_v47 = vrot.slane %v1600_v25, 4  ;;  %v14520_v51 = vrot.slane %v1603_v36, 5  ;;  %v10459_v40 = vrot.slane %v2250_v27, 11  ;;  %v12890_v27 = vld [vmem:[#allocation11 + $0x80] sm:$0xff]  }
 0x49b   : > { %v2263_v1 = vshrl.u32 %v2131_v21, 16  ;;  %v1592_v55 = vor.u32 %v1590_v22, %v1589_v44  ;;  %v1605_v58 = vor.u32 %v1603_v36, %v1602_v29  ;;  %v1582_v17 = vshrl.u32 %v1547_v2, 16  ;;  %12014 = vmatprep.subr.bf16.mxu1 %v12890_v27 }
 0x49c   : > { %v2512_v19 = vsel %vm14302_vm6, %v2507_v9, %v2511_v41  ;;  %v1595_v60 = vshrl.u32 %v1549_v46, 16  ;;  %v2261_v62 = vsel %vm14307_vm7, %v10459_v40, %v2260_v28  ;;  %v2283_v3 = vrot.slane %v2281_v32, 7  ;;  %v2133_v28 = vld [vmem:[#allocation2 + $0x9c] sm:$0x8]  ;;  %v12891_v40 = vld [vmem:[#allocation11 + $0x280] sm:$0xff]  }
 0x49d   : > { %v10490_v31 = vcombine.low %v2503_v26, %v2512_v19  ;;  %v10460_v34 = vrot.slane %v2263_v1, 11  ;;  %v10411_v5 = vrot.slane %v1582_v17, 11  ;;  %v1613_v8 = vshrl.u32 %v1552_v53, 16  ;;  %v2135_v19 = vld [vmem:[#allocation2 + $0xa8] sm:$0x8] }
 0x49e   : > { %v10412_v7 = vrot.slane %v1595_v60, 11  ;;  %v1616_v9 = vshll.u32 %v1552_v53, 16  ;;  %v1626_v26 = vshrl.u32 %v1554_v63, 16  ;;  %v1629_v43 = vshll.u32 %v1554_v63, 16 }
 0x49f   : > { %12011 = vmatmul.mubr.bf16.gmra.mrb[12].mxu1 %v10490_v31  ;;  %v2274_v41 = vsel %vm14307_vm7, %v10460_v34, %v2273_v18  ;;  %v10436_v11 = vcombine.low %v1552_v53, %v1554_v63  ;;  %v1593_v32 = vsel %vm14307_vm7, %v10411_v5, %v1592_v55  ;;  %v1615_v25 = vrot.slane %v1613_v8, 7  ;;  %v12887_v31 = vld [vmem:[#allocation11 + $0x1b8] sm:$0xff]   ;;  %v1556_v5 = vld [vmem:[#allocation2 + $0x34] sm:$0xf]  ;;  %v12893_v63 = vld [vmem:[#allocation11 + $0x88] sm:$0xff]  }
 0x4a0   : > { %3187 = vmatprep.mubr.bf16.mxu1 %v10435_v37  ;;  %v10471_v20 = vcombine.low %v2261_v62, %v2274_v41  ;;  %v1606_v22 = vsel %vm14307_vm7, %v10412_v7, %v1605_v58  ;;  %v1628_v37 = vrot.slane %v1626_v26, 7  ;;  %v1826_v21 = vrot.slane %v1613_v8, 4  ;;  %11341 = vmatpush3.bf16.msra.mxu0 %v12887_v31  ;;  %v1558_v7 = vld [vmem:[#allocation2 + $0x40] sm:$0xf] }
 0x4a1   : > { %v10427_v36 = vcombine.low %v1593_v32, %v1606_v22  ;;  %v1827_v18 = vrot.slane %v1616_v9, 5  ;;  %v1835_v2 = vrot.slane %v1626_v26, 4  ;;  %v1836_v44 = vrot.slane %v1629_v43, 5  ;;  %11406 = vmatprep.subr.bf16.mxu0 %v12891_v40  ;;  %v2137_v26 = vld [vmem:[#allocation2 + $0xb4] sm:$0x8] }
 0x4a2   : > { %2882 = vmatmul.mubr.bf16.gmra.mrb[16].mxu0 %v10471_v20  ;;  %v2276_v29 = vshrl.u32 %v2133_v28, 16  ;;  %v2286_v46 = vor.u32 %v2284_v54, %v2283_v3  ;;  %v2289_v55 = vshrl.u32 %v2135_v19, 16  ;;  %v2296_v58 = vrot.slane %v2294_v6, 7  ;;  %v1555_v20 = vld [vmem:[#allocation2 + $0x30] sm:$0x8] }
 0x4a3   : > { %2889 = vmatprep.mubr.bf16.mxu0 %v10480_v61  ;;  %v1828_v1 = vor.u32 %v1827_v18, %v1826_v21  ;;  %v1608_v17 = vshrl.u32 %v1551_v14, 16  ;;  %v1837_v60 = vor.u32 %v1836_v44, %v1835_v2  ;;  %v1618_v34 = vor.u32 %v1616_v9, %v1615_v25  ;;  %v1557_v32 = vld [vmem:[#allocation2 + $0x3c] sm:$0x8]  ;;  %v12896_v21 = vld [vmem:[#allocation11 + $0x90] sm:$0xff]  }
 0x4a4   : > { %v10461_v62 = vrot.slane %v2276_v29, 11  ;;  %v1621_v53 = vshrl.u32 %v1553_v30, 16  ;;  %v10462_v3 = vrot.slane %v2289_v55, 11  ;;  %v2299_v59 = vor.u32 %v2297_v10, %v2296_v58  ;;  %v1560_v55 = vld [vmem:[#allocation2 + $0x4c] sm:$0xf] }
 0x4a5   : > { %v14541_v54 = vrot.slane %v1828_v1, 4  ;;  %v10413_v61 = vrot.slane %v1608_v17, 11  ;;  %v14545_v6 = vrot.slane %v1837_v60, 4  ;;  %v1631_v41 = vor.u32 %v1629_v43, %v1628_v37 }
 0x4a6   : > { %v2287_v8 = vsel %vm14307_vm7, %v10461_v62, %v2286_v46  ;;  %v10414_v9 = vrot.slane %v1621_v53, 11  ;;  %v2300_v28 = vsel %vm14307_vm7, %v10462_v3, %v2299_v59  ;;  %v1639_v10 = vshrl.u32 %v1556_v5, 16  ;;  %v2141_v3 = vld [vmem:[#allocation2 + $0xcc] sm:$0x8] }
 0x4a7   : > { %3188 = vmatmul.mubr.bf16.vlgmr.msra.gmra.mrb[16].mxu1 %v10427_v36  ;;  %v1619_v0 = vsel %vm14307_vm7, %v10413_v61, %v1618_v34  ;;  %v1642_v19 = vshll.u32 %v1556_v5, 16  ;;  %v10472_v22 = vcombine.low %v2287_v8, %v2300_v28  ;;  %v1652_v14 = vshrl.u32 %v1558_v7, 16  ;;  %v1562_v34 = vld [vmem:[#allocation2 + $0x58] sm:$0xf]  ;;  %v1559_v8 = vld [vmem:[#allocation2 + $0x48] sm:$0x8] }
 0x4a8   : > { %3195 = vmatprep.mubr.bf16.mxu1 %v10436_v11  ;;  %v2139_v11 = vld [vmem:[#allocation2 + $0xc0] sm:$0x8]  ;;  %12015 = vmatpush3.bf16.msra.mxu1 %v12890_v27  ;;  %v1632_v25 = vsel %vm14307_vm7, %v10414_v9, %v1631_v41  ;;  %v1655_v43 = vshll.u32 %v1558_v7, 16  ;;  %v1641_v31 = vrot.slane %v1639_v10, 7  ;;  %v14555_v36 = vrot.slane %v1639_v10, 4 }
 0x4a9   : > { %12016 = vmatprep.subr.bf16.mxu1 %v12893_v63  ;;  %v10428_v30 = vcombine.low %v1619_v0, %v1632_v25  ;;  %v14557_v37 = vrot.slane %v1642_v19, 5  ;;  %v1654_v18 = vrot.slane %v1652_v14, 7  ;;  %v14559_v27 = vrot.slane %v1652_v14, 4 }
 0x4aa   : > { %2890 = vmatmul.mubr.bf16.gmra.mrb[20].mxu0 %v10472_v22  ;;  %v14561_v2 = vrot.slane %v1655_v43, 5  ;;  %v10437_v44 = vcombine.low %v1556_v5, %v1558_v7  ;;  %v2302_v29 = vshrl.u32 %v2137_v26, 16  ;;  %v2309_v46 = vrot.slane %v2307_v56, 7 }
 0x4ab   : > { %2897 = vmatprep.mubr.bf16.mxu0 %v10481_v13  ;;  %v2315_v40 = vshrl.u32 %v2139_v11, 16  ;;  %v2322_v1 = vrot.slane %v2320_v57, 7  ;;  %v1634_v58 = vshrl.u32 %v1555_v20, 16  ;;  %v1644_v17 = vor.u32 %v1642_v19, %v1641_v31  ;;  %v1561_v20 = vld [vmem:[#allocation2 + $0x54] sm:$0x8]  ;;  %v12902_v31 = vld [vmem:[#allocation11 + $0xa0] sm:$0xff]  }
 0x4ac   : > { %12017 = vmatpush3.bf16.msra.mxu1 %v12893_v63  ;;  %v1647_v60 = vshrl.u32 %v1557_v32, 16  ;;  %v1657_v62 = vor.u32 %v1655_v43, %v1654_v18  ;;  %v10463_v53 = vrot.slane %v2302_v29, 11  ;;  %v2312_v13 = vor.u32 %v2310_v23, %v2309_v46  ;;  %v2143_v63 = vld [vmem:[#allocation2 + $0xd8] sm:$0x8]  ;;  %v14597_v46 = vld [vmem:[#allocation2 + $0x88] sm:$0xf] }
 0x4ad   : > { %12018 = vmatprep.subr.bf16.mxu1 %v12896_v21  ;;  %v10464_v5 = vrot.slane %v2315_v40, 11  ;;  %v2325_v56 = vor.u32 %v2323_v48, %v2322_v1  ;;  %v10415_v59 = vrot.slane %v1634_v58, 11  ;;  %v1665_v57 = vshrl.u32 %v1560_v55, 16  ;;  %v12899_v32 = vld [vmem:[#allocation11 + $0x98] sm:$0xff]  }
 0x4ae   : > { %v10416_v61 = vrot.slane %v1647_v60, 11  ;;  %v1668_v7 = vshll.u32 %v1560_v55, 16  ;;  %v2313_v9 = vsel %vm14307_vm7, %v10463_v53, %v2312_v13  ;;  %v1678_v12 = vshrl.u32 %v1562_v34, 16 }
 0x4af   : > { %3196 = vmatmul.mubr.bf16.gmra.mrb[20].mxu1 %v10428_v30  ;;  %v2326_v41 = vsel %vm14307_vm7, %v10464_v5, %v2325_v56  ;;  %v1681_v23 = vshll.u32 %v1562_v34, 16  ;;  %v1645_v49 = vsel %vm14307_vm7, %v10415_v59, %v1644_v17  ;;  %v1667_v11 = vrot.slane %v1665_v57, 7  ;;  %v1564_v30 = vld [vmem:[#allocation2 + $0x7c] sm:$0xf]  ;;  %v1563_v56 = vld [vmem:[#allocation2 + $0x78] sm:$0x8] }
 0x4b0   : > { %3203 = vmatprep.mubr.bf16.mxu1 %v10437_v44  ;;  %12019 = vmatpush3.bf16.msra.mxu1 %v12896_v21  ;;  %v10473_v26 = vcombine.low %v2313_v9, %v2326_v41  ;;  %v1658_v48 = vsel %vm14307_vm7, %v10416_v61, %v1657_v62  ;;  %v1680_v0 = vrot.slane %v1678_v12, 7  ;;  %v14582_v10 = vrot.slane %v1665_v57, 4  ;;  %v3351_v62 = vld [vmem:[#allocation2 + $0x1c] sm:$0xf]  ;;  %v1565_v41 = vld [vmem:[#allocation2 + $0x84] sm:$0x8] }
 0x4b1   : > { %v10429_v28 = vcombine.low %v1645_v49, %v1658_v48  ;;  %v14584_v19 = vrot.slane %v1668_v7, 5  ;;  %v14586_v22 = vrot.slane %v1678_v12, 4  ;;  %v14588_v25 = vrot.slane %v1681_v23, 5  ;;  %12020 = vmatprep.subr.bf16.mxu1 %v12899_v32  ;;  %v3350_v12 = vld [vmem:[#allocation2 + $0x18] sm:$0x8] }
 0x4b2   : > { %2898 = vmatmul.mubr.bf16.gmra.mrb[24].mxu0 %v10473_v26  ;;  %v10438_v14 = vcombine.low %v1560_v55, %v1562_v34  ;;  %v2328_v43 = vshrl.u32 %v2141_v3, 16  ;;  %v2335_v21 = vrot.slane %v2333_v16, 7  ;;  %v2341_v18 = vshrl.u32 %v2143_v63, 16 }
 0x4b3   : > { %2905 = vmatprep.mubr.bf16.mxu0 %v10482_v50  ;;  %v2348_v44 = vrot.slane %v2346_v24, 7  ;;  %v1660_v29 = vshrl.u32 %v1559_v8, 16  ;;  %v1670_v1 = vor.u32 %v1668_v7, %v1667_v11  ;;  %v1673_v55 = vshrl.u32 %v1561_v20, 16  ;;  %v3352_v11 = vld [vmem:[#allocation2 + $0x24] sm:$0x8] }
 0x4b4   : > { %v10465_v40 = vrot.slane %v2328_v43, 11  ;;  %v1683_v58 = vor.u32 %v1681_v23, %v1680_v0  ;;  %v2338_v17 = vor.u32 %v2336_v45, %v2335_v21  ;;  %v10466_v50 = vrot.slane %v2341_v18, 11  ;;  %12021 = vmatpush3.bf16.msra.mxu1 %v12899_v32  ;;  %v12908_v43 = vld [vmem:[#allocation11 + $0xb0] sm:$0xff]  }
 0x4b5   : > { %v2351_v16 = vor.u32 %v2349_v35, %v2348_v44  ;;  %v10417_v60 = vrot.slane %v1660_v29, 11  ;;  %v10418_v24 = vrot.slane %v1673_v55, 11  ;;  %v1691_v34 = vshrl.u32 %v1564_v30, 16  ;;  %12022 = vmatprep.subr.bf16.mxu1 %v12902_v31  ;;  %v3353_v35 = vld [vmem:[#allocation2 + $0x28] sm:$0xf] }
 0x4b6   : > { %v1694_v53 = vshll.u32 %v1564_v30, 16  ;;  %v1704_v13 = vshrl.u32 %v14597_v46, 16  ;;  %v2339_v5 = vsel %vm14307_vm7, %v10465_v40, %v2338_v17  ;;  %v1707_v15 = vshll.u32 %v14597_v46, 16 }
 0x4b7   : > { %3204 = vmatmul.mubr.bf16.gmra.mrb[24].mxu1 %v10429_v28  ;;  %v2352_v39 = vsel %vm14307_vm7, %v10466_v50, %v2351_v16  ;;  %v1671_v45 = vsel %vm14307_vm7, %v10417_v60, %v1670_v1  ;;  %v1684_v59 = vsel %vm14307_vm7, %v10418_v24, %v1683_v58  ;;  %v1693_v61 = vrot.slane %v1691_v34, 7  ;;  %v12905_v28 = vld [vmem:[#allocation11 + $0xa8] sm:$0xff]   ;;  %v1568_v1 = vld [vmem:[#allocation2 + $0x94] sm:$0xf]  ;;  %v1570_v16 = vld [vmem:[#allocation2 + $0xa0] sm:$0xf] }
 0x4b8   : > { %3211 = vmatprep.mubr.bf16.mxu1 %v10438_v14  ;;  %v10474_v3 = vcombine.low %v2339_v5, %v2352_v39  ;;  %v1706_v57 = vrot.slane %v1704_v13, 7  ;;  %v10430_v7 = vcombine.low %v1671_v45, %v1684_v59  ;;  %v14613_v63 = vrot.slane %v1691_v34, 4  ;;  %12023 = vmatpush3.bf16.msra.mxu1 %v12902_v31 }
 0x4b9   : > { %v14615_v8 = vrot.slane %v1694_v53, 5  ;;  %v14617_v9 = vrot.slane %v1704_v13, 4  ;;  %v14619_v23 = vrot.slane %v1707_v15, 5  ;;  %v10439_v26 = vcombine.low %v1564_v30, %v14597_v46  ;;  %12024 = vmatprep.subr.bf16.mxu1 %v12905_v28 }
 0x4ba   : > { %2906 = vmatmul.mubr.bf16.gmra.mrb[28].mxu0 %v10474_v3  ;;  %v3388_v49 = vshrl.u32 %v3351_v62, 16  ;;  %v3391_v48 = vshll.u32 %v3351_v62, 16  ;;  %v3401_v0 = vshrl.u32 %v3353_v35, 16  ;;  %v3404_v20 = vshll.u32 %v3353_v35, 16  ;;  %v12892_v3 = vld [vmem:[#allocation11 + $0x240] sm:$0xff]  }
 0x4bb   : > { %v10563_v32 = vcombine.low %v3351_v62, %v3353_v35  ;;  %v1686_v14 = vshrl.u32 %v1563_v56, 16  ;;  %v1696_v44 = vor.u32 %v1694_v53, %v1693_v61  ;;  %v1699_v58 = vshrl.u32 %v1565_v41, 16  ;;  %v3355_v53 = vld [vmem:[#allocation2 + $0x34] sm:$0xf]  ;;  %v3357_v35 = vld [vmem:[#allocation2 + $0x40] sm:$0xf] }
 0x4bc   : > { %v3390_v21 = vrot.slane %v3388_v49, 7  ;;  %v14622_v18 = vrot.slane %v3388_v49, 4  ;;  %v14624_v31 = vrot.slane %v3391_v48, 5  ;;  %v3403_v29 = vrot.slane %v3401_v0, 7  ;;  %12025 = vmatpush3.bf16.msra.mxu1 %v12905_v28  ;;  %v12897_v49 = vld [vmem:[#allocation11 + $0x288] sm:$0xff]  }
 0x4bd   : > { %v14626_v30 = vrot.slane %v3401_v0, 4  ;;  %v14628_v46 = vrot.slane %v3404_v20, 5  ;;  %4086 = vmatprep.mubr.bf16.mxu0 %v10563_v32  ;;  %v10419_v40 = vrot.slane %v1686_v14, 11  ;;  %v1709_v17 = vor.u32 %v1707_v15, %v1706_v57  ;;  %12026 = vmatprep.subr.bf16.mxu1 %v12908_v43  ;;  %v3354_v32 = vld [vmem:[#allocation2 + $0x30] sm:$0x8] }
 0x4be   : > { %v3393_v55 = vor.u32 %v3391_v48, %v3390_v21  ;;  %v3383_v50 = vshrl.u32 %v3350_v12, 16  ;;  %v3406_v60 = vor.u32 %v3404_v20, %v3403_v29  ;;  %v3396_v24 = vshrl.u32 %v3352_v11, 16  ;;  %v1569_v20 = vld [vmem:[#allocation2 + $0x9c] sm:$0x8] }
 0x4bf   : > { %3212 = vmatmul.mubr.bf16.gmra.mrb[28].mxu1 %v10430_v7  ;;  %17079 = vst [vmem:[#allocation37_spill] sm:$0xff] %v14626_v30  ;;  %17080 = vst [vmem:[#allocation38_spill] sm:$0xff] %v14628_v46  ;;  %v1697_v62 = vsel %vm14307_vm7, %v10419_v40, %v1696_v44  ;;  %v1717_v34 = vshrl.u32 %v1568_v1, 16  ;;  %v10420_v13 = vrot.slane %v1699_v58, 11  ;;  %v1720_v39 = vshll.u32 %v1568_v1, 16 }
 0x4c0   : > { %3219 = vmatprep.mubr.bf16.mxu1 %v10439_v26  ;;  %v10539_v5 = vrot.slane %v3383_v50, 11  ;;  %v1730_v45 = vshrl.u32 %v1570_v16, 16  ;;  %v10540_v56 = vrot.slane %v3396_v24, 11  ;;  %v1733_v61 = vshll.u32 %v1570_v16, 16  ;;  %12027 = vmatpush3.bf16.msra.mxu1 %v12908_v43  ;;  %v1567_v26 = vld [vmem:[#allocation2 + $0x90] sm:$0x8] }
 0x4c1   : > { %v1719_v59 = vrot.slane %v1717_v34, 7  ;;  %v14632_v15 = vrot.slane %v1717_v34, 4  ;;  %v1710_v57 = vsel %vm14307_vm7, %v10420_v13, %v1709_v17  ;;  %v14638_v12 = vrot.slane %v1720_v39, 5  ;;  %v3356_v29 = vld [vmem:[#allocation2 + $0x3c] sm:$0x8]  ;;  %v12898_v50 = vld [vmem:[#allocation11 + $0x248] sm:$0xff]  }
 0x4c2   : > { %v3394_v7 = vsel %vm14307_vm7, %v10539_v5, %v3393_v55  ;;  %v1732_v41 = vrot.slane %v1730_v45, 7  ;;  %v10431_v48 = vcombine.low %v1697_v62, %v1710_v57  ;;  %v3407_v11 = vsel %vm14307_vm7, %v10540_v56, %v3406_v60  ;;  %v12911_v13 = vld [vmem:[#allocation11 + $0xb8] sm:$0xff]  }
 0x4c3   : > { %v14642_v28 = vrot.slane %v1730_v45, 4  ;;  %v14644_v0 = vrot.slane %v1733_v61, 5  ;;  %v10555_v14 = vcombine.low %v3394_v7, %v3407_v11  ;;  %v10440_v43 = vcombine.low %v1568_v1, %v1570_v16  ;;  %12028 = vmatprep.subr.bf16.mxu1 %v12911_v13 }
 0x4c4   : > { %v3414_v21 = vshrl.u32 %v3355_v53, 16  ;;  %v3417_v44 = vshll.u32 %v3355_v53, 16  ;;  %v3427_v40 = vshrl.u32 %v3357_v35, 16  ;;  %v3430_v55 = vshll.u32 %v3357_v35, 16  ;;  %12029 = vmatpush3.bf16.msra.mxu1 %v12911_v13 }
 0x4c5   : > { %v10564_v58 = vcombine.low %v3355_v53, %v3357_v35  ;;  %v1712_v17 = vshrl.u32 %v1567_v26, 16  ;;  %4087 = vmatmul.mubr.bf16.vlgmr.msra.gmra.mrb[32].mxu0 %v10555_v14  ;;  %v1722_v34 = vor.u32 %v1720_v39, %v1719_v59  ;;  %v1725_v57 = vshrl.u32 %v1569_v20, 16  ;;  %v1572_v53 = vld [vmem:[#allocation2 + $0xac] sm:$0xf]  ;;  %v12903_v35 = vld [vmem:[#allocation11 + $0x290] sm:$0xff]   ;;  %v14648_v14 = vld [vmem:[#allocation11 + $0x200] sm:$0xff]  }
 0x4c6   : > { %v3416_v60 = vrot.slane %v3414_v21, 7  ;;  %v3624_v62 = vrot.slane %v3414_v21, 4  ;;  %v3625_v24 = vrot.slane %v3417_v44, 5  ;;  %11407 = vmatpush3.bf16.msra.mxu0 %v12892_v3  ;;  %v3429_v5 = vrot.slane %v3427_v40, 7  ;;  %v1574_v3 = vld [vmem:[#allocation2 + $0xb8] sm:$0xf]  ;;  %12046 = vmatprep.subr.bf16.mxu1 %v14648_v14 }
 0x4c7   : > { %3220 = vmatmul.mubr.bf16.gmra.mrb[32].mxu1 %v10431_v48  ;;  %v3633_v45 = vrot.slane %v3427_v40, 4  ;;  %v3634_v1 = vrot.slane %v3430_v55, 5  ;;  %4094 = vmatprep.mubr.bf16.mxu0 %v10564_v58  ;;  %v10421_v16 = vrot.slane %v1712_v17, 11  ;;  %v1735_v7 = vor.u32 %v1733_v61, %v1732_v41  ;;  %v12904_v41 = vld [vmem:[#allocation11 + $0x250] sm:$0xff]  }
 0x4c8   : > { %3227 = vmatprep.mubr.bf16.mxu1 %v10440_v43  ;;  %v3626_v56 = vor.u32 %v3625_v24, %v3624_v62  ;;  %v3409_v48 = vshrl.u32 %v3354_v32, 16  ;;  %11408 = vmatprep.subr.bf16.mxu0 %v12897_v49  ;;  %v3419_v39 = vor.u32 %v3417_v44, %v3416_v60  ;;  %v3422_v59 = vshrl.u32 %v3356_v29, 16  ;;  %v12909_v49 = vld [vmem:[#allocation11 + $0x298] sm:$0xff]   ;;  %v3359_v62 = vld [vmem:[#allocation2 + $0x4c] sm:$0xf] }
 0x4c9   : > { %v3635_v26 = vor.u32 %v3634_v1, %v3633_v45  ;;  %v1723_v11 = vsel %vm14307_vm7, %v10421_v16, %v1722_v34  ;;  %v10422_v21 = vrot.slane %v1725_v57, 11  ;;  %v3432_v61 = vor.u32 %v3430_v55, %v3429_v5  ;;  %v3361_v5 = vld [vmem:[#allocation2 + $0x58] sm:$0xf]  ;;  %v1571_v45 = vld [vmem:[#allocation2 + $0xa8] sm:$0x8] }
 0x4ca   : > { %v14650_v43 = vrot.slane %v3626_v56, 4  ;;  %v10541_v20 = vrot.slane %v3409_v48, 11  ;;  %v10542_v40 = vrot.slane %v3422_v59, 11  ;;  %11409 = vmatpush3.bf16.msra.mxu0 %v12898_v50  ;;  %v1743_v58 = vshrl.u32 %v1572_v53, 16  ;;  %v3358_v48 = vld [vmem:[#allocation2 + $0x48] sm:$0x8] }
 0x4cb   : > { %v14652_v32 = vrot.slane %v3635_v26, 4  ;;  %v1746_v17 = vshll.u32 %v1572_v53, 16  ;;  %v1736_v44 = vsel %vm14307_vm7, %v10422_v21, %v1735_v7  ;;  %v1756_v60 = vshrl.u32 %v1574_v3, 16  ;;  %11410 = vmatprep.subr.bf16.mxu0 %v12903_v35  ;;  %v1573_v7 = vld [vmem:[#allocation2 + $0xb4] sm:$0x8]  ;;  %v12910_v21 = vld [vmem:[#allocation11 + $0x258] sm:$0xff]  }
 0x4cc   : > { %17081 = vst [vmem:[#allocation39_spill] sm:$0xff] %v14650_v43  ;;  %v3420_v29 = vsel %vm14307_vm7, %v10541_v20, %v3419_v39  ;;  %v1759_v24 = vshll.u32 %v1574_v3, 16  ;;  %v10432_v55 = vcombine.low %v1723_v11, %v1736_v44  ;;  %v3433_v34 = vsel %vm14307_vm7, %v10542_v40, %v3432_v61  ;;  %v3360_v59 = vld [vmem:[#allocation2 + $0x54] sm:$0x8]  ;;  %v12914_v44 = vld [vmem:[#allocation11 + $0x2a0] sm:$0xff]  }
 0x4cd   : > { %17082 = vst [vmem:[#allocation40_spill] sm:$0xff] %v14652_v32  ;;  %v1745_v13 = vrot.slane %v1743_v58, 7  ;;  %v14661_v50 = vrot.slane %v1743_v58, 4  ;;  %v10556_v1 = vcombine.low %v3420_v29, %v3433_v34  ;;  %v1758_v16 = vrot.slane %v1756_v60, 7 }
 0x4ce   : > { %v14663_v56 = vrot.slane %v1746_v17, 5  ;;  %v14665_v57 = vrot.slane %v1756_v60, 4  ;;  %v14667_v26 = vrot.slane %v1759_v24, 5  ;;  %v10441_v35 = vcombine.low %v1572_v53, %v1574_v3  ;;  %11411 = vmatpush3.bf16.msra.mxu0 %v12904_v41  ;;  %v12915_v53 = vld [vmem:[#allocation11 + $0x260] sm:$0xff]  }
 0x4cf   : > { %3228 = vmatmul.mubr.bf16.gmra.mrb[36].mxu1 %v10432_v55  ;;  %v3440_v11 = vshrl.u32 %v3359_v62, 16  ;;  %v3443_v39 = vshll.u32 %v3359_v62, 16  ;;  %4095 = vmatmul.mubr.bf16.gmra.mrb[36].mxu0 %v10556_v1  ;;  %v3453_v20 = vshrl.u32 %v3361_v5, 16  ;;  %v3456_v61 = vshll.u32 %v3361_v5, 16 }
 0x4d0   : > { %v10565_v40 = vcombine.low %v3359_v62, %v3361_v5  ;;  %v1738_v58 = vshrl.u32 %v1571_v45, 16  ;;  %11412 = vmatprep.subr.bf16.mxu0 %v12909_v49  ;;  %3235 = vmatprep.mubr.bf16.mxu1 %v10441_v35  ;;  %v1748_v34 = vor.u32 %v1746_v17, %v1745_v13  ;;  %v1751_v32 = vshrl.u32 %v1573_v7, 16  ;;  %v1576_v45 = vld [vmem:[#allocation2 + $0xc4] sm:$0xf]  ;;  %v1578_v17 = vld [vmem:[#allocation2 + $0xd0] sm:$0xf] }
 0x4d1   : > { %v3442_v29 = vrot.slane %v3440_v11, 7  ;;  %v14669_v60 = vrot.slane %v3440_v11, 4  ;;  %v14671_v55 = vrot.slane %v3443_v39, 5  ;;  %v3455_v3 = vrot.slane %v3453_v20, 7 }
 0x4d2   : > { %v14673_v4 = vrot.slane %v3453_v20, 4  ;;  %v14675_v41 = vrot.slane %v3456_v61, 5  ;;  %4102 = vmatprep.mubr.bf16.mxu0 %v10565_v40  ;;  %v10423_v1 = vrot.slane %v1738_v58, 11  ;;  %v1761_v62 = vor.u32 %v1759_v24, %v1758_v16  ;;  %11413 = vmatpush3.bf16.msra.mxu0 %v12910_v21  ;;  %v12919_v20 = vld [vmem:[#allocation11 + $0x2a8] sm:$0xff]   ;;  %v3363_v58 = vld [vmem:[#allocation2 + $0x64] sm:$0xf] }
 0x4d3   : > { %17083 = vst [vmem:[#allocation41_spill] sm:$0xff] %v14669_v60  ;;  %17084 = vst [vmem:[#allocation42_spill] sm:$0xff] %v14671_v55  ;;  %v3435_v5 = vshrl.u32 %v3358_v48, 16  ;;  %v3445_v49 = vor.u32 %v3443_v39, %v3442_v29  ;;  %v3448_v11 = vshrl.u32 %v3360_v59, 16  ;;  %v3458_v43 = vor.u32 %v3456_v61, %v3455_v3  ;;  %11414 = vmatprep.subr.bf16.mxu0 %v12914_v44  ;;  %v3365_v39 = vld [vmem:[#allocation2 + $0x70] sm:$0xf] }
 0x4d4   : > { %17085 = vst [vmem:[#allocation43_spill] sm:$0xff] %v14673_v4  ;;  %17086 = vst [vmem:[#allocation44_spill] sm:$0xff] %v14675_v41  ;;  %v1749_v35 = vsel %vm14307_vm7, %v10423_v1, %v1748_v34  ;;  %v1769_v13 = vshrl.u32 %v1576_v45, 16  ;;  %v10424_v4 = vrot.slane %v1751_v32, 11  ;;  %v1772_v41 = vshll.u32 %v1576_v45, 16 }
 0x4d5   : > { %v10543_v55 = vrot.slane %v3435_v5, 11  ;;  %v1782_v40 = vshrl.u32 %v1578_v17, 16  ;;  %v10544_v7 = vrot.slane %v3448_v11, 11  ;;  %v1785_v16 = vshll.u32 %v1578_v17, 16  ;;  %v1575_v32 = vld [vmem:[#allocation2 + $0xc0] sm:$0x8] }
 0x4d6   : > { %v1771_v24 = vrot.slane %v1769_v13, 7  ;;  %v14679_v48 = vrot.slane %v1769_v13, 4  ;;  %v1762_v21 = vsel %vm14307_vm7, %v10424_v4, %v1761_v62  ;;  %v14685_v44 = vrot.slane %v1772_v41, 5  ;;  %11415 = vmatpush3.bf16.msra.mxu0 %v12915_v53  ;;  %v1577_v5 = vld [vmem:[#allocation2 + $0xcc] sm:$0x8] }
 0x4d7   : > { %v3446_v59 = vsel %vm14307_vm7, %v10543_v55, %v3445_v49  ;;  %v1784_v61 = vrot.slane %v1782_v40, 7  ;;  %v10433_v29 = vcombine.low %v1749_v35, %v1762_v21  ;;  %v3459_v34 = vsel %vm14307_vm7, %v10544_v7, %v3458_v43  ;;  %v3362_v11 = vld [vmem:[#allocation2 + $0x60] sm:$0x8]  ;;  %11416 = vmatprep.subr.bf16.mxu0 %v12919_v20  ;;  %v3364_v49 = vld [vmem:[#allocation2 + $0x6c] sm:$0x8] }
 0x4d8   : > { %v14689_v3 = vrot.slane %v1782_v40, 4  ;;  %v14691_v1 = vrot.slane %v1785_v16, 5  ;;  %v10557_v4 = vcombine.low %v3446_v59, %v3459_v34  ;;  %v10442_v62 = vcombine.low %v1576_v45, %v1578_v17  ;;  %v12920_v21 = vld [vmem:[#allocation11 + $0x268] sm:$0xff]  }
 0x4d9   : > { %v3466_v13 = vshrl.u32 %v3363_v58, 16  ;;  %v3469_v55 = vshll.u32 %v3363_v58, 16  ;;  %3236 = vmatmul.mubr.bf16.gmra.mrb[40].mxu1 %v10433_v29  ;;  %v3479_v60 = vshrl.u32 %v3365_v39, 16  ;;  %v3482_v46 = vshll.u32 %v3365_v39, 16 }
 0x4da   : > { %v10566_v53 = vcombine.low %v3363_v58, %v3365_v39  ;;  %v1764_v35 = vshrl.u32 %v1575_v32, 16  ;;  %4103 = vmatmul.mubr.bf16.gmra.mrb[40].mxu0 %v10557_v4  ;;  %3243 = vmatprep.mubr.bf16.mxu1 %v10442_v62  ;;  %v1774_v30 = vor.u32 %v1772_v41, %v1771_v24  ;;  %v1777_v29 = vshrl.u32 %v1577_v5, 16 }
 0x4db   : > { %v3468_v43 = vrot.slane %v3466_v13, 7  ;;  %v14693_v40 = vrot.slane %v3466_v13, 4  ;;  %v14695_v7 = vrot.slane %v3469_v55, 5  ;;  %v3481_v20 = vrot.slane %v3479_v60, 7  ;;  %11417 = vmatpush3.bf16.msra.mxu0 %v12920_v21  ;;  %v1789_v13 = vld [vmem:[#allocation2 + $0x8] sm:$0x1] }
 0x4dc   : > { %v14697_v59 = vrot.slane %v3479_v60, 4  ;;  %v14699_v45 = vrot.slane %v3482_v46, 5  ;;  %4110 = vmatprep.mubr.bf16.mxu0 %v10566_v53  ;;  %v10425_v17 = vrot.slane %v1764_v35, 11  ;;  %v1787_v58 = vor.u32 %v1785_v16, %v1784_v61  ;;  %v3367_v16 = vld [vmem:[#allocation2 + $0x94] sm:$0xf] }
 0x4dd   : > { %17087 = vst [vmem:[#allocation45_spill] sm:$0xff] %v14695_v7  ;;  %v3461_v39 = vshrl.u32 %v3362_v11, 16  ;;  %v3471_v32 = vor.u32 %v3469_v55, %v3468_v43  ;;  %v3474_v4 = vshrl.u32 %v3364_v49, 16  ;;  %v3484_v62 = vor.u32 %v3482_v46, %v3481_v20  ;;  %v1790_v7 = vld [vmem:[#allocation2 + $0x14] sm:$0x1] }
 0x4de   : > { %17088 = vst [vmem:[#allocation46_spill] sm:$0xff] %v14699_v45  ;;  %v1775_v34 = vsel %vm14307_vm7, %v10425_v17, %v1774_v30  ;;  %v17089_v60 = vor.u32 %v14516_v42, %v14514_v38  ;;  %v10426_v24 = vrot.slane %v1777_v29, 11  ;;  %v1813_v53 = vshll.u32 %v1789_v13, 16  ;;  %v3369_v55 = vld [vmem:[#allocation2 + $0xa0] sm:$0xf] }
 0x4df   : > { %v10545_v45 = vrot.slane %v3461_v39, 11  ;;  %v1819_v5 = vor.u32 %v14520_v51, %v14518_v47  ;;  %v10546_v61 = vrot.slane %v3474_v4, 11  ;;  %v1822_v11 = vshll.u32 %v1790_v7, 16  ;;  %v1791_v21 = vld [vmem:[#allocation2 + $0x20] sm:$0x1] }
 0x4e0   : > { %v1811_v41 = vrot.slane %v17089_v60, 4  ;;  %v3492_v35 = vshrl.u32 %v3367_v16, 16  ;;  %v3495_v30 = vshll.u32 %v3367_v16, 16  ;;  %v1788_v46 = vsel %vm14307_vm7, %v10426_v24, %v1787_v58  ;;  %v1792_v43 = vld [vmem:[#allocation2 + $0x2c] sm:$0x1] }
 0x4e1   : > { %v3472_v49 = vsel %vm14307_vm7, %v10545_v45, %v3471_v32  ;;  %v1815_v38 = vrot.slane %v1813_v53, 5  ;;  %v1820_v42 = vrot.slane %v1819_v5, 4  ;;  %v10434_v20 = vcombine.low %v1775_v34, %v1788_v46  ;;  %v3366_v7 = vld [vmem:[#allocation2 + $0x90] sm:$0x8]  ;;  %v3368_v29 = vld [vmem:[#allocation2 + $0x9c] sm:$0x8] }
 0x4e2   : > { %v3485_v47 = vsel %vm14307_vm7, %v10546_v61, %v3484_v62  ;;  %v1824_v51 = vrot.slane %v1822_v11, 5  ;;  %v3494_v17 = vrot.slane %v3492_v35, 7  ;;  %v3505_v58 = vshrl.u32 %v3369_v55, 16  ;;  %v12924_v61 = vld [vmem:[#allocation11 + $0x2b0] sm:$0xff]  }
 0x4e3   : > { %v10558_v39 = vcombine.low %v3472_v49, %v3485_v47  ;;  %v1816_v4 = vsel %vm14302_vm6, %v1811_v41, %v1815_v38  ;;  %v3508_v13 = vshll.u32 %v3369_v55, 16  ;;  %3244 = vmatmul.mubr.bf16.gmra.mrb[44].mxu1 %v10434_v20  ;;  %v14718_v32 = vrot.slane %v3492_v35, 4  ;;  %v12925_v38 = vld [vmem:[#allocation11 + $0x270] sm:$0xff]   ;;  %11418 = vmatprep.subr.bf16.mxu0 %v12924_v61  ;;  %v1796_v61 = vld [vmem:[#allocation2 + $0x5c] sm:$0x1] }
 0x4e4   : > { %v1825_v45 = vsel %vm14302_vm6, %v1820_v42, %v1824_v51  ;;  %v14720_v34 = vrot.slane %v3495_v30, 5  ;;  %v10567_v60 = vcombine.low %v3367_v16, %v3369_v55  ;;  %v3507_v24 = vrot.slane %v3505_v58, 7  ;;  %11419 = vmatpush3.bf16.msra.mxu0 %v12925_v38  ;;  %v12930_v38 = vld [vmem:[#allocation11 + $0x278] sm:$0xff]  }
 0x4e5   : > { %4111 = vmatmul.mubr.bf16.gmra.mrb[44].mxu0 %v10558_v39  ;;  %v10443_v62 = vcombine.low %v1816_v4, %v1825_v45  ;;  %v14722_v53 = vrot.slane %v3505_v58, 4  ;;  %v14724_v5 = vrot.slane %v3508_v13, 5  ;;  %v1831_v41 = vshll.u32 %v1791_v21, 16  ;;  %v1793_v39 = vld [vmem:[#allocation2 + $0x38] sm:$0x1] }
 0x4e6   : > { %4118 = vmatprep.mubr.bf16.mxu0 %v10567_v60  ;;  %v1840_v11 = vshll.u32 %v1792_v43, 16  ;;  %v3487_v46 = vshrl.u32 %v3366_v7, 16  ;;  %v3497_v49 = vor.u32 %v3495_v30, %v3494_v17  ;;  %v3500_v35 = vshrl.u32 %v3368_v29, 16  ;;  %v12916_v43 = vld [vmem:[#allocation11 + $0x208] sm:$0xff]   ;;  %v1794_v17 = vld [vmem:[#allocation2 + $0x44] sm:$0x1] }
 0x4e7   : > { %12030 = vmatprep.mubr.bf16.mxu1 %v10443_v62  ;;  %v3510_v42 = vor.u32 %v3508_v13, %v3507_v24  ;;  %v1846_v16 = vor.u32 %v14557_v37, %v14555_v36  ;;  %v1855_v55 = vor.u32 %v14561_v2, %v14559_v27  ;;  %v1833_v20 = vrot.slane %v1831_v41, 5  ;;  %v12929_v58 = vld [vmem:[#allocation11 + $0x2b8] sm:$0xff]   ;;  %v1795_v24 = vld [vmem:[#allocation2 + $0x50] sm:$0x1] }
 0x4e8   : > { %v1842_v47 = vrot.slane %v1840_v11, 5  ;;  %v10547_v51 = vrot.slane %v3487_v46, 11  ;;  %v1864_v21 = vor.u32 %v14584_v19, %v14582_v10  ;;  %v10548_v30 = vrot.slane %v3500_v35, 11  ;;  %v3371_v10 = vld [vmem:[#allocation2 + $0xac] sm:$0xf]  ;;  %11420 = vmatprep.subr.bf16.mxu0 %v12929_v58 }
 0x4e9   : > { %v1847_v7 = vrot.slane %v1846_v16, 4  ;;  %v1849_v29 = vshll.u32 %v1793_v39, 16  ;;  %v1856_v4 = vrot.slane %v1855_v55, 4  ;;  %v1834_v36 = vsel %vm14302_vm6, %v14541_v54, %v1833_v20  ;;  %v3373_v19 = vld [vmem:[#allocation2 + $0xb8] sm:$0xf]  ;;  %11421 = vmatpush3.bf16.msra.mxu0 %v12930_v38 }
 0x4ea   : > { %v1843_v37 = vsel %vm14302_vm6, %v14545_v6, %v1842_v47  ;;  %v3498_v27 = vsel %vm14307_vm7, %v10547_v51, %v3497_v49  ;;  %v1858_v2 = vshll.u32 %v1794_v17, 16  ;;  %v3511_v45 = vsel %vm14307_vm7, %v10548_v30, %v3510_v42  ;;  %v3370_v6 = vld [vmem:[#allocation2 + $0xa8] sm:$0x8]  ;;  %v3372_v42 = vld [vmem:[#allocation2 + $0xb4] sm:$0x8] }
 0x4eb   : > { %v10444_v13 = vcombine.low %v1834_v36, %v1843_v37  ;;  %v1851_v60 = vrot.slane %v1849_v29, 5  ;;  %v3518_v62 = vshrl.u32 %v3371_v10, 16  ;;  %v10559_v54 = vcombine.low %v3498_v27, %v3511_v45  ;;  %v12918_v30 = vld [vmem:[#allocation11 + $0x210] sm:$0xff]  }
 0x4ec   : > { %v1860_v41 = vrot.slane %v1858_v2, 5  ;;  %v3521_v11 = vshll.u32 %v3371_v10, 16  ;;  %v3531_v46 = vshrl.u32 %v3373_v19, 16  ;;  %v3534_v16 = vshll.u32 %v3373_v19, 16 }
 0x4ed   : > { %12031 = vmatmul.mubr.bf16.vlgmr.msra.gmra.mrb[0].mxu1 %v10444_v13  ;;  %v1852_v49 = vsel %vm14302_vm6, %v1847_v7, %v1851_v60  ;;  %v3520_v35 = vrot.slane %v3518_v62, 7  ;;  %v14744_v55 = vrot.slane %v3518_v62, 4  ;;  %4119 = vmatmul.mubr.bf16.gmra.mrb[48].mxu0 %v10559_v54  ;;  %v10568_v29 = vcombine.low %v3371_v10, %v3373_v19  ;;  %v12921_v60 = vld [vmem:[#allocation11 + $0x218] sm:$0xff]  }
 0x4ee   : > { %12047 = vmatpush3.bf16.msra.mxu1 %v14648_v14  ;;  %v1861_v20 = vsel %vm14302_vm6, %v1856_v4, %v1860_v41  ;;  %v3533_v47 = vrot.slane %v3531_v46, 7  ;;  %v14749_v51 = vrot.slane %v3521_v11, 5  ;;  %v14751_v39 = vrot.slane %v3531_v46, 4  ;;  %v12934_v4 = vld [vmem:[#allocation11 + $0x340] sm:$0xff]  }
 0x4ef   : > { %12048 = vmatprep.subr.bf16.mxu1 %v12916_v43  ;;  %v10445_v17 = vcombine.low %v1852_v49, %v1861_v20  ;;  %v14753_v7 = vrot.slane %v3534_v16, 5  ;;  %v1865_v36 = vrot.slane %v1864_v21, 4  ;;  %v1867_v37 = vshll.u32 %v1795_v24, 16  ;;  %4126 = vmatprep.mubr.bf16.mxu0 %v10568_v29 }
 0x4f0   : > { %v1873_v14 = vor.u32 %v14588_v25, %v14586_v22  ;;  %v1876_v27 = vshll.u32 %v1796_v61, 16  ;;  %v3513_v2 = vshrl.u32 %v3370_v6, 16  ;;  %v3523_v58 = vor.u32 %v3521_v11, %v3520_v35  ;;  %11486 = vmatprep.subr.bf16.mxu0 %v12934_v4  ;;  %v1797_v22 = vld [vmem:[#allocation2 + $0x80] sm:$0x1]  ;;  %v3375_v6 = vld [vmem:[#allocation2 + $0xc4] sm:$0xf] }
 0x4f1   : > { %12034 = vmatprep.mubr.bf16.mxu1 %v10445_v17  ;;  %v3526_v13 = vshrl.u32 %v3372_v42, 16  ;;  %v3536_v45 = vor.u32 %v3534_v16, %v3533_v47  ;;  %v1882_v62 = vor.u32 %v14615_v8, %v14613_v63  ;;  %v1869_v10 = vrot.slane %v1867_v37, 5  ;;  %v3377_v35 = vld [vmem:[#allocation2 + $0xd0] sm:$0xf]  ;;  %v1800_v47 = vld [vmem:[#allocation2 + $0xa4] sm:$0x1] }
 0x4f2   : > { %12049 = vmatpush3.bf16.msra.mxu1 %v12916_v43  ;;  %v1874_v21 = vrot.slane %v1873_v14, 4  ;;  %v1878_v19 = vrot.slane %v1876_v27, 5  ;;  %v10549_v24 = vrot.slane %v3513_v2, 11  ;;  %v1891_v61 = vor.u32 %v14619_v23, %v14617_v9  ;;  %v1798_v43 = vld [vmem:[#allocation2 + $0x8c] sm:$0x1]  ;;  %v12923_v27 = vld [vmem:[#allocation11 + $0x220] sm:$0xff]  }
 0x4f3   : > { %v10550_v54 = vrot.slane %v3526_v13, 11  ;;  %12050 = vmatprep.subr.bf16.mxu1 %v12918_v30  ;;  %v1883_v25 = vrot.slane %v1882_v62, 4  ;;  %v1900_v41 = vor.u32 %v14638_v12, %v14632_v15  ;;  %v1870_v11 = vsel %vm14302_vm6, %v1865_v36, %v1869_v10  ;;  %v1799_v15 = vld [vmem:[#allocation2 + $0x98] sm:$0x1]  ;;  %v3374_v14 = vld [vmem:[#allocation2 + $0xc0] sm:$0x8] }
 0x4f4   : > { %v1879_v63 = vsel %vm14302_vm6, %v1874_v21, %v1878_v19  ;;  %v3524_v8 = vsel %vm14307_vm7, %v10549_v24, %v3523_v58  ;;  %v1885_v46 = vshll.u32 %v1797_v22, 16  ;;  %v1892_v9 = vrot.slane %v1891_v61, 4  ;;  %v3376_v13 = vld [vmem:[#allocation2 + $0xcc] sm:$0x8] }
 0x4f5   : > { %v10446_v38 = vcombine.low %v1870_v11, %v1879_v63  ;;  %v3537_v49 = vsel %vm14307_vm7, %v10550_v54, %v3536_v45  ;;  %v1894_v23 = vshll.u32 %v1798_v43, 16  ;;  %v3544_v42 = vshrl.u32 %v3375_v6, 16 }
 0x4f6   : > { %v10560_v12 = vcombine.low %v3524_v8, %v3537_v49  ;;  %12051 = vmatpush3.bf16.msra.mxu1 %v12918_v30  ;;  %v1887_v16 = vrot.slane %v1885_v46, 5  ;;  %v3547_v20 = vshll.u32 %v3375_v6, 16  ;;  %v3557_v29 = vshrl.u32 %v3377_v35, 16  ;;  %v12926_v8 = vld [vmem:[#allocation11 + $0x228] sm:$0xff]  }
 0x4f7   : > { %12035 = vmatmul.mubr.bf16.gmra.mrb[4].mxu1 %v10446_v38  ;;  %12052 = vmatprep.subr.bf16.mxu1 %v12921_v60  ;;  %v1896_v17 = vrot.slane %v1894_v23, 5  ;;  %v3560_v36 = vshll.u32 %v3377_v35, 16  ;;  %v10569_v37 = vcombine.low %v3375_v6, %v3377_v35  ;;  %v3546_v4 = vrot.slane %v3544_v42, 7  ;;  %v1802_v23 = vld [vmem:[#allocation2 + $0xbc] sm:$0x1] }
 0x4f8   : > { %4127 = vmatmul.mubr.bf16.gmra.mrb[52].mxu0 %v10560_v12  ;;  %v1888_v2 = vsel %vm14302_vm6, %v1883_v25, %v1887_v16  ;;  %v14773_v58 = vrot.slane %v3544_v42, 4  ;;  %v14775_v30 = vrot.slane %v3547_v20, 5  ;;  %v3559_v62 = vrot.slane %v3557_v29, 7  ;;  %v3379_v16 = vld [vmem:[#allocation2 + $0xdc] sm:$0xf] }
 0x4f9   : > { %v1897_v45 = vsel %vm14302_vm6, %v1892_v9, %v1896_v17  ;;  %v14779_v10 = vrot.slane %v3557_v29, 4  ;;  %v14781_v21 = vrot.slane %v3560_v36, 5  ;;  %4134 = vmatprep.mubr.bf16.mxu0 %v10569_v37  ;;  %v1901_v24 = vrot.slane %v1900_v41, 4  ;;  %v3381_v42 = vld [vmem:[#allocation2 + $0xe8] sm:$0xf] }
 0x4fa   : > { %12053 = vmatpush3.bf16.msra.mxu1 %v12921_v60  ;;  %v10447_v19 = vcombine.low %v1888_v2, %v1897_v45  ;;  %v1903_v54 = vshll.u32 %v1799_v15, 16  ;;  %v1909_v22 = vor.u32 %v14644_v0, %v14642_v28  ;;  %v1912_v25 = vshll.u32 %v1800_v47, 16  ;;  %v1801_v0 = vld [vmem:[#allocation2 + $0xb0] sm:$0x1]  ;;  %v1803_v47 = vld [vmem:[#allocation2 + $0xc8] sm:$0x1] }
 0x4fb   : > { %v3539_v61 = vshrl.u32 %v3374_v14, 16  ;;  %v3549_v11 = vor.u32 %v3547_v20, %v3546_v4  ;;  %v3552_v63 = vshrl.u32 %v3376_v13, 16  ;;  %12054 = vmatprep.subr.bf16.mxu1 %v12923_v27  ;;  %v3562_v6 = vor.u32 %v3560_v36, %v3559_v62  ;;  %v1804_v17 = vld [vmem:[#allocation2 + $0xd4] sm:$0x1]  ;;  %v3380_v62 = vld [vmem:[#allocation2 + $0xe4] sm:$0x8] }
 0x4fc   : > { %12038 = vmatprep.mubr.bf16.mxu1 %v10447_v19  ;;  %v1905_v43 = vrot.slane %v1903_v54, 5  ;;  %v1910_v46 = vrot.slane %v1909_v22, 4  ;;  %v1918_v38 = vor.u32 %v14663_v56, %v14661_v50  ;;  %v1914_v60 = vrot.slane %v1912_v25, 5 }
 0x4fd   : > { %v10551_v49 = vrot.slane %v3539_v61, 11  ;;  %v10552_v41 = vrot.slane %v3552_v63, 11  ;;  %v1927_v9 = vor.u32 %v14667_v26, %v14665_v57  ;;  %v1936_v35 = vor.u32 %v14685_v44, %v14679_v48  ;;  %v12928_v48 = vld [vmem:[#allocation11 + $0x230] sm:$0xff]  }
 0x4fe   : > { %v1906_v28 = vsel %vm14302_vm6, %v1901_v24, %v1905_v43  ;;  %12055 = vmatpush3.bf16.msra.mxu1 %v12923_v27  ;;  %v1945_v15 = vor.u32 %v14691_v1, %v14689_v3  ;;  %v3608_v50 = vor.u32 %v14624_v31, %v14622_v18  ;;  %v1915_v56 = vsel %vm14302_vm6, %v1910_v46, %v1914_v60  ;;  %v3378_v27 = vld [vmem:[#allocation2 + $0xd8] sm:$0x8] }
 0x4ff   : > { %v3550_v57 = vsel %vm14307_vm7, %v10551_v49, %v3549_v11  ;;  %v3563_v26 = vsel %vm14307_vm7, %v10552_v41, %v3562_v6  ;;  %12056 = vmatprep.subr.bf16.mxu1 %v12926_v8  ;;  %v1919_v12 = vrot.slane %v1918_v38, 4  ;;  %v10448_v44 = vcombine.low %v1906_v28, %v1915_v56  ;;  %v12931_v43 = vld [vmem:[#allocation11 + $0x238] sm:$0xff]   ;;  %v14815_v28 = vld [vmem:[#allocation11 + $0x2c0] sm:$0xff]  }
 0x500   : > { %v10561_v20 = vcombine.low %v3550_v57, %v3563_v26  ;;  %v1921_v3 = vshll.u32 %v1801_v0, 16  ;;  %v1928_v1 = vrot.slane %v1927_v9, 4  ;;  %v1930_v29 = vshll.u32 %v1802_v23, 16  ;;  %v17090_v56 = vld [vmem:[#allocation37_spill] sm:$0xff]  ;;  %v17091_v57 = vld [vmem:[#allocation38_spill] sm:$0xff] }
 0x501   : > { %v3570_v36 = vshrl.u32 %v3379_v16, 16  ;;  %v3573_v37 = vshll.u32 %v3379_v16, 16  ;;  %v3583_v14 = vshrl.u32 %v3381_v42, 16  ;;  %12039 = vmatmul.mubr.bf16.gmra.mrb[8].mxu1 %v10448_v44  ;;  %v3586_v4 = vshll.u32 %v3381_v42, 16  ;;  %v17093_v44 = vld [vmem:[#allocation42_spill] sm:$0xff] }
 0x502   : > { %4135 = vmatmul.mubr.bf16.gmra.mrb[56].mxu0 %v10561_v20  ;;  %v1923_v2 = vrot.slane %v1921_v3, 5  ;;  %v10570_v13 = vcombine.low %v3379_v16, %v3381_v42  ;;  %v1937_v45 = vrot.slane %v1936_v35, 4  ;;  %12057 = vmatpush3.bf16.msra.mxu1 %v12926_v8  ;;  %v1932_v19 = vrot.slane %v1930_v29, 5  ;;  %v3590_v42 = vld [vmem:[#allocation2 + $0x20] sm:$0x1]  ;;  %v17094_v3 = vld [vmem:[#allocation43_spill] sm:$0xff] }
 0x503   : > { %v3572_v24 = vrot.slane %v3570_v36, 7  ;;  %v3585_v54 = vrot.slane %v3583_v14, 7  ;;  %v14803_v22 = vrot.slane %v3570_v36, 4  ;;  %v14807_v61 = vrot.slane %v3573_v37, 5  ;;  %12058 = vmatprep.subr.bf16.mxu1 %v12928_v48  ;;  %v3591_v29 = vld [vmem:[#allocation2 + $0x2c] sm:$0x1] }
 0x504   : > { %v1924_v25 = vsel %vm14302_vm6, %v1919_v12, %v1923_v2  ;;  %v14809_v11 = vrot.slane %v3583_v14, 4  ;;  %v14811_v63 = vrot.slane %v3586_v4, 5  ;;  %4142 = vmatprep.mubr.bf16.mxu0 %v10570_v13  ;;  %v1933_v8 = vsel %vm14302_vm6, %v1928_v1, %v1932_v19  ;;  %v17095_v1 = vld [vmem:[#allocation44_spill] sm:$0xff] }
 0x505   : > { %v1939_v46 = vshll.u32 %v1803_v47, 16  ;;  %v1946_v6 = vrot.slane %v1945_v15, 4  ;;  %v1948_v38 = vshll.u32 %v1804_v17, 16  ;;  %v10449_v60 = vcombine.low %v1924_v25, %v1933_v8  ;;  %v17092_v15 = vld [vmem:[#allocation41_spill] sm:$0xff]  ;;  %v4266_v14 = vld [vmem:[#allocation2 + $0x7c] sm:$0xf] }
 0x506   : > { %v3565_v49 = vshrl.u32 %v3378_v27, 16  ;;  %v3575_v41 = vor.u32 %v3573_v37, %v3572_v24  ;;  %v3578_v9 = vshrl.u32 %v3380_v62, 16  ;;  %v3588_v35 = vor.u32 %v3586_v4, %v3585_v54  ;;  %12059 = vmatpush3.bf16.msra.mxu1 %v12928_v48  ;;  %v4268_v62 = vld [vmem:[#allocation2 + $0x88] sm:$0xf]  ;;  %v3593_v8 = vld [vmem:[#allocation2 + $0x44] sm:$0x1] }
 0x507   : > { %v1941_v0 = vrot.slane %v1939_v46, 5  ;;  %v1950_v23 = vrot.slane %v1948_v38, 5  ;;  %v3617_v26 = vor.u32 %v17091_v57, %v17090_v56  ;;  %12042 = vmatprep.mubr.bf16.mxu1 %v10449_v60  ;;  %12060 = vmatprep.subr.bf16.mxu1 %v12931_v43  ;;  %v3644_v20 = vor.u32 %v17093_v44, %v17092_v15 }
 0x508   : > { %v10553_v12 = vrot.slane %v3565_v49, 11  ;;  %v10554_v16 = vrot.slane %v3578_v9, 11  ;;  %v3653_v47 = vor.u32 %v17095_v1, %v17094_v3  ;;  %v3609_v36 = vrot.slane %v3608_v50, 4 }
 0x509   : > { %v1942_v17 = vsel %vm14302_vm6, %v1937_v45, %v1941_v0  ;;  %v1951_v48 = vsel %vm14302_vm6, %v1946_v6, %v1950_v23  ;;  %v3611_v37 = vshll.u32 %v3590_v42, 16  ;;  %v3618_v13 = vrot.slane %v3617_v26, 4  ;;  %v3592_v45 = vld [vmem:[#allocation2 + $0x38] sm:$0x1]  ;;  %v4265_v6 = vld [vmem:[#allocation2 + $0x78] sm:$0x8] }
 0x50a   : > { %v10450_v27 = vcombine.low %v1942_v17, %v1951_v48  ;;  %v3576_v2 = vsel %vm14307_vm7, %v10553_v12, %v3575_v41  ;;  %v3589_v4 = vsel %vm14307_vm7, %v10554_v16, %v3588_v35  ;;  %12061 = vmatpush3.bf16.msra.mxu1 %v12931_v43  ;;  %v3620_v54 = vshll.u32 %v3591_v29, 16  ;;  %v4267_v43 = vld [vmem:[#allocation2 + $0x84] sm:$0x8] }
 0x50b   : > { %v10562_v19 = vcombine.low %v3576_v2, %v3589_v4  ;;  %v3613_v24 = vrot.slane %v3611_v37, 5  ;;  %v4303_v25 = vshrl.u32 %v4266_v14, 16  ;;  %v4306_v18 = vshll.u32 %v4266_v14, 16  ;;  %12078 = vmatprep.subr.bf16.mxu1 %v14815_v28  ;;  %v17096_v29 = vld [vmem:[#allocation45_spill] sm:$0xff]  ;;  %v17097_v37 = vld [vmem:[#allocation46_spill] sm:$0xff] }
 0x50c   : > { %12043 = vmatmul.mubr.bf16.gmra.mrb[12].mxu1 %v10450_v27  ;;  %v4316_v31 = vshrl.u32 %v4268_v62, 16  ;;  %v4319_v50 = vshll.u32 %v4268_v62, 16  ;;  %v10627_v46 = vcombine.low %v4266_v14, %v4268_v62  ;;  %v3622_v60 = vrot.slane %v3620_v54, 5  ;;  %v12935_v4 = vld [vmem:[#allocation11 + $0x300] sm:$0xff]   ;;  %v17099_v54 = vld [vmem:[#allocation40_spill] sm:$0xff] }
 0x50d   : > { %4143 = vmatmul.mubr.bf16.gmra.mrb[60].mxu0 %v10562_v19  ;;  %v3614_v38 = vsel %vm14302_vm6, %v3609_v36, %v3613_v24  ;;  %v4305_v49 = vrot.slane %v4303_v25, 7  ;;  %v14837_v41 = vrot.slane %v4303_v25, 4  ;;  %v14839_v0 = vrot.slane %v4306_v18, 5  ;;  %v17098_v19 = vld [vmem:[#allocation39_spill] sm:$0xff] }
 0x50e   : > { %v4318_v9 = vrot.slane %v4316_v31, 7  ;;  %v14841_v23 = vrot.slane %v4316_v31, 4  ;;  %v14843_v35 = vrot.slane %v4319_v50, 5  ;;  %5001 = vmatprep.mubr.bf16.mxu0 %v10627_v46  ;;  %v3623_v56 = vsel %vm14302_vm6, %v3618_v13, %v3622_v60  ;;  %v3594_v13 = vld [vmem:[#allocation2 + $0x50] sm:$0x1] }
 0x50f   : > { %v4308_v57 = vor.u32 %v4306_v18, %v4305_v49  ;;  %v3629_v26 = vshll.u32 %v3592_v45, 16  ;;  %v3638_v12 = vshll.u32 %v3593_v8, 16  ;;  %v10571_v16 = vcombine.low %v3614_v38, %v3623_v56  ;;  %v4270_v18 = vld [vmem:[#allocation2 + $0x94] sm:$0xf]  ;;  %v4272_v60 = vld [vmem:[#allocation2 + $0xa0] sm:$0xf] }
 0x510   : > { %v4321_v42 = vor.u32 %v4319_v50, %v4318_v9  ;;  %v4298_v15 = vshrl.u32 %v4265_v6, 16  ;;  %v4311_v44 = vshrl.u32 %v4267_v43, 16  ;;  %v3662_v36 = vor.u32 %v17096_v29, %v14693_v40  ;;  %v12936_v6 = vld [vmem:[#allocation11 + $0x2c8] sm:$0xff]   ;;  %v12938_v29 = vld [vmem:[#allocation11 + $0x2d0] sm:$0xff]  }
 0x511   : > { %v3631_v17 = vrot.slane %v3629_v26, 5  ;;  %v3640_v48 = vrot.slane %v3638_v12, 5  ;;  %v3671_v14 = vor.u32 %v17097_v37, %v14697_v59  ;;  %12062 = vmatprep.mubr.bf16.mxu1 %v10571_v16  ;;  %v3680_v62 = vor.u32 %v14720_v34, %v14718_v32  ;;  %v3595_v59 = vld [vmem:[#allocation2 + $0x5c] sm:$0x1]  ;;  %v3596_v49 = vld [vmem:[#allocation2 + $0x68] sm:$0x1] }
 0x512   : > { %v10603_v27 = vrot.slane %v4298_v15, 11  ;;  %v10604_v2 = vrot.slane %v4311_v44, 11  ;;  %v3689_v45 = vor.u32 %v14724_v5, %v14722_v53  ;;  %v3645_v25 = vrot.slane %v3644_v20, 4  ;;  %v3597_v26 = vld [vmem:[#allocation2 + $0x74] sm:$0x1]  ;;  %v12939_v12 = vld [vmem:[#allocation11 + $0x348] sm:$0xff]  }
 0x513   : > { %v3632_v24 = vsel %vm14302_vm6, %v17098_v19, %v3631_v17  ;;  %v3641_v40 = vsel %vm14302_vm6, %v17099_v54, %v3640_v48  ;;  %v3647_v8 = vshll.u32 %v3594_v13, 16  ;;  %v3654_v38 = vrot.slane %v3653_v47, 4  ;;  %v4269_v17 = vld [vmem:[#allocation2 + $0x90] sm:$0x8]  ;;  %v4271_v48 = vld [vmem:[#allocation2 + $0x9c] sm:$0x8] }
 0x514   : > { %v10572_v31 = vcombine.low %v3632_v24, %v3641_v40  ;;  %v4309_v50 = vsel %vm14307_vm7, %v10603_v27, %v4308_v57  ;;  %v4322_v46 = vsel %vm14307_vm7, %v10604_v2, %v4321_v42  ;;  %v3656_v56 = vshll.u32 %v3595_v59, 16  ;;  %v12940_v40 = vld [vmem:[#allocation11 + $0x308] sm:$0xff]   ;;  %v4276_v32 = vld [vmem:[#allocation2 + $0xb8] sm:$0xf]  ;;  %v12943_v34 = vld [vmem:[#allocation11 + $0x2e0] sm:$0xff]  }
 0x515   : > { %v10619_v43 = vcombine.low %v4309_v50, %v4322_v46  ;;  %v3649_v9 = vrot.slane %v3647_v8, 5  ;;  %v4329_v20 = vshrl.u32 %v4270_v18, 16  ;;  %v4332_v16 = vshll.u32 %v4270_v18, 16 }
 0x516   : > { %12063 = vmatmul.mubr.bf16.vlgmr.msra.gmra.mrb[0].mxu1 %v10572_v31  ;;  %v4342_v15 = vshrl.u32 %v4272_v60, 16  ;;  %v4345_v57 = vshll.u32 %v4272_v60, 16  ;;  %v10628_v44 = vcombine.low %v4270_v18, %v4272_v60  ;;  %v3658_v1 = vrot.slane %v3656_v56, 5  ;;  %v12941_v31 = vld [vmem:[#allocation11 + $0x2d8] sm:$0xff]  }
 0x517   : > { %5002 = vmatmul.mubr.bf16.vlgmr.msra.gmra.mrb[64].mxu0 %v10619_v43  ;;  %12079 = vmatpush3.bf16.msra.mxu1 %v14815_v28  ;;  %v3650_v3 = vsel %vm14302_vm6, %v3645_v25, %v3649_v9  ;;  %v4331_v47 = vrot.slane %v4329_v20, 7  ;;  %v4539_v42 = vrot.slane %v4329_v20, 4  ;;  %v4540_v27 = vrot.slane %v4332_v16, 5  ;;  %v12945_v9 = vld [vmem:[#allocation11 + $0x310] sm:$0xff]   ;;  %v12949_v56 = vld [vmem:[#allocation11 + $0x358] sm:$0xff]  }
 0x518   : > { %11487 = vmatpush3.bf16.msra.mxu0 %v12935_v4  ;;  %12080 = vmatprep.subr.bf16.mxu1 %v12936_v6  ;;  %v4344_v37 = vrot.slane %v4342_v15, 7  ;;  %v4548_v2 = vrot.slane %v4342_v15, 4  ;;  %v4549_v13 = vrot.slane %v4345_v57, 5  ;;  %v3659_v19 = vsel %vm14302_vm6, %v3654_v38, %v3658_v1  ;;  %v12944_v4 = vld [vmem:[#allocation11 + $0x350] sm:$0xff]   ;;  %v3598_v15 = vld [vmem:[#allocation2 + $0x98] sm:$0x1] }
 0x519   : > { %5009 = vmatprep.mubr.bf16.mxu0 %v10628_v44  ;;  %v3663_v24 = vrot.slane %v3662_v36, 4  ;;  %v3665_v28 = vshll.u32 %v3596_v49, 16  ;;  %v3672_v54 = vrot.slane %v3671_v14, 4  ;;  %11488 = vmatprep.subr.bf16.mxu0 %v12939_v12  ;;  %v10573_v59 = vcombine.low %v3650_v3, %v3659_v19  ;;  %v3599_v44 = vld [vmem:[#allocation2 + $0xa4] sm:$0x1] }
 0x51a   : > { %v4541_v25 = vor.u32 %v4540_v27, %v4539_v42  ;;  %v4550_v8 = vor.u32 %v4549_v13, %v4548_v2  ;;  %v3674_v18 = vshll.u32 %v3597_v26, 16  ;;  %v4324_v46 = vshrl.u32 %v4269_v17, 16  ;;  %v4274_v42 = vld [vmem:[#allocation2 + $0xac] sm:$0xf]  ;;  %v3601_v13 = vld [vmem:[#allocation2 + $0xbc] sm:$0x1] }
 0x51b   : > { %12081 = vmatpush3.bf16.msra.mxu1 %v12936_v6  ;;  %v3667_v50 = vrot.slane %v3665_v28, 5  ;;  %v4334_v60 = vor.u32 %v4332_v16, %v4331_v47  ;;  %v4337_v43 = vshrl.u32 %v4271_v48, 16  ;;  %12066 = vmatprep.mubr.bf16.mxu1 %v10573_v59  ;;  %v4347_v49 = vor.u32 %v4345_v57, %v4344_v37  ;;  %v3600_v48 = vld [vmem:[#allocation2 + $0xb0] sm:$0x1]  ;;  %v12953_v19 = vld [vmem:[#allocation11 + $0x360] sm:$0xff]   ;;  %v12946_v59 = vld [vmem:[#allocation11 + $0x2e8] sm:$0xff]  }
 0x51c   : > { %v14873_v38 = vrot.slane %v4541_v25, 4  ;;  %v14875_v36 = vrot.slane %v4550_v8, 4  ;;  %v3676_v14 = vrot.slane %v3674_v18, 5  ;;  %12082 = vmatprep.subr.bf16.mxu1 %v12938_v29  ;;  %v10605_v26 = vrot.slane %v4324_v46, 11  ;;  %11489 = vmatpush3.bf16.msra.mxu0 %v12940_v40  ;;  %v4273_v40 = vld [vmem:[#allocation2 + $0xa8] sm:$0x8] }
 0x51d   : > { %v3668_v20 = vsel %vm14302_vm6, %v3663_v24, %v3667_v50  ;;  %v10606_v12 = vrot.slane %v4337_v43, 11  ;;  %v3698_v6 = vor.u32 %v14749_v51, %v14744_v55  ;;  %v3681_v57 = vrot.slane %v3680_v62, 4  ;;  %11490 = vmatprep.subr.bf16.mxu0 %v12944_v4  ;;  %v4275_v50 = vld [vmem:[#allocation2 + $0xb4] sm:$0x8]  ;;  %v12955_v46 = vld [vmem:[#allocation11 + $0x320] sm:$0xff]  }
 0x51e   : > { %v3677_v16 = vsel %vm14302_vm6, %v3672_v54, %v3676_v14  ;;  %v3690_v17 = vrot.slane %v3689_v45, 4  ;;  %v3707_v3 = vor.u32 %v14753_v7, %v14751_v39  ;;  %v4335_v55 = vsel %vm14307_vm7, %v10605_v26, %v4334_v60  ;;  %v12950_v39 = vld [vmem:[#allocation11 + $0x318] sm:$0xff]  }
 0x51f   : > { %v10574_v1 = vcombine.low %v3668_v20, %v3677_v16  ;;  %v4348_v51 = vsel %vm14307_vm7, %v10606_v12, %v4347_v49  ;;  %12083 = vmatpush3.bf16.msra.mxu1 %v12938_v29  ;;  %v3683_v47 = vshll.u32 %v3598_v15, 16  ;;  %v3692_v53 = vshll.u32 %v3599_v44, 16  ;;  %v12958_v49 = vld [vmem:[#allocation11 + $0x368] sm:$0xff]  }
 0x520   : > { %v10620_v62 = vcombine.low %v4335_v55, %v4348_v51  ;;  %12084 = vmatprep.subr.bf16.mxu1 %v12941_v31  ;;  %v4355_v5 = vshrl.u32 %v4274_v42, 16  ;;  %v4358_v45 = vshll.u32 %v4274_v42, 16  ;;  %v4368_v37 = vshrl.u32 %v4276_v32, 16  ;;  %11491 = vmatpush3.bf16.msra.mxu0 %v12945_v9 }
 0x521   : > { %12067 = vmatmul.mubr.bf16.gmra.mrb[4].mxu1 %v10574_v1  ;;  %v3685_v7 = vrot.slane %v3683_v47, 5  ;;  %v4371_v27 = vshll.u32 %v4276_v32, 16  ;;  %v10629_v2 = vcombine.low %v4274_v42, %v4276_v32  ;;  %v3694_v29 = vrot.slane %v3692_v53, 5  ;;  %11492 = vmatprep.subr.bf16.mxu0 %v12949_v56  ;;  %v3602_v47 = vld [vmem:[#allocation2 + $0xc8] sm:$0x1] }
 0x522   : > { %5010 = vmatmul.mubr.bf16.gmra.mrb[68].mxu0 %v10620_v62  ;;  %v4357_v24 = vrot.slane %v4355_v5, 7  ;;  %v14895_v28 = vrot.slane %v4355_v5, 4  ;;  %v14897_v54 = vrot.slane %v4358_v45, 5  ;;  %v4370_v8 = vrot.slane %v4368_v37, 7 }
 0x523   : > { %12085 = vmatpush3.bf16.msra.mxu1 %v12941_v31  ;;  %v3686_v25 = vsel %vm14302_vm6, %v3681_v57, %v3685_v7  ;;  %v14901_v18 = vrot.slane %v4368_v37, 4  ;;  %v14903_v4 = vrot.slane %v4371_v27, 5  ;;  %5017 = vmatprep.mubr.bf16.mxu0 %v10629_v2  ;;  %v3695_v60 = vsel %vm14302_vm6, %v3690_v17, %v3694_v29  ;;  %v12948_v57 = vld [vmem:[#allocation11 + $0x2f0] sm:$0xff]   ;;  %v3605_v2 = vld [vmem:[#allocation2 + $0xec] sm:$0x1] }
 0x524   : > { %v3699_v43 = vrot.slane %v3698_v6, 4  ;;  %v3701_v9 = vshll.u32 %v3600_v48, 16  ;;  %v3708_v14 = vrot.slane %v3707_v3, 4  ;;  %12086 = vmatprep.subr.bf16.mxu1 %v12943_v34  ;;  %v10575_v31 = vcombine.low %v3686_v25, %v3695_v60  ;;  %11493 = vmatpush3.bf16.msra.mxu0 %v12950_v39  ;;  %v4277_v25 = vld [vmem:[#allocation2 + $0xc0] sm:$0x8] }
 0x525   : > { %v3710_v56 = vshll.u32 %v3601_v13, 16  ;;  %v4350_v20 = vshrl.u32 %v4273_v40, 16  ;;  %v4360_v26 = vor.u32 %v4358_v45, %v4357_v24  ;;  %v4363_v16 = vshrl.u32 %v4275_v50, 16  ;;  %11494 = vmatprep.subr.bf16.mxu0 %v12953_v19  ;;  %v4280_v45 = vld [vmem:[#allocation2 + $0xd0] sm:$0xf] }
 0x526   : > { %v3703_v12 = vrot.slane %v3701_v9, 5  ;;  %v4373_v15 = vor.u32 %v4371_v27, %v4370_v8  ;;  %v3716_v44 = vor.u32 %v14775_v30, %v14773_v58  ;;  %12070 = vmatprep.mubr.bf16.mxu1 %v10575_v31  ;;  %v3725_v3 = vor.u32 %v14781_v21, %v14779_v10  ;;  %v12960_v30 = vld [vmem:[#allocation11 + $0x328] sm:$0xff]   ;;  %v3603_v21 = vld [vmem:[#allocation2 + $0xd4] sm:$0x1] }
 0x527   : > { %v3712_v17 = vrot.slane %v3710_v56, 5  ;;  %v10607_v6 = vrot.slane %v4350_v20, 11  ;;  %12087 = vmatpush3.bf16.msra.mxu1 %v12943_v34  ;;  %v3734_v1 = vor.u32 %v14807_v61, %v14803_v22  ;;  %v10608_v51 = vrot.slane %v4363_v16, 11  ;;  %v4278_v61 = vld [vmem:[#allocation2 + $0xc4] sm:$0xf]  ;;  %v12963_v13 = vld [vmem:[#allocation11 + $0x370] sm:$0xff]  }
 0x528   : > { %v3704_v55 = vsel %vm14302_vm6, %v3699_v43, %v3703_v12  ;;  %12088 = vmatprep.subr.bf16.mxu1 %v12946_v59  ;;  %v3717_v42 = vrot.slane %v3716_v44, 4  ;;  %v3743_v58 = vor.u32 %v14811_v63, %v14809_v11  ;;  %v3719_v34 = vshll.u32 %v3602_v47, 16  ;;  %11495 = vmatpush3.bf16.msra.mxu0 %v12955_v46  ;;  %v3604_v11 = vld [vmem:[#allocation2 + $0xe0] sm:$0x1]  ;;  %v12951_v63 = vld [vmem:[#allocation11 + $0x2f8] sm:$0xff]   ;;  %v12965_v43 = vld [vmem:[#allocation11 + $0x330] sm:$0xff]  }
 0x529   : > { %v3713_v32 = vsel %vm14302_vm6, %v3708_v14, %v3712_v17  ;;  %v4361_v10 = vsel %vm14307_vm7, %v10607_v6, %v4360_v26  ;;  %v3726_v22 = vrot.slane %v3725_v3, 4  ;;  %v4374_v53 = vsel %vm14307_vm7, %v10608_v51, %v4373_v15  ;;  %11496 = vmatprep.subr.bf16.mxu0 %v12958_v49  ;;  %v4279_v60 = vld [vmem:[#allocation2 + $0xcc] sm:$0x8]  ;;  %v14935_v56 = vld [vmem:[#allocation11 + $0x380] sm:$0xff]   ;;  %v12968_v15 = vld [vmem:[#allocation11 + $0x378] sm:$0xff]  }
 0x52a   : > { %v10576_v62 = vcombine.low %v3704_v55, %v3713_v32  ;;  %v3728_v5 = vshll.u32 %v3603_v21, 16  ;;  %v4381_v48 = vshrl.u32 %v4278_v61, 16  ;;  %v10621_v39 = vcombine.low %v4361_v10, %v4374_v53  ;;  %v12970_v55 = vld [vmem:[#allocation11 + $0x338] sm:$0xff]   ;;  %v4282_v32 = vld [vmem:[#allocation2 + $0xf4] sm:$0xf] }
 0x52b   : > { %12089 = vmatpush3.bf16.msra.mxu1 %v12946_v59  ;;  %v3721_v7 = vrot.slane %v3719_v34, 5  ;;  %v4384_v37 = vshll.u32 %v4278_v61, 16  ;;  %v4394_v27 = vshrl.u32 %v4280_v45, 16  ;;  %v4397_v24 = vshll.u32 %v4280_v45, 16  ;;  %v4506_v53 = vld [vmem:[#allocation2 + $0x8c] sm:$0x1] }
 0x52c   : > { %12071 = vmatmul.mubr.bf16.gmra.mrb[8].mxu1 %v10576_v62  ;;  %v3730_v19 = vrot.slane %v3728_v5, 5  ;;  %v4383_v29 = vrot.slane %v4381_v48, 7  ;;  %v14923_v40 = vrot.slane %v4381_v48, 4  ;;  %12090 = vmatprep.subr.bf16.mxu1 %v12948_v57  ;;  %v10630_v49 = vcombine.low %v4278_v61, %v4280_v45  ;;  %v4281_v5 = vld [vmem:[#allocation2 + $0xf0] sm:$0x8] }
 0x52d   : > { %5018 = vmatmul.mubr.bf16.gmra.mrb[72].mxu0 %v10621_v39  ;;  %v3722_v8 = vsel %vm14302_vm6, %v3717_v42, %v3721_v7  ;;  %v4396_v50 = vrot.slane %v4394_v27, 7  ;;  %v14927_v46 = vrot.slane %v4384_v37, 5  ;;  %v14929_v59 = vrot.slane %v4394_v27, 4  ;;  %v4283_v39 = vld [vmem:[#allocation2 + $0xfc] sm:$0x8] }
 0x52e   : > { %v3731_v9 = vsel %vm14302_vm6, %v3726_v22, %v3730_v19  ;;  %v14933_v14 = vrot.slane %v4397_v24, 5  ;;  %v3735_v31 = vrot.slane %v3734_v1, 4  ;;  %11497 = vmatpush3.bf16.msra.mxu0 %v12960_v30  ;;  %v3737_v26 = vshll.u32 %v3604_v11, 16  ;;  %5025 = vmatprep.mubr.bf16.mxu0 %v10630_v49  ;;  %v4505_v22 = vld [vmem:[#allocation2 + $0x80] sm:$0x1] }
 0x52f   : > { %v10577_v20 = vcombine.low %v3722_v8, %v3731_v9  ;;  %v3744_v12 = vrot.slane %v3743_v58, 4  ;;  %v3746_v16 = vshll.u32 %v3605_v2, 16  ;;  %12091 = vmatpush3.bf16.msra.mxu1 %v12948_v57  ;;  %11498 = vmatprep.subr.bf16.mxu0 %v12963_v13  ;;  %v4376_v44 = vshrl.u32 %v4277_v25, 16  ;;  %v12974_v58 = vld [vmem:[#allocation11 + $0x4c0] sm:$0xff]   ;;  %v4507_v13 = vld [vmem:[#allocation2 + $0x98] sm:$0x1] }
 0x530   : > { %v4386_v17 = vor.u32 %v4384_v37, %v4383_v29  ;;  %v4389_v6 = vshrl.u32 %v4279_v60, 16  ;;  %v4399_v3 = vor.u32 %v4397_v24, %v4396_v50  ;;  %12092 = vmatprep.subr.bf16.mxu1 %v12951_v63  ;;  %v3739_v51 = vrot.slane %v3737_v26, 5  ;;  %v4508_v8 = vld [vmem:[#allocation2 + $0xa4] sm:$0x1] }
 0x531   : > { %12074 = vmatprep.mubr.bf16.mxu1 %v10577_v20  ;;  %v3748_v1 = vrot.slane %v3746_v16, 5  ;;  %v4523_v47 = vor.u32 %v14839_v0, %v14837_v41  ;;  %v4532_v42 = vor.u32 %v14843_v35, %v14841_v23  ;;  %v10609_v57 = vrot.slane %v4376_v44, 11  ;;  %v4284_v0 = vld [vmem:[#allocation2 + $0x100] sm:$0xf] }
 0x532   : > { %v10610_v30 = vrot.slane %v4389_v6, 11  ;;  %v4559_v10 = vor.u32 %v14897_v54, %v14895_v28  ;;  %v4568_v21 = vor.u32 %v14903_v4, %v14901_v18  ;;  %11499 = vmatpush3.bf16.msra.mxu0 %v12965_v43  ;;  %v3740_v34 = vsel %vm14302_vm6, %v3735_v31, %v3739_v51  ;;  %v4511_v4 = vld [vmem:[#allocation2 + $0xc8] sm:$0x1] }
 0x533   : > { %v3749_v41 = vsel %vm14302_vm6, %v3744_v12, %v3748_v1  ;;  %12093 = vmatpush3.bf16.msra.mxu1 %v12951_v63  ;;  %v4407_v23 = vshrl.u32 %v4282_v32, 16  ;;  %v4410_v35 = vshll.u32 %v4282_v32, 16  ;;  %11500 = vmatprep.subr.bf16.mxu0 %v12968_v15  ;;  %v4387_v28 = vsel %vm14307_vm7, %v10609_v57, %v4386_v17 }
 0x534   : > { %v10578_v61 = vcombine.low %v3740_v34, %v3749_v41  ;;  %v4400_v54 = vsel %vm14307_vm7, %v10610_v30, %v4399_v3  ;;  %v4420_v62 = vshrl.u32 %v4284_v0, 16  ;;  %12110 = vmatprep.subr.bf16.mxu1 %v14935_v56  ;;  %v4423_v11 = vshll.u32 %v4284_v0, 16  ;;  %v12956_v41 = vld [vmem:[#allocation11 + $0x388] sm:$0xff]  }
 0x535   : > { %v10622_v45 = vcombine.low %v4387_v28, %v4400_v54  ;;  %v4409_v48 = vrot.slane %v4407_v23, 7  ;;  %v14954_v63 = vrot.slane %v4407_v23, 4  ;;  %v14956_v37 = vrot.slane %v4410_v35, 5  ;;  %v4285_v28 = vld [vmem:[#allocation2 + $0x108] sm:$0x8] }
 0x536   : > { %12075 = vmatmul.mubr.bf16.gmra.mrb[12].mxu1 %v10578_v61  ;;  %v4422_v7 = vrot.slane %v4420_v62, 7  ;;  %v14958_v27 = vrot.slane %v4420_v62, 4  ;;  %v10631_v2 = vcombine.low %v4282_v32, %v4284_v0  ;;  %11501 = vmatpush3.bf16.msra.mxu0 %v12970_v55  ;;  %v14960_v19 = vrot.slane %v4423_v11, 5  ;;  %v4288_v32 = vld [vmem:[#allocation2 + $0x118] sm:$0xf] }
 0x537   : > { %5026 = vmatmul.mubr.bf16.gmra.mrb[76].mxu0 %v10622_v45  ;;  %v4524_v29 = vrot.slane %v4523_v47, 4  ;;  %v4526_v24 = vshll.u32 %v4505_v22, 16  ;;  %v4533_v25 = vrot.slane %v4532_v42, 4  ;;  %11646 = vmatprep.subr.bf16.mxu0 %v12974_v58  ;;  %v4535_v50 = vshll.u32 %v4506_v53, 16  ;;  %v4510_v22 = vld [vmem:[#allocation2 + $0xbc] sm:$0x1] }
 0x538   : > { %5033 = vmatprep.mubr.bf16.mxu0 %v10631_v2  ;;  %v4402_v60 = vshrl.u32 %v4281_v5, 16  ;;  %v4412_v43 = vor.u32 %v4410_v35, %v4409_v48  ;;  %v4415_v9 = vshrl.u32 %v4283_v39, 16  ;;  %v4425_v31 = vor.u32 %v4423_v11, %v4422_v7  ;;  %v4287_v5 = vld [vmem:[#allocation2 + $0x114] sm:$0x8] }
 0x539   : > { %v4528_v49 = vrot.slane %v4526_v24, 5  ;;  %v4544_v20 = vshll.u32 %v4507_v13, 16  ;;  %v4553_v26 = vshll.u32 %v4508_v8, 16  ;;  %v4537_v12 = vrot.slane %v4535_v50, 5  ;;  %v12959_v45 = vld [vmem:[#allocation11 + $0x390] sm:$0xff]  }
 0x53a   : > { %v10611_v16 = vrot.slane %v4402_v60, 11  ;;  %v10612_v15 = vrot.slane %v4415_v9, 11  ;;  %v14962_v44 = vrot.slane %v4559_v10, 4  ;;  %v4577_v55 = vor.u32 %v14927_v46, %v14923_v40  ;;  %v4286_v46 = vld [vmem:[#allocation2 + $0x10c] sm:$0xf] }
 0x53b   : > { %v4529_v17 = vsel %vm14302_vm6, %v4524_v29, %v4528_v49  ;;  %v4546_v6 = vrot.slane %v4544_v20, 5  ;;  %v4555_v3 = vrot.slane %v4553_v26, 5  ;;  %v4538_v51 = vsel %vm14302_vm6, %v4533_v25, %v4537_v12  ;;  %v4509_v10 = vld [vmem:[#allocation2 + $0xb0] sm:$0x1]  ;;  %v4512_v29 = vld [vmem:[#allocation2 + $0xd4] sm:$0x1] }
 0x53c   : > { %v4413_v1 = vsel %vm14307_vm7, %v10611_v16, %v4412_v43  ;;  %v4426_v47 = vsel %vm14307_vm7, %v10612_v15, %v4425_v31  ;;  %v4586_v42 = vor.u32 %v14933_v14, %v14929_v59  ;;  %v10635_v58 = vcombine.low %v4529_v17, %v4538_v51  ;;  %v12961_v17 = vld [vmem:[#allocation11 + $0x398] sm:$0xff]   ;;  %v4292_v51 = vld [vmem:[#allocation2 + $0x130] sm:$0xf] }
 0x53d   : > { %v10623_v57 = vcombine.low %v4413_v1, %v4426_v47  ;;  %v4547_v30 = vsel %vm14302_vm6, %v14873_v38, %v4546_v6  ;;  %v4556_v40 = vsel %vm14302_vm6, %v14875_v36, %v4555_v3  ;;  %v4433_v0 = vshrl.u32 %v4286_v46, 16 }
 0x53e   : > { %v10636_v34 = vcombine.low %v4547_v30, %v4556_v40  ;;  %v4436_v23 = vshll.u32 %v4286_v46, 16  ;;  %v4446_v35 = vshrl.u32 %v4288_v32, 16  ;;  %12094 = vmatprep.mubr.bf16.mxu1 %v10635_v58  ;;  %v4449_v59 = vshll.u32 %v4288_v32, 16  ;;  %v12964_v58 = vld [vmem:[#allocation11 + $0x3a0] sm:$0xff]  }
 0x53f   : > { %5034 = vmatmul.mubr.bf16.gmra.mrb[80].mxu0 %v10623_v57  ;;  %v10632_v14 = vcombine.low %v4286_v46, %v4288_v32  ;;  %v4562_v61 = vshll.u32 %v4509_v10, 16  ;;  %v4569_v38 = vrot.slane %v4568_v21, 4  ;;  %v4435_v36 = vrot.slane %v4433_v0, 7  ;;  %v4514_v46 = vld [vmem:[#allocation2 + $0x104] sm:$0x1] }
 0x540   : > { %12095 = vmatmul.mubr.bf16.vlgmr.msra.gmra.mrb[0].mxu1 %v10636_v34  ;;  %v4448_v54 = vrot.slane %v4446_v35, 7  ;;  %v14985_v62 = vrot.slane %v4433_v0, 4  ;;  %v14987_v53 = vrot.slane %v4436_v23, 5  ;;  %v14990_v48 = vrot.slane %v4446_v35, 4  ;;  %v4289_v10 = vld [vmem:[#allocation2 + $0x120] sm:$0x8] }
 0x541   : > { %12111 = vmatpush3.bf16.msra.mxu1 %v14935_v56  ;;  %v14992_v11 = vrot.slane %v4449_v59, 5  ;;  %5041 = vmatprep.mubr.bf16.mxu0 %v10632_v14  ;;  %v4564_v39 = vrot.slane %v4562_v61, 5  ;;  %v4571_v18 = vshll.u32 %v4510_v22, 16  ;;  %v4428_v21 = vshrl.u32 %v4285_v28, 16  ;;  %v4291_v35 = vld [vmem:[#allocation2 + $0x12c] sm:$0x8] }
 0x542   : > { %12112 = vmatprep.subr.bf16.mxu1 %v12956_v41  ;;  %v4438_v7 = vor.u32 %v4436_v23, %v4435_v36  ;;  %v4441_v2 = vshrl.u32 %v4287_v5, 16  ;;  %v4451_v13 = vor.u32 %v4449_v59, %v4448_v54  ;;  %v4578_v56 = vrot.slane %v4577_v55, 4  ;;  %v4290_v55 = vld [vmem:[#allocation2 + $0x124] sm:$0xf] }
 0x543   : > { %v4565_v24 = vsel %vm14302_vm6, %v14962_v44, %v4564_v39  ;;  %v4573_v25 = vrot.slane %v4571_v18, 5  ;;  %v4580_v8 = vshll.u32 %v4511_v4, 16  ;;  %v10613_v50 = vrot.slane %v4428_v21, 11  ;;  %v12966_v39 = vld [vmem:[#allocation11 + $0x3a8] sm:$0xff]  }
 0x544   : > { %v10614_v60 = vrot.slane %v4441_v2, 11  ;;  %v4587_v43 = vrot.slane %v4586_v42, 4  ;;  %v4589_v9 = vshll.u32 %v4512_v29, 16  ;;  %v4595_v20 = vor.u32 %v14956_v37, %v14954_v63  ;;  %v4513_v42 = vld [vmem:[#allocation2 + $0xf8] sm:$0x1] }
 0x545   : > { %12113 = vmatpush3.bf16.msra.mxu1 %v12956_v41  ;;  %v4574_v49 = vsel %vm14302_vm6, %v4569_v38, %v4573_v25  ;;  %v4582_v31 = vrot.slane %v4580_v8, 5  ;;  %v4604_v26 = vor.u32 %v14960_v19, %v14958_v27  ;;  %v4439_v16 = vsel %vm14307_vm7, %v10613_v50, %v4438_v7  ;;  %v4515_v38 = vld [vmem:[#allocation2 + $0x110] sm:$0x1] }
 0x546   : > { %v10637_v12 = vcombine.low %v4565_v24, %v4574_v49  ;;  %v4452_v15 = vsel %vm14307_vm7, %v10614_v60, %v4451_v13  ;;  %v4591_v44 = vrot.slane %v4589_v9, 5  ;;  %12114 = vmatprep.subr.bf16.mxu1 %v12959_v45  ;;  %v4613_v63 = vor.u32 %v14987_v53, %v14985_v62  ;;  %v4516_v53 = vld [vmem:[#allocation2 + $0x11c] sm:$0x1] }
 0x547   : > { %v10624_v6 = vcombine.low %v4439_v16, %v4452_v15  ;;  %v4583_v3 = vsel %vm14302_vm6, %v4578_v56, %v4582_v31  ;;  %v4622_v37 = vor.u32 %v14992_v11, %v14990_v48  ;;  %v4459_v19 = vshrl.u32 %v4290_v55, 16  ;;  %v4294_v49 = vld [vmem:[#allocation2 + $0x13c] sm:$0xf]  ;;  %v12969_v31 = vld [vmem:[#allocation11 + $0x3b0] sm:$0xff]   ;;  %v4517_v16 = vld [vmem:[#allocation2 + $0x128] sm:$0x1] }
 0x548   : > { %12098 = vmatprep.mubr.bf16.mxu1 %v10637_v12  ;;  %v4592_v27 = vsel %vm14302_vm6, %v4587_v43, %v4591_v44  ;;  %v4462_v1 = vshll.u32 %v4290_v55, 16  ;;  %v4472_v47 = vshrl.u32 %v4292_v51, 16  ;;  %v4475_v30 = vshll.u32 %v4292_v51, 16 }
 0x549   : > { %5042 = vmatmul.mubr.bf16.gmra.mrb[84].mxu0 %v10624_v6  ;;  %v10638_v57 = vcombine.low %v4583_v3, %v4592_v27  ;;  %12115 = vmatpush3.bf16.msra.mxu1 %v12959_v45  ;;  %v10633_v40 = vcombine.low %v4290_v55, %v4292_v51  ;;  %v4596_v32 = vrot.slane %v4595_v20, 4  ;;  %v4461_v34 = vrot.slane %v4459_v19, 7  ;;  %v4296_v20 = vld [vmem:[#allocation2 + $0x148] sm:$0xf]  ;;  %v4518_v55 = vld [vmem:[#allocation2 + $0x134] sm:$0x1] }
 0x54a   : > { %12116 = vmatprep.subr.bf16.mxu1 %v12961_v17  ;;  %v4474_v41 = vrot.slane %v4472_v47, 7  ;;  %v15015_v0 = vrot.slane %v4459_v19, 4  ;;  %v15017_v23 = vrot.slane %v4462_v1, 5  ;;  %v15019_v22 = vrot.slane %v4472_v47, 4  ;;  %v4293_v51 = vld [vmem:[#allocation2 + $0x138] sm:$0x8] }
 0x54b   : > { %12099 = vmatmul.mubr.bf16.gmra.mrb[4].mxu1 %v10638_v57  ;;  %v15021_v59 = vrot.slane %v4475_v30, 5  ;;  %5049 = vmatprep.mubr.bf16.mxu0 %v10633_v40  ;;  %v4598_v14 = vshll.u32 %v4513_v42, 16  ;;  %v4605_v61 = vrot.slane %v4604_v26, 4  ;;  %v4607_v28 = vshll.u32 %v4514_v46, 16  ;;  %v12971_v47 = vld [vmem:[#allocation11 + $0x3b8] sm:$0xff]   ;;  %v11182_v42 = vpop.f32.mrb[0].mxu0 }
 0x54c   : > { %v4454_v36 = vshrl.u32 %v4289_v10, 16  ;;  %v4464_v54 = vor.u32 %v4462_v1, %v4461_v34  ;;  %v4467_v62 = vshrl.u32 %v4291_v35, 16  ;;  %v4477_v45 = vor.u32 %v4475_v30, %v4474_v41  ;;  %v4295_v1 = vld [vmem:[#allocation2 + $0x144] sm:$0x8]  ;;  %v4519_v46 = vld [vmem:[#allocation2 + $0x140] sm:$0x1] }
 0x54d   : > { %12117 = vmatpush3.bf16.msra.mxu1 %v12961_v17  ;;  %v4600_v5 = vrot.slane %v4598_v14, 5  ;;  %v4614_v48 = vrot.slane %v4613_v63, 4  ;;  %v4616_v11 = vshll.u32 %v4515_v38, 16  ;;  %v4609_v18 = vrot.slane %v4607_v28, 5  ;;  %v11183_v14 = vpop.f32.mrb[1].mxu0 }
 0x54e   : > { %v10615_v4 = vrot.slane %v4454_v36, 11  ;;  %v10616_v21 = vrot.slane %v4467_v62, 11  ;;  %v4623_v7 = vrot.slane %v4622_v37, 4  ;;  %12118 = vmatprep.subr.bf16.mxu1 %v12964_v58  ;;  %v4625_v29 = vshll.u32 %v4516_v53, 16 }
 0x54f   : > { %v4601_v2 = vsel %vm14302_vm6, %v4596_v32, %v4600_v5  ;;  %v4618_v13 = vrot.slane %v4616_v11, 5  ;;  %v4610_v24 = vsel %vm14302_vm6, %v4605_v61, %v4609_v18  ;;  %v4631_v8 = vor.u32 %v15017_v23, %v15015_v0  ;;  %v4520_v0 = vld [vmem:[#allocation2 + $0x14c] sm:$0x1] }
 0x550   : > { %v4465_v25 = vsel %vm14307_vm7, %v10615_v4, %v4464_v54  ;;  %v4478_v56 = vsel %vm14307_vm7, %v10616_v21, %v4477_v45  ;;  %v10639_v50 = vcombine.low %v4601_v2, %v4610_v24  ;;  %v4627_v9 = vrot.slane %v4625_v29, 5  ;;  %v12973_v45 = vld [vmem:[#allocation11 + $0x400] sm:$0xff]   ;;  %v15045_v4 = vpop.f32.mrb[2].mxu0 }
 0x551   : > { %v10625_v60 = vcombine.low %v4465_v25, %v4478_v56  ;;  %v4619_v43 = vsel %vm14302_vm6, %v4614_v48, %v4618_v13  ;;  %12119 = vmatpush3.bf16.msra.mxu1 %v12964_v58  ;;  %v4485_v26 = vshrl.u32 %v4294_v49, 16  ;;  %v4488_v12 = vshll.u32 %v4294_v49, 16  ;;  %v5180_v25 = vld [vmem:[#allocation2 + $0x88] sm:$0xf]  ;;  %v5182_v56 = vld [vmem:[#allocation2 + $0x94] sm:$0xf] }
 0x552   : > { %12120 = vmatprep.subr.bf16.mxu1 %v12966_v39  ;;  %v4640_v15 = vor.u32 %v15021_v59, %v15019_v22  ;;  %12102 = vmatprep.mubr.bf16.mxu1 %v10639_v50  ;;  %v4628_v44 = vsel %vm14302_vm6, %v4623_v7, %v4627_v9  ;;  %v4498_v17 = vshrl.u32 %v4296_v20, 16  ;;  %v4501_v6 = vshll.u32 %v4296_v20, 16 }
 0x553   : > { %5050 = vmatmul.mubr.bf16.gmra.mrb[88].mxu0 %v10625_v60  ;;  %v10634_v3 = vcombine.low %v4294_v49, %v4296_v20  ;;  %v10640_v63 = vcombine.low %v4619_v43, %v4628_v44  ;;  %v4487_v37 = vrot.slane %v4485_v26, 7  ;;  %v4647_v27 = vrot.slane %v4485_v26, 4  ;;  %v5181_v44 = vld [vmem:[#allocation2 + $0x90] sm:$0x8] }
 0x554   : > { %v4648_v19 = vrot.slane %v4488_v12, 5  ;;  %v4500_v58 = vrot.slane %v4498_v17, 7  ;;  %v4656_v57 = vrot.slane %v4498_v17, 4  ;;  %v4657_v30 = vrot.slane %v4501_v6, 5 }
 0x555   : > { %12121 = vmatpush3.bf16.msra.mxu1 %v12966_v39  ;;  %5057 = vmatprep.mubr.bf16.mxu0 %v10634_v3  ;;  %v4632_v40 = vrot.slane %v4631_v8, 4  ;;  %v4634_v32 = vshll.u32 %v4517_v16, 16  ;;  %v4641_v10 = vrot.slane %v4640_v15, 4  ;;  %v4643_v34 = vshll.u32 %v4518_v55, 16  ;;  %v5419_v8 = vld [vmem:[#allocation2 + $0x8c] sm:$0x1] }
 0x556   : > { %12103 = vmatmul.mubr.bf16.gmra.mrb[8].mxu1 %v10640_v63  ;;  %v4480_v41 = vshrl.u32 %v4293_v51, 16  ;;  %12122 = vmatprep.subr.bf16.mxu1 %v12969_v31  ;;  %v4490_v23 = vor.u32 %v4488_v12, %v4487_v37  ;;  %v4493_v35 = vshrl.u32 %v4295_v1, 16  ;;  %v4503_v22 = vor.u32 %v4501_v6, %v4500_v58  ;;  %v5179_v15 = vld [vmem:[#allocation2 + $0x84] sm:$0x8]  ;;  %v15055_v51 = vld [vmem:[#allocation2 + $0xa0] sm:$0xf] }
 0x557   : > { %v4649_v59 = vor.u32 %v4648_v19, %v4647_v27  ;;  %v4636_v61 = vrot.slane %v4634_v32, 5  ;;  %v4645_v38 = vrot.slane %v4643_v34, 5  ;;  %v4652_v36 = vshll.u32 %v4519_v46, 16  ;;  %v15057_v1 = vld [vmem:[#allocation2 + $0xac] sm:$0xf] }
 0x558   : > { %v10617_v28 = vrot.slane %v4480_v41, 11  ;;  %v10618_v54 = vrot.slane %v4493_v35, 11  ;;  %v4658_v53 = vor.u32 %v4657_v30, %v4656_v57  ;;  %v4661_v5 = vshll.u32 %v4520_v0, 16  ;;  %v5421_v30 = vld [vmem:[#allocation2 + $0xa4] sm:$0x1] }
 0x559   : > { %v4650_v62 = vrot.slane %v4649_v59, 4  ;;  %12123 = vmatpush3.bf16.msra.mxu1 %v12969_v31  ;;  %v4637_v48 = vsel %vm14302_vm6, %v4632_v40, %v4636_v61  ;;  %v4646_v11 = vsel %vm14302_vm6, %v4641_v10, %v4645_v38  ;;  %v4654_v18 = vrot.slane %v4652_v36, 5  ;;  %v5420_v31 = vld [vmem:[#allocation2 + $0x98] sm:$0x1]  ;;  %v11186_v40 = vpop.f32.mrb[3].mxu0 }
 0x55a   : > { %v4491_v39 = vsel %vm14307_vm7, %v10617_v28, %v4490_v23  ;;  %12124 = vmatprep.subr.bf16.mxu1 %v12971_v47  ;;  %v10641_v21 = vcombine.low %v4637_v48, %v4646_v11  ;;  %v4504_v7 = vsel %vm14307_vm7, %v10618_v54, %v4503_v22  ;;  %v4659_v2 = vrot.slane %v4658_v53, 4  ;;  %v5422_v22 = vld [vmem:[#allocation2 + $0xb0] sm:$0x1]  ;;  %v12976_v28 = vld [vmem:[#allocation11 + $0x480] sm:$0xff]  }
 0x55b   : > { %v4663_v13 = vrot.slane %v4661_v5, 5  ;;  %v10626_v29 = vcombine.low %v4491_v39, %v4504_v7  ;;  %v4655_v24 = vsel %vm14302_vm6, %v4650_v62, %v4654_v18  ;;  %v15051_v50 = vadd.f32 %v11183_v14, %v11182_v42 }
 0x55c   : > { %12106 = vmatprep.mubr.bf16.mxu1 %v10641_v21  ;;  %v5217_v43 = vshrl.u32 %v5180_v25, 16  ;;  %v5220_v9 = vshll.u32 %v5180_v25, 16  ;;  %v5230_v49 = vshrl.u32 %v5182_v56, 16  ;;  %v5233_v26 = vshll.u32 %v5182_v56, 16 }
 0x55d   : > { %v4664_v60 = vsel %vm14302_vm6, %v4659_v2, %v4663_v13  ;;  %12125 = vmatpush3.bf16.msra.mxu1 %v12971_v47  ;;  %5058 = vmatmul.mubr.bf16.gmra.mrb[92].mxu0 %v10626_v29  ;;  %v10691_v12 = vcombine.low %v5180_v25, %v5182_v56  ;;  %v5440_v16 = vshll.u32 %v5419_v8, 16  ;;  %v5449_v19 = vshll.u32 %v5420_v31, 16  ;;  %v12981_v2 = vld [vmem:[#allocation11 + $0x4c8] sm:$0xff]  }
 0x55e   : > { %v10642_v20 = vcombine.low %v4655_v24, %v4664_v60  ;;  %11566 = vmatprep.subr.bf16.mxu1 %v12973_v45  ;;  %v5219_v17 = vrot.slane %v5217_v43, 7  ;;  %v5232_v6 = vrot.slane %v5230_v49, 7  ;;  %v5435_v3 = vrot.slane %v5217_v43, 4  ;;  %v12983_v56 = vld [vmem:[#allocation11 + $0x488] sm:$0xff]   ;;  %v15075_v60 = vld [vmem:[#allocation2 + $0xb8] sm:$0xf] }
 0x55f   : > { %v5436_v55 = vrot.slane %v5220_v9, 5  ;;  %v5444_v63 = vrot.slane %v5230_v49, 4  ;;  %v5445_v37 = vrot.slane %v5233_v26, 5  ;;  %5915 = vmatprep.mubr.bf16.mxu0 %v10691_v12  ;;  %v5442_v27 = vrot.slane %v5440_v16, 5  ;;  %v15080_v12 = vld [vmem:[#allocation2 + $0xc4] sm:$0xf] }
 0x560   : > { %12107 = vmatmul.mubr.bf16.gmra.mrb[12].mxu1 %v10642_v20  ;;  %v5222_v47 = vor.u32 %v5220_v9, %v5219_v17  ;;  %v5235_v42 = vor.u32 %v5233_v26, %v5232_v6  ;;  %v5212_v57 = vshrl.u32 %v5179_v15, 16  ;;  %v5451_v32 = vrot.slane %v5449_v19, 5  ;;  %v12988_v9 = vld [vmem:[#allocation11 + $0x4d0] sm:$0xff]   ;;  %v12975_v26 = vld [vmem:[#allocation11 + $0x3c0] sm:$0xff]   ;;  %v12977_v17 = vld [vmem:[#allocation11 + $0x408] sm:$0xff]  }
 0x561   : > { %v5437_v58 = vor.u32 %v5436_v55, %v5435_v3  ;;  %v5446_v46 = vor.u32 %v5445_v37, %v5444_v63  ;;  %v5225_v10 = vshrl.u32 %v5181_v44, 16  ;;  %v5243_v34 = vshrl.u32 %v15055_v51, 16  ;;  %v5423_v3 = vld [vmem:[#allocation2 + $0xbc] sm:$0x1]  ;;  %v5424_v55 = vld [vmem:[#allocation2 + $0xc8] sm:$0x1] }
 0x562   : > { %v10667_v0 = vrot.slane %v5212_v57, 11  ;;  %v5246_v23 = vshll.u32 %v15055_v51, 16  ;;  %v5256_v35 = vshrl.u32 %v15057_v1, 16  ;;  %v5259_v61 = vshll.u32 %v15057_v1, 16 }
 0x563   : > { %v5438_v41 = vrot.slane %v5437_v58, 4  ;;  %v5447_v59 = vrot.slane %v5446_v46, 4  ;;  %v10668_v14 = vrot.slane %v5225_v10, 11  ;;  %v5453_v38 = vrot.slane %v5243_v34, 4  ;;  %v5185_v46 = vld [vmem:[#allocation2 + $0xa8] sm:$0x8] }
 0x564   : > { %v5223_v54 = vsel %vm14307_vm7, %v10667_v0, %v5222_v47  ;;  %v5454_v62 = vrot.slane %v5246_v23, 5  ;;  %v5458_v53 = vshll.u32 %v5421_v30, 16  ;;  %v5462_v48 = vrot.slane %v5256_v35, 4  ;;  %v5183_v47 = vld [vmem:[#allocation2 + $0x9c] sm:$0x8]  ;;  %v12978_v10 = vld [vmem:[#allocation11 + $0x3c8] sm:$0xff]  }
 0x565   : > { %v5443_v36 = vsel %vm14302_vm6, %v5438_v41, %v5442_v27  ;;  %v5452_v5 = vsel %vm14302_vm6, %v5447_v59, %v5451_v32  ;;  %v5236_v45 = vsel %vm14307_vm7, %v10668_v14, %v5235_v42  ;;  %v5463_v11 = vrot.slane %v5259_v61, 5  ;;  %v12990_v42 = vld [vmem:[#allocation11 + $0x490] sm:$0xff]   ;;  %v12995_v32 = vld [vmem:[#allocation11 + $0x4d8] sm:$0xff]  }
 0x566   : > { %v10699_v39 = vcombine.low %v5443_v36, %v5452_v5  ;;  %v10683_v18 = vcombine.low %v5223_v54, %v5236_v45  ;;  %v5455_v21 = vor.u32 %v5454_v62, %v5453_v38  ;;  %v5460_v7 = vrot.slane %v5458_v53, 5  ;;  %v5425_v54 = vld [vmem:[#allocation2 + $0xd4] sm:$0x1] }
 0x567   : > { %v5464_v13 = vor.u32 %v5463_v11, %v5462_v48  ;;  %v5467_v29 = vshll.u32 %v5422_v22, 16  ;;  %v10692_v24 = vcombine.low %v15055_v51, %v15057_v1  ;;  %v5245_v25 = vrot.slane %v5243_v34, 7  ;;  %v11188_v22 = vpop.f32.mrb[4].mxu0  ;;  %v12980_v62 = vld [vmem:[#allocation11 + $0x410] sm:$0xff]   ;;  %v5426_v11 = vld [vmem:[#allocation2 + $0xe0] sm:$0x1] }
 0x568   : > { %12126 = vmatprep.mubr.bf16.mxu1 %v10699_v39  ;;  %5916 = vmatmul.mubr.bf16.vlgmr.msra.gmra.mrb[96].mxu0 %v10683_v18  ;;  %v5456_v8 = vrot.slane %v5455_v21, 4  ;;  %v5258_v43 = vrot.slane %v5256_v35, 7  ;;  %v15078_v49 = vadd.f32 %v11186_v40, %v15045_v4  ;;  %v5269_v16 = vshrl.u32 %v15075_v60, 16  ;;  %v15098_v35 = vld [vmem:[#allocation2 + $0xd0] sm:$0xf]  ;;  %v12997_v39 = vld [vmem:[#allocation11 + $0x498] sm:$0xff]  }
 0x569   : > { %v5465_v31 = vrot.slane %v5464_v13, 4  ;;  %v5469_v20 = vrot.slane %v5467_v29, 5  ;;  %11647 = vmatpush3.bf16.msra.mxu0 %v12976_v28  ;;  %5923 = vmatprep.mubr.bf16.mxu0 %v10692_v24  ;;  %v5272_v15 = vshll.u32 %v15075_v60, 16  ;;  %v5282_v6 = vshrl.u32 %v15080_v12, 16  ;;  %v15102_v28 = vld [vmem:[#allocation2 + $0xdc] sm:$0xf] }
 0x56a   : > { %v5461_v44 = vsel %vm14302_vm6, %v5456_v8, %v5460_v7  ;;  %v5285_v4 = vshll.u32 %v15080_v12, 16  ;;  %v5248_v51 = vor.u32 %v5246_v23, %v5245_v25  ;;  %11648 = vmatprep.subr.bf16.mxu0 %v12981_v2  ;;  %v5471_v37 = vrot.slane %v5269_v16, 4  ;;  %v12982_v24 = vld [vmem:[#allocation11 + $0x3d0] sm:$0xff]   ;;  %v11189_v25 = vpop.f32.mrb[5].mxu0 }
 0x56b   : > { %v5470_v63 = vsel %vm14302_vm6, %v5465_v31, %v5469_v20  ;;  %v5472_v27 = vrot.slane %v5272_v15, 5  ;;  %v5476_v19 = vshll.u32 %v5423_v3, 16  ;;  %v5480_v57 = vrot.slane %v5282_v6, 4  ;;  %v12984_v31 = vld [vmem:[#allocation11 + $0x418] sm:$0xff]  }
 0x56c   : > { %v10700_v58 = vcombine.low %v5461_v44, %v5470_v63  ;;  %v5481_v30 = vrot.slane %v5285_v4, 5  ;;  %v5485_v40 = vshll.u32 %v5424_v55, 16  ;;  %v5238_v0 = vshrl.u32 %v5183_v47, 16 }
 0x56d   : > { %v5473_v34 = vor.u32 %v5472_v27, %v5471_v37  ;;  %v5478_v41 = vrot.slane %v5476_v19, 5  ;;  %v5251_v23 = vshrl.u32 %v5185_v46, 16  ;;  %11649 = vmatpush3.bf16.msra.mxu0 %v12983_v56  ;;  %v5261_v38 = vor.u32 %v5259_v61, %v5258_v43  ;;  %v12985_v19 = vld [vmem:[#allocation11 + $0x3d8] sm:$0xff]  }
 0x56e   : > { %12127 = vmatmul.mubr.bf16.vlgmr.msra.gmra.mrb[0].mxu1 %v10700_v58  ;;  %v5482_v59 = vor.u32 %v5481_v30, %v5480_v57  ;;  %v5487_v14 = vrot.slane %v5485_v40, 5  ;;  %v5295_v36 = vshrl.u32 %v15098_v35, 16  ;;  %11650 = vmatprep.subr.bf16.mxu0 %v12988_v9  ;;  %v10669_v5 = vrot.slane %v5238_v0, 11  ;;  %v15132_v58 = vld [vmem:[#allocation2 + $0x10c] sm:$0xf] }
 0x56f   : > { %11567 = vmatpush3.bf16.msra.mxu1 %v12975_v26  ;;  %v5474_v53 = vrot.slane %v5473_v34, 4  ;;  %v10670_v45 = vrot.slane %v5251_v23, 11  ;;  %v5298_v48 = vshll.u32 %v15098_v35, 16  ;;  %v5308_v1 = vshrl.u32 %v15102_v28, 16  ;;  %v12987_v34 = vld [vmem:[#allocation11 + $0x420] sm:$0xff]  }
 0x570   : > { %11568 = vmatprep.subr.bf16.mxu1 %v12977_v17  ;;  %v5483_v18 = vrot.slane %v5482_v59, 4  ;;  %v5311_v61 = vshll.u32 %v15102_v28, 16  ;;  %v5489_v21 = vrot.slane %v5295_v36, 4  ;;  %v5249_v2 = vsel %vm14307_vm7, %v10669_v5, %v5248_v51 }
 0x571   : > { %v5479_v7 = vsel %vm14302_vm6, %v5474_v53, %v5478_v41  ;;  %v5262_v13 = vsel %vm14307_vm7, %v10670_v45, %v5261_v38  ;;  %v5490_v29 = vrot.slane %v5298_v48, 5  ;;  %11651 = vmatpush3.bf16.msra.mxu0 %v12990_v42  ;;  %v5494_v43 = vshll.u32 %v5425_v54, 16  ;;  %v15130_v42 = vld [vmem:[#allocation2 + $0x100] sm:$0xf]  ;;  %v5187_v54 = vld [vmem:[#allocation2 + $0xb4] sm:$0x8] }
 0x572   : > { %v5488_v56 = vsel %vm14302_vm6, %v5483_v18, %v5487_v14  ;;  %v10684_v8 = vcombine.low %v5249_v2, %v5262_v13  ;;  %v5498_v9 = vrot.slane %v5308_v1, 4  ;;  %11652 = vmatprep.subr.bf16.mxu0 %v12995_v32  ;;  %v5499_v44 = vrot.slane %v5311_v61, 5  ;;  %v11191_v53 = vpop.f32.mrb[6].mxu0  ;;  %v12991_v18 = vld [vmem:[#allocation11 + $0x428] sm:$0xff]  }
 0x573   : > { %11569 = vmatpush3.bf16.msra.mxu1 %v12978_v10  ;;  %v10701_v20 = vcombine.low %v5479_v7, %v5488_v56  ;;  %v5491_v26 = vor.u32 %v5490_v29, %v5489_v21  ;;  %v5503_v17 = vshll.u32 %v5426_v11, 16  ;;  %v5496_v3 = vrot.slane %v5494_v43, 5  ;;  %v5427_v10 = vld [vmem:[#allocation2 + $0x104] sm:$0x1]  ;;  %v15156_v29 = vld [vmem:[#allocation2 + $0x118] sm:$0xf] }
 0x574   : > { %5924 = vmatmul.mubr.bf16.gmra.mrb[100].mxu0 %v10684_v8  ;;  %11570 = vmatprep.subr.bf16.mxu1 %v12980_v62  ;;  %v10693_v55 = vcombine.low %v15075_v60, %v15080_v12  ;;  %v5271_v51 = vrot.slane %v5269_v16, 7  ;;  %v5500_v37 = vor.u32 %v5499_v44, %v5498_v9  ;;  %v15128_v47 = vadd.f32 %v11189_v25, %v11188_v22  ;;  %v12989_v62 = vld [vmem:[#allocation11 + $0x3e0] sm:$0xff]  }
 0x575   : > { %12130 = vmatprep.mubr.bf16.mxu1 %v10701_v20  ;;  %v5492_v63 = vrot.slane %v5491_v26, 4  ;;  %v5505_v27 = vrot.slane %v5503_v17, 5  ;;  %11653 = vmatpush3.bf16.msra.mxu0 %v12997_v39  ;;  %v10694_v30 = vcombine.low %v15098_v35, %v15102_v28  ;;  %v5321_v46 = vshrl.u32 %v15130_v42, 16  ;;  %v5189_v39 = vld [vmem:[#allocation2 + $0xc0] sm:$0x8] }
 0x576   : > { %5931 = vmatprep.mubr.bf16.mxu0 %v10693_v55  ;;  %v5274_v57 = vor.u32 %v5272_v15, %v5271_v51  ;;  %v5501_v40 = vrot.slane %v5500_v37, 4  ;;  %v5324_v32 = vshll.u32 %v15130_v42, 16  ;;  %v5334_v41 = vshrl.u32 %v15132_v58, 16  ;;  %v5428_v15 = vld [vmem:[#allocation2 + $0x110] sm:$0x1]  ;;  %v12992_v55 = vld [vmem:[#allocation11 + $0x3e8] sm:$0xff]  }
 0x577   : > { %v5497_v16 = vsel %vm14302_vm6, %v5492_v63, %v5496_v3  ;;  %11571 = vmatpush3.bf16.msra.mxu1 %v12982_v24  ;;  %v5337_v60 = vshll.u32 %v15132_v58, 16  ;;  %v5512_v0 = vshll.u32 %v5427_v10, 16  ;;  %v5284_v23 = vrot.slane %v5282_v6, 7  ;;  %v11192_v24 = vpop.f32.mrb[7].mxu0  ;;  %v15160_v8 = vld [vmem:[#allocation2 + $0x124] sm:$0xf] }
 0x578   : > { %11572 = vmatprep.subr.bf16.mxu1 %v12984_v31  ;;  %v5506_v22 = vsel %vm14302_vm6, %v5501_v40, %v5505_v27  ;;  %v5507_v59 = vrot.slane %v5321_v46, 4  ;;  %v5508_v14 = vrot.slane %v5324_v32, 5  ;;  %v5521_v38 = vshll.u32 %v5428_v15, 16  ;;  %v5429_v31 = vld [vmem:[#allocation2 + $0x11c] sm:$0x1]  ;;  %v12994_v37 = vld [vmem:[#allocation11 + $0x430] sm:$0xff]  }
 0x579   : > { %v10702_v5 = vcombine.low %v5497_v16, %v5506_v22  ;;  %v5514_v45 = vrot.slane %v5512_v0, 5  ;;  %v5516_v11 = vrot.slane %v5334_v41, 4  ;;  %v5517_v6 = vrot.slane %v5337_v60, 5  ;;  %v5430_v3 = vld [vmem:[#allocation2 + $0x128] sm:$0x1]  ;;  %v13002_v10 = vld [vmem:[#allocation11 + $0x4e0] sm:$0xff]  }
 0x57a   : > { %v5509_v21 = vor.u32 %v5508_v14, %v5507_v59  ;;  %v5523_v7 = vrot.slane %v5521_v38, 5  ;;  %v5264_v2 = vshrl.u32 %v5187_v54, 16  ;;  %v5277_v13 = vshrl.u32 %v5189_v39, 16  ;;  %v13003_v22 = vld [vmem:[#allocation11 + $0x4a0] sm:$0xff]   ;;  %v12996_v54 = vld [vmem:[#allocation11 + $0x3f0] sm:$0xff]   ;;  %11654 = vmatprep.subr.bf16.mxu0 %v13002_v10 }
 0x57b   : > { %11573 = vmatpush3.bf16.msra.mxu1 %v12985_v19  ;;  %v5518_v25 = vor.u32 %v5517_v6, %v5516_v11  ;;  %v5287_v56 = vor.u32 %v5285_v4, %v5284_v23  ;;  %v5347_v43 = vshrl.u32 %v15156_v29, 16  ;;  %v5350_v9 = vshll.u32 %v15156_v29, 16  ;;  %v12998_v11 = vld [vmem:[#allocation11 + $0x438] sm:$0xff]   ;;  %11655 = vmatpush3.bf16.msra.mxu0 %v13003_v22  ;;  %v13006_v22 = vld [vmem:[#allocation11 + $0x4e8] sm:$0xff]  }
 0x57c   : > { %12131 = vmatmul.mubr.bf16.gmra.mrb[4].mxu1 %v10702_v5  ;;  %11574 = vmatprep.subr.bf16.mxu1 %v12987_v34  ;;  %v5510_v20 = vrot.slane %v5509_v21, 4  ;;  %v10671_v26 = vrot.slane %v5264_v2, 11  ;;  %v10672_v44 = vrot.slane %v5277_v13, 11  ;;  %v5360_v17 = vshrl.u32 %v15160_v8, 16  ;;  %v15193_v2 = vld [vmem:[#allocation2 + $0x130] sm:$0xf] }
 0x57d   : > { %v5519_v51 = vrot.slane %v5518_v25, 4  ;;  %v5363_v63 = vshll.u32 %v15160_v8, 16  ;;  %v5525_v12 = vrot.slane %v5347_v43, 4  ;;  %v5526_v4 = vrot.slane %v5350_v9, 5  ;;  %v15197_v13 = vld [vmem:[#allocation2 + $0x13c] sm:$0xf]  ;;  %11656 = vmatprep.subr.bf16.mxu0 %v13006_v22 }
 0x57e   : > { %v5515_v27 = vsel %vm14302_vm6, %v5510_v20, %v5514_v45  ;;  %v5275_v19 = vsel %vm14307_vm7, %v10671_v26, %v5274_v57  ;;  %v5288_v16 = vsel %vm14307_vm7, %v10672_v44, %v5287_v56  ;;  %v5530_v40 = vshll.u32 %v5429_v31, 16  ;;  %v12999_v56 = vld [vmem:[#allocation11 + $0x3f8] sm:$0xff]   ;;  %v5431_v26 = vld [vmem:[#allocation2 + $0x134] sm:$0x1]  ;;  %v5432_v44 = vld [vmem:[#allocation2 + $0x140] sm:$0x1] }
 0x57f   : > { %11575 = vmatpush3.bf16.msra.mxu1 %v12989_v62  ;;  %v5524_v34 = vsel %vm14302_vm6, %v5519_v51, %v5523_v7  ;;  %v10685_v15 = vcombine.low %v5275_v19, %v5288_v16  ;;  %v5527_v0 = vor.u32 %v5526_v4, %v5525_v12  ;;  %v5534_v23 = vrot.slane %v5360_v17, 4  ;;  %v11194_v62 = vpop.f32.mrb[8].mxu0  ;;  %v5191_v4 = vld [vmem:[#allocation2 + $0xcc] sm:$0x8]  ;;  %v5193_v16 = vld [vmem:[#allocation2 + $0xd8] sm:$0x8] }
 0x580   : > { %11576 = vmatprep.subr.bf16.mxu1 %v12991_v18  ;;  %v10703_v59 = vcombine.low %v5515_v27, %v5524_v34  ;;  %v5532_v14 = vrot.slane %v5530_v40, 5  ;;  %v5535_v57 = vrot.slane %v5363_v63, 5  ;;  %v5539_v38 = vshll.u32 %v5430_v3, 16  ;;  %v11195_v31 = vpop.f32.mrb[9].mxu0 }
 0x581   : > { %5932 = vmatmul.mubr.bf16.gmra.mrb[104].mxu0 %v10685_v15  ;;  %v5528_v5 = vrot.slane %v5527_v0, 4  ;;  %v5297_v45 = vrot.slane %v5295_v36, 7  ;;  %v15184_v6 = vadd.f32 %v11192_v24, %v11191_v53  ;;  %v5310_v21 = vrot.slane %v5308_v1, 7 }
 0x582   : > { %12134 = vmatprep.mubr.bf16.mxu1 %v10703_v59  ;;  %v5536_v39 = vor.u32 %v5535_v57, %v5534_v23  ;;  %v5541_v18 = vrot.slane %v5539_v38, 5  ;;  %5939 = vmatprep.mubr.bf16.mxu0 %v10694_v30  ;;  %v10695_v36 = vcombine.low %v15130_v42, %v15132_v58  ;;  %v5373_v24 = vshrl.u32 %v15193_v2, 16  ;;  %v15219_v23 = vld [vmem:[#allocation2 + $0x148] sm:$0xf]  ;;  %v15221_v57 = vld [vmem:[#allocation2 + $0x154] sm:$0xf] }
 0x583   : > { %11577 = vmatpush3.bf16.msra.mxu1 %v12992_v55  ;;  %v5533_v7 = vsel %vm14302_vm6, %v5528_v5, %v5532_v14  ;;  %v5376_v1 = vshll.u32 %v15193_v2, 16  ;;  %v5300_v25 = vor.u32 %v5298_v48, %v5297_v45  ;;  %v5386_v30 = vshrl.u32 %v15197_v13, 16 }
 0x584   : > { %11578 = vmatprep.subr.bf16.mxu1 %v12994_v37  ;;  %v5537_v53 = vrot.slane %v5536_v39, 4  ;;  %v5389_v20 = vshll.u32 %v15197_v13, 16  ;;  %v5313_v3 = vor.u32 %v5311_v61, %v5310_v21  ;;  %v15207_v55 = vadd.f32 %v11195_v31, %v11194_v62  ;;  %v11197_v37 = vpop.f32.mrb[10].mxu0  ;;  %v13007_v62 = vld [vmem:[#allocation11 + $0x4a8] sm:$0xff]  }
 0x585   : > { %v5543_v35 = vrot.slane %v5373_v24, 4  ;;  %v5544_v48 = vrot.slane %v5376_v1, 5  ;;  %v5548_v12 = vshll.u32 %v5431_v26, 16  ;;  %v5552_v28 = vrot.slane %v5386_v30, 4  ;;  %v11198_v40 = vpop.f32.mrb[11].mxu0  ;;  %11657 = vmatpush3.bf16.msra.mxu0 %v13007_v62 }
 0x586   : > { %v5542_v51 = vsel %vm14302_vm6, %v5537_v53, %v5541_v18  ;;  %v5553_v61 = vrot.slane %v5389_v20, 5  ;;  %v5557_v19 = vshll.u32 %v5432_v44, 16  ;;  %v5290_v15 = vshrl.u32 %v5191_v4, 16  ;;  %v5433_v18 = vld [vmem:[#allocation2 + $0x14c] sm:$0x1] }
 0x587   : > { %11579 = vmatpush3.bf16.msra.mxu1 %v12996_v54  ;;  %v10704_v27 = vcombine.low %v5533_v7, %v5542_v51  ;;  %v5545_v10 = vor.u32 %v5544_v48, %v5543_v35  ;;  %v5550_v34 = vrot.slane %v5548_v12, 5  ;;  %v5303_v0 = vshrl.u32 %v5193_v16, 16  ;;  %v5434_v53 = vld [vmem:[#allocation2 + $0x158] sm:$0x1]  ;;  %v11200_v48 = vpop.f32.mrb[12].mxu0 }
 0x588   : > { %11580 = vmatprep.subr.bf16.mxu1 %v12998_v11  ;;  %v5554_v59 = vor.u32 %v5553_v61, %v5552_v28  ;;  %v5559_v14 = vrot.slane %v5557_v19, 5  ;;  %v5399_v38 = vshrl.u32 %v15219_v23, 16  ;;  %v5402_v54 = vshll.u32 %v15219_v23, 16  ;;  %v11201_v61 = vpop.f32.mrb[13].mxu0 }
 0x589   : > { %12135 = vmatmul.mubr.bf16.gmra.mrb[8].mxu1 %v10704_v27  ;;  %v5546_v5 = vrot.slane %v5545_v10, 4  ;;  %v10673_v45 = vrot.slane %v5290_v15, 11  ;;  %v10674_v11 = vrot.slane %v5303_v0, 11  ;;  %v5412_v39 = vshrl.u32 %v15221_v57, 16 }
 0x58a   : > { %v5555_v21 = vrot.slane %v5554_v59, 4  ;;  %v5415_v7 = vshll.u32 %v15221_v57, 16  ;;  %v5561_v31 = vrot.slane %v5399_v38, 4  ;;  %v5562_v26 = vrot.slane %v5402_v54, 5 }
 0x58b   : > { %11581 = vmatpush3.bf16.msra.mxu1 %v12999_v56  ;;  %v5551_v44 = vsel %vm14302_vm6, %v5546_v5, %v5550_v34  ;;  %v5301_v51 = vsel %vm14307_vm7, %v10673_v45, %v5300_v25  ;;  %v5314_v56 = vsel %vm14307_vm7, %v10674_v11, %v5313_v3  ;;  %v5566_v35 = vshll.u32 %v5433_v18, 16  ;;  %v11203_v34 = vpop.f32.mrb[14].mxu0  ;;  %v6095_v11 = vld [vmem:[#allocation2 + $0x94] sm:$0xf]  ;;  %v6097_v18 = vld [vmem:[#allocation2 + $0xa0] sm:$0xf] }
 0x58c   : > { %v5560_v12 = vsel %vm14302_vm6, %v5555_v21, %v5559_v14  ;;  %v10686_v4 = vcombine.low %v5301_v51, %v5314_v56  ;;  %v5563_v27 = vor.u32 %v5562_v26, %v5561_v31  ;;  %v5570_v28 = vrot.slane %v5412_v39, 4  ;;  %v5195_v51 = vld [vmem:[#allocation2 + $0xfc] sm:$0x8]  ;;  %v11204_v58 = vpop.f32.mrb[15].mxu0 }
 0x58d   : > { %v10705_v19 = vcombine.low %v5551_v44, %v5560_v12  ;;  %v5568_v16 = vrot.slane %v5566_v35, 5  ;;  %v5571_v10 = vrot.slane %v5415_v7, 5  ;;  %v5575_v25 = vshll.u32 %v5434_v53, 16 }
 0x58e   : > { %5940 = vmatmul.mubr.bf16.gmra.mrb[108].mxu0 %v10686_v4  ;;  %v5564_v3 = vrot.slane %v5563_v27, 4  ;;  %v5323_v15 = vrot.slane %v5321_v46, 7  ;;  %v15245_v0 = vadd.f32 %v11198_v40, %v11197_v37  ;;  %v15247_v22 = vadd.f32 %v11201_v61, %v11200_v48  ;;  %v5197_v48 = vld [vmem:[#allocation2 + $0x108] sm:$0x8]  ;;  %v6094_v4 = vld [vmem:[#allocation2 + $0x90] sm:$0x8] }
 0x58f   : > { %12138 = vmatprep.mubr.bf16.mxu1 %v10705_v19  ;;  %v5572_v59 = vor.u32 %v5571_v10, %v5570_v28  ;;  %v5577_v14 = vrot.slane %v5575_v25, 5  ;;  %5947 = vmatprep.mubr.bf16.mxu0 %v10695_v36  ;;  %v5336_v62 = vrot.slane %v5334_v41, 7  ;;  %v10696_v46 = vcombine.low %v15156_v29, %v15160_v8  ;;  %v6096_v28 = vld [vmem:[#allocation2 + $0x9c] sm:$0x8]  ;;  %v13010_v61 = vld [vmem:[#allocation11 + $0x4f0] sm:$0xff]  }
 0x590   : > { %v5569_v5 = vsel %vm14302_vm6, %v5564_v3, %v5568_v16  ;;  %v10697_v37 = vcombine.low %v15193_v2, %v15197_v13  ;;  %v10698_v40 = vcombine.low %v15219_v23, %v15221_v57  ;;  %v5326_v36 = vor.u32 %v5324_v32, %v5323_v15  ;;  %11658 = vmatprep.subr.bf16.mxu0 %v13010_v61 }
 0x591   : > { %v5573_v45 = vrot.slane %v5572_v59, 4  ;;  %v5339_v41 = vor.u32 %v5337_v60, %v5336_v62  ;;  %v5349_v21 = vrot.slane %v5347_v43, 7  ;;  %v6132_v53 = vshrl.u32 %v6095_v11, 16 }
 0x592   : > { %v6135_v31 = vshll.u32 %v6095_v11, 16  ;;  %v6145_v26 = vshrl.u32 %v6097_v18, 16  ;;  %v6148_v44 = vshll.u32 %v6097_v18, 16  ;;  %v10755_v35 = vcombine.low %v6095_v11, %v6097_v18 }
 0x593   : > { %v5578_v56 = vsel %vm14302_vm6, %v5573_v45, %v5577_v14  ;;  %v5316_v12 = vshrl.u32 %v5195_v51, 16  ;;  %v15272_v42 = vor.u32 %v5350_v9, %v5349_v21  ;;  %v6134_v60 = vrot.slane %v6132_v53, 7 }
 0x594   : > { %v10706_v32 = vcombine.low %v5569_v5, %v5578_v56  ;;  %v6147_v43 = vrot.slane %v6145_v26, 7  ;;  %v15274_v27 = vrot.slane %v6132_v53, 4  ;;  %v15276_v19 = vrot.slane %v6135_v31, 5  ;;  %v6099_v5 = vld [vmem:[#allocation2 + $0xac] sm:$0xf] }
 0x595   : > { %v15278_v16 = vrot.slane %v6145_v26, 4  ;;  %v15280_v10 = vrot.slane %v6148_v44, 5  ;;  %v10675_v25 = vrot.slane %v5316_v12, 11  ;;  %v6137_v3 = vor.u32 %v6135_v31, %v6134_v60  ;;  %v6101_v53 = vld [vmem:[#allocation2 + $0xb8] sm:$0xf]  ;;  %v13011_v12 = vld [vmem:[#allocation11 + $0x4b0] sm:$0xff]  }
 0x596   : > { %12139 = vmatmul.mubr.bf16.gmra.mrb[12].mxu1 %v10706_v32  ;;  %v6150_v15 = vor.u32 %v6148_v44, %v6147_v43  ;;  %v5329_v9 = vshrl.u32 %v5197_v48, 16  ;;  %v6127_v59 = vshrl.u32 %v6094_v4, 16  ;;  %v6140_v62 = vshrl.u32 %v6096_v28, 16  ;;  %v6098_v32 = vld [vmem:[#allocation2 + $0xa8] sm:$0x8]  ;;  %11659 = vmatpush3.bf16.msra.mxu0 %v13011_v12 }
 0x597   : > { %6830 = vmatprep.mubr.bf16.mxu1 %v10755_v35  ;;  %v5327_v14 = vsel %vm14307_vm7, %v10675_v25, %v5326_v36  ;;  %v5362_v45 = vrot.slane %v5360_v17, 7  ;;  %v15286_v11 = vadd.f32 %v11204_v58, %v11203_v34  ;;  %v6158_v26 = vshrl.u32 %v6099_v5, 16  ;;  %v5199_v35 = vld [vmem:[#allocation2 + $0x114] sm:$0x8]  ;;  %v5201_v58 = vld [vmem:[#allocation2 + $0x120] sm:$0x8] }
 0x598   : > { %v10676_v18 = vrot.slane %v5329_v9, 11  ;;  %v10731_v21 = vrot.slane %v6127_v59, 11  ;;  %v6161_v31 = vshll.u32 %v6099_v5, 16  ;;  %v10732_v44 = vrot.slane %v6140_v62, 11  ;;  %v6100_v25 = vld [vmem:[#allocation2 + $0xb4] sm:$0x8] }
 0x599   : > { %v6171_v51 = vshrl.u32 %v6101_v53, 16  ;;  %v6174_v56 = vshll.u32 %v6101_v53, 16  ;;  %v10756_v48 = vcombine.low %v6099_v5, %v6101_v53  ;;  %v6160_v17 = vrot.slane %v6158_v26, 7 }
 0x59a   : > { %v5340_v36 = vsel %vm14307_vm7, %v10676_v18, %v5339_v41  ;;  %v6138_v4 = vsel %vm14307_vm7, %v10731_v21, %v6137_v3  ;;  %v6368_v34 = vrot.slane %v6158_v26, 4  ;;  %v6151_v43 = vsel %vm14307_vm7, %v10732_v44, %v6150_v15  ;;  %v15294_v41 = vpop.f32.mrb[16].mxu0 }
 0x59b   : > { %v10687_v60 = vcombine.low %v5327_v14, %v5340_v36  ;;  %v6173_v28 = vrot.slane %v6171_v51, 7  ;;  %v6369_v61 = vrot.slane %v6161_v31, 5  ;;  %v10747_v9 = vcombine.low %v6138_v4, %v6151_v43  ;;  %v6102_v43 = vld [vmem:[#allocation2 + $0xc0] sm:$0x8] }
 0x59c   : > { %v6377_v59 = vrot.slane %v6171_v51, 4  ;;  %v6378_v62 = vrot.slane %v6174_v56, 5  ;;  %v5342_v5 = vshrl.u32 %v5199_v35, 16  ;;  %v5355_v18 = vshrl.u32 %v5201_v58, 16  ;;  %v6103_v51 = vld [vmem:[#allocation2 + $0xc4] sm:$0xf] }
 0x59d   : > { %5948 = vmatmul.mubr.bf16.gmra.mrb[112].mxu0 %v10687_v60  ;;  %v6370_v3 = vor.u32 %v6369_v61, %v6368_v34  ;;  %v5365_v21 = vor.u32 %v5363_v63, %v5362_v45  ;;  %v6153_v14 = vshrl.u32 %v6098_v32, 16  ;;  %v6163_v26 = vor.u32 %v6161_v31, %v6160_v17  ;;  %v6105_v35 = vld [vmem:[#allocation2 + $0xd0] sm:$0xf]  ;;  %v5203_v58 = vld [vmem:[#allocation2 + $0x12c] sm:$0x8]  ;;  %v11262_v63 = vpop.f32.mrb[16].mxu1 }
 0x59e   : > { %6831 = vmatmul.mubr.bf16.vlgmr.msra.gmra.mrb[48].mxu1 %v10747_v9  ;;  %5955 = vmatprep.mubr.bf16.mxu0 %v10696_v46  ;;  %v6379_v15 = vor.u32 %v6378_v62, %v6377_v59  ;;  %v10677_v53 = vrot.slane %v5342_v5, 11  ;;  %v6166_v44 = vshrl.u32 %v6100_v25, 16  ;;  %v10678_v36 = vrot.slane %v5355_v18, 11  ;;  %v5205_v31 = vld [vmem:[#allocation2 + $0x138] sm:$0x8]  ;;  %v11207_v17 = vpop.f32.mrb[17].mxu0 }
 0x59f   : > { %v15301_v12 = vrot.slane %v6370_v3, 4  ;;  %6838 = vmatprep.mubr.bf16.mxu1 %v10756_v48  ;;  %v10733_v4 = vrot.slane %v6153_v14, 11  ;;  %v6176_v34 = vor.u32 %v6174_v56, %v6173_v28  ;;  %v6184_v46 = vshrl.u32 %v6103_v51, 16  ;;  %v6104_v28 = vld [vmem:[#allocation2 + $0xcc] sm:$0x8]  ;;  %v11263_v18 = vpop.f32.mrb[17].mxu1 }
 0x5a0   : > { %v15303_v45 = vrot.slane %v6379_v15, 4  ;;  %v5353_v29 = vsel %vm14307_vm7, %v10677_v53, %v15272_v42  ;;  %v10734_v8 = vrot.slane %v6166_v44, 11  ;;  %v5366_v32 = vsel %vm14307_vm7, %v10678_v36, %v5365_v21 }
 0x5a1   : > { %v6164_v48 = vsel %vm14307_vm7, %v10733_v4, %v6163_v26  ;;  %v6187_v60 = vshll.u32 %v6103_v51, 16  ;;  %v6197_v56 = vshrl.u32 %v6105_v35, 16  ;;  %v10688_v61 = vcombine.low %v5353_v29, %v5366_v32  ;;  %v11209_v26 = vpop.f32.mrb[18].mxu0  ;;  %v11265_v29 = vpop.f32.mrb[18].mxu1 }
 0x5a2   : > { %v6177_v25 = vsel %vm14307_vm7, %v10734_v8, %v6176_v34  ;;  %v6186_v9 = vrot.slane %v6184_v46, 7  ;;  %v6200_v42 = vshll.u32 %v6105_v35, 16  ;;  %v15314_v5 = vrot.slane %v6184_v46, 4  ;;  %v11210_v8 = vpop.f32.mrb[19].mxu0  ;;  %v11266_v32 = vpop.f32.mrb[19].mxu1 }
 0x5a3   : > { %v10748_v59 = vcombine.low %v6164_v48, %v6177_v25  ;;  %v6199_v62 = vrot.slane %v6197_v56, 7  ;;  %v15316_v3 = vrot.slane %v6187_v60, 5  ;;  %v15318_v21 = vrot.slane %v6197_v56, 4  ;;  %v13014_v48 = vld [vmem:[#allocation11 + $0x4f8] sm:$0xff]  }
 0x5a4   : > { %v15320_v14 = vrot.slane %v6200_v42, 5  ;;  %v10757_v15 = vcombine.low %v6103_v51, %v6105_v35  ;;  %v5368_v53 = vshrl.u32 %v5203_v58, 16  ;;  %v5375_v44 = vrot.slane %v5373_v24, 7  ;;  %11660 = vmatprep.subr.bf16.mxu0 %v13014_v48 }
 0x5a5   : > { %5956 = vmatmul.mubr.bf16.gmra.mrb[116].mxu0 %v10688_v61  ;;  %v5381_v36 = vshrl.u32 %v5205_v31, 16  ;;  %v5388_v4 = vrot.slane %v5386_v30, 7  ;;  %v6179_v34 = vshrl.u32 %v6102_v43, 16  ;;  %v6189_v51 = vor.u32 %v6187_v60, %v6186_v9  ;;  %v6107_v43 = vld [vmem:[#allocation2 + $0xdc] sm:$0xf] }
 0x5a6   : > { %6839 = vmatmul.mubr.bf16.gmra.mrb[52].mxu1 %v10748_v59  ;;  %5963 = vmatprep.mubr.bf16.mxu0 %v10697_v37  ;;  %v10679_v46 = vrot.slane %v5368_v53, 11  ;;  %v6192_v35 = vshrl.u32 %v6104_v28, 16  ;;  %v6202_v58 = vor.u32 %v6200_v42, %v6199_v62  ;;  %v5378_v24 = vor.u32 %v5376_v1, %v5375_v44  ;;  %v6109_v28 = vld [vmem:[#allocation2 + $0xe8] sm:$0xf]  ;;  %v5207_v9 = vld [vmem:[#allocation2 + $0x144] sm:$0x8] }
 0x5a7   : > { %6846 = vmatprep.mubr.bf16.mxu1 %v10757_v15  ;;  %v10680_v31 = vrot.slane %v5381_v36, 11  ;;  %v5391_v30 = vor.u32 %v5389_v20, %v5388_v4  ;;  %v10735_v56 = vrot.slane %v6179_v34, 11  ;;  %v15334_v25 = vadd.f32 %v11207_v17, %v15294_v41  ;;  %v13015_v42 = vld [vmem:[#allocation11 + $0x4b8] sm:$0xff]   ;;  %v5209_v59 = vld [vmem:[#allocation2 + $0x150] sm:$0x8]  ;;  %v11212_v15 = vpop.f32.mrb[20].mxu0 }
 0x5a8   : > { %v10736_v61 = vrot.slane %v6192_v35, 11  ;;  %v11264_v37 = vadd.f32 %v11263_v18, %v11262_v63  ;;  %v15336_v60 = vadd.f32 %v11210_v8, %v11209_v26  ;;  %v5379_v2 = vsel %vm14307_vm7, %v10679_v46, %v5378_v24  ;;  %v6106_v18 = vld [vmem:[#allocation2 + $0xd8] sm:$0x8]  ;;  %11661 = vmatpush3.bf16.msra.mxu0 %v13015_v42  ;;  %v6108_v4 = vld [vmem:[#allocation2 + $0xe4] sm:$0x8]  ;;  %v11268_v34 = vpop.f32.mrb[20].mxu1 }
 0x5a9   : > { %v5392_v13 = vsel %vm14307_vm7, %v10680_v31, %v5391_v30  ;;  %v6190_v1 = vsel %vm14307_vm7, %v10735_v56, %v6189_v51  ;;  %v11267_v20 = vadd.f32 %v11266_v32, %v11265_v29  ;;  %v6210_v62 = vshrl.u32 %v6107_v43, 16  ;;  %v11213_v29 = vpop.f32.mrb[21].mxu0  ;;  %v13018_v32 = vld [vmem:[#allocation11 + $0x440] sm:$0xff]  }
 0x5aa   : > { %v10689_v41 = vcombine.low %v5379_v2, %v5392_v13  ;;  %v6203_v63 = vsel %vm14307_vm7, %v10736_v61, %v6202_v58  ;;  %v15347_v17 = vadd.f32 %v11264_v37, %v15051_v50  ;;  %v6213_v44 = vshll.u32 %v6107_v43, 16  ;;  %v11269_v50 = vpop.f32.mrb[21].mxu1  ;;  %v11215_v58 = vpop.f32.mrb[22].mxu0  ;;  %v13019_v2 = vld [vmem:[#allocation11 + $0x580] sm:$0xff]   ;;  %12142 = vmatprep.subr.bf16.mxu1 %v13018_v32 }
 0x5ab   : > { %v10749_v53 = vcombine.low %v6190_v1, %v6203_v63  ;;  %v15350_v26 = vadd.f32 %v11267_v20, %v15078_v49  ;;  %v6223_v36 = vshrl.u32 %v6109_v28, 16  ;;  %v6212_v8 = vrot.slane %v6210_v62, 7  ;;  %v11271_v30 = vpop.f32.mrb[22].mxu1  ;;  %v11216_v56 = vpop.f32.mrb[23].mxu0  ;;  %11726 = vmatprep.subr.bf16.mxu0 %v13019_v2  ;;  %12143 = vmatpush3.bf16.msra.mxu1 %v13018_v32  ;;  %v13021_v2 = vld [vmem:[#allocation11 + $0x448] sm:$0xff]  }
 0x5ac   : > { %v6226_v46 = vshll.u32 %v6109_v28, 16  ;;  %v15352_v51 = vrot.slane %v6210_v62, 4  ;;  %v10758_v35 = vcombine.low %v6107_v43, %v6109_v28  ;;  %v15354_v24 = vrot.slane %v6213_v44, 5  ;;  %v11272_v42 = vpop.f32.mrb[23].mxu1  ;;  %12144 = vmatprep.subr.bf16.mxu1 %v13021_v2 }
 0x5ad   : > { %5964 = vmatmul.mubr.bf16.gmra.mrb[120].mxu0 %v10689_v41  ;;  %v6225_v48 = vrot.slane %v6223_v36, 7  ;;  %v15356_v31 = vrot.slane %v6223_v36, 4  ;;  %v5394_v49 = vshrl.u32 %v5207_v9, 16  ;;  %v5401_v43 = vrot.slane %v5399_v38, 7  ;;  %v6113_v36 = vld [vmem:[#allocation2 + $0x118] sm:$0xf] }
 0x5ae   : > { %17100 = vst [vmem:[#allocation37_spill] sm:$0xff] %v15352_v51  ;;  %17101 = vst [vmem:[#allocation38_spill] sm:$0xff] %v15354_v24  ;;  %6847 = vmatmul.mubr.bf16.gmra.mrb[56].mxu1 %v10749_v53  ;;  %5971 = vmatprep.mubr.bf16.mxu0 %v10698_v40  ;;  %v15361_v61 = vrot.slane %v6226_v46, 5  ;;  %v5407_v37 = vshrl.u32 %v5209_v59, 16  ;;  %v5414_v28 = vrot.slane %v5412_v39, 7  ;;  %v6205_v13 = vshrl.u32 %v6106_v18, 16 }
 0x5af   : > { %17102 = vst [vmem:[#allocation41_spill] sm:$0xff] %v15356_v31  ;;  %6854 = vmatprep.mubr.bf16.mxu1 %v10758_v35  ;;  %v10681_v9 = vrot.slane %v5394_v49, 11  ;;  %v6215_v1 = vor.u32 %v6213_v44, %v6212_v8  ;;  %v6218_v20 = vshrl.u32 %v6108_v4, 16  ;;  %v5404_v40 = vor.u32 %v5402_v54, %v5401_v43  ;;  %v15371_v59 = vpop.f32.mrb[24].mxu0  ;;  %v6111_v44 = vld [vmem:[#allocation2 + $0x10c] sm:$0xf]  ;;  %12145 = vmatpush3.bf16.msra.mxu1 %v13021_v2 }
 0x5b0   : > { %17103 = vst [vmem:[#allocation42_spill] sm:$0xff] %v15361_v61  ;;  %v10682_v41 = vrot.slane %v5407_v37, 11  ;;  %v5417_v63 = vor.u32 %v5415_v7, %v5414_v28  ;;  %v6228_v38 = vor.u32 %v6226_v46, %v6225_v48  ;;  %v10737_v39 = vrot.slane %v6205_v13, 11  ;;  %v7010_v4 = vld [vmem:[#allocation2 + $0xf4] sm:$0xf]  ;;  %v11274_v28 = vpop.f32.mrb[24].mxu1 }
 0x5b1   : > { %v10738_v62 = vrot.slane %v6218_v20, 11  ;;  %v15373_v53 = vadd.f32 %v11213_v29, %v11212_v15  ;;  %v11270_v18 = vadd.f32 %v11269_v50, %v11268_v34  ;;  %v5405_v23 = vsel %vm14307_vm7, %v10681_v9, %v5404_v40  ;;  %v7012_v29 = vld [vmem:[#allocation2 + $0x100] sm:$0xf]  ;;  %v6110_v48 = vld [vmem:[#allocation2 + $0x108] sm:$0x8]  ;;  %v11275_v40 = vpop.f32.mrb[25].mxu1 }
 0x5b2   : > { %v5418_v54 = vsel %vm14307_vm7, %v10682_v41, %v5417_v63  ;;  %v15379_v57 = vadd.f32 %v11216_v56, %v11215_v58  ;;  %v11273_v7 = vadd.f32 %v11272_v42, %v11271_v30  ;;  %v6216_v46 = vsel %vm14307_vm7, %v10737_v39, %v6215_v1  ;;  %v6112_v37 = vld [vmem:[#allocation2 + $0x114] sm:$0x8]  ;;  %v11219_v42 = vpop.f32.mrb[25].mxu0  ;;  %v7009_v1 = vld [vmem:[#allocation2 + $0xf0] sm:$0x8] }
 0x5b3   : > { %v10690_v8 = vcombine.low %v5405_v23, %v5418_v54  ;;  %v6229_v15 = vsel %vm14307_vm7, %v10738_v62, %v6228_v38  ;;  %v15386_v34 = vadd.f32 %v11270_v18, %v15128_v47  ;;  %v6236_v32 = vshrl.u32 %v6111_v44, 16  ;;  %v7011_v20 = vld [vmem:[#allocation2 + $0xfc] sm:$0x8]  ;;  %v11221_v41 = vpop.f32.mrb[26].mxu0  ;;  %v15407_v2 = vld [vmem:[#allocation2 + $0x124] sm:$0xf] }
 0x5b4   : > { %v10750_v35 = vcombine.low %v6216_v46, %v6229_v15  ;;  %v15389_v50 = vadd.f32 %v11273_v7, %v15184_v6  ;;  %v6239_v58 = vshll.u32 %v6111_v44, 16  ;;  %v6249_v49 = vshrl.u32 %v6113_v36, 16  ;;  %v11277_v15 = vpop.f32.mrb[26].mxu1 }
 0x5b5   : > { %5972 = vmatmul.mubr.bf16.gmra.mrb[124].mxu0 %v10690_v8  ;;  %v6252_v30 = vshll.u32 %v6113_v36, 16  ;;  %v10759_v56 = vcombine.low %v6111_v44, %v6113_v36  ;;  %v7047_v43 = vshrl.u32 %v7010_v4, 16  ;;  %v6238_v47 = vrot.slane %v6236_v32, 7 }
 0x5b6   : > { %6855 = vmatmul.mubr.bf16.gmra.mrb[60].mxu1 %v10750_v35  ;;  %v15391_v9 = vrot.slane %v6236_v32, 4  ;;  %v15393_v13 = vrot.slane %v6239_v58, 5  ;;  %v7050_v6 = vshll.u32 %v7010_v4, 16  ;;  %v6251_v63 = vrot.slane %v6249_v49, 7  ;;  %v11222_v35 = vpop.f32.mrb[27].mxu0  ;;  %v13024_v32 = vld [vmem:[#allocation11 + $0x450] sm:$0xff]  }
 0x5b7   : > { %v15395_v38 = vrot.slane %v6249_v49, 4  ;;  %v15397_v39 = vrot.slane %v6252_v30, 5  ;;  %6862 = vmatprep.mubr.bf16.mxu1 %v10759_v56  ;;  %v7049_v62 = vrot.slane %v7047_v43, 7  ;;  %v7060_v18 = vshrl.u32 %v7012_v29, 16  ;;  %12146 = vmatprep.subr.bf16.mxu1 %v13024_v32 }
 0x5b8   : > { %17104 = vst [vmem:[#allocation43_spill] sm:$0xff] %v15391_v9  ;;  %17105 = vst [vmem:[#allocation44_spill] sm:$0xff] %v15393_v13  ;;  %v7063_v44 = vshll.u32 %v7012_v29, 16  ;;  %v15399_v36 = vrot.slane %v7047_v43, 4  ;;  %v15401_v23 = vrot.slane %v7050_v6, 5  ;;  %v10819_v7 = vcombine.low %v7010_v4, %v7012_v29  ;;  %v11278_v13 = vpop.f32.mrb[27].mxu1  ;;  %12147 = vmatpush3.bf16.msra.mxu1 %v13024_v32 }
 0x5b9   : > { %17106 = vst [vmem:[#allocation45_spill] sm:$0xff] %v15395_v38  ;;  %17107 = vst [vmem:[#allocation46_spill] sm:$0xff] %v15397_v39  ;;  %v7052_v54 = vor.u32 %v7050_v6, %v7049_v62  ;;  %v6231_v8 = vshrl.u32 %v6110_v48, 16  ;;  %v6241_v46 = vor.u32 %v6239_v58, %v6238_v47  ;;  %v7062_v49 = vrot.slane %v7060_v18, 7  ;;  %v15412_v47 = vpop.f32.mrb[28].mxu0 }
 0x5ba   : > { %17108 = vst [vmem:[#allocation39_spill] sm:$0xff] %v15399_v36  ;;  %17109 = vst [vmem:[#allocation40_spill] sm:$0xff] %v15401_v23  ;;  %v15403_v38 = vrot.slane %v7060_v18, 4  ;;  %v15405_v56 = vrot.slane %v7063_v44, 5  ;;  %v6244_v39 = vshrl.u32 %v6112_v37, 16  ;;  %7745 = vmatprep.mubr.bf16.mxu0 %v10819_v7  ;;  %v6254_v36 = vor.u32 %v6252_v30, %v6251_v63  ;;  %v13020_v30 = vld [vmem:[#allocation11 + $0x540] sm:$0xff]  }
 0x5bb   : > { %v10739_v43 = vrot.slane %v6231_v8, 11  ;;  %v7042_v9 = vshrl.u32 %v7009_v1, 16  ;;  %v7055_v23 = vshrl.u32 %v7011_v20, 16  ;;  %v7065_v4 = vor.u32 %v7063_v44, %v7062_v49  ;;  %v6117_v20 = vld [vmem:[#allocation2 + $0x130] sm:$0xf]  ;;  %v15426_v18 = vpop.f32.mrb[28].mxu1 }
 0x5bc   : > { %17110 = vst [vmem:[#allocation47_spill] sm:$0xff] %v15403_v38  ;;  %17111 = vst [vmem:[#allocation48_spill] sm:$0xff] %v15405_v56  ;;  %v10740_v29 = vrot.slane %v6244_v39, 11  ;;  %v15410_v58 = vadd.f32 %v11219_v42, %v15371_v59  ;;  %v11276_v48 = vadd.f32 %v11275_v40, %v11274_v28  ;;  %v15416_v1 = vadd.f32 %v11222_v35, %v11221_v41  ;;  %v15418_v63 = vld [vmem:[#allocation2 + $0x10c] sm:$0xf]  ;;  %v11225_v8 = vpop.f32.mrb[29].mxu0 }
 0x5bd   : > { %v6242_v37 = vsel %vm14307_vm7, %v10739_v43, %v6241_v46  ;;  %v10795_v6 = vrot.slane %v7042_v9, 11  ;;  %v10796_v62 = vrot.slane %v7055_v23, 11  ;;  %v11279_v28 = vadd.f32 %v11278_v13, %v11277_v15  ;;  %v13025_v40 = vld [vmem:[#allocation11 + $0x588] sm:$0xff]   ;;  %v7016_v7 = vld [vmem:[#allocation2 + $0x118] sm:$0xf] }
 0x5be   : > { %v6255_v39 = vsel %vm14307_vm7, %v10740_v29, %v6254_v36  ;;  %v15423_v59 = vadd.f32 %v11276_v48, %v15207_v55  ;;  %v6262_v42 = vshrl.u32 %v15407_v2, 16  ;;  %v6265_v23 = vshll.u32 %v15407_v2, 16  ;;  %v6114_v36 = vld [vmem:[#allocation2 + $0x120] sm:$0x8]  ;;  %v6116_v43 = vld [vmem:[#allocation2 + $0x12c] sm:$0x8] }
 0x5bf   : > { %v10751_v9 = vcombine.low %v6242_v37, %v6255_v39  ;;  %v7053_v41 = vsel %vm14307_vm7, %v10795_v6, %v7052_v54  ;;  %v7066_v44 = vsel %vm14307_vm7, %v10796_v62, %v7065_v4  ;;  %v15434_v13 = vadd.f32 %v11279_v28, %v15245_v0  ;;  %v13026_v4 = vld [vmem:[#allocation11 + $0x548] sm:$0xff]   ;;  %v11281_v29 = vpop.f32.mrb[29].mxu1  ;;  %v7015_v39 = vld [vmem:[#allocation2 + $0x114] sm:$0x8] }
 0x5c0   : > { %v10811_v55 = vcombine.low %v7053_v41, %v7066_v44  ;;  %v6264_v46 = vrot.slane %v6262_v42, 7  ;;  %v6275_v15 = vshrl.u32 %v6117_v20, 16  ;;  %v6278_v35 = vshll.u32 %v6117_v20, 16  ;;  %v7013_v62 = vld [vmem:[#allocation2 + $0x108] sm:$0x8] }
 0x5c1   : > { %6863 = vmatmul.mubr.bf16.gmra.mrb[64].mxu1 %v10751_v9  ;;  %v15436_v32 = vrot.slane %v6262_v42, 4  ;;  %v15438_v49 = vrot.slane %v6265_v23, 5  ;;  %v10760_v54 = vcombine.low %v15407_v2, %v6117_v20  ;;  %v7073_v0 = vshrl.u32 %v15418_v63, 16  ;;  %v13027_v20 = vld [vmem:[#allocation11 + $0x458] sm:$0xff]  }
 0x5c2   : > { %7746 = vmatmul.mubr.bf16.vlgmr.msra.gmra.mrb[128].mxu0 %v10811_v55  ;;  %v6277_v48 = vrot.slane %v6275_v15, 7  ;;  %v15441_v37 = vrot.slane %v6275_v15, 4  ;;  %v7076_v6 = vshll.u32 %v15418_v63, 16  ;;  %v15445_v28 = vrot.slane %v6278_v35, 5  ;;  %12148 = vmatprep.subr.bf16.mxu1 %v13027_v20 }
 0x5c3   : > { %17112 = vst [vmem:[#allocation49_spill] sm:$0xff] %v15436_v32  ;;  %17113 = vst [vmem:[#allocation50_spill] sm:$0xff] %v15438_v49  ;;  %11727 = vmatpush3.bf16.msra.mxu0 %v13020_v30  ;;  %6870 = vmatprep.mubr.bf16.mxu1 %v10760_v54  ;;  %v7086_v42 = vshrl.u32 %v7016_v7, 16  ;;  %v7089_v9 = vshll.u32 %v7016_v7, 16  ;;  %v10820_v2 = vcombine.low %v15418_v63, %v7016_v7  ;;  %v7075_v41 = vrot.slane %v7073_v0, 7  ;;  %v11227_v30 = vpop.f32.mrb[30].mxu0 }
 0x5c4   : > { %17114 = vst [vmem:[#allocation51_spill] sm:$0xff] %v15441_v37  ;;  %17115 = vst [vmem:[#allocation52_spill] sm:$0xff] %v15445_v28  ;;  %v7283_v44 = vrot.slane %v7073_v0, 4  ;;  %v7284_v55 = vrot.slane %v7076_v6, 5  ;;  %v6257_v15 = vshrl.u32 %v6114_v36, 16  ;;  %11728 = vmatprep.subr.bf16.mxu0 %v13025_v40  ;;  %v6267_v49 = vor.u32 %v6265_v23, %v6264_v46  ;;  %v11283_v32 = vpop.f32.mrb[30].mxu1  ;;  %12149 = vmatpush3.bf16.msra.mxu1 %v13027_v20 }
 0x5c5   : > { %v7088_v56 = vrot.slane %v7086_v42, 7  ;;  %v7292_v38 = vrot.slane %v7086_v42, 4  ;;  %v7293_v37 = vrot.slane %v7089_v9, 5  ;;  %7753 = vmatprep.mubr.bf16.mxu0 %v10820_v2  ;;  %v13030_v28 = vld [vmem:[#allocation11 + $0x460] sm:$0xff]   ;;  %v6270_v31 = vshrl.u32 %v6116_v43, 16  ;;  %v11228_v63 = vpop.f32.mrb[31].mxu0 }
 0x5c6   : > { %v7285_v54 = vor.u32 %v7284_v55, %v7283_v44  ;;  %v10741_v61 = vrot.slane %v6257_v15, 11  ;;  %v6280_v24 = vor.u32 %v6278_v35, %v6277_v48  ;;  %v11284_v7 = vpop.f32.mrb[31].mxu1  ;;  %v7068_v51 = vshrl.u32 %v7013_v62, 16  ;;  %12150 = vmatprep.subr.bf16.mxu1 %v13030_v28  ;;  %v15452_v44 = vld [vmem:[#allocation2 + $0x13c] sm:$0xf] }
 0x5c7   : > { %v7294_v0 = vor.u32 %v7293_v37, %v7292_v38  ;;  %v7078_v36 = vor.u32 %v7076_v6, %v7075_v41  ;;  %v7081_v40 = vshrl.u32 %v7015_v39, 16  ;;  %11729 = vmatpush3.bf16.msra.mxu0 %v13026_v4  ;;  %v10742_v46 = vrot.slane %v6270_v31, 11  ;;  %v6121_v37 = vld [vmem:[#allocation2 + $0x148] sm:$0xf]  ;;  %v13031_v6 = vld [vmem:[#allocation11 + $0x590] sm:$0xff]   ;;  %v11286_v20 = vpop.f32.mrb[32].mxu1 }
 0x5c8   : > { %v15448_v42 = vrot.slane %v7285_v54, 4  ;;  %v6268_v23 = vsel %vm14307_vm7, %v10741_v61, %v6267_v49  ;;  %v7091_v2 = vor.u32 %v7089_v9, %v7088_v56  ;;  %v10797_v35 = vrot.slane %v7068_v51, 11  ;;  %v7018_v61 = vld [vmem:[#allocation2 + $0x124] sm:$0xf]  ;;  %12151 = vmatpush3.bf16.msra.mxu1 %v13030_v28  ;;  %v7020_v49 = vld [vmem:[#allocation2 + $0x130] sm:$0xf]  ;;  %11730 = vmatprep.subr.bf16.mxu0 %v13031_v6 }
 0x5c9   : > { %v15454_v43 = vrot.slane %v7294_v0, 4  ;;  %v10798_v48 = vrot.slane %v7081_v40, 11  ;;  %v15457_v38 = vadd.f32 %v11225_v8, %v15412_v47  ;;  %v6281_v4 = vsel %vm14307_vm7, %v10742_v46, %v6280_v24  ;;  %v13032_v9 = vld [vmem:[#allocation11 + $0x550] sm:$0xff]   ;;  %v6118_v28 = vld [vmem:[#allocation2 + $0x138] sm:$0x8]  ;;  %v11342_v40 = vpop.f32.mrb[32].mxu0 }
 0x5ca   : > { %17116 = vst [vmem:[#allocation53_spill] sm:$0xff] %v15448_v42  ;;  %v11282_v62 = vadd.f32 %v11281_v29, %v15426_v18  ;;  %v15462_v39 = vadd.f32 %v11228_v63, %v11227_v30  ;;  %v11285_v31 = vadd.f32 %v11284_v7, %v11283_v32  ;;  %v10752_v56 = vcombine.low %v6268_v23, %v6281_v4  ;;  %v6120_v54 = vld [vmem:[#allocation2 + $0x144] sm:$0x8]  ;;  %v7017_v0 = vld [vmem:[#allocation2 + $0x120] sm:$0x8]  ;;  %v11287_v23 = vpop.f32.mrb[33].mxu1 }
 0x5cb   : > { %17117 = vst [vmem:[#allocation54_spill] sm:$0xff] %v15454_v43  ;;  %v7079_v51 = vsel %vm14307_vm7, %v10797_v35, %v7078_v36  ;;  %v7092_v47 = vsel %vm14307_vm7, %v10798_v48, %v7091_v2  ;;  %v6288_v8 = vshrl.u32 %v15452_v44, 16  ;;  %v6291_v29 = vshll.u32 %v15452_v44, 16  ;;  %11731 = vmatpush3.bf16.msra.mxu0 %v13032_v9  ;;  %v7019_v36 = vld [vmem:[#allocation2 + $0x12c] sm:$0x8]  ;;  %v11343_v4 = vpop.f32.mrb[33].mxu0 }
 0x5cc   : > { %v10812_v24 = vcombine.low %v7079_v51, %v7092_v47  ;;  %v15470_v18 = vadd.f32 %v11282_v62, %v15247_v22  ;;  %v15473_v32 = vadd.f32 %v11285_v31, %v15286_v11  ;;  %6871 = vmatmul.mubr.bf16.gmra.mrb[68].mxu1 %v10752_v56  ;;  %v6301_v55 = vshrl.u32 %v6121_v37, 16  ;;  %v13033_v46 = vld [vmem:[#allocation11 + $0x468] sm:$0xff]   ;;  %v11289_v62 = vpop.f32.mrb[34].mxu1 }
 0x5cd   : > { %v6290_v41 = vrot.slane %v6288_v8, 7  ;;  %v6304_v15 = vshll.u32 %v6121_v37, 16  ;;  %v15476_v30 = vrot.slane %v6288_v8, 4  ;;  %v15478_v63 = vrot.slane %v6291_v29, 5  ;;  %12152 = vmatprep.subr.bf16.mxu1 %v13033_v46 }
 0x5ce   : > { %17118 = vst [vmem:[#allocation55_spill] sm:$0xff] %v15473_v32  ;;  %7754 = vmatmul.mubr.bf16.gmra.mrb[132].mxu0 %v10812_v24  ;;  %v10761_v22 = vcombine.low %v15452_v44, %v6121_v37  ;;  %v7099_v7 = vshrl.u32 %v7018_v61, 16  ;;  %v7102_v11 = vshll.u32 %v7018_v61, 16  ;;  %v6303_v2 = vrot.slane %v6301_v55, 7  ;;  %v11345_v24 = vpop.f32.mrb[34].mxu0  ;;  %12153 = vmatpush3.bf16.msra.mxu1 %v13033_v46 }
 0x5cf   : > { %17119 = vst [vmem:[#allocation56_spill] sm:$0xff] %v15476_v30  ;;  %17120 = vst [vmem:[#allocation57_spill] sm:$0xff] %v15478_v63  ;;  %v15481_v35 = vrot.slane %v6301_v55, 4  ;;  %v15483_v48 = vrot.slane %v6304_v15, 5  ;;  %v7112_v6 = vshrl.u32 %v7020_v49, 16  ;;  %v7115_v56 = vshll.u32 %v7020_v49, 16 }
 0x5d0   : > { %6878 = vmatprep.mubr.bf16.mxu1 %v10761_v22  ;;  %v7101_v31 = vrot.slane %v7099_v7, 7  ;;  %v15485_v51 = vrot.slane %v7099_v7, 4  ;;  %v15487_v44 = vrot.slane %v7102_v11, 5  ;;  %v10821_v8 = vcombine.low %v7018_v61, %v7020_v49  ;;  %v11290_v22 = vpop.f32.mrb[35].mxu1  ;;  %v13036_v30 = vld [vmem:[#allocation11 + $0x470] sm:$0xff]   ;;  %v13037_v49 = vld [vmem:[#allocation11 + $0x598] sm:$0xff]  }
 0x5d1   : > { %17121 = vst [vmem:[#allocation58_spill] sm:$0xff] %v15481_v35  ;;  %17122 = vst [vmem:[#allocation59_spill] sm:$0xff] %v15483_v48  ;;  %v7114_v37 = vrot.slane %v7112_v6, 7  ;;  %v15489_v47 = vrot.slane %v7112_v6, 4  ;;  %v6283_v9 = vshrl.u32 %v6118_v28, 16  ;;  %v15491_v55 = vrot.slane %v7115_v56, 5  ;;  %12154 = vmatprep.subr.bf16.mxu1 %v13036_v30  ;;  %11732 = vmatprep.subr.bf16.mxu0 %v13037_v49 }
 0x5d2   : > { %17123 = vst [vmem:[#allocation60_spill] sm:$0xff] %v15485_v51  ;;  %17124 = vst [vmem:[#allocation61_spill] sm:$0xff] %v15487_v44  ;;  %v6293_v43 = vor.u32 %v6291_v29, %v6290_v41  ;;  %v6296_v42 = vshrl.u32 %v6120_v54, 16  ;;  %v6306_v48 = vor.u32 %v6304_v15, %v6303_v2  ;;  %v11346_v35 = vpop.f32.mrb[35].mxu0  ;;  %7761 = vmatprep.mubr.bf16.mxu0 %v10821_v8  ;;  %v7094_v51 = vshrl.u32 %v7017_v0, 16 }
 0x5d3   : > { %17125 = vst [vmem:[#allocation62_spill] sm:$0xff] %v15489_v47  ;;  %17126 = vst [vmem:[#allocation63_spill] sm:$0xff] %v15491_v55  ;;  %v10743_v7 = vrot.slane %v6283_v9, 11  ;;  %v7104_v63 = vor.u32 %v7102_v11, %v7101_v31  ;;  %v7107_v44 = vshrl.u32 %v7019_v36, 16  ;;  %v7117_v6 = vor.u32 %v7115_v56, %v7114_v37  ;;  %v6123_v15 = vld [vmem:[#allocation2 + $0x154] sm:$0xf]  ;;  %12155 = vmatpush3.bf16.msra.mxu1 %v13036_v30 }
 0x5d4   : > { %v10744_v32 = vrot.slane %v6296_v42, 11  ;;  %v11288_v47 = vadd.f32 %v11287_v23, %v11286_v20  ;;  %v11344_v61 = vadd.f32 %v11343_v4, %v11342_v40  ;;  %v10799_v46 = vrot.slane %v7094_v51, 11  ;;  %v6125_v54 = vld [vmem:[#allocation2 + $0x160] sm:$0xf]  ;;  %v7022_v36 = vld [vmem:[#allocation2 + $0x13c] sm:$0xf] }
 0x5d5   : > { %v6294_v28 = vsel %vm14307_vm7, %v10743_v7, %v6293_v43  ;;  %v10800_v29 = vrot.slane %v7107_v44, 11  ;;  %v11291_v41 = vadd.f32 %v11290_v22, %v11289_v62  ;;  %v11347_v20 = vadd.f32 %v11346_v35, %v11345_v24  ;;  %v6122_v4 = vld [vmem:[#allocation2 + $0x150] sm:$0x8]  ;;  %v6124_v62 = vld [vmem:[#allocation2 + $0x15c] sm:$0x8]  ;;  %v11292_v37 = vpop.f32.mrb[36].mxu1 }
 0x5d6   : > { %v6307_v0 = vsel %vm14307_vm7, %v10744_v32, %v6306_v48  ;;  %v15498_v11 = vadd.f32 %v11288_v47, %v15334_v25  ;;  %v15501_v42 = vadd.f32 %v15347_v17, %v11344_v61  ;;  %v7105_v43 = vsel %vm14307_vm7, %v10799_v46, %v7104_v63  ;;  %v7024_v32 = vld [vmem:[#allocation2 + $0x148] sm:$0xf]  ;;  %v13038_v44 = vld [vmem:[#allocation11 + $0x558] sm:$0xff]   ;;  %v11348_v47 = vpop.f32.mrb[36].mxu0  ;;  %v11293_v24 = vpop.f32.mrb[37].mxu1 }
 0x5d7   : > { %v10753_v40 = vcombine.low %v6294_v28, %v6307_v0  ;;  %v7118_v23 = vsel %vm14307_vm7, %v10800_v29, %v7117_v6  ;;  %v15508_v2 = vadd.f32 %v11291_v41, %v15336_v60  ;;  %v15511_v48 = vadd.f32 %v15350_v26, %v11347_v20  ;;  %v7021_v9 = vld [vmem:[#allocation2 + $0x138] sm:$0x8]  ;;  %v11349_v22 = vpop.f32.mrb[37].mxu0  ;;  %v7023_v28 = vld [vmem:[#allocation2 + $0x144] sm:$0x8]  ;;  %11733 = vmatpush3.bf16.msra.mxu0 %v13038_v44 }
 0x5d8   : > { %17127 = vst [vmem:[#allocation64_spill] sm:$0xff] %v15501_v42  ;;  %v10813_v25 = vcombine.low %v7105_v43, %v7118_v23  ;;  %v6314_v17 = vshrl.u32 %v6123_v15, 16  ;;  %v6317_v35 = vshll.u32 %v6123_v15, 16  ;;  %v6327_v31 = vshrl.u32 %v6125_v54, 16  ;;  %v13039_v43 = vld [vmem:[#allocation11 + $0x478] sm:$0xff]   ;;  %v11295_v23 = vpop.f32.mrb[38].mxu1 }
 0x5d9   : > { %17128 = vst [vmem:[#allocation65_spill] sm:$0xff] %v15511_v48  ;;  %6879 = vmatmul.mubr.bf16.gmra.mrb[72].mxu1 %v10753_v40  ;;  %v6330_v56 = vshll.u32 %v6125_v54, 16  ;;  %v10762_v63 = vcombine.low %v6123_v15, %v6125_v54  ;;  %v7125_v51 = vshrl.u32 %v7022_v36, 16  ;;  %v7128_v26 = vshll.u32 %v7022_v36, 16  ;;  %v11296_v42 = vpop.f32.mrb[39].mxu1  ;;  %12156 = vmatprep.subr.bf16.mxu1 %v13039_v43 }
 0x5da   : > { %7762 = vmatmul.mubr.bf16.gmra.mrb[136].mxu0 %v10813_v25  ;;  %v6316_v60 = vrot.slane %v6314_v17, 7  ;;  %v15513_v8 = vrot.slane %v6314_v17, 4  ;;  %v15515_v30 = vrot.slane %v6317_v35, 5  ;;  %v6329_v7 = vrot.slane %v6327_v31, 7  ;;  %v11351_v25 = vpop.f32.mrb[38].mxu0  ;;  %v15525_v17 = vld [vmem:[#allocation11 + $0x500] sm:$0xff]   ;;  %12157 = vmatpush3.bf16.msra.mxu1 %v13039_v43 }
 0x5db   : > { %v15517_v6 = vrot.slane %v6327_v31, 4  ;;  %v15519_v61 = vrot.slane %v6330_v56, 5  ;;  %6886 = vmatprep.mubr.bf16.mxu1 %v10762_v63  ;;  %v7127_v49 = vrot.slane %v7125_v51, 7  ;;  %v7138_v46 = vshrl.u32 %v7024_v32, 16  ;;  %12174 = vmatprep.subr.bf16.mxu1 %v15525_v17 }
 0x5dc   : > { %v7141_v29 = vshll.u32 %v7024_v32, 16  ;;  %v15521_v41 = vrot.slane %v7125_v51, 4  ;;  %v15523_v15 = vrot.slane %v7128_v26, 5  ;;  %v10822_v54 = vcombine.low %v7022_v36, %v7024_v32  ;;  %v11352_v51 = vpop.f32.mrb[39].mxu0 }
 0x5dd   : > { %17129 = vst [vmem:[#allocation66_spill] sm:$0xff] %v15519_v61  ;;  %v6309_v0 = vshrl.u32 %v6122_v4, 16  ;;  %v6319_v20 = vor.u32 %v6317_v35, %v6316_v60  ;;  %v6322_v40 = vshrl.u32 %v6124_v62, 16  ;;  %v7140_v31 = vrot.slane %v7138_v46, 7  ;;  %v13043_v4 = vld [vmem:[#allocation11 + $0x560] sm:$0xff]  }
 0x5de   : > { %17130 = vst [vmem:[#allocation67_spill] sm:$0xff] %v15521_v41  ;;  %17131 = vst [vmem:[#allocation68_spill] sm:$0xff] %v15523_v15  ;;  %v15527_v63 = vrot.slane %v7138_v46, 4  ;;  %v15529_v48 = vrot.slane %v7141_v29, 5  ;;  %v6332_v44 = vor.u32 %v6330_v56, %v6329_v7  ;;  %v13042_v41 = vld [vmem:[#allocation11 + $0x5a0] sm:$0xff]   ;;  %7769 = vmatprep.mubr.bf16.mxu0 %v10822_v54  ;;  %v7120_v32 = vshrl.u32 %v7021_v9, 16 }
 0x5df   : > { %v10745_v15 = vrot.slane %v6309_v0, 11  ;;  %v10746_v36 = vrot.slane %v6322_v40, 11  ;;  %v7130_v35 = vor.u32 %v7128_v26, %v7127_v49  ;;  %v7133_v62 = vshrl.u32 %v7023_v28, 16  ;;  %11734 = vmatprep.subr.bf16.mxu0 %v13042_v41  ;;  %v15531_v46 = vpop.f32.mrb[40].mxu1  ;;  %v6334_v9 = vld [vmem:[#allocation2 + $0x98] sm:$0x1] }
 0x5e0   : > { %v7143_v60 = vor.u32 %v7141_v29, %v7140_v31  ;;  %v11294_v55 = vadd.f32 %v11293_v24, %v11292_v37  ;;  %v11350_v61 = vadd.f32 %v11349_v22, %v11348_v47  ;;  %v10801_v54 = vrot.slane %v7120_v32, 11  ;;  %v6335_v26 = vld [vmem:[#allocation2 + $0xa4] sm:$0x1]  ;;  %11735 = vmatpush3.bf16.msra.mxu0 %v13043_v4  ;;  %v11354_v49 = vpop.f32.mrb[40].mxu0  ;;  %v7026_v28 = vld [vmem:[#allocation2 + $0x16c] sm:$0xf] }
 0x5e1   : > { %v6320_v56 = vsel %vm14307_vm7, %v10745_v15, %v6319_v20  ;;  %v6333_v7 = vsel %vm14307_vm7, %v10746_v36, %v6332_v44  ;;  %v11297_v0 = vadd.f32 %v11296_v42, %v11295_v23  ;;  %v10802_v47 = vrot.slane %v7133_v62, 11  ;;  %v11299_v29 = vpop.f32.mrb[41].mxu1  ;;  %v7028_v40 = vld [vmem:[#allocation2 + $0x178] sm:$0xf]  ;;  %v6337_v44 = vld [vmem:[#allocation2 + $0xbc] sm:$0x1] }
 0x5e2   : > { %v10754_v37 = vcombine.low %v6320_v56, %v6333_v7  ;;  %v15539_v24 = vadd.f32 %v11294_v55, %v15373_v53  ;;  %v15542_v22 = vadd.f32 %v15386_v34, %v11350_v61  ;;  %v7131_v41 = vsel %vm14307_vm7, %v10801_v54, %v7130_v35  ;;  %v7027_v35 = vld [vmem:[#allocation2 + $0x174] sm:$0x8]  ;;  %v11355_v4 = vpop.f32.mrb[41].mxu0 }
 0x5e3   : > { %v15547_v42 = vadd.f32 %v11297_v0, %v15379_v57  ;;  %v11353_v15 = vadd.f32 %v11352_v51, %v11351_v25  ;;  %v6352_v20 = vor.u32 %v15276_v19, %v15274_v27  ;;  %v7144_v53 = vsel %vm14307_vm7, %v10802_v47, %v7143_v60  ;;  %v6336_v25 = vld [vmem:[#allocation2 + $0xb0] sm:$0x1]  ;;  %v7025_v51 = vld [vmem:[#allocation2 + $0x168] sm:$0x8]  ;;  %v11301_v0 = vpop.f32.mrb[42].mxu1 }
 0x5e4   : > { %6887 = vmatmul.mubr.bf16.gmra.mrb[76].mxu1 %v10754_v37  ;;  %v6355_v55 = vshll.u32 %v6334_v9, 16  ;;  %v6361_v34 = vor.u32 %v15280_v10, %v15278_v16  ;;  %v6364_v61 = vshll.u32 %v6335_v26, 16  ;;  %v10814_v43 = vcombine.low %v7131_v41, %v7144_v53  ;;  %v11357_v9 = vpop.f32.mrb[42].mxu0  ;;  %v13047_v53 = vld [vmem:[#allocation11 + $0x5a8] sm:$0xff]  }
 0x5e5   : > { %v15556_v23 = vadd.f32 %v15389_v50, %v11353_v15  ;;  %v6353_v57 = vrot.slane %v6352_v20, 4  ;;  %v7151_v31 = vshrl.u32 %v7026_v28, 16  ;;  %v7154_v32 = vshll.u32 %v7026_v28, 16  ;;  %v11302_v15 = vpop.f32.mrb[43].mxu1  ;;  %v11358_v20 = vpop.f32.mrb[43].mxu0  ;;  %11736 = vmatprep.subr.bf16.mxu0 %v13047_v53 }
 0x5e6   : > { %v6357_v27 = vrot.slane %v6355_v55, 5  ;;  %v6362_v19 = vrot.slane %v6361_v34, 4  ;;  %v6366_v36 = vrot.slane %v6364_v61, 5  ;;  %7770 = vmatmul.mubr.bf16.gmra.mrb[140].mxu0 %v10814_v43  ;;  %v7164_v60 = vshrl.u32 %v7028_v40, 16 }
 0x5e7   : > { %v7153_v62 = vrot.slane %v7151_v31, 7  ;;  %v7167_v16 = vshll.u32 %v7028_v40, 16  ;;  %v15558_v10 = vrot.slane %v7151_v31, 4  ;;  %v15564_v7 = vrot.slane %v7154_v32, 5 }
 0x5e8   : > { %v6358_v50 = vsel %vm14302_vm6, %v6353_v57, %v6357_v27  ;;  %v6367_v56 = vsel %vm14302_vm6, %v6362_v19, %v6366_v36  ;;  %v10823_v54 = vcombine.low %v7026_v28, %v7028_v40  ;;  %v7166_v37 = vrot.slane %v7164_v60, 7  ;;  %v13048_v57 = vld [vmem:[#allocation11 + $0x568] sm:$0xff]   ;;  %v15571_v19 = vpop.f32.mrb[44].mxu1 }
 0x5e9   : > { %v10763_v26 = vcombine.low %v6358_v50, %v6367_v56  ;;  %v15566_v47 = vrot.slane %v7164_v60, 4  ;;  %v15568_v41 = vrot.slane %v7167_v16, 5  ;;  %v6373_v55 = vshll.u32 %v6336_v25, 16  ;;  %11737 = vmatpush3.bf16.msra.mxu0 %v13048_v57  ;;  %v6341_v57 = vld [vmem:[#allocation2 + $0xec] sm:$0x1] }
 0x5ea   : > { %7777 = vmatprep.mubr.bf16.mxu0 %v10823_v54  ;;  %v6382_v34 = vshll.u32 %v6337_v44, 16  ;;  %v7146_v61 = vshrl.u32 %v7025_v51, 16  ;;  %v7156_v43 = vor.u32 %v7154_v32, %v7153_v62  ;;  %v7159_v31 = vshrl.u32 %v7027_v35, 16  ;;  %v15573_v54 = vpop.f32.mrb[44].mxu0  ;;  %v13044_v32 = vld [vmem:[#allocation11 + $0x508] sm:$0xff]   ;;  %v15581_v35 = vpop.f32.mrb[45].mxu1 }
 0x5eb   : > { %12158 = vmatprep.mubr.bf16.mxu1 %v10763_v26  ;;  %v7169_v28 = vor.u32 %v7167_v16, %v7166_v37  ;;  %v11300_v40 = vadd.f32 %v11299_v29, %v15531_v46  ;;  %v11356_v27 = vadd.f32 %v11355_v4, %v11354_v49  ;;  %v6375_v36 = vrot.slane %v6373_v55, 5  ;;  %v6338_v49 = vld [vmem:[#allocation2 + $0xc8] sm:$0x1]  ;;  %v6339_v29 = vld [vmem:[#allocation2 + $0xd4] sm:$0x1] }
 0x5ec   : > { %v6384_v60 = vrot.slane %v6382_v34, 5  ;;  %v10803_v50 = vrot.slane %v7146_v61, 11  ;;  %v11303_v56 = vadd.f32 %v11302_v15, %v11301_v0  ;;  %v10804_v25 = vrot.slane %v7159_v31, 11  ;;  %v7030_v16 = vld [vmem:[#allocation2 + $0x184] sm:$0xf] }
 0x5ed   : > { %v15576_v44 = vadd.f32 %v11300_v40, %v15410_v58  ;;  %v15579_v51 = vadd.f32 %v15423_v59, %v11356_v27  ;;  %v11359_v46 = vadd.f32 %v11358_v20, %v11357_v9  ;;  %v6376_v4 = vsel %vm14302_vm6, %v15301_v12, %v6375_v36  ;;  %v7032_v0 = vld [vmem:[#allocation2 + $0x190] sm:$0xf]  ;;  %v7029_v31 = vld [vmem:[#allocation2 + $0x180] sm:$0x8] }
 0x5ee   : > { %v6385_v62 = vsel %vm14302_vm6, %v15303_v45, %v6384_v60  ;;  %v7157_v58 = vsel %vm14307_vm7, %v10803_v50, %v7156_v43  ;;  %v15592_v59 = vadd.f32 %v11303_v56, %v15416_v1  ;;  %v7170_v26 = vsel %vm14307_vm7, %v10804_v25, %v7169_v28  ;;  %v6340_v1 = vld [vmem:[#allocation2 + $0xe0] sm:$0x1]  ;;  %v11361_v28 = vpop.f32.mrb[45].mxu0  ;;  %v13046_v27 = vld [vmem:[#allocation11 + $0x510] sm:$0xff]  }
 0x5ef   : > { %17132 = vst [vmem:[#allocation69_spill] sm:$0xff] %v15579_v51  ;;  %v10764_v9 = vcombine.low %v6376_v4, %v6385_v62  ;;  %v15597_v37 = vadd.f32 %v15434_v13, %v11359_v46  ;;  %v6388_v12 = vor.u32 %v15316_v3, %v15314_v5  ;;  %v10815_v15 = vcombine.low %v7157_v58, %v7170_v26  ;;  %v7031_v46 = vld [vmem:[#allocation2 + $0x18c] sm:$0x8]  ;;  %v17134_v58 = vld [vmem:[#allocation37_spill] sm:$0xff] }
 0x5f0   : > { %v6391_v45 = vshll.u32 %v6338_v49, 16  ;;  %v6397_v20 = vor.u32 %v15320_v14, %v15318_v21  ;;  %v6400_v53 = vshll.u32 %v6339_v29, 16  ;;  %v7177_v34 = vshrl.u32 %v7030_v16, 16  ;;  %v11307_v49 = vpop.f32.mrb[46].mxu1  ;;  %v11363_v29 = vpop.f32.mrb[46].mxu0 }
 0x5f1   : > { %17133 = vst [vmem:[#allocation70_spill] sm:$0xff] %v15597_v37  ;;  %12159 = vmatmul.mubr.bf16.vlgmr.msra.gmra.mrb[0].mxu1 %v10764_v9  ;;  %v6389_v55 = vrot.slane %v6388_v12, 4  ;;  %v7180_v61 = vshll.u32 %v7030_v16, 16  ;;  %v7190_v43 = vshrl.u32 %v7032_v0, 16  ;;  %7778 = vmatmul.mubr.bf16.gmra.mrb[144].mxu0 %v10815_v15  ;;  %v7193_v40 = vshll.u32 %v7032_v0, 16  ;;  %v17135_v9 = vld [vmem:[#allocation38_spill] sm:$0xff] }
 0x5f2   : > { %12175 = vmatpush3.bf16.msra.mxu1 %v15525_v17  ;;  %v6393_v13 = vrot.slane %v6391_v45, 5  ;;  %v6398_v5 = vrot.slane %v6397_v20, 4  ;;  %v6402_v3 = vrot.slane %v6400_v53, 5  ;;  %v7179_v21 = vrot.slane %v7177_v34, 7  ;;  %v11308_v15 = vpop.f32.mrb[47].mxu1  ;;  %v11364_v45 = vpop.f32.mrb[47].mxu0 }
 0x5f3   : > { %12176 = vmatprep.subr.bf16.mxu1 %v13044_v32  ;;  %v7192_v14 = vrot.slane %v7190_v43, 7  ;;  %v15604_v36 = vrot.slane %v7177_v34, 4  ;;  %v15606_v60 = vrot.slane %v7180_v61, 5  ;;  %v15612_v25 = vrot.slane %v7190_v43, 4  ;;  %v17136_v20 = vld [vmem:[#allocation41_spill] sm:$0xff]  ;;  %v17137_v53 = vld [vmem:[#allocation42_spill] sm:$0xff] }
 0x5f4   : > { %v6394_v50 = vsel %vm14302_vm6, %v6389_v55, %v6393_v13  ;;  %v6403_v56 = vsel %vm14302_vm6, %v6398_v5, %v6402_v3  ;;  %v15614_v17 = vrot.slane %v7193_v40, 5  ;;  %v10824_v62 = vcombine.low %v7030_v16, %v7032_v0  ;;  %v13049_v5 = vld [vmem:[#allocation11 + $0x518] sm:$0xff]   ;;  %v6342_v0 = vld [vmem:[#allocation2 + $0x110] sm:$0x1] }
 0x5f5   : > { %v10765_v4 = vcombine.low %v6394_v50, %v6403_v56  ;;  %v6406_v26 = vor.u32 %v17135_v9, %v17134_v58  ;;  %v6409_v12 = vshll.u32 %v6340_v1, 16  ;;  %v6415_v55 = vor.u32 %v17137_v53, %v17136_v20  ;;  %v13052_v56 = vld [vmem:[#allocation11 + $0x5b0] sm:$0xff]   ;;  %v6343_v20 = vld [vmem:[#allocation2 + $0x11c] sm:$0x1] }
 0x5f6   : > { %12177 = vmatpush3.bf16.msra.mxu1 %v13044_v32  ;;  %v6418_v34 = vshll.u32 %v6341_v57, 16  ;;  %v7172_v43 = vshrl.u32 %v7029_v31, 16  ;;  %v7182_v13 = vor.u32 %v7180_v61, %v7179_v21  ;;  %7785 = vmatprep.mubr.bf16.mxu0 %v10824_v62  ;;  %v7185_v50 = vshrl.u32 %v7031_v46, 16  ;;  %v13053_v57 = vld [vmem:[#allocation11 + $0x570] sm:$0xff]   ;;  %v15625_v46 = vld [vmem:[#allocation2 + $0x19c] sm:$0xf] }
 0x5f7   : > { %12162 = vmatprep.mubr.bf16.mxu1 %v10765_v4  ;;  %v6407_v3 = vrot.slane %v6406_v26, 4  ;;  %v6411_v37 = vrot.slane %v6409_v12, 5  ;;  %v7195_v16 = vor.u32 %v7193_v40, %v7192_v14  ;;  %v6416_v58 = vrot.slane %v6415_v55, 4  ;;  %12178 = vmatprep.subr.bf16.mxu1 %v13046_v27  ;;  %v15627_v40 = vld [vmem:[#allocation2 + $0x1a8] sm:$0xf]  ;;  %v13051_v14 = vld [vmem:[#allocation11 + $0x520] sm:$0xff]  }
 0x5f8   : > { %v6420_v1 = vrot.slane %v6418_v34, 5  ;;  %v10805_v9 = vrot.slane %v7172_v43, 11  ;;  %v11306_v32 = vadd.f32 %v15581_v35, %v15571_v19  ;;  %v10806_v31 = vrot.slane %v7185_v50, 11  ;;  %11738 = vmatprep.subr.bf16.mxu0 %v13052_v56  ;;  %v15629_v62 = vpop.f32.mrb[48].mxu0  ;;  %v17139_v53 = vld [vmem:[#allocation55_spill] sm:$0xff]  ;;  %v17142_v34 = vld [vmem:[#allocation44_spill] sm:$0xff] }
 0x5f9   : > { %v6412_v61 = vsel %vm14302_vm6, %v6407_v3, %v6411_v37  ;;  %v11362_v21 = vadd.f32 %v11361_v28, %v15573_v54  ;;  %v11309_v4 = vadd.f32 %v11308_v15, %v11307_v49  ;;  %v11365_v54 = vadd.f32 %v11364_v45, %v11363_v29  ;;  %11739 = vmatpush3.bf16.msra.mxu0 %v13053_v57  ;;  %v11367_v29 = vpop.f32.mrb[49].mxu0  ;;  %v17143_v45 = vld [vmem:[#allocation45_spill] sm:$0xff]  ;;  %v6345_v56 = vld [vmem:[#allocation2 + $0x134] sm:$0x1]  ;;  %v7033_v57 = vld [vmem:[#allocation2 + $0x198] sm:$0x8] }
 0x5fa   : > { %v6421_v19 = vsel %vm14302_vm6, %v6416_v58, %v6420_v1  ;;  %v7183_v35 = vsel %vm14307_vm7, %v10805_v9, %v7182_v13  ;;  %12179 = vmatpush3.bf16.msra.mxu1 %v13046_v27  ;;  %v15636_v37 = vadd.f32 %v11306_v32, %v15457_v38  ;;  %v7196_v49 = vsel %vm14307_vm7, %v10806_v31, %v7195_v16  ;;  %v17141_v27 = vld [vmem:[#allocation43_spill] sm:$0xff]  ;;  %v17144_v13 = vld [vmem:[#allocation46_spill] sm:$0xff]  ;;  %v11369_v58 = vpop.f32.mrb[50].mxu0  ;;  %v13057_v31 = vld [vmem:[#allocation11 + $0x5b8] sm:$0xff]  }
 0x5fb   : > { %v10766_v28 = vcombine.low %v6412_v61, %v6421_v19  ;;  %v15641_v26 = vadd.f32 %v15470_v18, %v11362_v21  ;;  %12180 = vmatprep.subr.bf16.mxu1 %v13049_v5  ;;  %v15644_v12 = vadd.f32 %v11309_v4, %v15462_v39  ;;  %v10816_v15 = vcombine.low %v7183_v35, %v7196_v49  ;;  %v6344_v16 = vld [vmem:[#allocation2 + $0x128] sm:$0x1]  ;;  %v11370_v61 = vpop.f32.mrb[51].mxu0 }
 0x5fc   : > { %v15647_v55 = vadd.f32 %v17139_v53, %v11365_v54  ;;  %v6424_v38 = vor.u32 %v17142_v34, %v17141_v27  ;;  %v6427_v43 = vshll.u32 %v6342_v0, 16  ;;  %v6433_v3 = vor.u32 %v17144_v13, %v17143_v45  ;;  %v13054_v35 = vld [vmem:[#allocation11 + $0x528] sm:$0xff]   ;;  %11740 = vmatprep.subr.bf16.mxu0 %v13057_v31  ;;  %v13058_v53 = vld [vmem:[#allocation11 + $0x578] sm:$0xff]  }
 0x5fd   : > { %17138 = vst [vmem:[#allocation37_spill] sm:$0xff] %v15641_v26  ;;  %12163 = vmatmul.mubr.bf16.gmra.mrb[4].mxu1 %v10766_v28  ;;  %v6436_v18 = vshll.u32 %v6343_v20, 16  ;;  %v7203_v50 = vshrl.u32 %v15625_v46, 16  ;;  %v7206_v39 = vshll.u32 %v15625_v46, 16  ;;  %7786 = vmatmul.mubr.bf16.gmra.mrb[148].mxu0 %v10816_v15  ;;  %v7216_v0 = vshrl.u32 %v15627_v40, 16  ;;  %v17146_v45 = vld [vmem:[#allocation50_spill] sm:$0xff] }
 0x5fe   : > { %17140 = vst [vmem:[#allocation38_spill] sm:$0xff] %v15647_v55  ;;  %12181 = vmatpush3.bf16.msra.mxu1 %v13049_v5  ;;  %v6425_v1 = vrot.slane %v6424_v38, 4  ;;  %v6429_v9 = vrot.slane %v6427_v43, 5  ;;  %v7219_v32 = vshll.u32 %v15627_v40, 16  ;;  %v6434_v21 = vrot.slane %v6433_v3, 4  ;;  %v17145_v43 = vld [vmem:[#allocation49_spill] sm:$0xff]  ;;  %11741 = vmatpush3.bf16.msra.mxu0 %v13058_v53 }
 0x5ff   : > { %v6438_v20 = vrot.slane %v6436_v18, 5  ;;  %v7205_v4 = vrot.slane %v7203_v50, 7  ;;  %v15657_v19 = vrot.slane %v7203_v50, 4  ;;  %12182 = vmatprep.subr.bf16.mxu1 %v13051_v14  ;;  %v7218_v5 = vrot.slane %v7216_v0, 7  ;;  %v7035_v15 = vld [vmem:[#allocation2 + $0x1a4] sm:$0x8] }
 0x600   : > { %v6430_v54 = vsel %vm14302_vm6, %v6425_v1, %v6429_v9  ;;  %v15661_v28 = vrot.slane %v7206_v39, 5  ;;  %v15663_v49 = vrot.slane %v7216_v0, 4  ;;  %v15667_v34 = vrot.slane %v7219_v32, 5  ;;  %v15673_v3 = vpop.f32.mrb[52].mxu0  ;;  %v17147_v1 = vld [vmem:[#allocation51_spill] sm:$0xff]  ;;  %v17148_v9 = vld [vmem:[#allocation52_spill] sm:$0xff] }
 0x601   : > { %v6439_v27 = vsel %vm14302_vm6, %v6434_v21, %v6438_v20  ;;  %v10825_v38 = vcombine.low %v15625_v46, %v15627_v40  ;;  %v6442_v13 = vor.u32 %v17146_v45, %v17145_v43  ;;  %v6445_v50 = vshll.u32 %v6344_v16, 16  ;;  %v13056_v55 = vld [vmem:[#allocation11 + $0x530] sm:$0xff]   ;;  %v6346_v46 = vld [vmem:[#allocation2 + $0x140] sm:$0x1]  ;;  %v15677_v40 = vpop.f32.mrb[53].mxu0 }
 0x602   : > { %v10767_v18 = vcombine.low %v6430_v54, %v6439_v27  ;;  %v6451_v0 = vor.u32 %v17148_v9, %v17147_v1  ;;  %v6454_v31 = vshll.u32 %v6345_v56, 16  ;;  %12183 = vmatpush3.bf16.msra.mxu1 %v13051_v14  ;;  %v7198_v20 = vshrl.u32 %v7033_v57, 16  ;;  %v6347_v45 = vld [vmem:[#allocation2 + $0x14c] sm:$0x1]  ;;  %v7038_v1 = vld [vmem:[#allocation2 + $0x1b4] sm:$0xf] }
 0x603   : > { %7793 = vmatprep.mubr.bf16.mxu0 %v10825_v38  ;;  %v6443_v21 = vrot.slane %v6442_v13, 4  ;;  %v7208_v26 = vor.u32 %v7206_v39, %v7205_v4  ;;  %v7211_v51 = vshrl.u32 %v7035_v15, 16  ;;  %12184 = vmatprep.subr.bf16.mxu1 %v13054_v35  ;;  %v6447_v43 = vrot.slane %v6445_v50, 5  ;;  %v15680_v13 = vld [vmem:[#allocation2 + $0x1c0] sm:$0xf]  ;;  %v13059_v39 = vld [vmem:[#allocation11 + $0x538] sm:$0xff]  }
 0x604   : > { %12166 = vmatprep.mubr.bf16.mxu1 %v10767_v18  ;;  %v6452_v54 = vrot.slane %v6451_v0, 4  ;;  %v6456_v16 = vrot.slane %v6454_v31, 5  ;;  %v7221_v27 = vor.u32 %v7219_v32, %v7218_v5  ;;  %v10807_v56 = vrot.slane %v7198_v20, 11  ;;  %v17149_v15 = vld [vmem:[#allocation56_spill] sm:$0xff]  ;;  %v17150_v18 = vld [vmem:[#allocation57_spill] sm:$0xff]  ;;  %v15688_v50 = vpop.f32.mrb[54].mxu0 }
 0x605   : > { %v10808_v14 = vrot.slane %v7211_v51, 11  ;;  %v11368_v53 = vadd.f32 %v11367_v29, %v15629_v62  ;;  %v11371_v38 = vadd.f32 %v11370_v61, %v11369_v58  ;;  %v6448_v57 = vsel %vm14302_vm6, %v6443_v21, %v6447_v43  ;;  %v11376_v31 = vpop.f32.mrb[55].mxu0  ;;  %v17153_v21 = vld [vmem:[#allocation58_spill] sm:$0xff]  ;;  %v17154_v20 = vld [vmem:[#allocation59_spill] sm:$0xff] }
 0x606   : > { %v6457_v4 = vsel %vm14302_vm6, %v6452_v54, %v6456_v16  ;;  %12185 = vmatpush3.bf16.msra.mxu1 %v13054_v35  ;;  %v6460_v32 = vor.u32 %v17150_v18, %v17149_v15  ;;  %v6463_v5 = vshll.u32 %v6346_v46, 16  ;;  %v7209_v62 = vsel %vm14307_vm7, %v10807_v56, %v7208_v26  ;;  %v6348_v16 = vld [vmem:[#allocation2 + $0x158] sm:$0x1]  ;;  %v15709_v18 = vld [vmem:[#allocation11 + $0x5c0] sm:$0xff]  }
 0x607   : > { %v10768_v51 = vcombine.low %v6448_v57, %v6457_v4  ;;  %v7222_v29 = vsel %vm14307_vm7, %v10808_v14, %v7221_v27  ;;  %v15695_v58 = vadd.f32 %v15498_v11, %v11368_v53  ;;  %12186 = vmatprep.subr.bf16.mxu1 %v13056_v55  ;;  %v15698_v35 = vadd.f32 %v15508_v2, %v11371_v38  ;;  %v13062_v27 = vld [vmem:[#allocation11 + $0x640] sm:$0xff]   ;;  %v7037_v38 = vld [vmem:[#allocation2 + $0x1b0] sm:$0x8] }
 0x608   : > { %v10817_v61 = vcombine.low %v7209_v62, %v7222_v29  ;;  %v6461_v9 = vrot.slane %v6460_v32, 4  ;;  %v6465_v0 = vrot.slane %v6463_v5, 5  ;;  %v6469_v46 = vor.u32 %v17154_v20, %v17153_v21  ;;  %v6349_v53 = vld [vmem:[#allocation2 + $0x164] sm:$0x1]  ;;  %11806 = vmatprep.subr.bf16.mxu0 %v13062_v27 }
 0x609   : > { %17151 = vst [vmem:[#allocation41_spill] sm:$0xff] %v15695_v58  ;;  %17152 = vst [vmem:[#allocation42_spill] sm:$0xff] %v15698_v35  ;;  %12167 = vmatmul.mubr.bf16.gmra.mrb[8].mxu1 %v10768_v51  ;;  %v6472_v43 = vshll.u32 %v6347_v45, 16  ;;  %v7229_v26 = vshrl.u32 %v7038_v1, 16  ;;  %v7232_v54 = vshll.u32 %v7038_v1, 16  ;;  %v7242_v56 = vshrl.u32 %v15680_v13, 16 }
 0x60a   : > { %7794 = vmatmul.mubr.bf16.gmra.mrb[152].mxu0 %v10817_v61  ;;  %v6466_v11 = vsel %vm14302_vm6, %v6461_v9, %v6465_v0  ;;  %v7245_v2 = vshll.u32 %v15680_v13, 16  ;;  %v10826_v14 = vcombine.low %v7038_v1, %v15680_v13  ;;  %12187 = vmatpush3.bf16.msra.mxu1 %v13056_v55  ;;  %v6470_v57 = vrot.slane %v6469_v46, 4  ;;  %v7039_v1 = vld [vmem:[#allocation2 + $0x1bc] sm:$0x8]  ;;  %v17155_v61 = vld [vmem:[#allocation66_spill] sm:$0xff] }
 0x60b   : > { %v6474_v4 = vrot.slane %v6472_v43, 5  ;;  %v7231_v45 = vrot.slane %v7229_v26, 7  ;;  %v15707_v15 = vrot.slane %v7229_v26, 4  ;;  %12188 = vmatprep.subr.bf16.mxu1 %v13059_v39  ;;  %v7244_v32 = vrot.slane %v7242_v56, 7  ;;  %v7249_v43 = vld [vmem:[#allocation2 + $0xf8] sm:$0x1] }
 0x60c   : > { %v15711_v5 = vrot.slane %v7232_v54, 5  ;;  %v15713_v51 = vrot.slane %v7242_v56, 4  ;;  %v15715_v62 = vrot.slane %v7245_v2, 5  ;;  %7801 = vmatprep.mubr.bf16.mxu0 %v10826_v14  ;;  %v6478_v13 = vor.u32 %v15515_v30, %v15513_v8  ;;  %v7250_v35 = vld [vmem:[#allocation2 + $0x104] sm:$0x1]  ;;  %v13069_v58 = vld [vmem:[#allocation11 + $0x5d8] sm:$0xff]  }
 0x60d   : > { %v6475_v55 = vsel %vm14302_vm6, %v6470_v57, %v6474_v4  ;;  %v6481_v29 = vshll.u32 %v6348_v16, 16  ;;  %v6487_v9 = vor.u32 %v17155_v61, %v15517_v6  ;;  %v6490_v21 = vshll.u32 %v6349_v53, 16  ;;  %v7925_v16 = vld [vmem:[#allocation2 + $0x100] sm:$0xf]  ;;  %v17157_v4 = vld [vmem:[#allocation40_spill] sm:$0xff] }
 0x60e   : > { %v10769_v0 = vcombine.low %v6466_v11, %v6475_v55  ;;  %v7224_v20 = vshrl.u32 %v7037_v38, 16  ;;  %v7234_v46 = vor.u32 %v7232_v54, %v7231_v45  ;;  %12189 = vmatpush3.bf16.msra.mxu1 %v13059_v39  ;;  %v6479_v26 = vrot.slane %v6478_v13, 4  ;;  %v7927_v11 = vld [vmem:[#allocation2 + $0x10c] sm:$0xf]  ;;  %v17156_v38 = vld [vmem:[#allocation39_spill] sm:$0xff] }
 0x60f   : > { %v6483_v27 = vrot.slane %v6481_v29, 5  ;;  %v6488_v56 = vrot.slane %v6487_v9, 4  ;;  %v7237_v14 = vshrl.u32 %v7039_v1, 16  ;;  %12206 = vmatprep.subr.bf16.mxu1 %v15709_v18  ;;  %v6492_v57 = vrot.slane %v6490_v21, 5  ;;  %v11378_v1 = vpop.f32.mrb[56].mxu0  ;;  %v17160_v21 = vld [vmem:[#allocation47_spill] sm:$0xff] }
 0x610   : > { %12170 = vmatprep.mubr.bf16.mxu1 %v10769_v0  ;;  %v10809_v8 = vrot.slane %v7224_v20, 11  ;;  %v7247_v30 = vor.u32 %v7245_v2, %v7244_v32  ;;  %v11374_v6 = vadd.f32 %v15677_v40, %v15673_v3  ;;  %v11377_v53 = vadd.f32 %v11376_v31, %v15688_v50  ;;  %v11379_v32 = vpop.f32.mrb[57].mxu0  ;;  %v17161_v20 = vld [vmem:[#allocation48_spill] sm:$0xff] }
 0x611   : > { %v6484_v39 = vsel %vm14302_vm6, %v6479_v26, %v6483_v27  ;;  %v10810_v54 = vrot.slane %v7237_v14, 11  ;;  %v7267_v45 = vor.u32 %v17157_v4, %v17156_v38  ;;  %v6493_v55 = vsel %vm14302_vm6, %v6488_v56, %v6492_v57  ;;  %v11381_v61 = vpop.f32.mrb[58].mxu0  ;;  %v7251_v57 = vld [vmem:[#allocation2 + $0x110] sm:$0x1] }
 0x612   : > { %v7235_v2 = vsel %vm14307_vm7, %v10809_v8, %v7234_v46  ;;  %v15736_v3 = vadd.f32 %v15539_v24, %v11374_v6  ;;  %v7270_v40 = vshll.u32 %v7249_v43, 16  ;;  %v10770_v13 = vcombine.low %v6484_v39, %v6493_v55  ;;  %v11382_v27 = vpop.f32.mrb[59].mxu0  ;;  %v7252_v39 = vld [vmem:[#allocation2 + $0x11c] sm:$0x1] }
 0x613   : > { %v7248_v29 = vsel %vm14307_vm7, %v10810_v54, %v7247_v30  ;;  %v15741_v50 = vadd.f32 %v15547_v42, %v11377_v53  ;;  %v7268_v31 = vrot.slane %v7267_v45, 4  ;;  %v7276_v26 = vor.u32 %v17161_v20, %v17160_v21  ;;  %v7924_v54 = vld [vmem:[#allocation2 + $0xfc] sm:$0x8]  ;;  %v7926_v45 = vld [vmem:[#allocation2 + $0x108] sm:$0x8] }
 0x614   : > { %17158 = vst [vmem:[#allocation55_spill] sm:$0xff] %v15736_v3  ;;  %v10818_v9 = vcombine.low %v7235_v2, %v7248_v29  ;;  %v7272_v0 = vrot.slane %v7270_v40, 5  ;;  %v7279_v46 = vshll.u32 %v7250_v35, 16  ;;  %12171 = vmatmul.mubr.bf16.gmra.mrb[12].mxu1 %v10770_v13  ;;  %v7962_v24 = vshrl.u32 %v7925_v16, 16  ;;  %v7253_v29 = vld [vmem:[#allocation2 + $0x128] sm:$0x1] }
 0x615   : > { %17159 = vst [vmem:[#allocation43_spill] sm:$0xff] %v15741_v50  ;;  %v7965_v43 = vshll.u32 %v7925_v16, 16  ;;  %v7975_v56 = vshrl.u32 %v7927_v11, 16  ;;  %v7978_v14 = vshll.u32 %v7927_v11, 16  ;;  %v7277_v8 = vrot.slane %v7276_v26, 4 }
 0x616   : > { %7802 = vmatmul.mubr.bf16.gmra.mrb[156].mxu0 %v10818_v9  ;;  %v7273_v42 = vsel %vm14302_vm6, %v7268_v31, %v7272_v0  ;;  %v7281_v30 = vrot.slane %v7279_v46, 5  ;;  %v10883_v6 = vcombine.low %v7925_v16, %v7927_v11  ;;  %v7964_v53 = vrot.slane %v7962_v24, 7  ;;  %v15757_v0 = vpop.f32.mrb[60].mxu0  ;;  %v15759_v50 = vld [vmem:[#allocation2 + $0x118] sm:$0xf] }
 0x617   : > { %v7977_v38 = vrot.slane %v7975_v56, 7  ;;  %v15747_v4 = vrot.slane %v7962_v24, 4  ;;  %v15749_v35 = vrot.slane %v7965_v43, 5  ;;  %v15753_v2 = vrot.slane %v7975_v56, 4  ;;  %v7254_v24 = vld [vmem:[#allocation2 + $0x134] sm:$0x1] }
 0x618   : > { %v7282_v55 = vsel %vm14302_vm6, %v7277_v8, %v7281_v30  ;;  %v15755_v40 = vrot.slane %v7978_v14, 5  ;;  %8660 = vmatprep.mubr.bf16.mxu0 %v10883_v6  ;;  %v7288_v13 = vshll.u32 %v7251_v57, 16  ;;  %v7967_v11 = vor.u32 %v7965_v43, %v7964_v53  ;;  %v15761_v56 = vpop.f32.mrb[61].mxu0  ;;  %v17164_v57 = vld [vmem:[#allocation60_spill] sm:$0xff]  ;;  %v17165_v6 = vld [vmem:[#allocation61_spill] sm:$0xff] }
 0x619   : > { %17162 = vst [vmem:[#allocation44_spill] sm:$0xff] %v15753_v2  ;;  %v10827_v16 = vcombine.low %v7273_v42, %v7282_v55  ;;  %v7980_v31 = vor.u32 %v7978_v14, %v7977_v38  ;;  %v7297_v9 = vshll.u32 %v7252_v39, 16  ;;  %v7957_v20 = vshrl.u32 %v7924_v54, 16  ;;  %v15765_v14 = vld [vmem:[#allocation2 + $0x124] sm:$0xf]  ;;  %v17168_v38 = vld [vmem:[#allocation54_spill] sm:$0xff] }
 0x61a   : > { %17163 = vst [vmem:[#allocation45_spill] sm:$0xff] %v15755_v40  ;;  %v7290_v21 = vrot.slane %v7288_v13, 5  ;;  %v7970_v26 = vshrl.u32 %v7926_v45, 16  ;;  %v11380_v46 = vadd.f32 %v11379_v32, %v11378_v1  ;;  %v11383_v30 = vadd.f32 %v11382_v27, %v11381_v61  ;;  %v17166_v39 = vld [vmem:[#allocation53_spill] sm:$0xff]  ;;  %v7257_v40 = vld [vmem:[#allocation2 + $0x170] sm:$0x1] }
 0x61b   : > { %12190 = vmatprep.mubr.bf16.mxu1 %v10827_v16  ;;  %v7299_v8 = vrot.slane %v7297_v9, 5  ;;  %v7303_v42 = vor.u32 %v17165_v6, %v17164_v57  ;;  %v7306_v43 = vshll.u32 %v7253_v29, 16  ;;  %v10859_v53 = vrot.slane %v7957_v20, 11  ;;  %v13063_v9 = vld [vmem:[#allocation11 + $0x600] sm:$0xff]   ;;  %v17171_v20 = vld [vmem:[#allocation63_spill] sm:$0xff]  ;;  %v13067_v6 = vld [vmem:[#allocation11 + $0x648] sm:$0xff]  }
 0x61c   : > { %v7291_v54 = vsel %vm14302_vm6, %v17166_v39, %v7290_v21  ;;  %v10860_v1 = vrot.slane %v7970_v26, 11  ;;  %v15771_v32 = vadd.f32 %v15576_v44, %v11380_v46  ;;  %v15777_v61 = vadd.f32 %v15592_v59, %v11383_v30  ;;  %v13064_v21 = vld [vmem:[#allocation11 + $0x5c8] sm:$0xff]   ;;  %v15785_v46 = vpop.f32.mrb[62].mxu0 }
 0x61d   : > { %v7300_v45 = vsel %vm14302_vm6, %v17168_v38, %v7299_v8  ;;  %v7304_v27 = vrot.slane %v7303_v42, 4  ;;  %v7308_v55 = vrot.slane %v7306_v43, 5  ;;  %v7968_v29 = vsel %vm14307_vm7, %v10859_v53, %v7967_v11  ;;  %v17170_v44 = vld [vmem:[#allocation62_spill] sm:$0xff]  ;;  %v11388_v42 = vpop.f32.mrb[63].mxu0 }
 0x61e   : > { %17167 = vst [vmem:[#allocation46_spill] sm:$0xff] %v15771_v32  ;;  %17169 = vst [vmem:[#allocation49_spill] sm:$0xff] %v15777_v61  ;;  %v10828_v13 = vcombine.low %v7291_v54, %v7300_v45  ;;  %v7981_v16 = vsel %vm14307_vm7, %v10860_v1, %v7980_v31  ;;  %v7312_v26 = vor.u32 %v17171_v20, %v17170_v44  ;;  %v7315_v30 = vshll.u32 %v7254_v24, 16  ;;  %v7255_v54 = vld [vmem:[#allocation2 + $0x140] sm:$0x1]  ;;  %v15802_v2 = vpop.f32.mrb[64].mxu0 }
 0x61f   : > { %v10875_v8 = vcombine.low %v7968_v29, %v7981_v16  ;;  %v7309_v59 = vsel %vm14302_vm6, %v7304_v27, %v7308_v55  ;;  %v7988_v57 = vshrl.u32 %v15759_v50, 16  ;;  %v7991_v31 = vshll.u32 %v15759_v50, 16  ;;  %v7256_v45 = vld [vmem:[#allocation2 + $0x14c] sm:$0x1]  ;;  %v13066_v27 = vld [vmem:[#allocation11 + $0x5d0] sm:$0xff]  }
 0x620   : > { %12191 = vmatmul.mubr.bf16.vlgmr.msra.gmra.mrb[0].mxu1 %v10828_v13  ;;  %v7313_v11 = vrot.slane %v7312_v26, 4  ;;  %v8001_v43 = vshrl.u32 %v15765_v14, 16  ;;  %v8004_v39 = vshll.u32 %v15765_v14, 16  ;;  %v7317_v53 = vrot.slane %v7315_v30, 5  ;;  %v7928_v44 = vld [vmem:[#allocation2 + $0x114] sm:$0x8] }
 0x621   : > { %8661 = vmatmul.mubr.bf16.vlgmr.msra.gmra.mrb[160].mxu0 %v10875_v8  ;;  %12207 = vmatpush3.bf16.msra.mxu1 %v15709_v18  ;;  %v7990_v1 = vrot.slane %v7988_v57, 7  ;;  %v8198_v38 = vrot.slane %v7988_v57, 4  ;;  %v10884_v24 = vcombine.low %v15759_v50, %v15765_v14  ;;  %v8199_v13 = vrot.slane %v7991_v31, 5  ;;  %v17172_v18 = vld [vmem:[#allocation67_spill] sm:$0xff]  ;;  %v17173_v26 = vld [vmem:[#allocation68_spill] sm:$0xff] }
 0x622   : > { %11807 = vmatpush3.bf16.msra.mxu0 %v13063_v9  ;;  %12208 = vmatprep.subr.bf16.mxu1 %v13064_v21  ;;  %v8003_v55 = vrot.slane %v8001_v43, 7  ;;  %v8207_v29 = vrot.slane %v8001_v43, 4  ;;  %v8208_v16 = vrot.slane %v8004_v39, 5  ;;  %v7318_v20 = vsel %vm14302_vm6, %v7313_v11, %v7317_v53  ;;  %v7930_v14 = vld [vmem:[#allocation2 + $0x120] sm:$0x8]  ;;  %v13068_v9 = vld [vmem:[#allocation11 + $0x608] sm:$0xff]  }
 0x623   : > { %8668 = vmatprep.mubr.bf16.mxu0 %v10884_v24  ;;  %v7321_v8 = vor.u32 %v17173_v26, %v17172_v18  ;;  %v7324_v30 = vshll.u32 %v7255_v54, 16  ;;  %v7330_v50 = vor.u32 %v15529_v48, %v15527_v63  ;;  %11808 = vmatprep.subr.bf16.mxu0 %v13067_v6  ;;  %v13072_v57 = vld [vmem:[#allocation11 + $0x650] sm:$0xff]   ;;  %v10829_v61 = vcombine.low %v7309_v59, %v7318_v20 }
 0x624   : > { %v8200_v32 = vor.u32 %v8199_v13, %v8198_v38  ;;  %v8209_v43 = vor.u32 %v8208_v16, %v8207_v29  ;;  %v7333_v3 = vshll.u32 %v7256_v45, 16  ;;  %v7983_v54 = vshrl.u32 %v7928_v44, 16  ;;  %v13073_v18 = vld [vmem:[#allocation11 + $0x610] sm:$0xff]   ;;  %v7258_v38 = vld [vmem:[#allocation2 + $0x17c] sm:$0x1]  ;;  %v15810_v13 = vpop.f32.mrb[65].mxu0 }
 0x625   : > { %12209 = vmatpush3.bf16.msra.mxu1 %v13064_v21  ;;  %v7322_v11 = vrot.slane %v7321_v8, 4  ;;  %v7326_v53 = vrot.slane %v7324_v30, 5  ;;  %v7331_v24 = vrot.slane %v7330_v50, 4  ;;  %12194 = vmatprep.mubr.bf16.mxu1 %v10829_v61  ;;  %v7993_v59 = vor.u32 %v7991_v31, %v7990_v1  ;;  %v15808_v45 = vld [vmem:[#allocation2 + $0x130] sm:$0xf]  ;;  %v15821_v1 = vpop.f32.mrb[66].mxu0 }
 0x626   : > { %v15804_v48 = vrot.slane %v8200_v32, 4  ;;  %v15806_v63 = vrot.slane %v8209_v43, 4  ;;  %v7335_v6 = vrot.slane %v7333_v3, 5  ;;  %12210 = vmatprep.subr.bf16.mxu1 %v13066_v27  ;;  %v10861_v29 = vrot.slane %v7983_v54, 11  ;;  %11809 = vmatpush3.bf16.msra.mxu0 %v13068_v9  ;;  %v7935_v8 = vld [vmem:[#allocation2 + $0x13c] sm:$0xf] }
 0x627   : > { %v7327_v21 = vsel %vm14302_vm6, %v7322_v11, %v7326_v53  ;;  %v7996_v16 = vshrl.u32 %v7930_v14, 16  ;;  %v8006_v44 = vor.u32 %v8004_v39, %v8003_v55  ;;  %v11386_v3 = vadd.f32 %v15761_v56, %v15757_v0  ;;  %11810 = vmatprep.subr.bf16.mxu0 %v13072_v57  ;;  %v15825_v30 = vpop.f32.mrb[67].mxu0  ;;  %v7260_v9 = vld [vmem:[#allocation2 + $0x194] sm:$0x1]  ;;  %v13078_v57 = vld [vmem:[#allocation11 + $0x618] sm:$0xff]  }
 0x628   : > { %v7336_v32 = vsel %vm14302_vm6, %v7331_v24, %v7335_v6  ;;  %v11389_v61 = vadd.f32 %v11388_v42, %v15785_v46  ;;  %v7339_v31 = vor.u32 %v15564_v7, %v15558_v10  ;;  %v7994_v26 = vsel %vm14307_vm7, %v10861_v29, %v7993_v59  ;;  %v13071_v46 = vld [vmem:[#allocation11 + $0x5e0] sm:$0xff]   ;;  %v13077_v42 = vld [vmem:[#allocation11 + $0x658] sm:$0xff]  }
 0x629   : > { %v10830_v20 = vcombine.low %v7327_v21, %v7336_v32  ;;  %v10862_v39 = vrot.slane %v7996_v16, 11  ;;  %12211 = vmatpush3.bf16.msra.mxu1 %v13066_v27  ;;  %v7342_v55 = vshll.u32 %v7257_v40, 16  ;;  %v15828_v0 = vadd.f32 %v15636_v37, %v11386_v3  ;;  %v7259_v37 = vld [vmem:[#allocation2 + $0x188] sm:$0x1] }
 0x62a   : > { %12212 = vmatprep.subr.bf16.mxu1 %v13069_v58  ;;  %v15831_v56 = vadd.f32 %v15644_v12, %v11389_v61  ;;  %v7340_v10 = vrot.slane %v7339_v31, 4  ;;  %v7348_v7 = vor.u32 %v15568_v41, %v15566_v47  ;;  %v7351_v50 = vshll.u32 %v7258_v38, 16  ;;  %11811 = vmatpush3.bf16.msra.mxu0 %v13073_v18  ;;  %v7932_v47 = vld [vmem:[#allocation2 + $0x12c] sm:$0x8]  ;;  %v15839_v41 = vpop.f32.mrb[68].mxu0 }
 0x62b   : > { %12195 = vmatmul.mubr.bf16.gmra.mrb[4].mxu1 %v10830_v20  ;;  %v8007_v40 = vsel %vm14307_vm7, %v10862_v39, %v8006_v44  ;;  %v7344_v27 = vrot.slane %v7342_v55, 5  ;;  %v8014_v14 = vshrl.u32 %v15808_v45, 16  ;;  %v8017_v11 = vshll.u32 %v15808_v45, 16  ;;  %11812 = vmatprep.subr.bf16.mxu0 %v13077_v42  ;;  %v7934_v38 = vld [vmem:[#allocation2 + $0x138] sm:$0x8]  ;;  %v15843_v21 = vpop.f32.mrb[69].mxu0 }
 0x62c   : > { %v10876_v12 = vcombine.low %v7994_v26, %v8007_v40  ;;  %v7349_v43 = vrot.slane %v7348_v7, 4  ;;  %v8027_v53 = vshrl.u32 %v7935_v8, 16  ;;  %v7353_v54 = vrot.slane %v7351_v50, 5  ;;  %v13074_v32 = vld [vmem:[#allocation11 + $0x5e8] sm:$0xff]   ;;  %v7261_v20 = vld [vmem:[#allocation2 + $0x1a0] sm:$0x1] }
 0x62d   : > { %12213 = vmatpush3.bf16.msra.mxu1 %v13069_v58  ;;  %v7345_v24 = vsel %vm14302_vm6, %v7340_v10, %v7344_v27  ;;  %v8016_v6 = vrot.slane %v8014_v14, 7  ;;  %v8030_v59 = vshll.u32 %v7935_v8, 16  ;;  %v15845_v29 = vrot.slane %v8014_v14, 4  ;;  %v13076_v7 = vld [vmem:[#allocation11 + $0x5f0] sm:$0xff]   ;;  %v15860_v14 = vpop.f32.mrb[70].mxu0 }
 0x62e   : > { %8669 = vmatmul.mubr.bf16.gmra.mrb[164].mxu0 %v10876_v12  ;;  %v8029_v18 = vrot.slane %v8027_v53, 7  ;;  %v15847_v16 = vrot.slane %v8017_v11, 5  ;;  %v15849_v44 = vrot.slane %v8027_v53, 4  ;;  %12214 = vmatprep.subr.bf16.mxu1 %v13071_v46  ;;  %v7354_v58 = vsel %vm14302_vm6, %v7349_v43, %v7353_v54 }
 0x62f   : > { %v15853_v3 = vrot.slane %v8030_v59, 5  ;;  %v10885_v61 = vcombine.low %v15808_v45, %v7935_v8  ;;  %v7357_v31 = vor.u32 %v15606_v60, %v15604_v36  ;;  %11813 = vmatpush3.bf16.msra.mxu0 %v13078_v57  ;;  %v10831_v26 = vcombine.low %v7345_v24, %v7354_v58  ;;  %v15862_v57 = vpop.f32.mrb[71].mxu0  ;;  %v13081_v24 = vld [vmem:[#allocation11 + $0x660] sm:$0xff]   ;;  %v7263_v58 = vld [vmem:[#allocation2 + $0x1b8] sm:$0x1] }
 0x630   : > { %v7360_v39 = vshll.u32 %v7259_v37, 16  ;;  %v7366_v55 = vor.u32 %v15614_v17, %v15612_v25  ;;  %v7369_v10 = vshll.u32 %v7260_v9, 16  ;;  %v8009_v40 = vshrl.u32 %v7932_v47, 16  ;;  %v7262_v37 = vld [vmem:[#allocation2 + $0x1ac] sm:$0x1]  ;;  %11814 = vmatprep.subr.bf16.mxu0 %v13081_v24 }
 0x631   : > { %8676 = vmatprep.mubr.bf16.mxu0 %v10885_v61  ;;  %v7358_v42 = vrot.slane %v7357_v31, 4  ;;  %v8019_v27 = vor.u32 %v8017_v11, %v8016_v6  ;;  %v8022_v50 = vshrl.u32 %v7934_v38, 16  ;;  %12215 = vmatpush3.bf16.msra.mxu1 %v13071_v46  ;;  %v8032_v8 = vor.u32 %v8030_v59, %v8029_v18  ;;  %v7937_v47 = vld [vmem:[#allocation2 + $0x148] sm:$0xf]  ;;  %v17175_v38 = vld [vmem:[#allocation65_spill] sm:$0xff]  ;;  %v13079_v61 = vld [vmem:[#allocation11 + $0x5f8] sm:$0xff]  }
 0x632   : > { %12198 = vmatprep.mubr.bf16.mxu1 %v10831_v26  ;;  %v7362_v45 = vrot.slane %v7360_v39, 5  ;;  %v7367_v36 = vrot.slane %v7366_v55, 4  ;;  %v7371_v60 = vrot.slane %v7369_v10, 5  ;;  %12216 = vmatprep.subr.bf16.mxu1 %v13074_v32  ;;  %v10863_v25 = vrot.slane %v8009_v40, 11  ;;  %v7264_v55 = vld [vmem:[#allocation2 + $0x1c4] sm:$0x1] }
 0x633   : > { %v10864_v17 = vrot.slane %v8022_v50, 11  ;;  %v11424_v9 = vadd.f32 %v15810_v13, %v15802_v2  ;;  %v11427_v12 = vadd.f32 %v15825_v30, %v15821_v1  ;;  %v7375_v11 = vor.u32 %v15661_v28, %v15657_v19  ;;  %v17174_v13 = vld [vmem:[#allocation64_spill] sm:$0xff]  ;;  %v7939_v30 = vld [vmem:[#allocation2 + $0x154] sm:$0xf]  ;;  %v7938_v50 = vld [vmem:[#allocation2 + $0x150] sm:$0x8] }
 0x634   : > { %v7363_v46 = vsel %vm14302_vm6, %v7358_v42, %v7362_v45  ;;  %v7372_v43 = vsel %vm14302_vm6, %v7367_v36, %v7371_v60  ;;  %v7378_v53 = vshll.u32 %v7261_v20, 16  ;;  %v8020_v6 = vsel %vm14307_vm7, %v10863_v25, %v8019_v27  ;;  %v15888_v45 = vld [vmem:[#allocation11 + $0x680] sm:$0xff]  }
 0x635   : > { %v10832_v54 = vcombine.low %v7363_v46, %v7372_v43  ;;  %v8033_v2 = vsel %vm14307_vm7, %v10864_v17, %v8032_v8  ;;  %v15879_v1 = vadd.f32 %v17174_v13, %v11424_v9  ;;  %12217 = vmatpush3.bf16.msra.mxu1 %v13074_v32  ;;  %v15882_v18 = vadd.f32 %v17175_v38, %v11427_v12  ;;  %v7936_v32 = vld [vmem:[#allocation2 + $0x144] sm:$0x8]  ;;  %v15898_v9 = vld [vmem:[#allocation2 + $0x178] sm:$0xf] }
 0x636   : > { %v10877_v59 = vcombine.low %v8020_v6, %v8033_v2  ;;  %v7376_v19 = vrot.slane %v7375_v11, 4  ;;  %v7380_v28 = vrot.slane %v7378_v53, 5  ;;  %12218 = vmatprep.subr.bf16.mxu1 %v13076_v7  ;;  %v7384_v31 = vor.u32 %v15667_v34, %v15663_v49  ;;  %v13083_v11 = vld [vmem:[#allocation11 + $0x620] sm:$0xff]   ;;  %v15906_v6 = vpop.f32.mrb[72].mxu0 }
 0x637   : > { %12199 = vmatmul.mubr.bf16.gmra.mrb[8].mxu1 %v10832_v54  ;;  %v7387_v20 = vshll.u32 %v7262_v37, 16  ;;  %v8040_v26 = vshrl.u32 %v7937_v47, 16  ;;  %v8043_v39 = vshll.u32 %v7937_v47, 16  ;;  %v8053_v42 = vshrl.u32 %v7939_v30, 16  ;;  %11815 = vmatpush3.bf16.msra.mxu0 %v13083_v11  ;;  %v15908_v38 = vpop.f32.mrb[73].mxu0 }
 0x638   : > { %8677 = vmatmul.mubr.bf16.gmra.mrb[168].mxu0 %v10877_v59  ;;  %v7381_v10 = vsel %vm14302_vm6, %v7376_v19, %v7380_v28  ;;  %v8056_v40 = vshll.u32 %v7939_v30, 16  ;;  %v10886_v27 = vcombine.low %v7937_v47, %v7939_v30  ;;  %v7385_v36 = vrot.slane %v7384_v31, 4  ;;  %v7943_v31 = vld [vmem:[#allocation2 + $0x184] sm:$0xf] }
 0x639   : > { %v7389_v60 = vrot.slane %v7387_v20, 5  ;;  %v8042_v8 = vrot.slane %v8040_v26, 7  ;;  %v15890_v25 = vrot.slane %v8040_v26, 4  ;;  %12219 = vmatpush3.bf16.msra.mxu1 %v13076_v7  ;;  %v8055_v49 = vrot.slane %v8053_v42, 7  ;;  %v11437_v26 = vpop.f32.mrb[74].mxu0 }
 0x63a   : > { %v15892_v34 = vrot.slane %v8043_v39, 5  ;;  %v15894_v37 = vrot.slane %v8053_v42, 4  ;;  %v15896_v17 = vrot.slane %v8056_v40, 5  ;;  %8684 = vmatprep.mubr.bf16.mxu0 %v10886_v27  ;;  %12220 = vmatprep.subr.bf16.mxu1 %v13079_v61  ;;  %v7393_v46 = vor.u32 %v15711_v5, %v15707_v15  ;;  %v13086_v15 = vld [vmem:[#allocation11 + $0x668] sm:$0xff]   ;;  %v8165_v27 = vld [vmem:[#allocation2 + $0x110] sm:$0x1] }
 0x63b   : > { %v7390_v12 = vsel %vm14302_vm6, %v7385_v36, %v7389_v60  ;;  %v7396_v43 = vshll.u32 %v7263_v58, 16  ;;  %v7402_v7 = vor.u32 %v15715_v62, %v15713_v51  ;;  %v7405_v47 = vshll.u32 %v7264_v55, 16  ;;  %11816 = vmatprep.subr.bf16.mxu0 %v13086_v15  ;;  %v13088_v36 = vld [vmem:[#allocation11 + $0x628] sm:$0xff]   ;;  %v15946_v15 = vld [vmem:[#allocation2 + $0x190] sm:$0xf] }
 0x63c   : > { %v10833_v53 = vcombine.low %v7381_v10, %v7390_v12  ;;  %v8035_v24 = vshrl.u32 %v7936_v32, 16  ;;  %v8045_v54 = vor.u32 %v8043_v39, %v8042_v8  ;;  %v7394_v2 = vrot.slane %v7393_v46, 4  ;;  %v8164_v32 = vld [vmem:[#allocation2 + $0x104] sm:$0x1]  ;;  %v11438_v10 = vpop.f32.mrb[75].mxu0  ;;  %11817 = vmatpush3.bf16.msra.mxu0 %v13088_v36 }
 0x63d   : > { %v7398_v13 = vrot.slane %v7396_v43, 5  ;;  %v7403_v30 = vrot.slane %v7402_v7, 4  ;;  %v8048_v59 = vshrl.u32 %v7938_v50, 16  ;;  %12221 = vmatpush3.bf16.msra.mxu1 %v13079_v61  ;;  %v7407_v5 = vrot.slane %v7405_v47, 5  ;;  %v7940_v50 = vld [vmem:[#allocation2 + $0x174] sm:$0x8] }
 0x63e   : > { %12202 = vmatprep.mubr.bf16.mxu1 %v10833_v53  ;;  %v10865_v19 = vrot.slane %v8035_v24, 11  ;;  %v8058_v51 = vor.u32 %v8056_v40, %v8055_v49  ;;  %v11430_v62 = vadd.f32 %v15843_v21, %v15839_v41  ;;  %12238 = vmatprep.subr.bf16.mxu1 %v15888_v45  ;;  %v11433_v61 = vadd.f32 %v15862_v57, %v15860_v14  ;;  %v7942_v12 = vld [vmem:[#allocation2 + $0x180] sm:$0x8]  ;;  %v15933_v46 = vpop.f32.mrb[76].mxu0  ;;  %v8166_v53 = vld [vmem:[#allocation2 + $0x11c] sm:$0x1] }
 0x63f   : > { %v7399_v28 = vsel %vm14302_vm6, %v7394_v2, %v7398_v13  ;;  %v10866_v58 = vrot.slane %v8048_v59, 11  ;;  %v8066_v20 = vshrl.u32 %v15898_v9, 16  ;;  %v7408_v39 = vsel %vm14302_vm6, %v7403_v30, %v7407_v5  ;;  %v8167_v47 = vld [vmem:[#allocation2 + $0x128] sm:$0x1]  ;;  %v17176_v13 = vld [vmem:[#allocation44_spill] sm:$0xff]  ;;  %v17177_v30 = vld [vmem:[#allocation45_spill] sm:$0xff] }
 0x640   : > { %v8046_v41 = vsel %vm14307_vm7, %v10865_v19, %v8045_v54  ;;  %v15923_v21 = vadd.f32 %v15542_v22, %v11430_v62  ;;  %v8069_v55 = vshll.u32 %v15898_v9, 16  ;;  %v10834_v42 = vcombine.low %v7399_v28, %v7408_v39  ;;  %v15948_v5 = vpop.f32.mrb[77].mxu0 }
 0x641   : > { %v8059_v14 = vsel %vm14307_vm7, %v10866_v58, %v8058_v51  ;;  %v15929_v57 = vadd.f32 %v15556_v23, %v11433_v61  ;;  %v8068_v40 = vrot.slane %v8066_v20, 7  ;;  %v8079_v8 = vshrl.u32 %v7943_v31, 16 }
 0x642   : > { %v10878_v60 = vcombine.low %v8046_v41, %v8059_v14  ;;  %v8082_v49 = vshll.u32 %v7943_v31, 16  ;;  %v15931_v22 = vrot.slane %v8066_v20, 4  ;;  %12203 = vmatmul.mubr.bf16.gmra.mrb[12].mxu1 %v10834_v42  ;;  %v15935_v43 = vrot.slane %v8069_v55, 5  ;;  %v7947_v41 = vld [vmem:[#allocation2 + $0x19c] sm:$0xf] }
 0x643   : > { %v10887_v7 = vcombine.low %v15898_v9, %v7943_v31  ;;  %v8182_v23 = vor.u32 %v15749_v35, %v15747_v4  ;;  %v8185_v11 = vshll.u32 %v8164_v32, 16  ;;  %v8081_v24 = vrot.slane %v8079_v8, 7 }
 0x644   : > { %8685 = vmatmul.mubr.bf16.gmra.mrb[172].mxu0 %v10878_v60  ;;  %v15940_v54 = vrot.slane %v8079_v8, 4  ;;  %v15942_v2 = vrot.slane %v8082_v49, 5  ;;  %v8191_v59 = vor.u32 %v17177_v30, %v17176_v13  ;;  %v8194_v35 = vshll.u32 %v8165_v27, 16  ;;  %v15959_v60 = vpop.f32.mrb[78].mxu0  ;;  %v13091_v8 = vld [vmem:[#allocation11 + $0x670] sm:$0xff]  }
 0x645   : > { %8692 = vmatprep.mubr.bf16.mxu0 %v10887_v7  ;;  %v8183_v9 = vrot.slane %v8182_v23, 4  ;;  %v8187_v4 = vrot.slane %v8185_v11, 5  ;;  %v8061_v19 = vshrl.u32 %v7940_v50, 16  ;;  %v8071_v62 = vor.u32 %v8069_v55, %v8068_v40  ;;  %v17178_v23 = vld [vmem:[#allocation69_spill] sm:$0xff]  ;;  %v13084_v11 = vld [vmem:[#allocation11 + $0x688] sm:$0xff]   ;;  %11818 = vmatprep.subr.bf16.mxu0 %v13091_v8 }
 0x646   : > { %v8192_v51 = vrot.slane %v8191_v59, 4  ;;  %v8074_v28 = vshrl.u32 %v7942_v12, 16  ;;  %v8084_v58 = vor.u32 %v8082_v49, %v8081_v24  ;;  %v8196_v31 = vrot.slane %v8194_v35, 5  ;;  %v8168_v13 = vld [vmem:[#allocation2 + $0x134] sm:$0x1] }
 0x647   : > { %v8188_v61 = vsel %vm14302_vm6, %v8183_v9, %v8187_v4  ;;  %v10867_v20 = vrot.slane %v8061_v19, 11  ;;  %v8203_v39 = vshll.u32 %v8166_v53, 16  ;;  %v8212_v42 = vshll.u32 %v8167_v47, 16  ;;  %v17179_v53 = vld [vmem:[#allocation70_spill] sm:$0xff]  ;;  %v8169_v30 = vld [vmem:[#allocation2 + $0x140] sm:$0x1] }
 0x648   : > { %v10868_v32 = vrot.slane %v8074_v28, 11  ;;  %v11436_v14 = vadd.f32 %v15908_v38, %v15906_v6  ;;  %v11439_v36 = vadd.f32 %v11438_v10, %v11437_v26  ;;  %v8197_v27 = vsel %vm14302_vm6, %v8192_v51, %v8196_v31  ;;  %v15966_v38 = vpop.f32.mrb[79].mxu0  ;;  %v7944_v19 = vld [vmem:[#allocation2 + $0x18c] sm:$0x8]  ;;  %v13093_v51 = vld [vmem:[#allocation11 + $0x630] sm:$0xff]  }
 0x649   : > { %v8072_v55 = vsel %vm14307_vm7, %v10867_v20, %v8071_v62  ;;  %v8205_v40 = vrot.slane %v8203_v39, 5  ;;  %v8092_v50 = vshrl.u32 %v15946_v15, 16  ;;  %v10891_v49 = vcombine.low %v8188_v61, %v8197_v27  ;;  %v7946_v61 = vld [vmem:[#allocation2 + $0x198] sm:$0x8]  ;;  %v8170_v31 = vld [vmem:[#allocation2 + $0x14c] sm:$0x1]  ;;  %11819 = vmatpush3.bf16.msra.mxu0 %v13093_v51 }
 0x64a   : > { %v8085_v12 = vsel %vm14307_vm7, %v10868_v32, %v8084_v58  ;;  %v8214_v7 = vrot.slane %v8212_v42, 5  ;;  %v15964_v6 = vadd.f32 %v17178_v23, %v11436_v14  ;;  %v15972_v47 = vadd.f32 %v17179_v53, %v11439_v36  ;;  %v15983_v20 = vpop.f32.mrb[80].mxu0  ;;  %v8171_v14 = vld [vmem:[#allocation2 + $0x158] sm:$0x1]  ;;  %v13087_v23 = vld [vmem:[#allocation11 + $0x690] sm:$0xff]  }
 0x64b   : > { %v10879_v26 = vcombine.low %v8072_v55, %v8085_v12  ;;  %v8206_v10 = vsel %vm14302_vm6, %v15804_v48, %v8205_v40  ;;  %v8094_v24 = vrot.slane %v8092_v50, 7  ;;  %12222 = vmatprep.mubr.bf16.mxu1 %v10891_v49  ;;  %v8095_v9 = vshll.u32 %v15946_v15, 16 }
 0x64c   : > { %v8215_v59 = vsel %vm14302_vm6, %v15806_v63, %v8214_v7  ;;  %v8105_v4 = vshrl.u32 %v7947_v41, 16  ;;  %v8108_v35 = vshll.u32 %v7947_v41, 16  ;;  %v15978_v62 = vrot.slane %v8092_v50, 4 }
 0x64d   : > { %8693 = vmatmul.mubr.bf16.gmra.mrb[176].mxu0 %v10879_v26  ;;  %v10892_v48 = vcombine.low %v8206_v10, %v8215_v59  ;;  %v10888_v28 = vcombine.low %v15946_v15, %v7947_v41  ;;  %v8218_v58 = vor.u32 %v15847_v16, %v15845_v29  ;;  %v15985_v39 = vrot.slane %v8095_v9, 5  ;;  %v15993_v41 = vpop.f32.mrb[81].mxu0  ;;  %v7949_v26 = vld [vmem:[#allocation2 + $0x1a8] sm:$0xf] }
 0x64e   : > { %v8107_v63 = vrot.slane %v8105_v4, 7  ;;  %v15987_v32 = vrot.slane %v8105_v4, 4  ;;  %v15989_v42 = vrot.slane %v8108_v35, 5  ;;  %v8221_v15 = vshll.u32 %v8168_v13, 16 }
 0x64f   : > { %12223 = vmatmul.mubr.bf16.vlgmr.msra.gmra.mrb[0].mxu1 %v10892_v48  ;;  %8700 = vmatprep.mubr.bf16.mxu0 %v10888_v28  ;;  %v8219_v36 = vrot.slane %v8218_v58, 4  ;;  %v8227_v29 = vor.u32 %v15853_v3, %v15849_v44  ;;  %v8230_v16 = vshll.u32 %v8169_v30, 16  ;;  %v8087_v27 = vshrl.u32 %v7944_v19, 16  ;;  %v13089_v28 = vld [vmem:[#allocation11 + $0x698] sm:$0xff]  }
 0x650   : > { %12239 = vmatpush3.bf16.msra.mxu1 %v15888_v45  ;;  %v8097_v55 = vor.u32 %v8095_v9, %v8094_v24  ;;  %v8100_v40 = vshrl.u32 %v7946_v61, 16  ;;  %v8110_v50 = vor.u32 %v8108_v35, %v8107_v63  ;;  %v8223_v8 = vrot.slane %v8221_v15, 5  ;;  %v16000_v45 = vpop.f32.mrb[82].mxu0  ;;  %v8172_v63 = vld [vmem:[#allocation2 + $0x17c] sm:$0x1]  ;;  %v17180_v15 = vld [vmem:[#allocation37_spill] sm:$0xff] }
 0x651   : > { %12240 = vmatprep.subr.bf16.mxu1 %v13084_v11  ;;  %v8228_v49 = vrot.slane %v8227_v29, 4  ;;  %v8232_v12 = vrot.slane %v8230_v16, 5  ;;  %v8236_v7 = vor.u32 %v15892_v34, %v15890_v25  ;;  %v10869_v10 = vrot.slane %v8087_v27, 11  ;;  %v7948_v16 = vld [vmem:[#allocation2 + $0x1a4] sm:$0x8] }
 0x652   : > { %v10870_v44 = vrot.slane %v8100_v40, 11  ;;  %v8239_v3 = vshll.u32 %v8170_v31, 16  ;;  %v8245_v53 = vor.u32 %v15896_v17, %v15894_v37  ;;  %v8224_v24 = vsel %vm14302_vm6, %v8219_v36, %v8223_v8  ;;  %v7951_v37 = vld [vmem:[#allocation2 + $0x1b4] sm:$0xf]  ;;  %v16010_v17 = vpop.f32.mrb[83].mxu0  ;;  %v13092_v27 = vld [vmem:[#allocation11 + $0x6a0] sm:$0xff]  }
 0x653   : > { %v8233_v13 = vsel %vm14302_vm6, %v8228_v49, %v8232_v12  ;;  %v8237_v30 = vrot.slane %v8236_v7, 4  ;;  %v8248_v59 = vshll.u32 %v8171_v14, 16  ;;  %v8098_v34 = vsel %vm14307_vm7, %v10869_v10, %v8097_v55  ;;  %v8173_v14 = vld [vmem:[#allocation2 + $0x188] sm:$0x1]  ;;  %v7950_v8 = vld [vmem:[#allocation2 + $0x1b0] sm:$0x8] }
 0x654   : > { %12241 = vmatpush3.bf16.msra.mxu1 %v13084_v11  ;;  %v10893_v25 = vcombine.low %v8224_v24, %v8233_v13  ;;  %v8111_v9 = vsel %vm14307_vm7, %v10870_v44, %v8110_v50  ;;  %v8241_v4 = vrot.slane %v8239_v3, 5  ;;  %v8246_v19 = vrot.slane %v8245_v53, 4  ;;  %v17181_v40 = vld [vmem:[#allocation38_spill] sm:$0xff]  ;;  %v8174_v44 = vld [vmem:[#allocation2 + $0x194] sm:$0x1] }
 0x655   : > { %v10880_v35 = vcombine.low %v8098_v34, %v8111_v9  ;;  %v8250_v51 = vrot.slane %v8248_v59, 5  ;;  %12242 = vmatprep.subr.bf16.mxu1 %v13087_v23  ;;  %v11442_v48 = vadd.f32 %v15948_v5, %v15933_v46  ;;  %v11445_v58 = vadd.f32 %v15966_v38, %v15959_v60  ;;  %v8175_v3 = vld [vmem:[#allocation2 + $0x1a0] sm:$0x1] }
 0x656   : > { %12226 = vmatprep.mubr.bf16.mxu1 %v10893_v25  ;;  %v8242_v11 = vsel %vm14302_vm6, %v8237_v30, %v8241_v4  ;;  %v8118_v61 = vshrl.u32 %v7949_v26, 16  ;;  %v8121_v31 = vshll.u32 %v7949_v26, 16  ;;  %v8131_v46 = vshrl.u32 %v7951_v37, 16  ;;  %v13096_v30 = vld [vmem:[#allocation11 + $0x678] sm:$0xff]   ;;  %v13094_v4 = vld [vmem:[#allocation11 + $0x6a8] sm:$0xff]  }
 0x657   : > { %8701 = vmatmul.mubr.bf16.gmra.mrb[180].mxu0 %v10880_v35  ;;  %v8251_v36 = vsel %vm14302_vm6, %v8246_v19, %v8250_v51  ;;  %v16021_v29 = vadd.f32 %v17180_v15, %v11442_v48  ;;  %v8134_v5 = vshll.u32 %v7951_v37, 16  ;;  %v16024_v50 = vadd.f32 %v17181_v40, %v11445_v58  ;;  %11820 = vmatprep.subr.bf16.mxu0 %v13096_v30  ;;  %v7955_v15 = vld [vmem:[#allocation2 + $0x1cc] sm:$0xf] }
 0x658   : > { %v10894_v55 = vcombine.low %v8242_v11, %v8251_v36  ;;  %12243 = vmatpush3.bf16.msra.mxu1 %v13087_v23  ;;  %v8120_v60 = vrot.slane %v8118_v61, 7  ;;  %v16026_v38 = vrot.slane %v8118_v61, 4  ;;  %v8133_v49 = vrot.slane %v8131_v46, 7 }
 0x659   : > { %12244 = vmatprep.subr.bf16.mxu1 %v13089_v28  ;;  %v16028_v12 = vrot.slane %v8121_v31, 5  ;;  %v16030_v7 = vrot.slane %v8131_v46, 4  ;;  %v16032_v10 = vrot.slane %v8134_v5, 5  ;;  %v10889_v53 = vcombine.low %v7949_v26, %v7951_v37  ;;  %v16038_v26 = vld [vmem:[#allocation2 + $0x1c0] sm:$0xf]  ;;  %v13098_v37 = vld [vmem:[#allocation11 + $0x638] sm:$0xff]  }
 0x65a   : > { %12227 = vmatmul.mubr.bf16.gmra.mrb[4].mxu1 %v10894_v55  ;;  %v8254_v23 = vor.u32 %v15935_v43, %v15931_v22  ;;  %v8257_v24 = vshll.u32 %v8172_v63, 16  ;;  %v8263_v13 = vor.u32 %v15942_v2, %v15940_v54  ;;  %v8266_v59 = vshll.u32 %v8173_v14, 16  ;;  %v16042_v2 = vpop.f32.mrb[84].mxu0  ;;  %11821 = vmatpush3.bf16.msra.mxu0 %v13098_v37  ;;  %v7954_v37 = vld [vmem:[#allocation2 + $0x1c8] sm:$0x8] }
 0x65b   : > { %v8113_v25 = vshrl.u32 %v7948_v16, 16  ;;  %v8123_v34 = vor.u32 %v8121_v31, %v8120_v60  ;;  %v8126_v9 = vshrl.u32 %v7950_v8, 16  ;;  %8708 = vmatprep.mubr.bf16.mxu0 %v10889_v53  ;;  %v8136_v48 = vor.u32 %v8134_v5, %v8133_v49  ;;  %v16048_v63 = vpop.f32.mrb[85].mxu0 }
 0x65c   : > { %12245 = vmatpush3.bf16.msra.mxu1 %v13089_v28  ;;  %v8255_v35 = vrot.slane %v8254_v23, 4  ;;  %v8259_v19 = vrot.slane %v8257_v24, 5  ;;  %v8264_v51 = vrot.slane %v8263_v13, 4  ;;  %v8268_v22 = vrot.slane %v8266_v59, 5  ;;  %v16056_v46 = vpop.f32.mrb[86].mxu0 }
 0x65d   : > { %v10871_v43 = vrot.slane %v8113_v25, 11  ;;  %v10872_v11 = vrot.slane %v8126_v9, 11  ;;  %v8272_v54 = vor.u32 %v15985_v39, %v15978_v62  ;;  %12246 = vmatprep.subr.bf16.mxu1 %v13092_v27  ;;  %v8275_v58 = vshll.u32 %v8174_v44, 16  ;;  %v16058_v55 = vpop.f32.mrb[87].mxu0  ;;  %v13097_v44 = vld [vmem:[#allocation11 + $0x6b0] sm:$0xff]  }
 0x65e   : > { %v8260_v28 = vsel %vm14302_vm6, %v8255_v35, %v8259_v19  ;;  %v8281_v61 = vor.u32 %v15989_v42, %v15987_v32  ;;  %v8284_v31 = vshll.u32 %v8175_v3, 16  ;;  %v8269_v14 = vsel %vm14302_vm6, %v8264_v51, %v8268_v22  ;;  %v8176_v24 = vld [vmem:[#allocation2 + $0x1ac] sm:$0x1]  ;;  %v16068_v13 = vpop.f32.mrb[88].mxu0  ;;  %v8177_v25 = vld [vmem:[#allocation2 + $0x1b8] sm:$0x1] }
 0x65f   : > { %v8124_v62 = vsel %vm14307_vm7, %v10871_v43, %v8123_v34  ;;  %v8137_v39 = vsel %vm14307_vm7, %v10872_v11, %v8136_v48  ;;  %v8273_v36 = vrot.slane %v8272_v54, 4  ;;  %v10895_v5 = vcombine.low %v8260_v28, %v8269_v14  ;;  %v7952_v34 = vld [vmem:[#allocation2 + $0x1bc] sm:$0x8]  ;;  %v16078_v9 = vpop.f32.mrb[89].mxu0 }
 0x660   : > { %v10881_v16 = vcombine.low %v8124_v62, %v8137_v39  ;;  %v8277_v32 = vrot.slane %v8275_v58, 5  ;;  %v8282_v42 = vrot.slane %v8281_v61, 4  ;;  %12247 = vmatpush3.bf16.msra.mxu1 %v13092_v27  ;;  %v8286_v40 = vrot.slane %v8284_v31, 5  ;;  %v16080_v22 = vpop.f32.mrb[90].mxu0  ;;  %v13099_v58 = vld [vmem:[#allocation11 + $0x6b8] sm:$0xff]  }
 0x661   : > { %v11448_v60 = vadd.f32 %v15993_v41, %v15983_v20  ;;  %12248 = vmatprep.subr.bf16.mxu1 %v13094_v4  ;;  %v11451_v8 = vadd.f32 %v16010_v17, %v16000_v45  ;;  %v8144_v49 = vshrl.u32 %v16038_v26, 16  ;;  %12230 = vmatprep.mubr.bf16.mxu1 %v10895_v5  ;;  %v8147_v27 = vshll.u32 %v16038_v26, 16  ;;  %v17182_v41 = vld [vmem:[#allocation41_spill] sm:$0xff]  ;;  %v17184_v17 = vld [vmem:[#allocation42_spill] sm:$0xff]  ;;  %v16085_v61 = vpop.f32.mrb[91].mxu0 }
 0x662   : > { %8709 = vmatmul.mubr.bf16.gmra.mrb[184].mxu0 %v10881_v16  ;;  %v8278_v3 = vsel %vm14302_vm6, %v8273_v36, %v8277_v32  ;;  %v8157_v53 = vshrl.u32 %v7955_v15, 16  ;;  %v8160_v23 = vshll.u32 %v7955_v15, 16  ;;  %v8287_v20 = vsel %vm14302_vm6, %v8282_v42, %v8286_v40  ;;  %v8178_v39 = vld [vmem:[#allocation2 + $0x1c4] sm:$0x1]  ;;  %v16089_v36 = vpop.f32.mrb[92].mxu0 }
 0x663   : > { %v16073_v45 = vadd.f32 %v17182_v41, %v11448_v60  ;;  %v16076_v30 = vadd.f32 %v17184_v17, %v11451_v8  ;;  %v8146_v59 = vrot.slane %v8144_v49, 7  ;;  %v10896_v35 = vcombine.low %v8278_v3, %v8287_v20 }
 0x664   : > { %12249 = vmatpush3.bf16.msra.mxu1 %v13094_v4  ;;  %v8159_v19 = vrot.slane %v8157_v53, 7  ;;  %v8306_v51 = vrot.slane %v8144_v49, 4  ;;  %v8307_v48 = vrot.slane %v8147_v27, 5  ;;  %v8315_v43 = vrot.slane %v8157_v53, 4 }
 0x665   : > { %17183 = vst [vmem:[#allocation50_spill] sm:$0xff] %v16073_v45  ;;  %17185 = vst [vmem:[#allocation51_spill] sm:$0xff] %v16076_v30  ;;  %v8316_v11 = vrot.slane %v8160_v23, 5  ;;  %v10890_v54 = vcombine.low %v16038_v26, %v7955_v15  ;;  %v8290_v28 = vor.u32 %v16028_v12, %v16026_v38  ;;  %12250 = vmatprep.subr.bf16.mxu1 %v13097_v44  ;;  %12231 = vmatmul.mubr.bf16.gmra.mrb[8].mxu1 %v10896_v35  ;;  %v8179_v38 = vld [vmem:[#allocation2 + $0x1d0] sm:$0x1] }
 0x666   : > { %v8293_v31 = vshll.u32 %v8176_v24, 16  ;;  %v8299_v4 = vor.u32 %v16032_v10, %v16030_v7  ;;  %v8302_v14 = vshll.u32 %v8177_v25, 16  ;;  %v8139_v62 = vshrl.u32 %v7952_v34, 16  ;;  %v16097_v24 = vpop.f32.mrb[93].mxu0  ;;  %v9088_v45 = vld [vmem:[#allocation2 + $0x194] sm:$0x1] }
 0x667   : > { %8716 = vmatprep.mubr.bf16.mxu0 %v10890_v54  ;;  %v8291_v5 = vrot.slane %v8290_v28, 4  ;;  %v8149_v26 = vor.u32 %v8147_v27, %v8146_v59  ;;  %v8152_v15 = vshrl.u32 %v7954_v37, 16  ;;  %v8162_v16 = vor.u32 %v8160_v23, %v8159_v19  ;;  %v8840_v23 = vld [vmem:[#allocation2 + $0x10c] sm:$0xf]  ;;  %v8842_v59 = vld [vmem:[#allocation2 + $0x118] sm:$0xf] }
 0x668   : > { %v8295_v12 = vrot.slane %v8293_v31, 5  ;;  %v8300_v32 = vrot.slane %v8299_v4, 4  ;;  %v8304_v42 = vrot.slane %v8302_v14, 5  ;;  %v10873_v40 = vrot.slane %v8139_v62, 11  ;;  %12251 = vmatpush3.bf16.msra.mxu1 %v13097_v44  ;;  %v17186_v31 = vld [vmem:[#allocation55_spill] sm:$0xff] }
 0x669   : > { %v10874_v60 = vrot.slane %v8152_v15, 11  ;;  %v8308_v8 = vor.u32 %v8307_v48, %v8306_v51  ;;  %v8311_v49 = vshll.u32 %v8178_v39, 16  ;;  %v8317_v7 = vor.u32 %v8316_v11, %v8315_v43  ;;  %12252 = vmatprep.subr.bf16.mxu1 %v13099_v58  ;;  %v16103_v51 = vpop.f32.mrb[94].mxu0  ;;  %v9079_v4 = vld [vmem:[#allocation2 + $0x110] sm:$0x1] }
 0x66a   : > { %v8296_v10 = vsel %vm14302_vm6, %v8291_v5, %v8295_v12  ;;  %v8305_v3 = vsel %vm14302_vm6, %v8300_v32, %v8304_v42  ;;  %v8150_v27 = vsel %vm14307_vm7, %v10873_v40, %v8149_v26  ;;  %v8320_v53 = vshll.u32 %v8179_v38, 16  ;;  %v16109_v54 = vpop.f32.mrb[95].mxu0  ;;  %v9080_v14 = vld [vmem:[#allocation2 + $0x11c] sm:$0x1]  ;;  %v17188_v39 = vld [vmem:[#allocation43_spill] sm:$0xff] }
 0x66b   : > { %v10897_v20 = vcombine.low %v8296_v10, %v8305_v3  ;;  %v8163_v44 = vsel %vm14307_vm7, %v10874_v60, %v8162_v16  ;;  %v8309_v41 = vrot.slane %v8308_v8, 4  ;;  %v8313_v17 = vrot.slane %v8311_v49, 5  ;;  %v8839_v26 = vld [vmem:[#allocation2 + $0x108] sm:$0x8]  ;;  %v8841_v15 = vld [vmem:[#allocation2 + $0x114] sm:$0x8] }
 0x66c   : > { %v10882_v25 = vcombine.low %v8150_v27, %v8163_v44  ;;  %v8318_v34 = vrot.slane %v8317_v7, 4  ;;  %v8322_v35 = vrot.slane %v8320_v53, 5  ;;  %v11454_v19 = vadd.f32 %v16048_v63, %v16042_v2  ;;  %12253 = vmatpush3.bf16.msra.mxu1 %v13099_v58  ;;  %v16119_v42 = vld [vmem:[#allocation2 + $0x124] sm:$0xf]  ;;  %v16121_v53 = vld [vmem:[#allocation2 + $0x130] sm:$0xf] }
 0x66d   : > { %12234 = vmatprep.mubr.bf16.mxu1 %v10897_v20  ;;  %v8314_v48 = vsel %vm14302_vm6, %v8309_v41, %v8313_v17  ;;  %v11457_v37 = vadd.f32 %v16058_v55, %v16056_v46  ;;  %v8877_v43 = vshrl.u32 %v8840_v23, 16  ;;  %v8880_v11 = vshll.u32 %v8840_v23, 16  ;;  %v9081_v20 = vld [vmem:[#allocation2 + $0x128] sm:$0x1]  ;;  %v16123_v44 = vpop.f32.mrb[96].mxu0 }
 0x66e   : > { %8717 = vmatmul.mubr.bf16.gmra.mrb[188].mxu0 %v10882_v25  ;;  %v8323_v28 = vsel %vm14302_vm6, %v8318_v34, %v8322_v35  ;;  %v16114_v2 = vadd.f32 %v17186_v31, %v11454_v19  ;;  %v8890_v63 = vshrl.u32 %v8842_v59, 16  ;;  %v8893_v58 = vshll.u32 %v8842_v59, 16  ;;  %v9082_v35 = vld [vmem:[#allocation2 + $0x134] sm:$0x1]  ;;  %v16126_v19 = vpop.f32.mrb[97].mxu0 }
 0x66f   : > { %v10898_v62 = vcombine.low %v8314_v48, %v8323_v28  ;;  %v16117_v5 = vadd.f32 %v17188_v39, %v11457_v37  ;;  %v8879_v46 = vrot.slane %v8877_v43, 7  ;;  %v9095_v55 = vrot.slane %v8877_v43, 4 }
 0x670   : > { %17187 = vst [vmem:[#allocation52_spill] sm:$0xff] %v16114_v2  ;;  %v8892_v16 = vrot.slane %v8890_v63, 7  ;;  %v9096_v38 = vrot.slane %v8880_v11, 5  ;;  %v9104_v12 = vrot.slane %v8890_v63, 4  ;;  %v9105_v32 = vrot.slane %v8893_v58, 5 }
 0x671   : > { %17189 = vst [vmem:[#allocation56_spill] sm:$0xff] %v16117_v5  ;;  %12235 = vmatmul.mubr.bf16.gmra.mrb[12].mxu1 %v10898_v62  ;;  %v8882_v40 = vor.u32 %v8880_v11, %v8879_v46  ;;  %v10947_v60 = vcombine.low %v8840_v23, %v8842_v59  ;;  %v9100_v8 = vshll.u32 %v9079_v4, 16  ;;  %v9109_v49 = vshll.u32 %v9080_v14, 16  ;;  %v16128_v23 = vpop.f32.mrb[48].mxu1  ;;  %v16131_v11 = vpop.f32.mrb[98].mxu0 }
 0x672   : > { %v8895_v7 = vor.u32 %v8893_v58, %v8892_v16  ;;  %v9097_v10 = vor.u32 %v9096_v38, %v9095_v55  ;;  %v9106_v3 = vor.u32 %v9105_v32, %v9104_v12  ;;  %v8872_v27 = vshrl.u32 %v8839_v26, 16  ;;  %v16133_v28 = vpop.f32.mrb[49].mxu1  ;;  %v16139_v14 = vpop.f32.mrb[99].mxu0  ;;  %v9085_v5 = vld [vmem:[#allocation2 + $0x158] sm:$0x1] }
 0x673   : > { %9575 = vmatprep.mubr.bf16.mxu0 %v10947_v60  ;;  %v9102_v41 = vrot.slane %v9100_v8, 5  ;;  %v9111_v17 = vrot.slane %v9109_v49, 5  ;;  %v8885_v25 = vshrl.u32 %v8841_v15, 16  ;;  %v8903_v34 = vshrl.u32 %v16119_v42, 16  ;;  %v16141_v62 = vpop.f32.mrb[50].mxu1  ;;  %v16151_v15 = vpop.f32.mrb[100].mxu0 }
 0x674   : > { %v9098_v59 = vrot.slane %v9097_v10, 4  ;;  %v9107_v48 = vrot.slane %v9106_v3, 4  ;;  %v10923_v37 = vrot.slane %v8872_v27, 11  ;;  %v16980_v43 = vshll.u32 %v16119_v42, 16  ;;  %17190 = vst [vmem:[#allocation57_spill] sm:$0xff] %v16141_v62 }
 0x675   : > { %v10924_v31 = vrot.slane %v8885_v25, 11  ;;  %v16979_v63 = vshrl.u32 %v16121_v53, 16  ;;  %v16978_v58 = vshll.u32 %v16121_v53, 16  ;;  %v9113_v4 = vrot.slane %v8903_v34, 4  ;;  %v16157_v60 = vld [vmem:[#allocation2 + $0x13c] sm:$0xf] }
 0x676   : > { %v9103_v39 = vsel %vm14302_vm6, %v9098_v59, %v9102_v41  ;;  %v9112_v46 = vsel %vm14302_vm6, %v9107_v48, %v9111_v17  ;;  %v8883_v55 = vsel %vm14307_vm7, %v10923_v37, %v8882_v40  ;;  %v9114_v26 = vrot.slane %v16980_v43, 5  ;;  %v16161_v3 = vld [vmem:[#allocation2 + $0x148] sm:$0xf]  ;;  %v9083_v17 = vld [vmem:[#allocation2 + $0x140] sm:$0x1]  ;;  %v16169_v25 = vpop.f32.mrb[101].mxu0 }
 0x677   : > { %v10955_v16 = vcombine.low %v9103_v39, %v9112_v46  ;;  %v8896_v38 = vsel %vm14307_vm7, %v10924_v31, %v8895_v7  ;;  %v9118_v12 = vshll.u32 %v9081_v20, 16  ;;  %v9122_v32 = vrot.slane %v16979_v63, 4  ;;  %v9084_v31 = vld [vmem:[#allocation2 + $0x14c] sm:$0x1]  ;;  %v16211_v43 = vld [vmem:[#allocation2 + $0x160] sm:$0xf] }
 0x678   : > { %v10939_v8 = vcombine.low %v8883_v55, %v8896_v38  ;;  %v9115_v49 = vor.u32 %v9114_v26, %v9113_v4  ;;  %v9123_v40 = vrot.slane %v16978_v58, 5  ;;  %v9127_v10 = vshll.u32 %v9082_v35, 16  ;;  %v16172_v4 = vpop.f32.mrb[102].mxu0  ;;  %v17191_v39 = vld [vmem:[#allocation46_spill] sm:$0xff]  ;;  %v8843_v55 = vld [vmem:[#allocation2 + $0x120] sm:$0x8] }
 0x679   : > { %12254 = vmatprep.mubr.bf16.mxu1 %v10955_v16  ;;  %v9120_v27 = vrot.slane %v9118_v12, 5  ;;  %v11460_v41 = vadd.f32 %v16078_v9, %v16068_v13  ;;  %v11463_v7 = vadd.f32 %v16085_v61, %v16080_v22  ;;  %v10948_v20 = vcombine.low %v16119_v42, %v16121_v53  ;;  %v17193_v9 = vld [vmem:[#allocation49_spill] sm:$0xff]  ;;  %v16182_v26 = vpop.f32.mrb[103].mxu0  ;;  %v16184_v16 = vpop.f32.mrb[51].mxu1 }
 0x67a   : > { %9576 = vmatmul.mubr.bf16.vlgmr.msra.gmra.mrb[192].mxu0 %v10939_v8  ;;  %v9116_v59 = vrot.slane %v9115_v49, 4  ;;  %v9124_v48 = vor.u32 %v9123_v40, %v9122_v32  ;;  %v9129_v35 = vrot.slane %v9127_v10, 5  ;;  %v16975_v37 = vshrl.u32 %v16157_v60, 16  ;;  %17195 = vst [vmem:[#allocation66_spill] sm:$0xff] %v16184_v16  ;;  %v8845_v49 = vld [vmem:[#allocation2 + $0x12c] sm:$0x8] }
 0x67b   : > { %v16175_v13 = vadd.f32 %v17191_v39, %v11460_v41  ;;  %v16178_v22 = vadd.f32 %v17193_v9, %v11463_v7  ;;  %9583 = vmatprep.mubr.bf16.mxu0 %v10948_v20  ;;  %v16976_v61 = vshll.u32 %v16157_v60, 16  ;;  %v16977_v46 = vshrl.u32 %v16161_v3, 16  ;;  %v16191_v40 = vpop.f32.mrb[104].mxu0 }
 0x67c   : > { %v9121_v38 = vsel %vm14302_vm6, %v9116_v59, %v9120_v27  ;;  %v9125_v12 = vrot.slane %v9124_v48, 4  ;;  %v16981_v32 = vshll.u32 %v16161_v3, 16  ;;  %v9131_v8 = vrot.slane %v16975_v37, 4  ;;  %v16197_v39 = vpop.f32.mrb[105].mxu0  ;;  %v16199_v27 = vpop.f32.mrb[52].mxu1 }
 0x67d   : > { %17192 = vst [vmem:[#allocation58_spill] sm:$0xff] %v16175_v13  ;;  %17194 = vst [vmem:[#allocation59_spill] sm:$0xff] %v16178_v22  ;;  %v9132_v10 = vrot.slane %v16976_v61, 5  ;;  %v9136_v41 = vshll.u32 %v9083_v17, 16  ;;  %v9140_v7 = vrot.slane %v16977_v46, 4  ;;  %v9145_v20 = vshll.u32 %v9084_v31, 16 }
 0x67e   : > { %17196 = vst [vmem:[#allocation39_spill] sm:$0xff] %v16199_v27  ;;  %v9130_v59 = vsel %vm14302_vm6, %v9125_v12, %v9129_v35  ;;  %v9141_v48 = vrot.slane %v16981_v32, 5  ;;  %v8898_v9 = vshrl.u32 %v8843_v55, 16  ;;  %v8905_v37 = vrot.slane %v8903_v34, 7  ;;  %v16207_v61 = vld [vmem:[#allocation2 + $0x154] sm:$0xf] }
 0x67f   : > { %v16209_v17 = vpop.f32.mrb[106].mxu0  ;;  %v10956_v46 = vcombine.low %v9121_v38, %v9130_v59  ;;  %v9133_v31 = vor.u32 %v9132_v10, %v9131_v8  ;;  %v9138_v58 = vrot.slane %v9136_v41, 5  ;;  %v9147_v63 = vrot.slane %v9145_v20, 5  ;;  %v16215_v35 = vpop.f32.mrb[53].mxu1 }
 0x680   : > { %v16213_v22 = vpop.f32.mrb[107].mxu0  ;;  %17197 = vst [vmem:[#allocation40_spill] sm:$0xff] %v16215_v35  ;;  %v9142_v12 = vor.u32 %v9141_v48, %v9140_v7  ;;  %v10925_v32 = vrot.slane %v8898_v9, 11  ;;  %v17198_v55 = vshll.u32 %v16119_v42, 16  ;;  %v8911_v34 = vshrl.u32 %v8845_v49, 16  ;;  %v16221_v27 = vpop.f32.mrb[54].mxu1 }
 0x681   : > { %v16219_v2 = vpop.f32.mrb[108].mxu0  ;;  %17199 = vst [vmem:[#allocation47_spill] sm:$0xff] %v16221_v27  ;;  %12255 = vmatmul.mubr.bf16.vlgmr.msra.gmra.mrb[0].mxu1 %v10956_v46  ;;  %v9134_v38 = vrot.slane %v9133_v31, 4  ;;  %v17200_v8 = vshrl.u32 %v16121_v53, 16  ;;  %v16982_v41 = vshrl.u32 %v16207_v61, 16  ;;  %v16229_v59 = vpop.f32.mrb[55].mxu1  ;;  %v11466_v62 = vadd.f32 %v16097_v24, %v16089_v36 }
 0x682   : > { %v8908_v13 = vor.u32 %v17198_v55, %v8905_v37  ;;  %v16227_v7 = vpop.f32.mrb[109].mxu0  ;;  %17201 = vst [vmem:[#allocation48_spill] sm:$0xff] %v16229_v59  ;;  %v9143_v42 = vrot.slane %v9142_v12, 4  ;;  %v10926_v49 = vrot.slane %v8911_v34, 11  ;;  %v9086_v46 = vld [vmem:[#allocation2 + $0x164] sm:$0x1] }
 0x683   : > { %v8918_v10 = vrot.slane %v17200_v8, 7  ;;  %v16234_v9 = vpop.f32.mrb[110].mxu0  ;;  %v9139_v31 = vsel %vm14302_vm6, %v9134_v38, %v9138_v58  ;;  %v17202_v55 = vshll.u32 %v16121_v53, 16  ;;  %v9149_v12 = vrot.slane %v16982_v41, 4  ;;  %v16243_v59 = vld [vmem:[#allocation2 + $0x184] sm:$0xf] }
 0x684   : > { %v8909_v37 = vsel %vm14307_vm7, %v10925_v32, %v8908_v13  ;;  %v16245_v13 = vpop.f32.mrb[111].mxu0  ;;  %v16247_v32 = vpop.f32.mrb[56].mxu1  ;;  %v9148_v34 = vsel %vm14302_vm6, %v9143_v42, %v9147_v63  ;;  %v17204_v48 = vshll.u32 %v16207_v61, 16  ;;  %v9154_v38 = vshll.u32 %v9085_v5, 16  ;;  %v9087_v63 = vld [vmem:[#allocation2 + $0x188] sm:$0x1] }
 0x685   : > { %v8921_v8 = vor.u32 %v17202_v55, %v8918_v10  ;;  %17203 = vst [vmem:[#allocation60_spill] sm:$0xff] %v16247_v32  ;;  %v17205_v53 = vshrl.u32 %v16211_v43, 16  ;;  %v16255_v55 = vld [vmem:[#allocation2 + $0x190] sm:$0xf]  ;;  %v16257_v20 = vpop.f32.mrb[112].mxu0  ;;  %v10957_v41 = vcombine.low %v9139_v31, %v9148_v34  ;;  %v17206_v32 = vshll.u32 %v16211_v43, 16 }
 0x686   : > { %v9150_v58 = vrot.slane %v17204_v48, 5  ;;  %v9163_v30 = vshll.u32 %v9086_v46, 16  ;;  %v16263_v42 = vpop.f32.mrb[113].mxu0  ;;  %v16265_v48 = vpop.f32.mrb[57].mxu1  ;;  %v11469_v46 = vadd.f32 %v16109_v54, %v16103_v51  ;;  %v16282_v24 = vadd.f32 %v15828_v0, %v11466_v62 }
 0x687   : > { %v9158_v10 = vrot.slane %v17205_v53, 4  ;;  %v8922_v27 = vsel %vm14307_vm7, %v10926_v49, %v8921_v8  ;;  %v9159_v35 = vrot.slane %v17206_v32, 5  ;;  %17207 = vst [vmem:[#allocation61_spill] sm:$0xff] %v16265_v48  ;;  %v9156_v53 = vrot.slane %v9154_v38, 5  ;;  %v16269_v31 = vpop.f32.mrb[114].mxu0  ;;  %v16271_v34 = vpop.f32.mrb[58].mxu1  ;;  %12258 = vmatprep.mubr.bf16.mxu1 %v10957_v41 }
 0x688   : > { %v10940_v5 = vcombine.low %v8909_v37, %v8922_v27  ;;  %v9151_v16 = vor.u32 %v9150_v58, %v9149_v12  ;;  %17208 = vst [vmem:[#allocation53_spill] sm:$0xff] %v16271_v34  ;;  %v9165_v8 = vrot.slane %v9163_v30, 5  ;;  %v10949_v32 = vcombine.low %v16157_v60, %v16161_v3  ;;  %v8847_v27 = vld [vmem:[#allocation2 + $0x138] sm:$0x8]  ;;  %v16277_v37 = vpop.f32.mrb[115].mxu0  ;;  %v16279_v12 = vpop.f32.mrb[59].mxu1 }
 0x689   : > { %v9160_v49 = vor.u32 %v9159_v35, %v9158_v10  ;;  %17209 = vst [vmem:[#allocation54_spill] sm:$0xff] %v16277_v37  ;;  %17210 = vst [vmem:[#allocation62_spill] sm:$0xff] %v16279_v12  ;;  %v16983_v41 = vshrl.u32 %v16243_v59, 16  ;;  %v16984_v30 = vshll.u32 %v16243_v59, 16  ;;  %v8849_v35 = vld [vmem:[#allocation2 + $0x144] sm:$0x8]  ;;  %v16289_v54 = vadd.f32 %v15831_v56, %v11469_v46 }
 0x68a   : > { %9584 = vmatmul.mubr.bf16.gmra.mrb[196].mxu0 %v10940_v5  ;;  %v9152_v36 = vrot.slane %v9151_v16, 4  ;;  %17211 = vst [vmem:[#allocation63_spill] sm:$0xff] %v16282_v24  ;;  %v16286_v58 = vpop.f32.mrb[116].mxu0  ;;  %v16293_v16 = vld [vmem:[#allocation2 + $0x19c] sm:$0xf]  ;;  %v16297_v62 = vpop.f32.mrb[60].mxu1 }
 0x68b   : > { %17212 = vst [vmem:[#allocation67_spill] sm:$0xff] %v16286_v58  ;;  %v9161_v51 = vrot.slane %v9160_v49, 4  ;;  %17213 = vst [vmem:[#allocation68_spill] sm:$0xff] %v16289_v54  ;;  %9591 = vmatprep.mubr.bf16.mxu0 %v10949_v32  ;;  %v16295_v0 = vpop.f32.mrb[117].mxu0  ;;  %v9167_v49 = vrot.slane %v16983_v41, 4  ;;  %v9168_v56 = vrot.slane %v16984_v30, 5 }
 0x68c   : > { %17214 = vst [vmem:[#allocation64_spill] sm:$0xff] %v16295_v0  ;;  %17215 = vst [vmem:[#allocation65_spill] sm:$0xff] %v16297_v62  ;;  %v9157_v5 = vsel %vm14302_vm6, %v9152_v36, %v9156_v53  ;;  %v9172_v46 = vshll.u32 %v9087_v63, 16  ;;  %v16305_v32 = vpop.f32.mrb[118].mxu0  ;;  %v16307_v38 = vpop.f32.mrb[61].mxu1  ;;  %v17218_v54 = vshrl.u32 %v16255_v55, 16 }
 0x68d   : > { %17216 = vst [vmem:[#allocation44_spill] sm:$0xff] %v16305_v32  ;;  %17217 = vst [vmem:[#allocation45_spill] sm:$0xff] %v16307_v38  ;;  %v9166_v10 = vsel %vm14302_vm6, %v9161_v51, %v9165_v8  ;;  %v17219_v62 = vshll.u32 %v16255_v55, 16  ;;  %v9181_v36 = vshll.u32 %v9088_v45, 16  ;;  %v16315_v12 = vld [vmem:[#allocation2 + $0x1a8] sm:$0xf]  ;;  %v9169_v34 = vor.u32 %v9168_v56, %v9167_v49 }
 0x68e   : > { %v9176_v24 = vrot.slane %v17218_v54, 4  ;;  %v16317_v41 = vpop.f32.mrb[119].mxu0  ;;  %v16319_v30 = vpop.f32.mrb[62].mxu1  ;;  %v10958_v63 = vcombine.low %v9157_v5, %v9166_v10  ;;  %v9174_v48 = vrot.slane %v9172_v46, 5  ;;  %v8924_v38 = vshrl.u32 %v8847_v27, 16 }
 0x68f   : > { %v9177_v53 = vrot.slane %v17219_v62, 5  ;;  %17220 = vst [vmem:[#allocation69_spill] sm:$0xff] %v16317_v41  ;;  %17221 = vst [vmem:[#allocation70_spill] sm:$0xff] %v16319_v30  ;;  %v16321_v32 = vpop.f32.mrb[120].mxu0  ;;  %v16323_v8 = vpop.f32.mrb[63].mxu1  ;;  %v9183_v54 = vrot.slane %v9181_v36, 5 }
 0x690   : > { %17222 = vst [vmem:[#allocation37_spill] sm:$0xff] %v16323_v8  ;;  %v17223_v0 = vshrl.u32 %v16157_v60, 16  ;;  %v8937_v45 = vshrl.u32 %v8849_v35, 16  ;;  %v9089_v58 = vld [vmem:[#allocation2 + $0x1a0] sm:$0x1]  ;;  %v16327_v37 = vpop.f32.mrb[121].mxu0  ;;  %12259 = vmatmul.mubr.bf16.gmra.mrb[4].mxu1 %v10958_v63 }
 0x691   : > { %v9178_v51 = vor.u32 %v9177_v53, %v9176_v24  ;;  %17224 = vst [vmem:[#allocation38_spill] sm:$0xff] %v16327_v37  ;;  %v9170_v41 = vrot.slane %v9169_v34, 4  ;;  %v10927_v30 = vrot.slane %v8924_v38, 11  ;;  %v17225_v10 = vshrl.u32 %v16161_v3, 16  ;;  %v9090_v49 = vld [vmem:[#allocation2 + $0x1ac] sm:$0x1] }
 0x692   : > { %v8931_v62 = vrot.slane %v17223_v0, 7  ;;  %v16332_v56 = vpop.f32.mrb[122].mxu0  ;;  %v17227_v46 = vshll.u32 %v16157_v60, 16  ;;  %v10928_v0 = vrot.slane %v8937_v45, 11  ;;  %v16985_v35 = vshll.u32 %v16293_v16, 16 }
 0x693   : > { %v8944_v5 = vrot.slane %v17225_v10, 7  ;;  %17226 = vst [vmem:[#allocation41_spill] sm:$0xff] %v16332_v56  ;;  %v9179_v24 = vrot.slane %v9178_v51, 4  ;;  %v16337_v36 = vpop.f32.mrb[123].mxu0  ;;  %v9175_v34 = vsel %vm14302_vm6, %v9170_v41, %v9174_v48  ;;  %v17229_v38 = vshll.u32 %v16161_v3, 16 }
 0x694   : > { %v8934_v53 = vor.u32 %v17227_v46, %v8931_v62  ;;  %17228 = vst [vmem:[#allocation42_spill] sm:$0xff] %v16337_v36  ;;  %v16986_v10 = vshrl.u32 %v16315_v12, 16  ;;  %v16345_v8 = vld [vmem:[#allocation2 + $0x1b4] sm:$0xf]  ;;  %v16347_v51 = vpop.f32.mrb[124].mxu0  ;;  %v17231_v45 = vshrl.u32 %v16293_v16, 16 }
 0x695   : > { %v8947_v63 = vor.u32 %v17229_v38, %v8944_v5  ;;  %17230 = vst [vmem:[#allocation55_spill] sm:$0xff] %v16347_v51  ;;  %v9184_v60 = vsel %vm14302_vm6, %v9179_v24, %v9183_v54  ;;  %v9186_v3 = vrot.slane %v16985_v35, 5  ;;  %v16357_v41 = vld [vmem:[#allocation2 + $0x1c0] sm:$0xf]  ;;  %v16359_v5 = vpop.f32.mrb[125].mxu0  ;;  %v9190_v27 = vshll.u32 %v9089_v58, 16 }
 0x696   : > { %v8935_v62 = vsel %vm14307_vm7, %v10927_v30, %v8934_v53  ;;  %v9185_v48 = vrot.slane %v17231_v45, 4  ;;  %v10959_v46 = vcombine.low %v9175_v34, %v9184_v60  ;;  %v9194_v54 = vrot.slane %v16986_v10, 4  ;;  %v16365_v24 = vpop.f32.mrb[126].mxu0  ;;  %v9091_v36 = vld [vmem:[#allocation2 + $0x1b8] sm:$0x1] }
 0x697   : > { %v8948_v38 = vsel %vm14307_vm7, %v10928_v0, %v8947_v63  ;;  %17232 = vst [vmem:[#allocation43_spill] sm:$0xff] %v16365_v24  ;;  %v17233_v45 = vshll.u32 %v16315_v12, 16  ;;  %v9199_v35 = vshll.u32 %v9090_v49, 16  ;;  %v9092_v56 = vld [vmem:[#allocation2 + $0x1c4] sm:$0x1]  ;;  %v16369_v37 = vpop.f32.mrb[127].mxu0  ;;  %v11504_v58 = vadd.f32 %v16126_v19, %v16123_v44 }
 0x698   : > { %v10941_v30 = vcombine.low %v8935_v62, %v8948_v38  ;;  %v9187_v53 = vor.u32 %v9186_v3, %v9185_v48  ;;  %17234 = vst [vmem:[#allocation46_spill] sm:$0xff] %v16369_v37  ;;  %12262 = vmatprep.mubr.bf16.mxu1 %v10959_v46  ;;  %v9192_v34 = vrot.slane %v9190_v27, 5  ;;  %v11507_v0 = vadd.f32 %v16139_v14, %v16131_v11  ;;  %v8851_v60 = vld [vmem:[#allocation2 + $0x150] sm:$0x8]  ;;  %v16377_v62 = vpop.f32.mrb[64].mxu1  ;;  %v16380_v46 = vpop.f32.mrb[128].mxu0 }
 0x699   : > { %v9195_v51 = vrot.slane %v17233_v45, 5  ;;  %v10950_v63 = vcombine.low %v16207_v61, %v16211_v43  ;;  %17235 = vst [vmem:[#allocation49_spill] sm:$0xff] %v16377_v62  ;;  %v9201_v3 = vrot.slane %v9199_v35, 5  ;;  %v16987_v38 = vshrl.u32 %v16345_v8, 16  ;;  %17236 = vst [vmem:[#allocation71_spill] sm:$0xff] %v16380_v46  ;;  %v16382_v27 = vpop.f32.mrb[65].mxu1 }
 0x69a   : > { %9592 = vmatmul.mubr.bf16.gmra.mrb[200].mxu0 %v10941_v30  ;;  %v9188_v49 = vrot.slane %v9187_v53, 4  ;;  %17237 = vst [vmem:[#allocation72_spill] sm:$0xff] %v16382_v27  ;;  %v16385_v44 = vadd.f32 %v15879_v1, %v11504_v58  ;;  %v16388_v19 = vadd.f32 %v15882_v18, %v11507_v0  ;;  %v16988_v11 = vshll.u32 %v16345_v8, 16  ;;  %v8853_v30 = vld [vmem:[#allocation2 + $0x15c] sm:$0x8]  ;;  %v16394_v35 = vpop.f32.mrb[66].mxu1 }
 0x69b   : > { %v9196_v48 = vor.u32 %v9195_v51, %v9194_v54  ;;  %9599 = vmatprep.mubr.bf16.mxu0 %v10950_v63  ;;  %v16989_v14 = vshrl.u32 %v16357_v41, 16  ;;  %v16392_v51 = vpop.f32.mrb[129].mxu0  ;;  %17239 = vst [vmem:[#allocation74_spill] sm:$0xff] %v16394_v35  ;;  %v16990_v1 = vshll.u32 %v16357_v41, 16  ;;  %v9203_v18 = vrot.slane %v16987_v38, 4  ;;  %v16405_v0 = vpop.f32.mrb[67].mxu1 }
 0x69c   : > { %17238 = vst [vmem:[#allocation73_spill] sm:$0xff] %v16392_v51  ;;  %v9193_v54 = vsel %vm14302_vm6, %v9188_v49, %v9192_v34  ;;  %v16401_v45 = vld [vmem:[#allocation2 + $0x1cc] sm:$0xf]  ;;  %v16403_v58 = vpop.f32.mrb[130].mxu0  ;;  %17241 = vst [vmem:[#allocation76_spill] sm:$0xff] %v16405_v0  ;;  %v9204_v63 = vrot.slane %v16988_v11, 5 }
 0x69d   : > { %v9197_v53 = vrot.slane %v9196_v48, 4  ;;  %17240 = vst [vmem:[#allocation75_spill] sm:$0xff] %v16403_v58  ;;  %v9208_v10 = vshll.u32 %v9091_v36, 16  ;;  %v9212_v35 = vrot.slane %v16989_v14, 4  ;;  %v9217_v34 = vshll.u32 %v9092_v56, 16  ;;  %v16411_v49 = vpop.f32.mrb[131].mxu0 }
 0x69e   : > { %17242 = vst [vmem:[#allocation77_spill] sm:$0xff] %v16411_v49  ;;  %v9213_v38 = vrot.slane %v16990_v1, 5  ;;  %v8950_v51 = vshrl.u32 %v8851_v60, 16  ;;  %v17243_v58 = vshrl.u32 %v16207_v61, 16  ;;  %v9205_v27 = vor.u32 %v9204_v63, %v9203_v18  ;;  %v16419_v62 = vld [vmem:[#allocation2 + $0x1d8] sm:$0xf] }
 0x69f   : > { %v9202_v48 = vsel %vm14302_vm6, %v9197_v53, %v9201_v3  ;;  %v9210_v11 = vrot.slane %v9208_v10, 5  ;;  %v9219_v36 = vrot.slane %v9217_v34, 5  ;;  %v17244_v49 = vshll.u32 %v16207_v61, 16  ;;  %v9093_v18 = vld [vmem:[#allocation2 + $0x1d0] sm:$0x1] }
 0x6a0   : > { %v8957_v0 = vrot.slane %v17243_v58, 7  ;;  %v10960_v46 = vcombine.low %v9193_v54, %v9202_v48  ;;  %v9214_v14 = vor.u32 %v9213_v38, %v9212_v35  ;;  %v10929_v56 = vrot.slane %v8950_v51, 11  ;;  %v9094_v61 = vld [vmem:[#allocation2 + $0x1dc] sm:$0x1]  ;;  %v8855_v48 = vld [vmem:[#allocation2 + $0x180] sm:$0x8] }
 0x6a1   : > { %v8963_v24 = vshrl.u32 %v8853_v30, 16  ;;  %v9206_v3 = vrot.slane %v9205_v27, 4  ;;  %v17245_v53 = vshrl.u32 %v16211_v43, 16  ;;  %v9059_v1 = vshrl.u32 %v16401_v45, 16 }
 0x6a2   : > { %v8960_v37 = vor.u32 %v17244_v49, %v8957_v0  ;;  %12263 = vmatmul.mubr.bf16.gmra.mrb[8].mxu1 %v10960_v46  ;;  %v9062_v54 = vshll.u32 %v16401_v45, 16  ;;  %v9215_v10 = vrot.slane %v9214_v14, 4  ;;  %v9072_v51 = vshrl.u32 %v16419_v62, 16 }
 0x6a3   : > { %v8970_v60 = vrot.slane %v17245_v53, 7  ;;  %v10930_v38 = vrot.slane %v8963_v24, 11  ;;  %v9211_v46 = vsel %vm14302_vm6, %v9206_v3, %v9210_v11  ;;  %v17246_v27 = vshll.u32 %v16211_v43, 16 }
 0x6a4   : > { %v8961_v58 = vsel %vm14307_vm7, %v10929_v56, %v8960_v37  ;;  %v16991_v35 = vshll.u32 %v16419_v62, 16  ;;  %v9221_v0 = vrot.slane %v9059_v1, 4  ;;  %v9220_v14 = vsel %vm14302_vm6, %v9215_v10, %v9219_v36  ;;  %v16447_v56 = vpop.f32.mrb[68].mxu1  ;;  %v16451_v10 = vpop.f32.mrb[132].mxu0 }
 0x6a5   : > { %v8973_v30 = vor.u32 %v17246_v27, %v8970_v60  ;;  %v9222_v37 = vrot.slane %v9062_v54, 5  ;;  %v9226_v24 = vshll.u32 %v9093_v18, 16  ;;  %v9230_v63 = vrot.slane %v9072_v51, 4  ;;  %v8857_v18 = vld [vmem:[#allocation2 + $0x18c] sm:$0x8] }
 0x6a6   : > { %v10961_v34 = vcombine.low %v9211_v46, %v9220_v14  ;;  %v9231_v11 = vrot.slane %v16991_v35, 5  ;;  %v9235_v49 = vshll.u32 %v9094_v61, 16  ;;  %v11510_v60 = vadd.f32 %v16169_v25, %v16151_v15  ;;  %v16453_v46 = vpop.f32.mrb[69].mxu1  ;;  %v8861_v35 = vld [vmem:[#allocation2 + $0x1a4] sm:$0x8] }
 0x6a7   : > { %v8974_v43 = vsel %vm14307_vm7, %v10930_v38, %v8973_v30  ;;  %v9223_v36 = vor.u32 %v9222_v37, %v9221_v0  ;;  %v9228_v53 = vrot.slane %v9226_v24, 5  ;;  %v11513_v61 = vadd.f32 %v16182_v26, %v16172_v4  ;;  %v16461_v0 = vpop.f32.mrb[70].mxu1 }
 0x6a8   : > { %v10942_v3 = vcombine.low %v8961_v58, %v8974_v43  ;;  %12266 = vmatprep.mubr.bf16.mxu1 %v10961_v34  ;;  %v9232_v38 = vor.u32 %v9231_v11, %v9230_v63  ;;  %v9237_v27 = vrot.slane %v9235_v49, 5  ;;  %v10951_v30 = vcombine.low %v16243_v59, %v16255_v55  ;;  %v16459_v58 = vpop.f32.mrb[133].mxu0  ;;  %v16470_v34 = vpop.f32.mrb[71].mxu1 }
 0x6a9   : > { %v9224_v15 = vrot.slane %v9223_v36, 4  ;;  %v16464_v25 = vadd.f32 %v15923_v21, %v11510_v60  ;;  %v8976_v14 = vshrl.u32 %v8855_v48, 16  ;;  %v17247_v37 = vshrl.u32 %v16243_v59, 16  ;;  %v16468_v63 = vpop.f32.mrb[134].mxu0 }
 0x6aa   : > { %9600 = vmatmul.mubr.bf16.gmra.mrb[204].mxu0 %v10942_v3  ;;  %v9233_v4 = vrot.slane %v9232_v38, 4  ;;  %v16473_v26 = vadd.f32 %v15929_v57, %v11513_v61  ;;  %v8989_v43 = vshrl.u32 %v8857_v18, 16  ;;  %v17248_v11 = vshrl.u32 %v16255_v55, 16  ;;  %v16477_v3 = vpop.f32.mrb[135].mxu0 }
 0x6ab   : > { %v8983_v24 = vrot.slane %v17247_v37, 7  ;;  %9607 = vmatprep.mubr.bf16.mxu0 %v10951_v30  ;;  %v9229_v21 = vsel %vm14302_vm6, %v9224_v15, %v9228_v53  ;;  %v10931_v48 = vrot.slane %v8976_v14, 11  ;;  %v17249_v36 = vshll.u32 %v16243_v59, 16  ;;  %v8859_v37 = vld [vmem:[#allocation2 + $0x198] sm:$0x8] }
 0x6ac   : > { %v8996_v49 = vrot.slane %v17248_v11, 7  ;;  %v11516_v38 = vadd.f32 %v16197_v39, %v16191_v40  ;;  %v9238_v57 = vsel %vm14302_vm6, %v9233_v4, %v9237_v27  ;;  %v10932_v18 = vrot.slane %v8989_v43, 11  ;;  %v8863_v27 = vld [vmem:[#allocation2 + $0x1b0] sm:$0x8] }
 0x6ad   : > { %v8986_v60 = vor.u32 %v17249_v36, %v8983_v24  ;;  %v17250_v61 = vshll.u32 %v16255_v55, 16  ;;  %v11519_v11 = vadd.f32 %v16213_v22, %v16209_v17  ;;  %v10962_v53 = vcombine.low %v9229_v21, %v9238_v57 }
 0x6ae   : > { %v16494_v15 = vadd.f32 %v15964_v6, %v11516_v38  ;;  %v10952_v40 = vcombine.low %v16293_v16, %v16315_v12  ;;  %v9002_v55 = vshrl.u32 %v8859_v37, 16  ;;  %v17251_v22 = vshrl.u32 %v16293_v16, 16 }
 0x6af   : > { %v8999_v30 = vor.u32 %v17250_v61, %v8996_v49  ;;  %v8987_v59 = vsel %vm14307_vm7, %v10931_v48, %v8986_v60  ;;  %v16501_v39 = vadd.f32 %v15972_v47, %v11519_v11  ;;  %12267 = vmatmul.mubr.bf16.gmra.mrb[12].mxu1 %v10962_v53  ;;  %v9015_v24 = vshrl.u32 %v8861_v35, 16  ;;  %v8865_v49 = vld [vmem:[#allocation2 + $0x1bc] sm:$0x8]  ;;  %v16527_v61 = vpop.f32.mrb[72].mxu1 }
 0x6b0   : > { %v9009_v17 = vrot.slane %v17251_v22, 7  ;;  %v17252_v6 = vshrl.u32 %v16315_v12, 16  ;;  %v11522_v43 = vadd.f32 %v16227_v7, %v16219_v2  ;;  %v10933_v21 = vrot.slane %v9002_v55, 11 }
 0x6b1   : > { %v9000_v33 = vsel %vm14307_vm7, %v10932_v18, %v8999_v30  ;;  %v17253_v48 = vshll.u32 %v16293_v16, 16  ;;  %v11525_v36 = vadd.f32 %v16245_v13, %v16234_v9  ;;  %v10953_v60 = vcombine.low %v16345_v8, %v16357_v41 }
 0x6b2   : > { %v10943_v14 = vcombine.low %v8987_v59, %v9000_v33  ;;  %v9022_v4 = vrot.slane %v17252_v6, 7  ;;  %v10934_v38 = vrot.slane %v9015_v24, 11  ;;  %v17254_v35 = vshll.u32 %v16315_v12, 16  ;;  %v8867_v59 = vld [vmem:[#allocation2 + $0x1c8] sm:$0x8] }
 0x6b3   : > { %v9012_v47 = vor.u32 %v17253_v48, %v9009_v17  ;;  %v16518_v57 = vadd.f32 %v16021_v29, %v11522_v43  ;;  %v9028_v2 = vshrl.u32 %v8863_v27, 16  ;;  %v16523_v16 = vadd.f32 %v16024_v50, %v11525_v36  ;;  %v16537_v50 = vpop.f32.mrb[73].mxu1  ;;  %v17260_v43 = vld [vmem:[#allocation54_spill] sm:$0xff] }
 0x6b4   : > { %9608 = vmatmul.mubr.bf16.gmra.mrb[208].mxu0 %v10943_v14  ;;  %v9025_v37 = vor.u32 %v17254_v35, %v9022_v4  ;;  %v17255_v9 = vshrl.u32 %v16345_v8, 16  ;;  %v9041_v18 = vshrl.u32 %v8865_v49, 16  ;;  %v17256_v29 = vshrl.u32 %v16357_v41, 16  ;;  %v16545_v24 = vpop.f32.mrb[74].mxu1  ;;  %v17262_v48 = vld [vmem:[#allocation66_spill] sm:$0xff] }
 0x6b5   : > { %9615 = vmatprep.mubr.bf16.mxu0 %v10952_v40  ;;  %v9013_v7 = vsel %vm14307_vm7, %v10933_v21, %v9012_v47  ;;  %v10935_v30 = vrot.slane %v9028_v2, 11  ;;  %v11528_v53 = vadd.f32 %v16263_v42, %v16257_v20  ;;  %v16535_v40 = vpop.f32.mrb[136].mxu0  ;;  %v17257_v55 = vshll.u32 %v16345_v8, 16  ;;  %v17259_v42 = vld [vmem:[#allocation50_spill] sm:$0xff]  ;;  %v17261_v21 = vld [vmem:[#allocation57_spill] sm:$0xff]  ;;  %v17263_v2 = vld [vmem:[#allocation51_spill] sm:$0xff] }
 0x6b6   : > { %v9035_v13 = vrot.slane %v17255_v9, 7  ;;  %v9026_v12 = vsel %vm14307_vm7, %v10934_v38, %v9025_v37  ;;  %v9048_v11 = vrot.slane %v17256_v29, 7  ;;  %v10936_v17 = vrot.slane %v9041_v18, 11  ;;  %v16543_v14 = vpop.f32.mrb[137].mxu0  ;;  %v8869_v47 = vld [vmem:[#allocation2 + $0x1d4] sm:$0x8] }
 0x6b7   : > { %v10944_v33 = vcombine.low %v9013_v7, %v9026_v12  ;;  %v11584_v27 = vadd.f32 %v16133_v28, %v16128_v23  ;;  %v17258_v6 = vshll.u32 %v16357_v41, 16  ;;  %v12434_v4 = vadd.f32 %v17259_v42, %v11528_v53  ;;  %v16554_v36 = vpop.f32.mrb[138].mxu0  ;;  %v16556_v38 = vpop.f32.mrb[75].mxu1  ;;  %v17265_v53 = vld [vmem:[#allocation64_spill] sm:$0xff] }
 0x6b8   : > { %v9038_v22 = vor.u32 %v17257_v55, %v9035_v13  ;;  %v11531_v49 = vadd.f32 %v17260_v43, %v16269_v31  ;;  %v11587_v8 = vadd.f32 %v17262_v48, %v17261_v21  ;;  %v10954_v41 = vcombine.low %v16401_v45, %v16419_v62  ;;  %v16563_v37 = vpop.f32.mrb[139].mxu0  ;;  %v17266_v55 = vld [vmem:[#allocation39_spill] sm:$0xff]  ;;  %v17273_v45 = vld [vmem:[#allocation38_spill] sm:$0xff]  ;;  %v17274_v21 = vld [vmem:[#allocation52_spill] sm:$0xff] }
 0x6b9   : > { %v9051_v20 = vor.u32 %v17258_v6, %v9048_v11  ;;  %v12363_v28 = vadd.f32 %v16385_v44, %v11584_v27  ;;  %v9054_v35 = vshrl.u32 %v8867_v59, 16  ;;  %v9061_v13 = vrot.slane %v9059_v1, 7  ;;  %v17264_v11 = vld [vmem:[#allocation67_spill] sm:$0xff]  ;;  %v17269_v27 = vld [vmem:[#allocation69_spill] sm:$0xff] }
 0x6ba   : > { %v9039_v23 = vsel %vm14307_vm7, %v10935_v30, %v9038_v22  ;;  %v12452_v7 = vadd.f32 %v17263_v2, %v11531_v49  ;;  %v12381_v9 = vadd.f32 %v16388_v19, %v11587_v8  ;;  %v9067_v30 = vshrl.u32 %v8869_v47, 16  ;;  %v17267_v22 = vld [vmem:[#allocation40_spill] sm:$0xff]  ;;  %v17271_v43 = vld [vmem:[#allocation47_spill] sm:$0xff] }
 0x6bb   : > { %v9052_v31 = vsel %vm14307_vm7, %v10936_v17, %v9051_v20  ;;  %v10937_v12 = vrot.slane %v9054_v35, 11  ;;  %v9074_v44 = vrot.slane %v9072_v51, 7  ;;  %v9064_v29 = vor.u32 %v9062_v54, %v9061_v13  ;;  %v17268_v19 = vld [vmem:[#allocation44_spill] sm:$0xff]  ;;  %v17276_v35 = vld [vmem:[#allocation58_spill] sm:$0xff]  ;;  %v17278_v13 = vld [vmem:[#allocation61_spill] sm:$0xff] }
 0x6bc   : > { %v10945_v18 = vcombine.low %v9039_v23, %v9052_v31  ;;  %9616 = vmatmul.mubr.bf16.gmra.mrb[212].mxu0 %v10944_v33  ;;  %v11534_v59 = vadd.f32 %v17265_v53, %v17264_v11  ;;  %v11590_v17 = vadd.f32 %v17267_v22, %v17266_v55  ;;  %v11537_v6 = vadd.f32 %v17269_v27, %v17268_v19  ;;  %v17272_v51 = vld [vmem:[#allocation48_spill] sm:$0xff]  ;;  %v17280_v11 = vld [vmem:[#allocation42_spill] sm:$0xff]  ;;  %v11624_v22 = vpop.f32.mrb[76].mxu1  ;;  %v17286_v27 = vld [vmem:[#allocation43_spill] sm:$0xff] }
 0x6bd   : > { %9623 = vmatprep.mubr.bf16.mxu0 %v10953_v60  ;;  %v10938_v1 = vrot.slane %v9067_v30, 11  ;;  %v17270_v20 = vshll.u32 %v16419_v62, 16  ;;  %v11593_v33 = vadd.f32 %v17272_v51, %v17271_v43  ;;  %v11540_v54 = vadd.f32 %v17273_v45, %v16321_v32  ;;  %v17275_v47 = vld [vmem:[#allocation56_spill] sm:$0xff]  ;;  %v17282_v53 = vld [vmem:[#allocation62_spill] sm:$0xff]  ;;  %v11625_v51 = vpop.f32.mrb[77].mxu1 }
 0x6be   : > { %v9065_v49 = vsel %vm14307_vm7, %v10937_v12, %v9064_v29  ;;  %v12425_v48 = vadd.f32 %v17274_v21, %v11534_v59  ;;  %v12354_v8 = vadd.f32 %v16464_v25, %v11590_v17  ;;  %v12443_v23 = vadd.f32 %v17275_v47, %v11537_v6  ;;  %v17277_v2 = vld [vmem:[#allocation60_spill] sm:$0xff]  ;;  %v17281_v29 = vld [vmem:[#allocation53_spill] sm:$0xff]  ;;  %v17283_v25 = vld [vmem:[#allocation55_spill] sm:$0xff] }
 0x6bf   : > { %v9077_v42 = vor.u32 %v17270_v20, %v9074_v44  ;;  %v12372_v62 = vadd.f32 %v16473_v26, %v11593_v33  ;;  %v12470_v31 = vadd.f32 %v17276_v35, %v11540_v54  ;;  %v11596_v30 = vadd.f32 %v17278_v13, %v17277_v2  ;;  %v17279_v44 = vld [vmem:[#allocation41_spill] sm:$0xff]  ;;  %v17287_v6 = vld [vmem:[#allocation46_spill] sm:$0xff]  ;;  %v17290_v33 = vld [vmem:[#allocation59_spill] sm:$0xff] }
 0x6c0   : > { %v11543_v12 = vadd.f32 %v17280_v11, %v17279_v44  ;;  %v11599_v59 = vadd.f32 %v17282_v53, %v17281_v29  ;;  %v11546_v55 = vadd.f32 %v16359_v5, %v17283_v25  ;;  %v17284_v17 = vld [vmem:[#allocation65_spill] sm:$0xff]  ;;  %v17288_v20 = vld [vmem:[#allocation70_spill] sm:$0xff]  ;;  %v17293_v47 = vld [vmem:[#allocation72_spill] sm:$0xff]  ;;  %v11680_v53 = vpop.f32.mrb[140].mxu0 }
 0x6c1   : > { %v9078_v60 = vsel %vm14307_vm7, %v10938_v1, %v9077_v42  ;;  %v12399_v52 = vadd.f32 %v16494_v15, %v11596_v30  ;;  %v17285_v26 = vld [vmem:[#allocation45_spill] sm:$0xff]  ;;  %v11549_v1 = vadd.f32 %v17287_v6, %v17286_v27  ;;  %v11627_v15 = vpop.f32.mrb[78].mxu1  ;;  %v17294_v2 = vld [vmem:[#allocation68_spill] sm:$0xff]  ;;  %v17295_v44 = vld [vmem:[#allocation71_spill] sm:$0xff] }
 0x6c2   : > { %v10946_v32 = vcombine.low %v9065_v49, %v9078_v60  ;;  %v11602_v19 = vadd.f32 %v17285_v26, %v17284_v17  ;;  %v17289_v42 = vld [vmem:[#allocation37_spill] sm:$0xff]  ;;  %v12488_v45 = vadd.f32 %v17290_v33, %v11543_v12  ;;  %v12417_v54 = vadd.f32 %v16501_v39, %v11599_v59  ;;  %v17291_v49 = vld [vmem:[#allocation63_spill] sm:$0xff]  ;;  %v11628_v25 = vpop.f32.mrb[79].mxu1  ;;  %v17297_v39 = vld [vmem:[#allocation74_spill] sm:$0xff] }
 0x6c3   : > { %v11605_v43 = vadd.f32 %v17289_v42, %v17288_v20  ;;  %v12461_v21 = vadd.f32 %v17291_v49, %v11546_v55  ;;  %v17292_v5 = vld [vmem:[#allocation49_spill] sm:$0xff]  ;;  %v12479_v13 = vadd.f32 %v17294_v2, %v11549_v1  ;;  %v17298_v59 = vld [vmem:[#allocation76_spill] sm:$0xff]  ;;  %v17299_v17 = vld [vmem:[#allocation75_spill] sm:$0xff] }
 0x6c4   : > { %v11608_v60 = vadd.f32 %v17293_v47, %v17292_v5  ;;  %v12390_v35 = vadd.f32 %v16518_v57, %v11602_v19  ;;  %v17296_v11 = vld [vmem:[#allocation73_spill] sm:$0xff]  ;;  %9624 = vmatmul.mubr.bf16.gmra.mrb[216].mxu0 %v10945_v18  ;;  %v11611_v55 = vadd.f32 %v17298_v59, %v17297_v39  ;;  %v11614_v57 = vadd.f32 %v16453_v46, %v16447_v56  ;;  %v11681_v19 = vpop.f32.mrb[141].mxu0 }
 0x6c5   : > { %v12408_v30 = vadd.f32 %v16523_v16, %v11605_v43  ;;  %v11664_v29 = vadd.f32 %v17296_v11, %v17295_v44  ;;  %v17300_v26 = vld [vmem:[#allocation77_spill] sm:$0xff]  ;;  %9631 = vmatprep.mubr.bf16.mxu0 %v10954_v41  ;;  %v11670_v16 = vadd.f32 %v16459_v58, %v16451_v10  ;;  %v11617_v18 = vadd.f32 %v16470_v34, %v16461_v0  ;;  %v11683_v1 = vpop.f32.mrb[142].mxu0 }
 0x6c6   : > { %v12435_v12 = vadd.f32 %v12434_v4, %v11608_v60  ;;  %v11667_v27 = vadd.f32 %v17300_v26, %v17299_v17  ;;  %v11673_v4 = vadd.f32 %v16477_v3, %v16468_v63  ;;  %v12453_v20 = vadd.f32 %v12452_v7, %v11611_v55  ;;  %v11684_v46 = vpop.f32.mrb[143].mxu0  ;;  %v13112_v39 = vld [vmem:[#allocation12 + $0x20] sm:$0xff]  }
 0x6c7   : > { %v16627_v6 = vadd.f32 %v12363_v28, %v11664_v29  ;;  %v12426_v43 = vadd.f32 %v12425_v48, %v11614_v57  ;;  %v11620_v56 = vadd.f32 %v16537_v50, %v16527_v61  ;;  %v16639_v28 = vadd.f32 %v12354_v8, %v11670_v16 }
 0x6c8   : > { %v16635_v42 = vadd.f32 %v12381_v9, %v11667_v27  ;;  %v12444_v41 = vadd.f32 %v12443_v23, %v11617_v18  ;;  %v16641_v33 = vadd.f32 %v12372_v62, %v11673_v4  ;;  %v11676_v10 = vadd.f32 %v16543_v14, %v16535_v40  ;;  %v13113_v27 = vld [vmem:[#allocation12 + $0x28] sm:$0xff]   ;;  %v13114_v4 = vld [vmem:[#allocation12 + $0x30] sm:$0xff]  }
 0x6c9   : > { %v12471_v58 = vadd.f32 %v12470_v31, %v11620_v56  ;;  %v11623_v0 = vadd.f32 %v16556_v38, %v16545_v24  ;;  %v11679_v63 = vadd.f32 %v16563_v37, %v16554_v36  ;;  %v11626_v34 = vadd.f32 %v11625_v51, %v11624_v22  ;;  %v11686_v24 = vpop.f32.mrb[144].mxu0  ;;  %v13108_v38 = vld [vmem:[#allocation12] sm:$0xff]   ;;  %v13109_v31 = vld [vmem:[#allocation12 + $0x8] sm:$0xff]  }
 0x6ca   : > { %v16649_v3 = vadd.f32 %v12399_v52, %v11676_v10  ;;  %v11682_v61 = vadd.f32 %v11681_v19, %v11680_v53  ;;  %v11629_v50 = vadd.f32 %v11628_v25, %v11627_v15  ;;  %v11685_v7 = vadd.f32 %v11684_v46, %v11683_v1  ;;  %v11687_v62 = vpop.f32.mrb[145].mxu0  ;;  %12270 = vmatprep.subr.bf16.mxu1 %v13108_v38  ;;  %v13115_v1 = vld [vmem:[#allocation12 + $0x38] sm:$0xff]  }
 0x6cb   : > { %v12489_v9 = vadd.f32 %v12488_v45, %v11623_v0  ;;  %v16651_v48 = vadd.f32 %v12417_v54, %v11679_v63  ;;  %v12462_v8 = vadd.f32 %v12461_v21, %v11626_v34  ;;  %v11688_v36 = vadd.f32 %v11687_v62, %v11686_v24  ;;  %v11689_v37 = vpop.f32.mrb[146].mxu0  ;;  %12271 = vmatpush3.bf16.msra.mxu1 %v13108_v38 }
 0x6cc   : > { %v16653_v23 = vadd.f32 %v12390_v35, %v11682_v61  ;;  %v12480_v40 = vadd.f32 %v12479_v13, %v11629_v50  ;;  %v16655_v14 = vadd.f32 %v12408_v30, %v11685_v7  ;;  %9632 = vmatmul.mubr.bf16.gmra.mrb[220].mxu0 %v10946_v32  ;;  %v11690_v22 = vpop.f32.mrb[147].mxu0  ;;  %12272 = vmatprep.subr.bf16.mxu1 %v13109_v31  ;;  %v13110_v35 = vld [vmem:[#allocation12 + $0x10] sm:$0xff]   ;;  %v13111_v30 = vld [vmem:[#allocation12 + $0x18] sm:$0xff]  }
 0x6cd   : > { %v16657_v52 = vadd.f32 %v12435_v12, %v11688_v36  ;;  %v11691_v51 = vadd.f32 %v11690_v22, %v11689_v37 }
 0x6cf   : > { %v16659_v45 = vadd.f32 %v12453_v20, %v11691_v51  ;;  %12273 = vmatpush3.bf16.msra.mxu1 %v13109_v31 }
 0x6d0   : > { %v11692_v54 = vpop.f32.mrb[148].mxu0  ;;  %12274 = vmatprep.subr.bf16.mxu1 %v13110_v35 }
 0x6d1   : > { %v11693_v49 = vpop.f32.mrb[149].mxu0 }
 0x6d2   : > { %v11694_v21 = vadd.f32 %v11693_v49, %v11692_v54  ;;  %v11695_v32 = vpop.f32.mrb[150].mxu0 }
 0x6d3   : > { %v11696_v5 = vpop.f32.mrb[151].mxu0  ;;  %12275 = vmatpush3.bf16.msra.mxu1 %v13110_v35 }
 0x6d4   : > { %v16661_v47 = vadd.f32 %v12426_v43, %v11694_v21  ;;  %v11697_v60 = vadd.f32 %v11696_v5, %v11695_v32  ;;  %12276 = vmatprep.subr.bf16.mxu1 %v13111_v30 }
 0x6d6   : > { %v16663_v15 = vadd.f32 %v12444_v41, %v11697_v60 }
 0x6d7   : > { %12277 = vmatpush3.bf16.msra.mxu1 %v13111_v30 }
 0x6d8   : > { %12278 = vmatprep.subr.bf16.mxu1 %v13112_v39 }
 0x6db   : > { %12279 = vmatpush3.bf16.msra.mxu1 %v13112_v39 }
 0x6dc   : > { %12280 = vmatprep.subr.bf16.mxu1 %v13113_v27 }
 0x6dd   : > { %v11698_v2 = vpop.f32.mrb[152].mxu0 }
 0x6de   : > { %v11699_v13 = vpop.f32.mrb[153].mxu0 }
 0x6df   : > { %v11700_v44 = vadd.f32 %v11699_v13, %v11698_v2  ;;  %v11701_v11 = vpop.f32.mrb[154].mxu0  ;;  %12281 = vmatpush3.bf16.msra.mxu1 %v13113_v27 }
 0x6e0   : > { %v11702_v29 = vpop.f32.mrb[155].mxu0  ;;  %12282 = vmatprep.subr.bf16.mxu1 %v13114_v4 }
 0x6e1   : > { %v16665_v53 = vadd.f32 %v12471_v58, %v11700_v44  ;;  %v11703_v25 = vadd.f32 %v11702_v29, %v11701_v11 }
 0x6e3   : > { %v16667_v12 = vadd.f32 %v12489_v9, %v11703_v25  ;;  %12283 = vmatpush3.bf16.msra.mxu1 %v13114_v4 }
 0x6e4   : > { %12284 = vmatprep.subr.bf16.mxu1 %v13115_v1 }
 0x6e7   : > { %12285 = vmatpush3.bf16.msra.mxu1 %v13115_v1 }
 0x6e9   : > { %v11704_v59 = vpop.f32.mrb[156].mxu0 }
 0x6ea   : > { %v11705_v55 = vpop.f32.mrb[157].mxu0 }
 0x6eb   : > { %v11706_v17 = vadd.f32 %v11705_v55, %v11704_v59  ;;  %v11707_v26 = vpop.f32.mrb[158].mxu0 }
 0x6ec   : > { %v11708_v57 = vpop.f32.mrb[159].mxu0 }
 0x6ed   : > { %v16669_v19 = vadd.f32 %v12462_v8, %v11706_v17  ;;  %v11709_v16 = vadd.f32 %v11708_v57, %v11707_v26 }
 0x6ef   : > { %v16671_v18 = vadd.f32 %v12480_v40, %v11709_v16 }
 0x6f4   : > { %v11742_v20 = vpop.f32.mrb[160].mxu0 }
 0x6f5   : > { %v11743_v43 = vpop.f32.mrb[161].mxu0 }
 0x6f6   : > { %v11744_v56 = vadd.f32 %v11743_v43, %v11742_v20  ;;  %v11745_v46 = vpop.f32.mrb[162].mxu0 }
 0x6f7   : > { %v11746_v41 = vpop.f32.mrb[163].mxu0 }
 0x6f8   : > { %v16674_v10 = vadd.f32 %v16627_v6, %v11744_v56  ;;  %v11747_v58 = vadd.f32 %v11746_v41, %v11745_v46 }
 0x6fa   : > { %v16677_v0 = vadd.f32 %v16635_v42, %v11747_v58 }
 0x701   : > { %v11748_v63 = vpop.f32.mrb[164].mxu0 }
 0x702   : > { %v11749_v34 = vpop.f32.mrb[165].mxu0 }
 0x703   : > { %v11750_v61 = vadd.f32 %v11749_v34, %v11748_v63  ;;  %v11751_v50 = vpop.f32.mrb[166].mxu0 }
 0x704   : > { %v11752_v7 = vpop.f32.mrb[167].mxu0 }
 0x705   : > { %v16680_v9 = vadd.f32 %v16639_v28, %v11750_v61  ;;  %v11753_v8 = vadd.f32 %v11752_v7, %v11751_v50 }
 0x707   : > { %v16683_v40 = vadd.f32 %v16641_v33, %v11753_v8 }
 0x70b   : > { %v11754_v24 = vpop.f32.mrb[168].mxu0 }
 0x70c   : > { %v11755_v6 = vpop.f32.mrb[169].mxu0 }
 0x70d   : > { %v11756_v38 = vadd.f32 %v11755_v6, %v11754_v24  ;;  %v11757_v62 = vpop.f32.mrb[170].mxu0  ;;  %v16731_v6 = vld [vmem:[%s17302_s15] ss:$0 sm:$0xff]  ;;  %s13290_s15 = scalar_lea.vmem %s16844_s13, 1024 }
 0x70e   : > { %v11758_v36 = vpop.f32.mrb[171].mxu0  ;;  %p13291_p8 = scmp.ne.s32.totalorder %s16844_s13, %s13290_s15 }
 0x70f   : > { %v16686_v42 = vadd.f32 %v16649_v3, %v11756_v38  ;;  %v11759_v37 = vadd.f32 %v11758_v36, %v11757_v62 }
 0x710   : > { %p13292_p9 = pnand %p13291_p8, %p17309_p2 }
 0x711   : > { %v16689_v31 = vadd.f32 %v16651_v48, %v11759_v37 }
 0x712   : > { %p13293_p7 = pneg %p13292_p9 }
 0x717   : > { %v11760_v22 = vpop.f32.mrb[172].mxu0 }
 0x718   : > { %v11761_v51 = vpop.f32.mrb[173].mxu0 }
 0x719   : > { %v11762_v28 = vadd.f32 %v11761_v51, %v11760_v22  ;;  %v11763_v54 = vpop.f32.mrb[174].mxu0 }
 0x71a   : > { %v11764_v49 = vpop.f32.mrb[175].mxu0 }
 0x71b   : > { %v16692_v33 = vadd.f32 %v16653_v23, %v11762_v28  ;;  %v11765_v21 = vadd.f32 %v11764_v49, %v11763_v54 }
 0x71d   : > { %v16695_v32 = vadd.f32 %v16655_v14, %v11765_v21 }
 0x720   : > { %v11766_v5 = vpop.f32.mrb[176].mxu0 }
 0x721   : > { %v11767_v60 = vpop.f32.mrb[177].mxu0 }
 0x722   : > { %v11768_v3 = vadd.f32 %v11767_v60, %v11766_v5  ;;  %v11769_v35 = vpop.f32.mrb[178].mxu0 }
 0x723   : > { %v11770_v2 = vpop.f32.mrb[179].mxu0 }
 0x724   : > { %v16698_v48 = vadd.f32 %v16657_v52, %v11768_v3  ;;  %v11771_v13 = vadd.f32 %v11770_v2, %v11769_v35 }
 0x726   : > { %v16701_v30 = vadd.f32 %v16659_v45, %v11771_v13 }
 0x72a   : > { %v11772_v44 = vpop.f32.mrb[180].mxu0 }
 0x72b   : > { %v11773_v11 = vpop.f32.mrb[181].mxu0 }
 0x72c   : > { %v11774_v23 = vadd.f32 %v11773_v11, %v11772_v44  ;;  %v11775_v29 = vpop.f32.mrb[182].mxu0 }
 0x72d   : > { %v11776_v25 = vpop.f32.mrb[183].mxu0 }
 0x72e   : > { %v16704_v14 = vadd.f32 %v16661_v47, %v11774_v23  ;;  %v11777_v39 = vadd.f32 %v11776_v25, %v11775_v29 }
 0x730   : > { %v16707_v59 = vadd.f32 %v16663_v15, %v11777_v39 }
 0x735   : > { %v11778_v55 = vpop.f32.mrb[184].mxu0 }
 0x736   : > { %v11779_v17 = vpop.f32.mrb[185].mxu0 }
 0x737   : > { %v11780_v52 = vadd.f32 %v11779_v17, %v11778_v55  ;;  %v11781_v26 = vpop.f32.mrb[186].mxu0 }
 0x738   : > { %v11782_v27 = vpop.f32.mrb[187].mxu0 }
 0x739   : > { %v16710_v45 = vadd.f32 %v16665_v53, %v11780_v52  ;;  %v11783_v57 = vadd.f32 %v11782_v27, %v11781_v26 }
 0x73b   : > { %v16713_v16 = vadd.f32 %v16667_v12, %v11783_v57 }
 0x741   : > { %v11784_v4 = vpop.f32.mrb[188].mxu0 }
 0x742   : > { %v11785_v1 = vpop.f32.mrb[189].mxu0 }
 0x743   : > { %v11786_v47 = vadd.f32 %v11785_v1, %v11784_v4  ;;  %v11787_v20 = vpop.f32.mrb[190].mxu0 }
 0x744   : > { %v11788_v43 = vpop.f32.mrb[191].mxu0 }
 0x745   : > { %v16716_v15 = vadd.f32 %v16669_v19, %v11786_v47  ;;  %v11789_v56 = vadd.f32 %v11788_v43, %v11787_v20  ;;  %v16726_v19 = vld [vmem:[%s17301_s20] ss:$0 sm:$0xff]  ;;  %s17308_s20 = smov %s17307_s25 }
 0x747   : > { %v16719_v46 = vadd.f32 %v16671_v18, %v11789_v56 }
 0x74d   : > { %v11822_v41 = vpop.f32.mrb[192].mxu0 }
 0x74e   : > { %v11823_v58 = vpop.f32.mrb[193].mxu0 }
 0x74f   : > { %v11824_v53 = vadd.f32 %v11823_v58, %v11822_v41  ;;  %v11825_v63 = vpop.f32.mrb[194].mxu0 }
 0x750   : > { %v11826_v34 = vpop.f32.mrb[195].mxu0 }
 0x751   : > { %v12366_v12 = vadd.f32 %v16674_v10, %v11824_v53  ;;  %v11827_v61 = vadd.f32 %v11826_v34, %v11825_v63 }
 0x753   : > { %v12384_v50 = vadd.f32 %v16677_v0, %v11827_v61 }
 0x754   : > { %v12256_v7 = vpop.f32.mrb[0].mxu1 }
 0x755   : > { %v9674_v8 = vpop.f32.mrb[1].mxu1 }
 0x756   : > { %v12367_v24 = vadd.f32 %v12366_v12, %v9674_v8  ;;  %v12257_v18 = vpop.f32.mrb[2].mxu1 }
 0x757   : > { %v9677_v38 = vpop.f32.mrb[3].mxu1 }
 0x758   : > { %v9760_v10 = vmul.f32 %v12367_v24, %v16726_v19  ;;  %v12385_v62 = vadd.f32 %v12384_v50, %v9677_v38 }
 0x75a   : > { %v9783_v0 = vadd.f32 %v16731_v6, %v9760_v10  ;;  %v9761_v36 = vmul.f32 %v12385_v62, %v16726_v19 }
 0x75c   : > { %v9784_v22 = vadd.f32 %v16731_v6, %v9761_v36  ;;  %v9799_v49 = vmax.f32 %v9783_v0, 0.0 }
 0x75d   : > { %v11828_v37 = vpop.f32.mrb[196].mxu0 }
 0x75e   : > { %v11829_v51 = vpop.f32.mrb[197].mxu0  ;;  %v9800_v21 = vmax.f32 %v9784_v22, 0.0 }
 0x75f   : > { %v11830_v28 = vadd.f32 %v11829_v51, %v11828_v37  ;;  %v11831_v54 = vpop.f32.mrb[198].mxu0 }
 0x760   : > { %v11832_v5 = vpop.f32.mrb[199].mxu0  ;;  %v9815_v35 = vpack.c.bf16 %v9800_v21, %v9799_v49 }
 0x761   : > { %v12357_v60 = vadd.f32 %v16680_v9, %v11830_v28  ;;  %v11833_v3 = vadd.f32 %v11832_v5, %v11831_v54 }
 0x762   : > { %12286 = vmatprep.mubr.bf16.mxu1 %v9815_v35 }
 0x763   : > { %v12260_v2 = vpop.f32.mrb[4].mxu1  ;;  %v12358_v13 = vadd.f32 %v12357_v60, %v12256_v7  ;;  %v12375_v44 = vadd.f32 %v16683_v40, %v11833_v3 }
 0x764   : > { %v9690_v11 = vpop.f32.mrb[5].mxu1 }
 0x765   : > { %v9762_v23 = vmul.f32 %v12358_v13, %v16726_v19  ;;  %v12261_v29 = vpop.f32.mrb[6].mxu1  ;;  %v12376_v25 = vadd.f32 %v12375_v44, %v12257_v18 }
 0x766   : > { %v9693_v39 = vpop.f32.mrb[7].mxu1 }
 0x767   : > { %v9785_v55 = vadd.f32 %v16731_v6, %v9762_v23  ;;  %v9763_v17 = vmul.f32 %v12376_v25, %v16726_v19 }
 0x769   : > { %v9786_v52 = vadd.f32 %v16731_v6, %v9763_v17  ;;  %v9801_v26 = vmax.f32 %v9785_v55, 0.0 }
 0x76b   : > { %v9802_v27 = vmax.f32 %v9786_v52, 0.0 }
 0x76d   : > { %v11834_v9 = vpop.f32.mrb[200].mxu0  ;;  %v9816_v40 = vpack.c.bf16 %v9802_v27, %v9801_v26 }
 0x76e   : > { %v11835_v57 = vpop.f32.mrb[201].mxu0 }
 0x76f   : > { %v11836_v4 = vadd.f32 %v11835_v57, %v11834_v9  ;;  %v11837_v1 = vpop.f32.mrb[202].mxu0  ;;  %12287 = vmatmul.mubr.bf16.vlgmr.msra.gmra.mrb[80].mxu1 %v9816_v40 }
 0x770   : > { %v11838_v47 = vpop.f32.mrb[203].mxu0 }
 0x771   : > { %v12402_v20 = vadd.f32 %v16686_v42, %v11836_v4  ;;  %v11839_v43 = vadd.f32 %v11838_v47, %v11837_v1 }
 0x773   : > { %v12403_v56 = vadd.f32 %v12402_v20, %v9690_v11  ;;  %v12420_v41 = vadd.f32 %v16689_v31, %v11839_v43 }
 0x775   : > { %v12264_v58 = vpop.f32.mrb[8].mxu1  ;;  %v9764_v53 = vmul.f32 %v12403_v56, %v16726_v19  ;;  %v12421_v34 = vadd.f32 %v12420_v41, %v9693_v39 }
 0x776   : > { %v9706_v63 = vpop.f32.mrb[9].mxu1 }
 0x777   : > { %v12265_v12 = vpop.f32.mrb[10].mxu1  ;;  %v9765_v61 = vmul.f32 %v12421_v34, %v16726_v19  ;;  %v9787_v7 = vadd.f32 %v16731_v6, %v9764_v53 }
 0x778   : > { %v9709_v50 = vpop.f32.mrb[11].mxu1 }
 0x779   : > { %v9788_v8 = vadd.f32 %v16731_v6, %v9765_v61  ;;  %v9803_v42 = vmax.f32 %v9787_v7, 0.0 }
 0x77b   : > { %v9804_v18 = vmax.f32 %v9788_v8, 0.0 }
 0x77d   : > { %v11840_v24 = vpop.f32.mrb[204].mxu0  ;;  %v9817_v31 = vpack.c.bf16 %v9804_v18, %v9803_v42 }
 0x77e   : > { %v11841_v38 = vpop.f32.mrb[205].mxu0 }
 0x77f   : > { %v11842_v10 = vadd.f32 %v11841_v38, %v11840_v24  ;;  %v11843_v62 = vpop.f32.mrb[206].mxu0  ;;  %12290 = vmatprep.mubr.bf16.mxu1 %v9817_v31 }
 0x780   : > { %v11844_v0 = vpop.f32.mrb[207].mxu0 }
 0x781   : > { %v12393_v36 = vadd.f32 %v16692_v33, %v11842_v10  ;;  %v11845_v37 = vadd.f32 %v11844_v0, %v11843_v62 }
 0x782   : > { %v16750_v22 = vpop.f32.mrb[12].mxu1 }
 0x783   : > { %v12394_v51 = vadd.f32 %v12393_v36, %v12260_v2  ;;  %v12411_v28 = vadd.f32 %v16695_v32, %v11845_v37  ;;  %v9722_v54 = vpop.f32.mrb[13].mxu1 }
 0x784   : > { %v16754_v21 = vpop.f32.mrb[14].mxu1 }
 0x785   : > { %v9766_v49 = vmul.f32 %v12394_v51, %v16726_v19  ;;  %v12412_v5 = vadd.f32 %v12411_v28, %v12261_v29  ;;  %v9725_v3 = vpop.f32.mrb[15].mxu1 }
 0x787   : > { %v11846_v60 = vpop.f32.mrb[208].mxu0  ;;  %v9767_v13 = vmul.f32 %v12412_v5, %v16726_v19  ;;  %v9789_v11 = vadd.f32 %v16731_v6, %v9766_v49 }
 0x788   : > { %v11847_v35 = vpop.f32.mrb[209].mxu0 }
 0x789   : > { %v11848_v44 = vadd.f32 %v11847_v35, %v11846_v60  ;;  %v11849_v33 = vpop.f32.mrb[210].mxu0  ;;  %v9790_v32 = vadd.f32 %v16731_v6, %v9767_v13  ;;  %v9805_v17 = vmax.f32 %v9789_v11, 0.0 }
 0x78a   : > { %v11850_v23 = vpop.f32.mrb[211].mxu0 }
 0x78b   : > { %v12438_v2 = vadd.f32 %v16698_v48, %v11848_v44  ;;  %v11851_v25 = vadd.f32 %v11850_v23, %v11849_v33  ;;  %v9806_v29 = vmax.f32 %v9790_v32, 0.0 }
 0x78d   : > { %v12439_v39 = vadd.f32 %v12438_v2, %v9706_v63  ;;  %v12456_v55 = vadd.f32 %v16701_v30, %v11851_v25  ;;  %v9818_v27 = vpack.c.bf16 %v9806_v29, %v9805_v17 }
 0x78f   : > { %v9768_v52 = vmul.f32 %v12439_v39, %v16726_v19  ;;  %v12457_v9 = vadd.f32 %v12456_v55, %v9709_v50  ;;  %v11852_v26 = vpop.f32.mrb[212].mxu0  ;;  %12291 = vmatmul.mubr.bf16.gmra.mrb[84].mxu1 %v9818_v27 }
 0x790   : > { %v11853_v57 = vpop.f32.mrb[213].mxu0 }
 0x791   : > { %v9769_v4 = vmul.f32 %v12457_v9, %v16726_v19  ;;  %v11854_v1 = vadd.f32 %v11853_v57, %v11852_v26  ;;  %v11855_v40 = vpop.f32.mrb[214].mxu0  ;;  %v9791_v48 = vadd.f32 %v16731_v6, %v9768_v52  ;;  %v11112_v52 = vld [vmem:[%s13950_s5 + $0x8] sm:$0xff]   ;;  %v11041_v9 = vld [vmem:[%s13950_s5] sm:$0xff]  }
 0x792   : > { %v11856_v47 = vpop.f32.mrb[215].mxu0 }
 0x793   : > { %v12429_v20 = vadd.f32 %v16704_v14, %v11854_v1  ;;  %v11857_v43 = vadd.f32 %v11856_v47, %v11855_v40  ;;  %v9792_v30 = vadd.f32 %v16731_v6, %v9769_v4  ;;  %v9807_v53 = vmax.f32 %v9791_v48, 0.0 }
 0x794   : > { %v11042_v4 = vunpack.c.l.bf16 %v11041_v9  ;;  %v11047_v47 = vunpack.c.h.bf16 %v11112_v52 }
 0x795   : > { %v12430_v56 = vadd.f32 %v12429_v20, %v12264_v58  ;;  %v12447_v41 = vadd.f32 %v16707_v59, %v11857_v43  ;;  %v9808_v63 = vmax.f32 %v9792_v30, 0.0 }
 0x797   : > { %v9770_v34 = vmul.f32 %v12430_v56, %v16726_v19  ;;  %v12448_v61 = vadd.f32 %v12447_v41, %v12265_v12  ;;  %v11858_v50 = vpop.f32.mrb[216].mxu0  ;;  %v9819_v7 = vpack.c.bf16 %v9808_v63, %v9807_v53  ;;  %v11043_v56 = vunpack.c.h.bf16 %v11041_v9 }
 0x798   : > { %v11859_v8 = vpop.f32.mrb[217].mxu0 }
 0x799   : > { %v9771_v24 = vmul.f32 %v12448_v61, %v16726_v19  ;;  %v11860_v42 = vadd.f32 %v11859_v8, %v11858_v50  ;;  %v11861_v18 = vpop.f32.mrb[218].mxu0  ;;  %12294 = vmatprep.mubr.bf16.mxu1 %v9819_v7  ;;  %v9793_v14 = vadd.f32 %v16731_v6, %v9770_v34 }
 0x79a   : > { %v11862_v38 = vpop.f32.mrb[219].mxu0 }
 0x79b   : > { %v12474_v58 = vadd.f32 %v16710_v45, %v11860_v42  ;;  %v11863_v10 = vadd.f32 %v11862_v38, %v11861_v18  ;;  %v9794_v59 = vadd.f32 %v16731_v6, %v9771_v24  ;;  %v9809_v12 = vmax.f32 %v9793_v14, 0.0  ;;  %v11114_v38 = vld [vmem:[%s13950_s5 + $0x18] sm:$0xff]  }
 0x79d   : > { %v12475_v62 = vadd.f32 %v12474_v58, %v9722_v54  ;;  %v12492_v31 = vadd.f32 %v16713_v16, %v11863_v10  ;;  %v9810_v0 = vmax.f32 %v9794_v59, 0.0  ;;  %v11113_v58 = vld [vmem:[%s13950_s5 + $0x10] sm:$0xff]  }
 0x79f   : > { %v9772_v36 = vmul.f32 %v12475_v62, %v16726_v19  ;;  %v12493_v37 = vadd.f32 %v12492_v31, %v9725_v3  ;;  %v11864_v51 = vpop.f32.mrb[220].mxu0  ;;  %v9820_v28 = vpack.c.bf16 %v9810_v0, %v9809_v12  ;;  %v11054_v62 = vunpack.c.l.bf16 %v11114_v38 }
 0x7a0   : > { %v11865_v49 = vpop.f32.mrb[221].mxu0  ;;  %v11050_v0 = vunpack.c.l.bf16 %v11113_v58 }
 0x7a1   : > { %v9773_v5 = vmul.f32 %v12493_v37, %v16726_v19  ;;  %v11866_v60 = vadd.f32 %v11865_v49, %v11864_v51  ;;  %v11867_v35 = vpop.f32.mrb[222].mxu0  ;;  %12295 = vmatmul.mubr.bf16.gmra.mrb[88].mxu1 %v9820_v28  ;;  %v9795_v45 = vadd.f32 %v16731_v6, %v9772_v36  ;;  %v11055_v28 = vunpack.c.h.bf16 %v11114_v38 }
 0x7a2   : > { %v11868_v13 = vpop.f32.mrb[223].mxu0 }
 0x7a3   : > { %v12465_v54 = vadd.f32 %v16716_v15, %v11866_v60  ;;  %v11869_v44 = vadd.f32 %v11868_v13, %v11867_v35  ;;  %v9796_v16 = vadd.f32 %v16731_v6, %v9773_v5  ;;  %v9811_v11 = vmax.f32 %v9795_v45, 0.0 }
 0x7a4   : > { %v11051_v35 = vunpack.c.h.bf16 %v11113_v58 }
 0x7a5   : > { %v12466_v33 = vadd.f32 %v12465_v54, %v16750_v22  ;;  %v12483_v3 = vadd.f32 %v16719_v46, %v11869_v44  ;;  %v9812_v23 = vmax.f32 %v9796_v16, 0.0  ;;  %v16788_v46 = vld [vmem:[%s17303_s4] ss:$0 sm:$0xff]  ;;  %s13296_s4 = scalar_lea.vmem %s13295_s22, 2048 }
 0x7a6   : > { %p13298_p13 = scmp.lt.s32.totalorder %s13296_s4, %s13290_s15 }
 0x7a7   : > { %v9774_v2 = vmul.f32 %v12466_v33, %v16726_v19  ;;  %v12484_v25 = vadd.f32 %v12483_v3, %v16754_v21  ;;  %v9821_v32 = vpack.c.bf16 %v9812_v23, %v9811_v11 }
 0x7a8   : > { %p13299_p11 = por %p13298_p13, %p13297_p6 }
 0x7a9   : > { %v9775_v39 = vmul.f32 %v12484_v25, %v16726_v19  ;;  %12298 = vmatprep.mubr.bf16.mxu1 %v9821_v32  ;;  %v9797_v15 = vadd.f32 %v16731_v6, %v9774_v2  ;;  %v16795_v19 = vld [vmem:[%s17304_s12] ss:$0 sm:$0xff] }
 0x7aa   : > { %p13300_p0 = pnand %p13299_p11, %p13293_p7 }
 0x7ab   : > { %v9798_v55 = vadd.f32 %v16731_v6, %v9775_v39  ;;  %v9813_v17 = vmax.f32 %v9797_v15, 0.0  ;;  %v11046_v6 = vunpack.c.l.bf16 %v11112_v52  ;;  %v11116_v39 = vld [vmem:[%s13950_s5 + $0x28] sm:$0xff]   ;;  %v11115_v15 = vld [vmem:[%s13950_s5 + $0x20] sm:$0xff]  }
 0x7ac   : > { %v11058_v9 = vunpack.c.l.bf16 %v11115_v15 }
 0x7ad   : > { %v9814_v22 = vmax.f32 %v9798_v55, 0.0 }
 0x7af   : > { %v9822_v29 = vpack.c.bf16 %v9814_v22, %v9813_v17  ;;  %v11062_v22 = vunpack.c.l.bf16 %v11116_v39 }
 0x7b1   : > { %12299 = vmatmul.mubr.bf16.gmra.mrb[92].mxu1 %v9822_v29 }
 0x842   : > { %v12288_v21 = vpop.f32.mrb[80].mxu1 }
 0x843   : > { %v9993_v26 = vmul.f32 %v12288_v21, %v16788_v46  ;;  %v9921_v27 = vpop.f32.mrb[81].mxu1 }
 0x844   : > { %v9991_v57 = vmul.f32 %v16788_v46, %v9921_v27  ;;  %v12289_v1 = vpop.f32.mrb[82].mxu1  ;;  %v11063_v27 = vunpack.c.h.bf16 %v11116_v39 }
 0x845   : > { %v10016_v40 = vadd.f32 %v16795_v19, %v9993_v26  ;;  %v9994_v48 = vmul.f32 %v12289_v1, %v16788_v46  ;;  %v9924_v20 = vpop.f32.mrb[83].mxu1 }
 0x846   : > { %v10014_v43 = vadd.f32 %v16795_v19, %v9991_v57  ;;  %v9992_v30 = vmul.f32 %v16788_v46, %v9924_v20 }
 0x847   : > { %v10064_v41 = vadd.f32 %v11046_v6, %v10016_v40  ;;  %v10017_v53 = vadd.f32 %v16795_v19, %v9994_v48  ;;  %v11059_v40 = vunpack.c.h.bf16 %v11115_v15 }
 0x848   : > { %v10062_v63 = vadd.f32 %v11042_v4, %v10014_v43  ;;  %v10015_v34 = vadd.f32 %v16795_v19, %v9992_v30 }
 0x849   : > { %v10065_v61 = vadd.f32 %v11047_v47, %v10017_v53  ;;  %v10080_v7 = vmax.f32 %v10064_v41, 0.0 }
 0x84a   : > { %v10063_v50 = vadd.f32 %v11043_v56, %v10015_v34  ;;  %v10078_v24 = vmax.f32 %v10062_v63, 0.0 }
 0x84b   : > { %v10081_v8 = vmax.f32 %v10065_v61, 0.0 }
 0x84c   : > { %v10079_v42 = vmax.f32 %v10063_v50, 0.0 }
 0x84d   : > { %v11080_v18 = vpack.c.bf16 %v10081_v8, %v10080_v7  ;;  %v11118_v7 = vld [vmem:[%s13950_s5 + $0x38] sm:$0xff]   ;;  %v11117_v8 = vld [vmem:[%s13950_s5 + $0x30] sm:$0xff]   ;;  %s10140_s5 = sadd.s32 %s11039_s18, %s11002_s19 }
 0x84e   : > { %v11075_v14 = vpack.c.bf16 %v10079_v42, %v10078_v24  ;;  %v11066_v58 = vunpack.c.l.bf16 %v11117_v8  ;;  %s11003_s11 = sshll.u32 %s10140_s5, 6 }
 0x84f   : > { %11119 = vst [vmem:[%s14183_s0 + $0x8] sm:$0xff] %v11080_v18   ;;  %v11070_v18 = vunpack.c.l.bf16 %v11118_v7  ;;  %s16849_s6 = scalar_lea.hbm %s17307_s25, %s11003_s11 }
 0x850   : > { %11076 = vst [vmem:[%s14183_s0] sm:$0xff] %v11075_v14  }
 0x862   : > { %v12292_v10 = vpop.f32.mrb[84].mxu1 }
 0x863   : > { %v9997_v59 = vmul.f32 %v12292_v10, %v16788_v46  ;;  %v9937_v31 = vpop.f32.mrb[85].mxu1 }
 0x864   : > { %v9995_v12 = vmul.f32 %v16788_v46, %v9937_v31  ;;  %v12293_v36 = vpop.f32.mrb[86].mxu1  ;;  %v11071_v31 = vunpack.c.h.bf16 %v11118_v7 }
 0x865   : > { %v10020_v37 = vadd.f32 %v16795_v19, %v9997_v59  ;;  %v9998_v51 = vmul.f32 %v12293_v36, %v16788_v46  ;;  %v9940_v49 = vpop.f32.mrb[87].mxu1 }
 0x866   : > { %v10018_v5 = vadd.f32 %v16795_v19, %v9995_v12  ;;  %v9996_v60 = vmul.f32 %v16788_v46, %v9940_v49 }
 0x867   : > { %v10068_v45 = vadd.f32 %v11054_v62, %v10020_v37  ;;  %v10021_v13 = vadd.f32 %v16795_v19, %v9998_v51  ;;  %v11067_v37 = vunpack.c.h.bf16 %v11117_v8 }
 0x868   : > { %v10066_v54 = vadd.f32 %v11050_v0, %v10018_v5  ;;  %v10019_v44 = vadd.f32 %v16795_v19, %v9996_v60 }
 0x869   : > { %v10069_v16 = vadd.f32 %v11055_v28, %v10021_v13  ;;  %v10084_v3 = vmax.f32 %v10068_v45, 0.0 }
 0x86a   : > { %v10067_v33 = vadd.f32 %v11051_v35, %v10019_v44  ;;  %v10082_v23 = vmax.f32 %v10066_v54, 0.0 }
 0x86b   : > { %v10085_v11 = vmax.f32 %v10069_v16, 0.0 }
 0x86c   : > { %v10083_v2 = vmax.f32 %v10067_v33, 0.0 }
 0x86d   : > { %v11090_v25 = vpack.c.bf16 %v10085_v11, %v10084_v3 }
 0x86e   : > { %v11085_v32 = vpack.c.bf16 %v10083_v2, %v10082_v23 }
 0x86f   : > { %11121 = vst [vmem:[%s14183_s0 + $0x18] sm:$0xff] %v11090_v25  }
 0x870   : > { %11120 = vst [vmem:[%s14183_s0 + $0x10] sm:$0xff] %v11085_v32  }
 0x874   : > { %v12296_v55 = vpop.f32.mrb[88].mxu1 }
 0x875   : > { %v10001_v17 = vmul.f32 %v12296_v55, %v16788_v46  ;;  %v9953_v29 = vpop.f32.mrb[89].mxu1 }
 0x876   : > { %v9999_v52 = vmul.f32 %v16788_v46, %v9953_v29  ;;  %v12297_v21 = vpop.f32.mrb[90].mxu1 }
 0x877   : > { %v10024_v26 = vadd.f32 %v16795_v19, %v10001_v17  ;;  %v10002_v6 = vmul.f32 %v12297_v21, %v16788_v46  ;;  %v9956_v57 = vpop.f32.mrb[91].mxu1 }
 0x878   : > { %v10022_v4 = vadd.f32 %v16795_v19, %v9999_v52  ;;  %v10000_v1 = vmul.f32 %v16788_v46, %v9956_v57 }
 0x879   : > { %v10072_v48 = vadd.f32 %v11062_v22, %v10024_v26  ;;  %v10025_v47 = vadd.f32 %v16795_v19, %v10002_v6 }
 0x87a   : > { %v10070_v20 = vadd.f32 %v11058_v9, %v10022_v4  ;;  %v10023_v43 = vadd.f32 %v16795_v19, %v10000_v1 }
 0x87b   : > { %v10073_v30 = vadd.f32 %v11063_v27, %v10025_v47  ;;  %v10088_v41 = vmax.f32 %v10072_v48, 0.0 }
 0x87c   : > { %v10071_v56 = vadd.f32 %v11059_v40, %v10023_v43  ;;  %v10086_v63 = vmax.f32 %v10070_v20, 0.0 }
 0x87d   : > { %v10089_v53 = vmax.f32 %v10073_v30, 0.0 }
 0x87e   : > { %v10087_v34 = vmax.f32 %v10071_v56, 0.0 }
 0x87f   : > { %v11100_v61 = vpack.c.bf16 %v10089_v53, %v10088_v41 }
 0x880   : > { %v11095_v50 = vpack.c.bf16 %v10087_v34, %v10086_v63 }
 0x881   : > { %11123 = vst [vmem:[%s14183_s0 + $0x28] sm:$0xff] %v11100_v61  }
 0x882   : > { %11122 = vst [vmem:[%s14183_s0 + $0x20] sm:$0xff] %v11095_v50  }
 0x884   : > { %v12300_v24 = vpop.f32.mrb[92].mxu1 }
 0x885   : > { %v10005_v42 = vmul.f32 %v12300_v24, %v16788_v46  ;;  %v9969_v14 = vpop.f32.mrb[93].mxu1 }
 0x886   : > { %v10003_v38 = vmul.f32 %v16788_v46, %v9969_v14  ;;  %v12301_v10 = vpop.f32.mrb[94].mxu1 }
 0x887   : > { %v10028_v59 = vadd.f32 %v16795_v19, %v10005_v42  ;;  %v10006_v62 = vmul.f32 %v12301_v10, %v16788_v46  ;;  %v9972_v12 = vpop.f32.mrb[95].mxu1 }
 0x888   : > { %v10026_v0 = vadd.f32 %v16795_v19, %v10003_v38  ;;  %v10004_v36 = vmul.f32 %v16788_v46, %v9972_v12 }
 0x889   : > { %v10076_v51 = vadd.f32 %v11070_v18, %v10028_v59  ;;  %v10029_v28 = vadd.f32 %v16795_v19, %v10006_v62 }
 0x88a   : > { %v10074_v49 = vadd.f32 %v11066_v58, %v10026_v0  ;;  %v10027_v5 = vadd.f32 %v16795_v19, %v10004_v36 }
 0x88b   : > { %v10077_v60 = vadd.f32 %v11071_v31, %v10029_v28  ;;  %v10092_v45 = vmax.f32 %v10076_v51, 0.0 }
 0x88c   : > { %v10075_v35 = vadd.f32 %v11067_v37, %v10027_v5  ;;  %v10090_v54 = vmax.f32 %v10074_v49, 0.0 }
 0x88d   : > { %v10093_v13 = vmax.f32 %v10077_v60, 0.0 }
 0x88e   : > { %v10091_v46 = vmax.f32 %v10075_v35, 0.0 }
 0x88f   : > { %v11110_v44 = vpack.c.bf16 %v10093_v13, %v10092_v45 }
 0x890   : > { %v11105_v16 = vpack.c.bf16 %v10091_v46, %v10090_v54 }
 0x891   : > { %11125 = vst [vmem:[%s14183_s0 + $0x38] sm:$0xff] %v11110_v44  }
 0x892   : > { %11124 = vst [vmem:[%s14183_s0 + $0x30] sm:$0xff] %v11105_v16  }
 0x893   : > { %13303 = shalt.err (!%p13300_p0)
}
 0x894   : > { %s13304_s0 = scalar_lea.hbm %s16849_s6, 1024  ;;  %s13308_s12 = scalar_lea.hbm %s17308_s20, 4096 }
 0x895   : > { %p13305_p1 = scmp.ne.s32.totalorder %s16849_s6, %s13304_s0  ;;  %p13309_p4 = scmp.lt.u32.totalorder %s16849_s6, %s17308_s20 }
 0x896   : > { %p13310_p5 = scmp.lt.u32.totalorder %s13308_s12, %s13304_s0  ;;  %p13312_p8 = scmp.lt.u32.totalorder %s13304_s0, %s16849_s6 }
 0x897   : > { %p13306_p3 = pnand %p13305_p1, %p17309_p2 }
 0x898   : > { %p13311_p10 = por %p13310_p5, %p13309_p4 }
 0x899   : > { %p13307_p12 = pneg %p13306_p3 }
 0x89a   : > { %p13313_p9 = por %p13312_p8, %p13311_p10 }
 0x89c   : > { %p13314_p7 = pnand %p13313_p9, %p13307_p12 }
 0x89e   : > { %13317 = shalt.err (!%p13314_p7)
}
 0x89f   : > { %s13466_s18 = smov 64   ;;  %s13467_s19 = smov 4  }
 0x8a0   : > { %12640 = dma.vmem_to_hbm [thread:$0]  (%p17309_p2), %s16844_s13, 1024, %s16849_s6, %s10127_s14, %s13466_s18, %s13466_s18, %s13467_s19  }
 0x8a1 PF: > { %s17310_s5 = sld [smem:[#allocation36_spill]]  ;;  %p12673_p6 = scmp.ge.s32.totalorder %s13452_s16, 2 }
 0x8a2   : > { %s10158_s11 = sand.u32 1, %s13424_s27  }
 0x8a3   : > { %s10159_s21 = scalar_lea.sflag [#allocation5], %s10158_s11 }
 0x8a7   : > { %p17311_p13 = scmp.ne.s32.totalorder %s17310_s5, 0 }
 0x8a9   : > { %p12663_p11 = pnand %p12673_p6, %p17311_p13 }
 0x8ab   : > { %13395 = dma.done.wait (!%p12663_p11), %s10159_s21, 1024  }
 0x8ac   : > { %13397 = vsyncadd (!%p12663_p11), %s10159_s21, 4294966272  ;;  %s33_s16 = sadd.s32 1, %s13452_s16   ;;  %s17313_s21 = sld [smem:[#allocation22_spill]] }
 0x8ad   : > { %p16882_p0 = scmp.ge.s32.totalorder %s33_s16, 6   ;;  %s17314_s22 = sld [smem:[#allocation23_spill]] }
 0x8ae   : > { %s17315_s10 = sld [smem:[#allocation24_spill]]  ;;  %s17316_s30 = smov %s13695_s24 }
 0x8af   : > { %s17317_s13 = sld [smem:[#allocation35_spill]]  ;;  %s17318_s6 = sld [smem:[#allocation27_spill]] }
 0x8b0   : > { %s17319_s14 = sld [smem:[#allocation28_spill]]  ;;  %s17320_s15 = sld [smem:[#allocation30_spill]] }
 0x8b1   : > { %s17321_s4 = sld [smem:[#allocation31_spill]]  ;;  %s17322_s23 = smov %s17348_s2 }
 0x8b2   : > { %s17324_s25 = smov %s13420_s26  ;;  %s17325_s26 = smov %s17316_s30 }
 0x8b3   : > { %s17326_s27 = smov %s13428_s28  ;;  %s17327_s28 = smov %s13432_s29 }
 0x8b4   : > { %s17323_s24 = smov %s17315_s10  ;;  %32 = sbr.rel (!%p16882_p0) target bundleno = 28 (0x1c), region = 178 }
 0x8b5   : > { %s17328_s29 = smov %s17317_s13  ;;  %s17329_s30 = smov %s17318_s6 }
 0x8b6   : > { %s17330_s13 = smov %s17319_s14  ;;  %s17331_s14 = smov %s17320_s15 }
 0x8b7   : > { %s17332_s15 = smov %s17321_s4 }
 0x8bb   :  { %10164 = vsyncpa [#allocation4], 1 }
 0x8bc   :  { %10166 = vsyncpa [#allocation4 + $0x1], 1 }
 0x8bd   :  { %10167 = vsyncpa [#allocation7], 1 }
 0x8be   :  { %10169 = vsyncpa [#allocation7 + $0x1], 1 }
 0x8bf   :  { %10170 = vsyncpa [#allocation10], 1 }
 0x8c0   :  { %10171 = vsyncpa [#allocation13], 1 }
 0x8c1   :  { %10172 = vsyncpa [#allocation5], 1 }
 0x8c2   :  { %10174 = vsyncpa [#allocation5 + $0x1], 1 }

</bundles_post_ra>
